<compile_context>
chip_gen: v7x
topology: tpu7x:2x2x1
jax: 0.10.0
libtpu: 0.0.40
codegen_flags: <defaults>
</compile_context>

<pallas_src>
import functools
from collections import namedtuple

import jax
import jax.numpy as jnp
from jax import lax
from jax.experimental import pallas as pl
from jax.experimental.pallas import tpu as pltpu


def _round_up(x, m):
    return (x + m - 1) // m * m


@functools.lru_cache(maxsize=None)
def _vmem_limit_bytes():
    # 3/4 of physical VMEM, capped at 96 MiB (v5e/v6e: 128 MiB, v7x: 64 MiB).
    try:
        cap = pltpu.get_tpu_info().vmem_capacity_bytes
        return int(min(cap * 3 // 4, 96 * 1024 * 1024))
    except Exception:
        return 48 * 1024 * 1024


# ----------------------------- Pallas kernels ------------------------------

def _gemm_bias_relu_kernel(a_ref, w_ref, b_ref, o_ref):
    # a: (TM, Kp) bf16, w: (Kp, Cp) bf16, b: (1, Cp) f32 -> o: (TM, Cp) bf16
    acc = jnp.dot(a_ref[...], w_ref[...], preferred_element_type=jnp.float32)
    o_ref[...] = jnp.maximum(acc + b_ref[...], 0.0).astype(o_ref.dtype)


def _implicit_conv_kernel(x_ref, w_ref, b_ref, o_ref, acc_ref, *,
                          KH, row_stride, TM):
    # x: (1, L, Ckp) bf16  -- whole W-folded slab of one image (VMEM resident)
    # w: (KH, Ckp, Cp) bf16, b: (1, Cp) f32 -> o: (1, TM, Cp) bf16
    # acc: (TM, Cp) f32 VMEM scratch
    i = pl.program_id(1)                     # M-tile index over slab rows
    base = i * TM                            # TM and row_stride are 8-aligned
    start0 = pl.multiple_of(base, 8)
    acc_ref[...] = jnp.dot(x_ref[0, pl.ds(start0, TM), :], w_ref[0],
                           preferred_element_type=jnp.float32)
    for kh in range(1, KH):
        start = pl.multiple_of(base + kh * row_stride, 8)
        acc_ref[...] += jnp.dot(x_ref[0, pl.ds(start, TM), :], w_ref[kh],
                                preferred_element_type=jnp.float32)
    o_ref[0] = jnp.maximum(acc_ref[...] + b_ref[...], 0.0).astype(o_ref.dtype)


def _maxpool3x3s2_kernel(ee_ref, eo_ref, oe_ref, oo_ref, o_ref, *, oh, ow):
    # Even/odd phase split of the image: the 3x3/stride-2 window max becomes
    # nine unit-stride reads of the four phase planes.
    ee = ee_ref[0]           # rows 2i,   cols 2j
    eo = eo_ref[0]           # rows 2i,   cols 2j+1
    oe = oe_ref[0]           # rows 2i+1, cols 2j
    oo = oo_ref[0]           # rows 2i+1, cols 2j+1
    r = jnp.maximum(ee[:oh, :ow], ee[:oh, 1:ow + 1])
    r = jnp.maximum(r, jnp.maximum(ee[1:oh + 1, :ow], ee[1:oh + 1, 1:ow + 1]))
    r = jnp.maximum(r, jnp.maximum(eo[:oh, :ow], eo[1:oh + 1, :ow]))
    r = jnp.maximum(r, jnp.maximum(oe[:oh, :ow], oe[:oh, 1:ow + 1]))
    r = jnp.maximum(r, oo[:oh, :ow])
    o_ref[0] = r


# ------------------------------ layer wrappers ------------------------------

def _conv1_im2col(x_nhwc, w, b, stride, pad):
    """Conv1 (stride 4, Cin=3) via one fused patches op + tiled bf16 GEMM."""
    N, H, W_, Cin = x_nhwc.shape
    Cout, _, KH, KW = w.shape
    xb = x_nhwc.astype(jnp.bfloat16)
    # Single patch-extraction op; output feature order is (c, kh, kw).
    p = lax.conv_general_dilated_patches(
        xb, filter_shape=(KH, KW), window_strides=(stride, stride),
        padding=((pad, pad), (pad, pad)),
        dimension_numbers=("NHWC", "HWIO", "NHWC"))
    oh = (H + 2 * pad - KH) // stride + 1
    ow = (W_ + 2 * pad - KW) // stride + 1
    K = Cin * KH * KW
    p = p.reshape(N * oh * ow, K)
    wm = jnp.transpose(w, (1, 2, 3, 0)).reshape(K, Cout).astype(jnp.bfloat16)

    M = N * oh * ow
    TM = 256
    Mp = _round_up(M, TM)
    Kp = _round_up(K, 128)
    Cp = _round_up(Cout, 128)

    p_pad = jnp.pad(p, ((0, Mp - M), (0, Kp - K)))
    w_pad = jnp.pad(wm, ((0, Kp - K), (0, Cp - Cout)))
    b_pad = jnp.pad(b, (0, Cp - Cout)).reshape(1, Cp).astype(jnp.float32)

    cost = pl.CostEstimate(
        flops=2 * Mp * Kp * Cp, transcendentals=0,
        bytes_accessed=Mp * Kp * 2 + Kp * Cp * 2 + Mp * Cp * 2)

    out = pl.pallas_call(
        _gemm_bias_relu_kernel,
        out_shape=jax.ShapeDtypeStruct((Mp, Cp), jnp.bfloat16),
        grid=(Mp // TM,),
        in_specs=[pl.BlockSpec((TM, Kp), lambda i: (i, 0)),
                  pl.BlockSpec((Kp, Cp), lambda i: (0, 0)),
                  pl.BlockSpec((1, Cp), lambda i: (0, 0))],
        out_specs=pl.BlockSpec((TM, Cp), lambda i: (i, 0)),
        compiler_params=pltpu.CompilerParams(
            dimension_semantics=("parallel",),
            vmem_limit_bytes=_vmem_limit_bytes()),
        cost_estimate=cost,
    )(p_pad, w_pad, b_pad)

    return out[:M, :Cout].reshape(N, oh, ow, Cout)


def _conv_implicit_s1(x_nhwc, w, b, pad):
    """Stride-1 conv + ReLU: implicit GEMM, KW folded into K, M-tiled grid."""
    N, H, W_, Cin = x_nhwc.shape
    Cout, _, KH, KW = w.shape
    xb = x_nhwc.astype(jnp.bfloat16)
    xp = jnp.pad(xb, ((0, 0), (pad, pad), (pad, pad), (0, 0)))
    Hp, Wf = H + 2 * pad, W_ + 2 * pad
    oh, ow = Hp - KH + 1, Wf - KW + 1

    # Fold the KW taps into the channel dim: per-matmul K = KW*Cin.
    Ck = KW * Cin
    Ckp = _round_up(Ck, 128)
    ow_p = _round_up(ow, 8)                  # 8-aligned slab row stride
    folded = jnp.concatenate([xp[:, :, kw:kw + ow, :] for kw in range(KW)],
                             axis=-1)
    folded = jnp.pad(folded, ((0, 0), (0, 0), (0, ow_p - ow), (0, Ckp - Ck)))

    Ms = oh * ow_p                           # valid slab rows (incl. junk cols)
    TM = min(256, _round_up(Ms, 8))
    Ms_pad = _round_up(Ms, TM)
    n_mt = Ms_pad // TM
    L = Ms_pad + (KH - 1) * ow_p             # rows reachable by the last tap
    slab = folded.reshape(N, Hp * ow_p, Ckp)
    slab = jnp.pad(slab, ((0, 0), (0, L - Hp * ow_p), (0, 0)))

    Cp = _round_up(Cout, 128)
    wt = jnp.transpose(w, (2, 3, 1, 0)).reshape(KH, Ck, Cout).astype(jnp.bfloat16)
    wt = jnp.pad(wt, ((0, 0), (0, Ckp - Ck), (0, Cp - Cout)))
    b_pad = jnp.pad(b, (0, Cp - Cout)).reshape(1, Cp).astype(jnp.float32)

    kernel = functools.partial(_implicit_conv_kernel,
                               KH=KH, row_stride=ow_p, TM=TM)
    cost = pl.CostEstimate(
        flops=2 * N * Ms_pad * KH * Ckp * Cp, transcendentals=0,
        bytes_accessed=N * L * Ckp * 2 + KH * Ckp * Cp * 2 + N * Ms_pad * Cp * 2)

    out = pl.pallas_call(
        kernel,
        out_shape=jax.ShapeDtypeStruct((N, Ms_pad, Cp), jnp.bfloat16),
        grid=(N, n_mt),
        in_specs=[pl.BlockSpec((1, L, Ckp), lambda n, i: (n, 0, 0)),
                  pl.BlockSpec((KH, Ckp, Cp), lambda n, i: (0, 0, 0)),
                  pl.BlockSpec((1, Cp), lambda n, i: (0, 0))],
        out_specs=pl.BlockSpec((1, TM, Cp), lambda n, i: (n, i, 0)),
        scratch_shapes=[pltpu.VMEM((TM, Cp), jnp.float32)],
        compiler_params=pltpu.CompilerParams(
            dimension_semantics=("parallel", "parallel"),
            vmem_limit_bytes=_vmem_limit_bytes()),
        cost_estimate=cost,
    )(slab, wt, b_pad)

    # Drop padded channels, padded slab rows and the junk (row-stride) columns.
    out = out[:, :Ms, :Cout].reshape(N, oh, ow_p, Cout)[:, :, :ow, :]
    return out


def maxpool2d_3x3s2(x_nhwc):
    """MaxPool2d(kernel=3, stride=2), floor mode — single Pallas kernel."""
    N, H, W_, C = x_nhwc.shape
    oh = (H - 3) // 2 + 1
    ow = (W_ - 3) // 2 + 1
    # Even/odd phase split (total = 1x the data, done by XLA) so the window
    # max is 9 unit-stride in-kernel reads — no 3x stack materialization.
    ee = x_nhwc[:, 0::2, 0::2, :]
    eo = x_nhwc[:, 0::2, 1::2, :]
    oe = x_nhwc[:, 1::2, 0::2, :]
    oo = x_nhwc[:, 1::2, 1::2, :]
    kernel = functools.partial(_maxpool3x3s2_kernel, oh=oh, ow=ow)

    def spec(a):
        return pl.BlockSpec((1,) + a.shape[1:], lambda n: (n, 0, 0, 0))

    return pl.pallas_call(
        kernel,
        out_shape=jax.ShapeDtypeStruct((N, oh, ow, C), x_nhwc.dtype),
        grid=(N,),
        in_specs=[spec(ee), spec(eo), spec(oe), spec(oo)],
        out_specs=pl.BlockSpec((1, oh, ow, C), lambda n: (n, 0, 0, 0)),
        compiler_params=pltpu.CompilerParams(
            dimension_semantics=("parallel",),
            vmem_limit_bytes=_vmem_limit_bytes()),
    )(ee, eo, oe, oo)


# -------------------------- parameters & forward ----------------------------

_CONV_SPECS = [
    # (Cout, Cin, KH, KW, stride, pad)  -- torchvision alexnet.features convs
    (64, 3, 11, 11, 4, 2),    # features[0]
    (192, 64, 5, 5, 1, 2),    # features[3]
    (384, 192, 3, 3, 1, 1),   # features[6]
    (256, 384, 3, 3, 1, 1),   # features[8]
    (256, 256, 3, 3, 1, 1),   # features[10]
]


def init_params(key):
    # TODO(synk): pretrained torchvision AlexNet weights cannot be loaded
    # in-script; random initialization with identical shapes is used instead.
    params = []
    for (co, ci, kh, kw, _, _) in _CONV_SPECS:
        key, k_w, k_b = jax.random.split(key, 3)
        fan_in = ci * kh * kw
        w = jax.random.normal(k_w, (co, ci, kh, kw), jnp.float32) / jnp.sqrt(
            jnp.float32(fan_in))
        b = jax.random.normal(k_b, (co,), jnp.float32) * 0.01
        params.append((w, b))
    return params


AlexnetOutputs = namedtuple(
    'AlexnetOutputs', ['relu1', 'relu2', 'relu3', 'relu4', 'relu5'])


def alexnet_forward(x_nchw, params):
    x = jnp.transpose(x_nchw, (0, 2, 3, 1))          # NCHW -> NHWC
    (w1, b1), (w2, b2), (w3, b3), (w4, b4), (w5, b5) = params

    # slice1: Conv(3->64, k11, s4, p2) + ReLU
    h = _conv1_im2col(x, w1, b1, stride=4, pad=2)
    h_relu1 = h
    # slice2: MaxPool(3,2) + Conv(64->192, k5, p2) + ReLU
    h = maxpool2d_3x3s2(h)
    h = _conv_implicit_s1(h, w2, b2, pad=2)
    h_relu2 = h
    # slice3: MaxPool(3,2) + Conv(192->384, k3, p1) + ReLU
    h = maxpool2d_3x3s2(h)
    h = _conv_implicit_s1(h, w3, b3, pad=1)
    h_relu3 = h
    # slice4: Conv(384->256, k3, p1) + ReLU
    h = _conv_implicit_s1(h, w4, b4, pad=1)
    h_relu4 = h
    # slice5: Conv(256->256, k3, p1) + ReLU
    h = _conv_implicit_s1(h, w5, b5, pad=1)
    h_relu5 = h

    to_nchw = lambda t: jnp.transpose(t, (0, 3, 1, 2)).astype(jnp.float32)
    return AlexnetOutputs(*(to_nchw(t) for t in
                            (h_relu1, h_relu2, h_relu3, h_relu4, h_relu5)))


if __name__ == "__main__":
    key = jax.random.PRNGKey(0)
    key, k_x = jax.random.split(key)
    # Small AlexNet-compatible input: batch=2, 3 channels, 64x64 spatial (NCHW)
    x = jax.random.normal(k_x, (2, 3, 64, 64), jnp.float32)
    params = init_params(key)

    fwd = jax.jit(functools.partial(alexnet_forward, params=params))
    out = fwd(x)
    jax.block_until_ready(out)

    # shape sanity (NCHW, matching PyTorch semantics)
    assert out.relu1.shape == (2, 64, 15, 15)
    assert out.relu2.shape == (2, 192, 7, 7)
    assert out.relu3.shape == (2, 384, 3, 3)
    assert out.relu4.shape == (2, 256, 3, 3)
    assert out.relu5.shape == (2, 256, 3, 3)
    print("KERNEL_OK")
</pallas_src>

<mosaic_0001>
module attributes {stable_mosaic.version = 11 : i64} {
  func.func @_gemm_bias_relu_kernel(%arg0: i32, %arg1: memref<256x384xbf16, #tpu.memory_space<vmem>>, %arg2: memref<384x128xbf16, #tpu.memory_space<vmem>>, %arg3: memref<1x128xf32, #tpu.memory_space<vmem>>, %arg4: memref<256x128xbf16, #tpu.memory_space<vmem>>) attributes {dimension_semantics = [#tpu.dimension_semantics<parallel>], iteration_bounds = array<i64: 2>, scalar_prefetch = 0 : i64, scratch_operands = 0 : i64, tpu.core_type = #tpu.core_type<tc>, window_params = [{transform_indices = @transform_0, window_bounds = array<i64: 256, 384>}, {pipeline_mode = #tpu.pipeline_mode<synchronous>, transform_indices = @transform_1, window_bounds = array<i64: 384, 128>}, {pipeline_mode = #tpu.pipeline_mode<synchronous>, transform_indices = @transform_2, window_bounds = array<i64: 1, 128>}, {transform_indices = @transform_3, window_bounds = array<i64: 256, 128>}]} {
    %c0 = arith.constant 0 : index
    %c0_0 = arith.constant 0 : index
    %0 = vector.load %arg1[%c0, %c0_0] : memref<256x384xbf16, #tpu.memory_space<vmem>>, vector<256x384xbf16>
    %c0_1 = arith.constant 0 : index
    %c0_2 = arith.constant 0 : index
    %1 = vector.load %arg2[%c0_1, %c0_2] : memref<384x128xbf16, #tpu.memory_space<vmem>>, vector<384x128xbf16>
    %cst = arith.constant dense<0.000000e+00> : vector<256x128xf32>
    %2 = tpu.matmul %0, %1, %cst {dimension_numbers = #tpu.dot_dimension_numbers<[1], [0], [0], [1], [0, 0, 1, 1], [], []>} : vector<256x384xbf16>, vector<384x128xbf16>, vector<256x128xf32> -> vector<256x128xf32>
    %c0_3 = arith.constant 0 : index
    %c0_4 = arith.constant 0 : index
    %3 = vector.load %arg3[%c0_3, %c0_4] : memref<1x128xf32, #tpu.memory_space<vmem>>, vector<1x128xf32>
    %4 = vector.broadcast %3 : vector<1x128xf32> to vector<256x128xf32>
    %5 = arith.addf %2, %4 : vector<256x128xf32>
    %cst_5 = arith.constant 0.000000e+00 : f32
    %6 = vector.broadcast %cst_5 : f32 to vector<256x128xf32>
    %7 = arith.maximumf %5, %6 : vector<256x128xf32>
    %8 = arith.truncf %7 : vector<256x128xf32> to vector<256x128xbf16>
    %c0_6 = arith.constant 0 : index
    %c0_7 = arith.constant 0 : index
    %9 = vector.load %arg4[%c0_6, %c0_7] : memref<256x128xbf16, #tpu.memory_space<vmem>>, vector<256x128xbf16>
    tpu.vector_store %arg4[%c0_6, %c0_7], %8 {strides = array<i32>} : memref<256x128xbf16, #tpu.memory_space<vmem>>, vector<256x128xbf16>,
    return
  }
  func.func @transform_0(%arg0: i32) -> (i32, i32) {
    %c0_i32 = arith.constant 0 : i32
    %c0_i32_0 = arith.constant 0 : i32
    return %arg0, %c0_i32 : i32, i32
  }
  func.func @transform_1(%arg0: i32) -> (i32, i32) {
    %c0_i32 = arith.constant 0 : i32
    %c0_i32_0 = arith.constant 0 : i32
    %c0_i32_1 = arith.constant 0 : i32
    return %c0_i32, %c0_i32_0 : i32, i32
  }
  func.func @transform_2(%arg0: i32) -> (i32, i32) {
    %c0_i32 = arith.constant 0 : i32
    %c0_i32_0 = arith.constant 0 : i32
    %c0_i32_1 = arith.constant 0 : i32
    return %c0_i32, %c0_i32_0 : i32, i32
  }
  func.func @transform_3(%arg0: i32) -> (i32, i32) {
    %c0_i32 = arith.constant 0 : i32
    %c0_i32_0 = arith.constant 0 : i32
    return %arg0, %c0_i32 : i32, i32
  }
}

module attributes {stable_mosaic.version = 11 : i64} {
  func.func @_maxpool3x3s2_kernel(%arg0: i32, %arg1: memref<1x8x8x64xbf16, #tpu.memory_space<vmem>>, %arg2: memref<1x8x7x64xbf16, #tpu.memory_space<vmem>>, %arg3: memref<1x7x8x64xbf16, #tpu.memory_space<vmem>>, %arg4: memref<1x7x7x64xbf16, #tpu.memory_space<vmem>>, %arg5: memref<1x7x7x64xbf16, #tpu.memory_space<vmem>>) attributes {dimension_semantics = [#tpu.dimension_semantics<parallel>], iteration_bounds = array<i64: 2>, scalar_prefetch = 0 : i64, scratch_operands = 0 : i64, tpu.core_type = #tpu.core_type<tc>, window_params = [{transform_indices = @transform_0, window_bounds = array<i64: 1, 8, 8, 64>}, {transform_indices = @transform_1, window_bounds = array<i64: 1, 8, 7, 64>}, {transform_indices = @transform_2, window_bounds = array<i64: 1, 7, 8, 64>}, {transform_indices = @transform_3, window_bounds = array<i64: 1, 7, 7, 64>}, {transform_indices = @transform_4, window_bounds = array<i64: 1, 7, 7, 64>}]} {
    %c0 = arith.constant 0 : index
    %c0_0 = arith.constant 0 : index
    %c0_1 = arith.constant 0 : index
    %c0_2 = arith.constant 0 : index
    %0 = vector.load %arg1[%c0, %c0_0, %c0_1, %c0_2] : memref<1x8x8x64xbf16, #tpu.memory_space<vmem>>, vector<1x8x8x64xbf16>
    %1 = vector.shape_cast %0 : vector<1x8x8x64xbf16> to vector<8x8x64xbf16>
    %c0_3 = arith.constant 0 : index
    %c0_4 = arith.constant 0 : index
    %c0_5 = arith.constant 0 : index
    %c0_6 = arith.constant 0 : index
    %2 = vector.load %arg2[%c0_3, %c0_4, %c0_5, %c0_6] : memref<1x8x7x64xbf16, #tpu.memory_space<vmem>>, vector<1x8x7x64xbf16>
    %3 = vector.shape_cast %2 : vector<1x8x7x64xbf16> to vector<8x7x64xbf16>
    %c0_7 = arith.constant 0 : index
    %c0_8 = arith.constant 0 : index
    %c0_9 = arith.constant 0 : index
    %c0_10 = arith.constant 0 : index
    %4 = vector.load %arg3[%c0_7, %c0_8, %c0_9, %c0_10] : memref<1x7x8x64xbf16, #tpu.memory_space<vmem>>, vector<1x7x8x64xbf16>
    %5 = vector.shape_cast %4 : vector<1x7x8x64xbf16> to vector<7x8x64xbf16>
    %c0_11 = arith.constant 0 : index
    %c0_12 = arith.constant 0 : index
    %c0_13 = arith.constant 0 : index
    %c0_14 = arith.constant 0 : index
    %6 = vector.load %arg4[%c0_11, %c0_12, %c0_13, %c0_14] : memref<1x7x7x64xbf16, #tpu.memory_space<vmem>>, vector<1x7x7x64xbf16>
    %7 = vector.shape_cast %6 : vector<1x7x7x64xbf16> to vector<7x7x64xbf16>
    %8 = vector.extract_strided_slice %1 {offsets = [0, 0, 0], sizes = [7, 7, 64], strides = [1, 1, 1]} : vector<8x8x64xbf16> to vector<7x7x64xbf16>
    %9 = vector.extract_strided_slice %1 {offsets = [0, 1, 0], sizes = [7, 7, 64], strides = [1, 1, 1]} : vector<8x8x64xbf16> to vector<7x7x64xbf16>
    %10 = arith.maximumf %8, %9 : vector<7x7x64xbf16>
    %11 = vector.extract_strided_slice %1 {offsets = [1, 0, 0], sizes = [7, 7, 64], strides = [1, 1, 1]} : vector<8x8x64xbf16> to vector<7x7x64xbf16>
    %12 = vector.extract_strided_slice %1 {offsets = [1, 1, 0], sizes = [7, 7, 64], strides = [1, 1, 1]} : vector<8x8x64xbf16> to vector<7x7x64xbf16>
    %13 = arith.maximumf %11, %12 : vector<7x7x64xbf16>
    %14 = arith.maximumf %10, %13 : vector<7x7x64xbf16>
    %15 = vector.extract_strided_slice %3 {offsets = [0, 0, 0], sizes = [7, 7, 64], strides = [1, 1, 1]} : vector<8x7x64xbf16> to vector<7x7x64xbf16>
    %16 = vector.extract_strided_slice %3 {offsets = [1, 0, 0], sizes = [7, 7, 64], strides = [1, 1, 1]} : vector<8x7x64xbf16> to vector<7x7x64xbf16>
    %17 = arith.maximumf %15, %16 : vector<7x7x64xbf16>
    %18 = arith.maximumf %14, %17 : vector<7x7x64xbf16>
    %19 = vector.extract_strided_slice %5 {offsets = [0, 0, 0], sizes = [7, 7, 64], strides = [1, 1, 1]} : vector<7x8x64xbf16> to vector<7x7x64xbf16>
    %20 = vector.extract_strided_slice %5 {offsets = [0, 1, 0], sizes = [7, 7, 64], strides = [1, 1, 1]} : vector<7x8x64xbf16> to vector<7x7x64xbf16>
    %21 = arith.maximumf %19, %20 : vector<7x7x64xbf16>
    %22 = arith.maximumf %18, %21 : vector<7x7x64xbf16>
    %23 = arith.maximumf %22, %7 : vector<7x7x64xbf16>
    %c0_15 = arith.constant 0 : index
    %c0_16 = arith.constant 0 : index
    %c0_17 = arith.constant 0 : index
    %c0_18 = arith.constant 0 : index
    %24 = vector.load %arg5[%c0_15, %c0_16, %c0_17, %c0_18] : memref<1x7x7x64xbf16, #tpu.memory_space<vmem>>, vector<1x7x7x64xbf16>
    %25 = vector.shape_cast %24 : vector<1x7x7x64xbf16> to vector<7x7x64xbf16>
    %26 = vector.shape_cast %23 : vector<7x7x64xbf16> to vector<1x7x7x64xbf16>
    tpu.vector_store %arg5[%c0_15, %c0_16, %c0_17, %c0_18], %26 {strides = array<i32>} : memref<1x7x7x64xbf16, #tpu.memory_space<vmem>>, vector<1x7x7x64xbf16>,
    return
  }
  func.func @transform_0(%arg0: i32) -> (i32, i32, i32, i32) {
    %c0_i32 = arith.constant 0 : i32
    %c0_i32_0 = arith.constant 0 : i32
    %c0_i32_1 = arith.constant 0 : i32
    %c0_i32_2 = arith.constant 0 : i32
    return %arg0, %c0_i32, %c0_i32_0, %c0_i32_1 : i32, i32, i32, i32
  }
  func.func @transform_1(%arg0: i32) -> (i32, i32, i32, i32) {
    %c0_i32 = arith.constant 0 : i32
    %c0_i32_0 = arith.constant 0 : i32
    %c0_i32_1 = arith.constant 0 : i32
    %c0_i32_2 = arith.constant 0 : i32
    return %arg0, %c0_i32, %c0_i32_0, %c0_i32_1 : i32, i32, i32, i32
  }
  func.func @transform_2(%arg0: i32) -> (i32, i32, i32, i32) {
    %c0_i32 = arith.constant 0 : i32
    %c0_i32_0 = arith.constant 0 : i32
    %c0_i32_1 = arith.constant 0 : i32
    %c0_i32_2 = arith.constant 0 : i32
    return %arg0, %c0_i32, %c0_i32_0, %c0_i32_1 : i32, i32, i32, i32
  }
  func.func @transform_3(%arg0: i32) -> (i32, i32, i32, i32) {
    %c0_i32 = arith.constant 0 : i32
    %c0_i32_0 = arith.constant 0 : i32
    %c0_i32_1 = arith.constant 0 : i32
    %c0_i32_2 = arith.constant 0 : i32
    return %arg0, %c0_i32, %c0_i32_0, %c0_i32_1 : i32, i32, i32, i32
  }
  func.func @transform_4(%arg0: i32) -> (i32, i32, i32, i32) {
    %c0_i32 = arith.constant 0 : i32
    %c0_i32_0 = arith.constant 0 : i32
    %c0_i32_1 = arith.constant 0 : i32
    %c0_i32_2 = arith.constant 0 : i32
    return %arg0, %c0_i32, %c0_i32_0, %c0_i32_1 : i32, i32, i32, i32
  }
}

module attributes {stable_mosaic.version = 11 : i64} {
  func.func @_implicit_conv_kernel(%arg0: i32, %arg1: i32, %arg2: memref<1x88x384xbf16, #tpu.memory_space<vmem>>, %arg3: memref<5x384x256xbf16, #tpu.memory_space<vmem>>, %arg4: memref<1x256xf32, #tpu.memory_space<vmem>>, %arg5: memref<1x56x256xbf16, #tpu.memory_space<vmem>>, %arg6: memref<56x256xf32, #tpu.memory_space<vmem>>) attributes {dimension_semantics = [#tpu.dimension_semantics<parallel>, #tpu.dimension_semantics<parallel>], iteration_bounds = array<i64: 2, 1>, scalar_prefetch = 0 : i64, scratch_operands = 1 : i64, tpu.core_type = #tpu.core_type<tc>, window_params = [{transform_indices = @transform_0, window_bounds = array<i64: 1, 88, 384>}, {pipeline_mode = #tpu.pipeline_mode<synchronous>, transform_indices = @transform_1, window_bounds = array<i64: 5, 384, 256>}, {pipeline_mode = #tpu.pipeline_mode<synchronous>, transform_indices = @transform_2, window_bounds = array<i64: 1, 256>}, {transform_indices = @transform_3, window_bounds = array<i64: 1, 56, 256>}]} {
    %c56_i32 = arith.constant 56 : i32
    %0 = arith.muli %arg1, %c56_i32 : i32
    %1 = tpu.assume_multiple %0, 8 : i32
    %c0 = arith.constant 0 : index
    %2 = arith.index_cast %1 : i32 to index
    %c0_0 = arith.constant 0 : index
    %3 = vector.load %arg2[%c0, %2, %c0_0] : memref<1x88x384xbf16, #tpu.memory_space<vmem>>, vector<1x56x384xbf16>
    %4 = vector.shape_cast %3 : vector<1x56x384xbf16> to vector<56x384xbf16>
    %c0_1 = arith.constant 0 : index
    %c0_2 = arith.constant 0 : index
    %c0_3 = arith.constant 0 : index
    %5 = vector.load %arg3[%c0_1, %c0_2, %c0_3] : memref<5x384x256xbf16, #tpu.memory_space<vmem>>, vector<1x384x256xbf16>
    %6 = vector.shape_cast %5 : vector<1x384x256xbf16> to vector<384x256xbf16>
    %cst = arith.constant dense<0.000000e+00> : vector<56x256xf32>
    %7 = tpu.matmul %4, %6, %cst {dimension_numbers = #tpu.dot_dimension_numbers<[1], [0], [0], [1], [0, 0, 1, 1], [], []>} : vector<56x384xbf16>, vector<384x256xbf16>, vector<56x256xf32> -> vector<56x256xf32>
    %c0_4 = arith.constant 0 : index
    %c0_5 = arith.constant 0 : index
    %8 = vector.load %arg6[%c0_4, %c0_5] : memref<56x256xf32, #tpu.memory_space<vmem>>, vector<56x256xf32>
    tpu.vector_store %arg6[%c0_4, %c0_5], %7 {strides = array<i32>} : memref<56x256xf32, #tpu.memory_space<vmem>>, vector<56x256xf32>,
    %c8_i32 = arith.constant 8 : i32
    %9 = arith.addi %0, %c8_i32 : i32
    %10 = tpu.assume_multiple %9, 8 : i32
    %c0_6 = arith.constant 0 : index
    %c0_7 = arith.constant 0 : index
    %11 = vector.load %arg6[%c0_6, %c0_7] : memref<56x256xf32, #tpu.memory_space<vmem>>, vector<56x256xf32>
    %c0_8 = arith.constant 0 : index
    %12 = arith.index_cast %10 : i32 to index
    %c0_9 = arith.constant 0 : index
    %13 = vector.load %arg2[%c0_8, %12, %c0_9] : memref<1x88x384xbf16, #tpu.memory_space<vmem>>, vector<1x56x384xbf16>
    %14 = vector.shape_cast %13 : vector<1x56x384xbf16> to vector<56x384xbf16>
    %c1 = arith.constant 1 : index
    %c0_10 = arith.constant 0 : index
    %c0_11 = arith.constant 0 : index
    %15 = vector.load %arg3[%c1, %c0_10, %c0_11] : memref<5x384x256xbf16, #tpu.memory_space<vmem>>, vector<1x384x256xbf16>
    %16 = vector.shape_cast %15 : vector<1x384x256xbf16> to vector<384x256xbf16>
    %cst_12 = arith.constant dense<0.000000e+00> : vector<56x256xf32>
    %17 = tpu.matmul %14, %16, %cst_12 {dimension_numbers = #tpu.dot_dimension_numbers<[1], [0], [0], [1], [0, 0, 1, 1], [], []>} : vector<56x384xbf16>, vector<384x256xbf16>, vector<56x256xf32> -> vector<56x256xf32>
    %18 = arith.addf %11, %17 : vector<56x256xf32>
    %c0_13 = arith.constant 0 : index
    %c0_14 = arith.constant 0 : index
    %19 = vector.load %arg6[%c0_13, %c0_14] : memref<56x256xf32, #tpu.memory_space<vmem>>, vector<56x256xf32>
    tpu.vector_store %arg6[%c0_13, %c0_14], %18 {strides = array<i32>} : memref<56x256xf32, #tpu.memory_space<vmem>>, vector<56x256xf32>,
    %c16_i32 = arith.constant 16 : i32
    %20 = arith.addi %0, %c16_i32 : i32
    %21 = tpu.assume_multiple %20, 8 : i32
    %c0_15 = arith.constant 0 : index
    %c0_16 = arith.constant 0 : index
    %22 = vector.load %arg6[%c0_15, %c0_16] : memref<56x256xf32, #tpu.memory_space<vmem>>, vector<56x256xf32>
    %c0_17 = arith.constant 0 : index
    %23 = arith.index_cast %21 : i32 to index
    %c0_18 = arith.constant 0 : index
    %24 = vector.load %arg2[%c0_17, %23, %c0_18] : memref<1x88x384xbf16, #tpu.memory_space<vmem>>, vector<1x56x384xbf16>
    %25 = vector.shape_cast %24 : vector<1x56x384xbf16> to vector<56x384xbf16>
    %c2 = arith.constant 2 : index
    %c0_19 = arith.constant 0 : index
    %c0_20 = arith.constant 0 : index
    %26 = vector.load %arg3[%c2, %c0_19, %c0_20] : memref<5x384x256xbf16, #tpu.memory_space<vmem>>, vector<1x384x256xbf16>
    %27 = vector.shape_cast %26 : vector<1x384x256xbf16> to vector<384x256xbf16>
    %cst_21 = arith.constant dense<0.000000e+00> : vector<56x256xf32>
    %28 = tpu.matmul %25, %27, %cst_21 {dimension_numbers = #tpu.dot_dimension_numbers<[1], [0], [0], [1], [0, 0, 1, 1], [], []>} : vector<56x384xbf16>, vector<384x256xbf16>, vector<56x256xf32> -> vector<56x256xf32>
    %29 = arith.addf %22, %28 : vector<56x256xf32>
    %c0_22 = arith.constant 0 : index
    %c0_23 = arith.constant 0 : index
    %30 = vector.load %arg6[%c0_22, %c0_23] : memref<56x256xf32, #tpu.memory_space<vmem>>, vector<56x256xf32>
    tpu.vector_store %arg6[%c0_22, %c0_23], %29 {strides = array<i32>} : memref<56x256xf32, #tpu.memory_space<vmem>>, vector<56x256xf32>,
    %c24_i32 = arith.constant 24 : i32
    %31 = arith.addi %0, %c24_i32 : i32
    %32 = tpu.assume_multiple %31, 8 : i32
    %c0_24 = arith.constant 0 : index
    %c0_25 = arith.constant 0 : index
    %33 = vector.load %arg6[%c0_24, %c0_25] : memref<56x256xf32, #tpu.memory_space<vmem>>, vector<56x256xf32>
    %c0_26 = arith.constant 0 : index
    %34 = arith.index_cast %32 : i32 to index
    %c0_27 = arith.constant 0 : index
    %35 = vector.load %arg2[%c0_26, %34, %c0_27] : memref<1x88x384xbf16, #tpu.memory_space<vmem>>, vector<1x56x384xbf16>
    %36 = vector.shape_cast %35 : vector<1x56x384xbf16> to vector<56x384xbf16>
    %c3 = arith.constant 3 : index
    %c0_28 = arith.constant 0 : index
    %c0_29 = arith.constant 0 : index
    %37 = vector.load %arg3[%c3, %c0_28, %c0_29] : memref<5x384x256xbf16, #tpu.memory_space<vmem>>, vector<1x384x256xbf16>
    %38 = vector.shape_cast %37 : vector<1x384x256xbf16> to vector<384x256xbf16>
    %cst_30 = arith.constant dense<0.000000e+00> : vector<56x256xf32>
    %39 = tpu.matmul %36, %38, %cst_30 {dimension_numbers = #tpu.dot_dimension_numbers<[1], [0], [0], [1], [0, 0, 1, 1], [], []>} : vector<56x384xbf16>, vector<384x256xbf16>, vector<56x256xf32> -> vector<56x256xf32>
    %40 = arith.addf %33, %39 : vector<56x256xf32>
    %c0_31 = arith.constant 0 : index
    %c0_32 = arith.constant 0 : index
    %41 = vector.load %arg6[%c0_31, %c0_32] : memref<56x256xf32, #tpu.memory_space<vmem>>, vector<56x256xf32>
    tpu.vector_store %arg6[%c0_31, %c0_32], %40 {strides = array<i32>} : memref<56x256xf32, #tpu.memory_space<vmem>>, vector<56x256xf32>,
    %c32_i32 = arith.constant 32 : i32
    %42 = arith.addi %0, %c32_i32 : i32
    %43 = tpu.assume_multiple %42, 8 : i32
    %c0_33 = arith.constant 0 : index
    %c0_34 = arith.constant 0 : index
    %44 = vector.load %arg6[%c0_33, %c0_34] : memref<56x256xf32, #tpu.memory_space<vmem>>, vector<56x256xf32>
    %c0_35 = arith.constant 0 : index
    %45 = arith.index_cast %43 : i32 to index
    %c0_36 = arith.constant 0 : index
    %46 = vector.load %arg2[%c0_35, %45, %c0_36] : memref<1x88x384xbf16, #tpu.memory_space<vmem>>, vector<1x56x384xbf16>
    %47 = vector.shape_cast %46 : vector<1x56x384xbf16> to vector<56x384xbf16>
    %c4 = arith.constant 4 : index
    %c0_37 = arith.constant 0 : index
    %c0_38 = arith.constant 0 : index
    %48 = vector.load %arg3[%c4, %c0_37, %c0_38] : memref<5x384x256xbf16, #tpu.memory_space<vmem>>, vector<1x384x256xbf16>
    %49 = vector.shape_cast %48 : vector<1x384x256xbf16> to vector<384x256xbf16>
    %cst_39 = arith.constant dense<0.000000e+00> : vector<56x256xf32>
    %50 = tpu.matmul %47, %49, %cst_39 {dimension_numbers = #tpu.dot_dimension_numbers<[1], [0], [0], [1], [0, 0, 1, 1], [], []>} : vector<56x384xbf16>, vector<384x256xbf16>, vector<56x256xf32> -> vector<56x256xf32>
    %51 = arith.addf %44, %50 : vector<56x256xf32>
    %c0_40 = arith.constant 0 : index
    %c0_41 = arith.constant 0 : index
    %52 = vector.load %arg6[%c0_40, %c0_41] : memref<56x256xf32, #tpu.memory_space<vmem>>, vector<56x256xf32>
    tpu.vector_store %arg6[%c0_40, %c0_41], %51 {strides = array<i32>} : memref<56x256xf32, #tpu.memory_space<vmem>>, vector<56x256xf32>,
    %c0_42 = arith.constant 0 : index
    %c0_43 = arith.constant 0 : index
    %53 = vector.load %arg6[%c0_42, %c0_43] : memref<56x256xf32, #tpu.memory_space<vmem>>, vector<56x256xf32>
    %c0_44 = arith.constant 0 : index
    %c0_45 = arith.constant 0 : index
    %54 = vector.load %arg4[%c0_44, %c0_45] : memref<1x256xf32, #tpu.memory_space<vmem>>, vector<1x256xf32>
    %55 = vector.broadcast %54 : vector<1x256xf32> to vector<56x256xf32>
    %56 = arith.addf %53, %55 : vector<56x256xf32>
    %cst_46 = arith.constant 0.000000e+00 : f32
    %57 = vector.broadcast %cst_46 : f32 to vector<56x256xf32>
    %58 = arith.maximumf %56, %57 : vector<56x256xf32>
    %59 = arith.truncf %58 : vector<56x256xf32> to vector<56x256xbf16>
    %c0_47 = arith.constant 0 : index
    %c0_48 = arith.constant 0 : index
    %c0_49 = arith.constant 0 : index
    %60 = vector.load %arg5[%c0_47, %c0_48, %c0_49] : memref<1x56x256xbf16, #tpu.memory_space<vmem>>, vector<1x56x256xbf16>
    %61 = vector.shape_cast %60 : vector<1x56x256xbf16> to vector<56x256xbf16>
    %62 = vector.shape_cast %59 : vector<56x256xbf16> to vector<1x56x256xbf16>
    tpu.vector_store %arg5[%c0_47, %c0_48, %c0_49], %62 {strides = array<i32>} : memref<1x56x256xbf16, #tpu.memory_space<vmem>>, vector<1x56x256xbf16>,
    return
  }
  func.func @transform_0(%arg0: i32, %arg1: i32) -> (i32, i32, i32) {
    %c0_i32 = arith.constant 0 : i32
    %c0_i32_0 = arith.constant 0 : i32
    %c0_i32_1 = arith.constant 0 : i32
    return %arg0, %c0_i32, %c0_i32_0 : i32, i32, i32
  }
  func.func @transform_1(%arg0: i32, %arg1: i32) -> (i32, i32, i32) {
    %c0_i32 = arith.constant 0 : i32
    %c0_i32_0 = arith.constant 0 : i32
    %c0_i32_1 = arith.constant 0 : i32
    %c0_i32_2 = arith.constant 0 : i32
    return %c0_i32, %c0_i32_0, %c0_i32_1 : i32, i32, i32
  }
  func.func @transform_2(%arg0: i32, %arg1: i32) -> (i32, i32) {
    %c0_i32 = arith.constant 0 : i32
    %c0_i32_0 = arith.constant 0 : i32
    %c0_i32_1 = arith.constant 0 : i32
    return %c0_i32, %c0_i32_0 : i32, i32
  }
  func.func @transform_3(%arg0: i32, %arg1: i32) -> (i32, i32, i32) {
    %c0_i32 = arith.constant 0 : i32
    %c0_i32_0 = arith.constant 0 : i32
    return %arg0, %arg1, %c0_i32 : i32, i32, i32
  }
}

module attributes {stable_mosaic.version = 11 : i64} {
  func.func @_maxpool3x3s2_kernel(%arg0: i32, %arg1: memref<1x4x4x192xbf16, #tpu.memory_space<vmem>>, %arg2: memref<1x4x3x192xbf16, #tpu.memory_space<vmem>>, %arg3: memref<1x3x4x192xbf16, #tpu.memory_space<vmem>>, %arg4: memref<1x3x3x192xbf16, #tpu.memory_space<vmem>>, %arg5: memref<1x3x3x192xbf16, #tpu.memory_space<vmem>>) attributes {dimension_semantics = [#tpu.dimension_semantics<parallel>], iteration_bounds = array<i64: 2>, scalar_prefetch = 0 : i64, scratch_operands = 0 : i64, tpu.core_type = #tpu.core_type<tc>, window_params = [{transform_indices = @transform_0, window_bounds = array<i64: 1, 4, 4, 192>}, {transform_indices = @transform_1, window_bounds = array<i64: 1, 4, 3, 192>}, {transform_indices = @transform_2, window_bounds = array<i64: 1, 3, 4, 192>}, {transform_indices = @transform_3, window_bounds = array<i64: 1, 3, 3, 192>}, {transform_indices = @transform_4, window_bounds = array<i64: 1, 3, 3, 192>}]} {
    %c0 = arith.constant 0 : index
    %c0_0 = arith.constant 0 : index
    %c0_1 = arith.constant 0 : index
    %c0_2 = arith.constant 0 : index
    %0 = vector.load %arg1[%c0, %c0_0, %c0_1, %c0_2] : memref<1x4x4x192xbf16, #tpu.memory_space<vmem>>, vector<1x4x4x192xbf16>
    %1 = vector.shape_cast %0 : vector<1x4x4x192xbf16> to vector<4x4x192xbf16>
    %c0_3 = arith.constant 0 : index
    %c0_4 = arith.constant 0 : index
    %c0_5 = arith.constant 0 : index
    %c0_6 = arith.constant 0 : index
    %2 = vector.load %arg2[%c0_3, %c0_4, %c0_5, %c0_6] : memref<1x4x3x192xbf16, #tpu.memory_space<vmem>>, vector<1x4x3x192xbf16>
    %3 = vector.shape_cast %2 : vector<1x4x3x192xbf16> to vector<4x3x192xbf16>
    %c0_7 = arith.constant 0 : index
    %c0_8 = arith.constant 0 : index
    %c0_9 = arith.constant 0 : index
    %c0_10 = arith.constant 0 : index
    %4 = vector.load %arg3[%c0_7, %c0_8, %c0_9, %c0_10] : memref<1x3x4x192xbf16, #tpu.memory_space<vmem>>, vector<1x3x4x192xbf16>
    %5 = vector.shape_cast %4 : vector<1x3x4x192xbf16> to vector<3x4x192xbf16>
    %c0_11 = arith.constant 0 : index
    %c0_12 = arith.constant 0 : index
    %c0_13 = arith.constant 0 : index
    %c0_14 = arith.constant 0 : index
    %6 = vector.load %arg4[%c0_11, %c0_12, %c0_13, %c0_14] : memref<1x3x3x192xbf16, #tpu.memory_space<vmem>>, vector<1x3x3x192xbf16>
    %7 = vector.shape_cast %6 : vector<1x3x3x192xbf16> to vector<3x3x192xbf16>
    %8 = vector.extract_strided_slice %1 {offsets = [0, 0, 0], sizes = [3, 3, 192], strides = [1, 1, 1]} : vector<4x4x192xbf16> to vector<3x3x192xbf16>
    %9 = vector.extract_strided_slice %1 {offsets = [0, 1, 0], sizes = [3, 3, 192], strides = [1, 1, 1]} : vector<4x4x192xbf16> to vector<3x3x192xbf16>
    %10 = arith.maximumf %8, %9 : vector<3x3x192xbf16>
    %11 = vector.extract_strided_slice %1 {offsets = [1, 0, 0], sizes = [3, 3, 192], strides = [1, 1, 1]} : vector<4x4x192xbf16> to vector<3x3x192xbf16>
    %12 = vector.extract_strided_slice %1 {offsets = [1, 1, 0], sizes = [3, 3, 192], strides = [1, 1, 1]} : vector<4x4x192xbf16> to vector<3x3x192xbf16>
    %13 = arith.maximumf %11, %12 : vector<3x3x192xbf16>
    %14 = arith.maximumf %10, %13 : vector<3x3x192xbf16>
    %15 = vector.extract_strided_slice %3 {offsets = [0, 0, 0], sizes = [3, 3, 192], strides = [1, 1, 1]} : vector<4x3x192xbf16> to vector<3x3x192xbf16>
    %16 = vector.extract_strided_slice %3 {offsets = [1, 0, 0], sizes = [3, 3, 192], strides = [1, 1, 1]} : vector<4x3x192xbf16> to vector<3x3x192xbf16>
    %17 = arith.maximumf %15, %16 : vector<3x3x192xbf16>
    %18 = arith.maximumf %14, %17 : vector<3x3x192xbf16>
    %19 = vector.extract_strided_slice %5 {offsets = [0, 0, 0], sizes = [3, 3, 192], strides = [1, 1, 1]} : vector<3x4x192xbf16> to vector<3x3x192xbf16>
    %20 = vector.extract_strided_slice %5 {offsets = [0, 1, 0], sizes = [3, 3, 192], strides = [1, 1, 1]} : vector<3x4x192xbf16> to vector<3x3x192xbf16>
    %21 = arith.maximumf %19, %20 : vector<3x3x192xbf16>
    %22 = arith.maximumf %18, %21 : vector<3x3x192xbf16>
    %23 = arith.maximumf %22, %7 : vector<3x3x192xbf16>
    %c0_15 = arith.constant 0 : index
    %c0_16 = arith.constant 0 : index
    %c0_17 = arith.constant 0 : index
    %c0_18 = arith.constant 0 : index
    %24 = vector.load %arg5[%c0_15, %c0_16, %c0_17, %c0_18] : memref<1x3x3x192xbf16, #tpu.memory_space<vmem>>, vector<1x3x3x192xbf16>
    %25 = vector.shape_cast %24 : vector<1x3x3x192xbf16> to vector<3x3x192xbf16>
    %26 = vector.shape_cast %23 : vector<3x3x192xbf16> to vector<1x3x3x192xbf16>
    tpu.vector_store %arg5[%c0_15, %c0_16, %c0_17, %c0_18], %26 {strides = array<i32>} : memref<1x3x3x192xbf16, #tpu.memory_space<vmem>>, vector<1x3x3x192xbf16>,
    return
  }
  func.func @transform_0(%arg0: i32) -> (i32, i32, i32, i32) {
    %c0_i32 = arith.constant 0 : i32
    %c0_i32_0 = arith.constant 0 : i32
    %c0_i32_1 = arith.constant 0 : i32
    %c0_i32_2 = arith.constant 0 : i32
    return %arg0, %c0_i32, %c0_i32_0, %c0_i32_1 : i32, i32, i32, i32
  }
  func.func @transform_1(%arg0: i32) -> (i32, i32, i32, i32) {
    %c0_i32 = arith.constant 0 : i32
    %c0_i32_0 = arith.constant 0 : i32
    %c0_i32_1 = arith.constant 0 : i32
    %c0_i32_2 = arith.constant 0 : i32
    return %arg0, %c0_i32, %c0_i32_0, %c0_i32_1 : i32, i32, i32, i32
  }
  func.func @transform_2(%arg0: i32) -> (i32, i32, i32, i32) {
    %c0_i32 = arith.constant 0 : i32
    %c0_i32_0 = arith.constant 0 : i32
    %c0_i32_1 = arith.constant 0 : i32
    %c0_i32_2 = arith.constant 0 : i32
    return %arg0, %c0_i32, %c0_i32_0, %c0_i32_1 : i32, i32, i32, i32
  }
  func.func @transform_3(%arg0: i32) -> (i32, i32, i32, i32) {
    %c0_i32 = arith.constant 0 : i32
    %c0_i32_0 = arith.constant 0 : i32
    %c0_i32_1 = arith.constant 0 : i32
    %c0_i32_2 = arith.constant 0 : i32
    return %arg0, %c0_i32, %c0_i32_0, %c0_i32_1 : i32, i32, i32, i32
  }
  func.func @transform_4(%arg0: i32) -> (i32, i32, i32, i32) {
    %c0_i32 = arith.constant 0 : i32
    %c0_i32_0 = arith.constant 0 : i32
    %c0_i32_1 = arith.constant 0 : i32
    %c0_i32_2 = arith.constant 0 : i32
    return %arg0, %c0_i32, %c0_i32_0, %c0_i32_1 : i32, i32, i32, i32
  }
}

module attributes {stable_mosaic.version = 11 : i64} {
  func.func @_implicit_conv_kernel(%arg0: i32, %arg1: i32, %arg2: memref<1x40x640xbf16, #tpu.memory_space<vmem>>, %arg3: memref<3x640x384xbf16, #tpu.memory_space<vmem>>, %arg4: memref<1x384xf32, #tpu.memory_space<vmem>>, %arg5: memref<1x24x384xbf16, #tpu.memory_space<vmem>>, %arg6: memref<24x384xf32, #tpu.memory_space<vmem>>) attributes {dimension_semantics = [#tpu.dimension_semantics<parallel>, #tpu.dimension_semantics<parallel>], iteration_bounds = array<i64: 2, 1>, scalar_prefetch = 0 : i64, scratch_operands = 1 : i64, tpu.core_type = #tpu.core_type<tc>, window_params = [{transform_indices = @transform_0, window_bounds = array<i64: 1, 40, 640>}, {pipeline_mode = #tpu.pipeline_mode<synchronous>, transform_indices = @transform_1, window_bounds = array<i64: 3, 640, 384>}, {pipeline_mode = #tpu.pipeline_mode<synchronous>, transform_indices = @transform_2, window_bounds = array<i64: 1, 384>}, {transform_indices = @transform_3, window_bounds = array<i64: 1, 24, 384>}]} {
    %c24_i32 = arith.constant 24 : i32
    %0 = arith.muli %arg1, %c24_i32 : i32
    %1 = tpu.assume_multiple %0, 8 : i32
    %c0 = arith.constant 0 : index
    %2 = arith.index_cast %1 : i32 to index
    %c0_0 = arith.constant 0 : index
    %3 = vector.load %arg2[%c0, %2, %c0_0] : memref<1x40x640xbf16, #tpu.memory_space<vmem>>, vector<1x24x640xbf16>
    %4 = vector.shape_cast %3 : vector<1x24x640xbf16> to vector<24x640xbf16>
    %c0_1 = arith.constant 0 : index
    %c0_2 = arith.constant 0 : index
    %c0_3 = arith.constant 0 : index
    %5 = vector.load %arg3[%c0_1, %c0_2, %c0_3] : memref<3x640x384xbf16, #tpu.memory_space<vmem>>, vector<1x640x384xbf16>
    %6 = vector.shape_cast %5 : vector<1x640x384xbf16> to vector<640x384xbf16>
    %cst = arith.constant dense<0.000000e+00> : vector<24x384xf32>
    %7 = tpu.matmul %4, %6, %cst {dimension_numbers = #tpu.dot_dimension_numbers<[1], [0], [0], [1], [0, 0, 1, 1], [], []>} : vector<24x640xbf16>, vector<640x384xbf16>, vector<24x384xf32> -> vector<24x384xf32>
    %c0_4 = arith.constant 0 : index
    %c0_5 = arith.constant 0 : index
    %8 = vector.load %arg6[%c0_4, %c0_5] : memref<24x384xf32, #tpu.memory_space<vmem>>, vector<24x384xf32>
    tpu.vector_store %arg6[%c0_4, %c0_5], %7 {strides = array<i32>} : memref<24x384xf32, #tpu.memory_space<vmem>>, vector<24x384xf32>,
    %c8_i32 = arith.constant 8 : i32
    %9 = arith.addi %0, %c8_i32 : i32
    %10 = tpu.assume_multiple %9, 8 : i32
    %c0_6 = arith.constant 0 : index
    %c0_7 = arith.constant 0 : index
    %11 = vector.load %arg6[%c0_6, %c0_7] : memref<24x384xf32, #tpu.memory_space<vmem>>, vector<24x384xf32>
    %c0_8 = arith.constant 0 : index
    %12 = arith.index_cast %10 : i32 to index
    %c0_9 = arith.constant 0 : index
    %13 = vector.load %arg2[%c0_8, %12, %c0_9] : memref<1x40x640xbf16, #tpu.memory_space<vmem>>, vector<1x24x640xbf16>
    %14 = vector.shape_cast %13 : vector<1x24x640xbf16> to vector<24x640xbf16>
    %c1 = arith.constant 1 : index
    %c0_10 = arith.constant 0 : index
    %c0_11 = arith.constant 0 : index
    %15 = vector.load %arg3[%c1, %c0_10, %c0_11] : memref<3x640x384xbf16, #tpu.memory_space<vmem>>, vector<1x640x384xbf16>
    %16 = vector.shape_cast %15 : vector<1x640x384xbf16> to vector<640x384xbf16>
    %cst_12 = arith.constant dense<0.000000e+00> : vector<24x384xf32>
    %17 = tpu.matmul %14, %16, %cst_12 {dimension_numbers = #tpu.dot_dimension_numbers<[1], [0], [0], [1], [0, 0, 1, 1], [], []>} : vector<24x640xbf16>, vector<640x384xbf16>, vector<24x384xf32> -> vector<24x384xf32>
    %18 = arith.addf %11, %17 : vector<24x384xf32>
    %c0_13 = arith.constant 0 : index
    %c0_14 = arith.constant 0 : index
    %19 = vector.load %arg6[%c0_13, %c0_14] : memref<24x384xf32, #tpu.memory_space<vmem>>, vector<24x384xf32>
    tpu.vector_store %arg6[%c0_13, %c0_14], %18 {strides = array<i32>} : memref<24x384xf32, #tpu.memory_space<vmem>>, vector<24x384xf32>,
    %c16_i32 = arith.constant 16 : i32
    %20 = arith.addi %0, %c16_i32 : i32
    %21 = tpu.assume_multiple %20, 8 : i32
    %c0_15 = arith.constant 0 : index
    %c0_16 = arith.constant 0 : index
    %22 = vector.load %arg6[%c0_15, %c0_16] : memref<24x384xf32, #tpu.memory_space<vmem>>, vector<24x384xf32>
    %c0_17 = arith.constant 0 : index
    %23 = arith.index_cast %21 : i32 to index
    %c0_18 = arith.constant 0 : index
    %24 = vector.load %arg2[%c0_17, %23, %c0_18] : memref<1x40x640xbf16, #tpu.memory_space<vmem>>, vector<1x24x640xbf16>
    %25 = vector.shape_cast %24 : vector<1x24x640xbf16> to vector<24x640xbf16>
    %c2 = arith.constant 2 : index
    %c0_19 = arith.constant 0 : index
    %c0_20 = arith.constant 0 : index
    %26 = vector.load %arg3[%c2, %c0_19, %c0_20] : memref<3x640x384xbf16, #tpu.memory_space<vmem>>, vector<1x640x384xbf16>
    %27 = vector.shape_cast %26 : vector<1x640x384xbf16> to vector<640x384xbf16>
    %cst_21 = arith.constant dense<0.000000e+00> : vector<24x384xf32>
    %28 = tpu.matmul %25, %27, %cst_21 {dimension_numbers = #tpu.dot_dimension_numbers<[1], [0], [0], [1], [0, 0, 1, 1], [], []>} : vector<24x640xbf16>, vector<640x384xbf16>, vector<24x384xf32> -> vector<24x384xf32>
    %29 = arith.addf %22, %28 : vector<24x384xf32>
    %c0_22 = arith.constant 0 : index
    %c0_23 = arith.constant 0 : index
    %30 = vector.load %arg6[%c0_22, %c0_23] : memref<24x384xf32, #tpu.memory_space<vmem>>, vector<24x384xf32>
    tpu.vector_store %arg6[%c0_22, %c0_23], %29 {strides = array<i32>} : memref<24x384xf32, #tpu.memory_space<vmem>>, vector<24x384xf32>,
    %c0_24 = arith.constant 0 : index
    %c0_25 = arith.constant 0 : index
    %31 = vector.load %arg6[%c0_24, %c0_25] : memref<24x384xf32, #tpu.memory_space<vmem>>, vector<24x384xf32>
    %c0_26 = arith.constant 0 : index
    %c0_27 = arith.constant 0 : index
    %32 = vector.load %arg4[%c0_26, %c0_27] : memref<1x384xf32, #tpu.memory_space<vmem>>, vector<1x384xf32>
    %33 = vector.broadcast %32 : vector<1x384xf32> to vector<24x384xf32>
    %34 = arith.addf %31, %33 : vector<24x384xf32>
    %cst_28 = arith.constant 0.000000e+00 : f32
    %35 = vector.broadcast %cst_28 : f32 to vector<24x384xf32>
    %36 = arith.maximumf %34, %35 : vector<24x384xf32>
    %37 = arith.truncf %36 : vector<24x384xf32> to vector<24x384xbf16>
    %c0_29 = arith.constant 0 : index
    %c0_30 = arith.constant 0 : index
    %c0_31 = arith.constant 0 : index
    %38 = vector.load %arg5[%c0_29, %c0_30, %c0_31] : memref<1x24x384xbf16, #tpu.memory_space<vmem>>, vector<1x24x384xbf16>
    %39 = vector.shape_cast %38 : vector<1x24x384xbf16> to vector<24x384xbf16>
    %40 = vector.shape_cast %37 : vector<24x384xbf16> to vector<1x24x384xbf16>
    tpu.vector_store %arg5[%c0_29, %c0_30, %c0_31], %40 {strides = array<i32>} : memref<1x24x384xbf16, #tpu.memory_space<vmem>>, vector<1x24x384xbf16>,
    return
  }
  func.func @transform_0(%arg0: i32, %arg1: i32) -> (i32, i32, i32) {
    %c0_i32 = arith.constant 0 : i32
    %c0_i32_0 = arith.constant 0 : i32
    %c0_i32_1 = arith.constant 0 : i32
    return %arg0, %c0_i32, %c0_i32_0 : i32, i32, i32
  }
  func.func @transform_1(%arg0: i32, %arg1: i32) -> (i32, i32, i32) {
    %c0_i32 = arith.constant 0 : i32
    %c0_i32_0 = arith.constant 0 : i32
    %c0_i32_1 = arith.constant 0 : i32
    %c0_i32_2 = arith.constant 0 : i32
    return %c0_i32, %c0_i32_0, %c0_i32_1 : i32, i32, i32
  }
  func.func @transform_2(%arg0: i32, %arg1: i32) -> (i32, i32) {
    %c0_i32 = arith.constant 0 : i32
    %c0_i32_0 = arith.constant 0 : i32
    %c0_i32_1 = arith.constant 0 : i32
    return %c0_i32, %c0_i32_0 : i32, i32
  }
  func.func @transform_3(%arg0: i32, %arg1: i32) -> (i32, i32, i32) {
    %c0_i32 = arith.constant 0 : i32
    %c0_i32_0 = arith.constant 0 : i32
    return %arg0, %arg1, %c0_i32 : i32, i32, i32
  }
}

module attributes {stable_mosaic.version = 11 : i64} {
  func.func @_implicit_conv_kernel(%arg0: i32, %arg1: i32, %arg2: memref<1x40x1152xbf16, #tpu.memory_space<vmem>>, %arg3: memref<3x1152x256xbf16, #tpu.memory_space<vmem>>, %arg4: memref<1x256xf32, #tpu.memory_space<vmem>>, %arg5: memref<1x24x256xbf16, #tpu.memory_space<vmem>>, %arg6: memref<24x256xf32, #tpu.memory_space<vmem>>) attributes {dimension_semantics = [#tpu.dimension_semantics<parallel>, #tpu.dimension_semantics<parallel>], iteration_bounds = array<i64: 2, 1>, scalar_prefetch = 0 : i64, scratch_operands = 1 : i64, tpu.core_type = #tpu.core_type<tc>, window_params = [{transform_indices = @transform_0, window_bounds = array<i64: 1, 40, 1152>}, {pipeline_mode = #tpu.pipeline_mode<synchronous>, transform_indices = @transform_1, window_bounds = array<i64: 3, 1152, 256>}, {pipeline_mode = #tpu.pipeline_mode<synchronous>, transform_indices = @transform_2, window_bounds = array<i64: 1, 256>}, {transform_indices = @transform_3, window_bounds = array<i64: 1, 24, 256>}]} {
    %c24_i32 = arith.constant 24 : i32
    %0 = arith.muli %arg1, %c24_i32 : i32
    %1 = tpu.assume_multiple %0, 8 : i32
    %c0 = arith.constant 0 : index
    %2 = arith.index_cast %1 : i32 to index
    %c0_0 = arith.constant 0 : index
    %3 = vector.load %arg2[%c0, %2, %c0_0] : memref<1x40x1152xbf16, #tpu.memory_space<vmem>>, vector<1x24x1152xbf16>
    %4 = vector.shape_cast %3 : vector<1x24x1152xbf16> to vector<24x1152xbf16>
    %c0_1 = arith.constant 0 : index
    %c0_2 = arith.constant 0 : index
    %c0_3 = arith.constant 0 : index
    %5 = vector.load %arg3[%c0_1, %c0_2, %c0_3] : memref<3x1152x256xbf16, #tpu.memory_space<vmem>>, vector<1x1152x256xbf16>
    %6 = vector.shape_cast %5 : vector<1x1152x256xbf16> to vector<1152x256xbf16>
    %cst = arith.constant dense<0.000000e+00> : vector<24x256xf32>
    %7 = tpu.matmul %4, %6, %cst {dimension_numbers = #tpu.dot_dimension_numbers<[1], [0], [0], [1], [0, 0, 1, 1], [], []>} : vector<24x1152xbf16>, vector<1152x256xbf16>, vector<24x256xf32> -> vector<24x256xf32>
    %c0_4 = arith.constant 0 : index
    %c0_5 = arith.constant 0 : index
    %8 = vector.load %arg6[%c0_4, %c0_5] : memref<24x256xf32, #tpu.memory_space<vmem>>, vector<24x256xf32>
    tpu.vector_store %arg6[%c0_4, %c0_5], %7 {strides = array<i32>} : memref<24x256xf32, #tpu.memory_space<vmem>>, vector<24x256xf32>,
    %c8_i32 = arith.constant 8 : i32
    %9 = arith.addi %0, %c8_i32 : i32
    %10 = tpu.assume_multiple %9, 8 : i32
    %c0_6 = arith.constant 0 : index
    %c0_7 = arith.constant 0 : index
    %11 = vector.load %arg6[%c0_6, %c0_7] : memref<24x256xf32, #tpu.memory_space<vmem>>, vector<24x256xf32>
    %c0_8 = arith.constant 0 : index
    %12 = arith.index_cast %10 : i32 to index
    %c0_9 = arith.constant 0 : index
    %13 = vector.load %arg2[%c0_8, %12, %c0_9] : memref<1x40x1152xbf16, #tpu.memory_space<vmem>>, vector<1x24x1152xbf16>
    %14 = vector.shape_cast %13 : vector<1x24x1152xbf16> to vector<24x1152xbf16>
    %c1 = arith.constant 1 : index
    %c0_10 = arith.constant 0 : index
    %c0_11 = arith.constant 0 : index
    %15 = vector.load %arg3[%c1, %c0_10, %c0_11] : memref<3x1152x256xbf16, #tpu.memory_space<vmem>>, vector<1x1152x256xbf16>
    %16 = vector.shape_cast %15 : vector<1x1152x256xbf16> to vector<1152x256xbf16>
    %cst_12 = arith.constant dense<0.000000e+00> : vector<24x256xf32>
    %17 = tpu.matmul %14, %16, %cst_12 {dimension_numbers = #tpu.dot_dimension_numbers<[1], [0], [0], [1], [0, 0, 1, 1], [], []>} : vector<24x1152xbf16>, vector<1152x256xbf16>, vector<24x256xf32> -> vector<24x256xf32>
    %18 = arith.addf %11, %17 : vector<24x256xf32>
    %c0_13 = arith.constant 0 : index
    %c0_14 = arith.constant 0 : index
    %19 = vector.load %arg6[%c0_13, %c0_14] : memref<24x256xf32, #tpu.memory_space<vmem>>, vector<24x256xf32>
    tpu.vector_store %arg6[%c0_13, %c0_14], %18 {strides = array<i32>} : memref<24x256xf32, #tpu.memory_space<vmem>>, vector<24x256xf32>,
    %c16_i32 = arith.constant 16 : i32
    %20 = arith.addi %0, %c16_i32 : i32
    %21 = tpu.assume_multiple %20, 8 : i32
    %c0_15 = arith.constant 0 : index
    %c0_16 = arith.constant 0 : index
    %22 = vector.load %arg6[%c0_15, %c0_16] : memref<24x256xf32, #tpu.memory_space<vmem>>, vector<24x256xf32>
    %c0_17 = arith.constant 0 : index
    %23 = arith.index_cast %21 : i32 to index
    %c0_18 = arith.constant 0 : index
    %24 = vector.load %arg2[%c0_17, %23, %c0_18] : memref<1x40x1152xbf16, #tpu.memory_space<vmem>>, vector<1x24x1152xbf16>
    %25 = vector.shape_cast %24 : vector<1x24x1152xbf16> to vector<24x1152xbf16>
    %c2 = arith.constant 2 : index
    %c0_19 = arith.constant 0 : index
    %c0_20 = arith.constant 0 : index
    %26 = vector.load %arg3[%c2, %c0_19, %c0_20] : memref<3x1152x256xbf16, #tpu.memory_space<vmem>>, vector<1x1152x256xbf16>
    %27 = vector.shape_cast %26 : vector<1x1152x256xbf16> to vector<1152x256xbf16>
    %cst_21 = arith.constant dense<0.000000e+00> : vector<24x256xf32>
    %28 = tpu.matmul %25, %27, %cst_21 {dimension_numbers = #tpu.dot_dimension_numbers<[1], [0], [0], [1], [0, 0, 1, 1], [], []>} : vector<24x1152xbf16>, vector<1152x256xbf16>, vector<24x256xf32> -> vector<24x256xf32>
    %29 = arith.addf %22, %28 : vector<24x256xf32>
    %c0_22 = arith.constant 0 : index
    %c0_23 = arith.constant 0 : index
    %30 = vector.load %arg6[%c0_22, %c0_23] : memref<24x256xf32, #tpu.memory_space<vmem>>, vector<24x256xf32>
    tpu.vector_store %arg6[%c0_22, %c0_23], %29 {strides = array<i32>} : memref<24x256xf32, #tpu.memory_space<vmem>>, vector<24x256xf32>,
    %c0_24 = arith.constant 0 : index
    %c0_25 = arith.constant 0 : index
    %31 = vector.load %arg6[%c0_24, %c0_25] : memref<24x256xf32, #tpu.memory_space<vmem>>, vector<24x256xf32>
    %c0_26 = arith.constant 0 : index
    %c0_27 = arith.constant 0 : index
    %32 = vector.load %arg4[%c0_26, %c0_27] : memref<1x256xf32, #tpu.memory_space<vmem>>, vector<1x256xf32>
    %33 = vector.broadcast %32 : vector<1x256xf32> to vector<24x256xf32>
    %34 = arith.addf %31, %33 : vector<24x256xf32>
    %cst_28 = arith.constant 0.000000e+00 : f32
    %35 = vector.broadcast %cst_28 : f32 to vector<24x256xf32>
    %36 = arith.maximumf %34, %35 : vector<24x256xf32>
    %37 = arith.truncf %36 : vector<24x256xf32> to vector<24x256xbf16>
    %c0_29 = arith.constant 0 : index
    %c0_30 = arith.constant 0 : index
    %c0_31 = arith.constant 0 : index
    %38 = vector.load %arg5[%c0_29, %c0_30, %c0_31] : memref<1x24x256xbf16, #tpu.memory_space<vmem>>, vector<1x24x256xbf16>
    %39 = vector.shape_cast %38 : vector<1x24x256xbf16> to vector<24x256xbf16>
    %40 = vector.shape_cast %37 : vector<24x256xbf16> to vector<1x24x256xbf16>
    tpu.vector_store %arg5[%c0_29, %c0_30, %c0_31], %40 {strides = array<i32>} : memref<1x24x256xbf16, #tpu.memory_space<vmem>>, vector<1x24x256xbf16>,
    return
  }
  func.func @transform_0(%arg0: i32, %arg1: i32) -> (i32, i32, i32) {
    %c0_i32 = arith.constant 0 : i32
    %c0_i32_0 = arith.constant 0 : i32
    %c0_i32_1 = arith.constant 0 : i32
    return %arg0, %c0_i32, %c0_i32_0 : i32, i32, i32
  }
  func.func @transform_1(%arg0: i32, %arg1: i32) -> (i32, i32, i32) {
    %c0_i32 = arith.constant 0 : i32
    %c0_i32_0 = arith.constant 0 : i32
    %c0_i32_1 = arith.constant 0 : i32
    %c0_i32_2 = arith.constant 0 : i32
    return %c0_i32, %c0_i32_0, %c0_i32_1 : i32, i32, i32
  }
  func.func @transform_2(%arg0: i32, %arg1: i32) -> (i32, i32) {
    %c0_i32 = arith.constant 0 : i32
    %c0_i32_0 = arith.constant 0 : i32
    %c0_i32_1 = arith.constant 0 : i32
    return %c0_i32, %c0_i32_0 : i32, i32
  }
  func.func @transform_3(%arg0: i32, %arg1: i32) -> (i32, i32, i32) {
    %c0_i32 = arith.constant 0 : i32
    %c0_i32_0 = arith.constant 0 : i32
    return %arg0, %arg1, %c0_i32 : i32, i32, i32
  }
}

module attributes {stable_mosaic.version = 11 : i64} {
  func.func @_implicit_conv_kernel(%arg0: i32, %arg1: i32, %arg2: memref<1x40x768xbf16, #tpu.memory_space<vmem>>, %arg3: memref<3x768x256xbf16, #tpu.memory_space<vmem>>, %arg4: memref<1x256xf32, #tpu.memory_space<vmem>>, %arg5: memref<1x24x256xbf16, #tpu.memory_space<vmem>>, %arg6: memref<24x256xf32, #tpu.memory_space<vmem>>) attributes {dimension_semantics = [#tpu.dimension_semantics<parallel>, #tpu.dimension_semantics<parallel>], iteration_bounds = array<i64: 2, 1>, scalar_prefetch = 0 : i64, scratch_operands = 1 : i64, tpu.core_type = #tpu.core_type<tc>, window_params = [{transform_indices = @transform_0, window_bounds = array<i64: 1, 40, 768>}, {pipeline_mode = #tpu.pipeline_mode<synchronous>, transform_indices = @transform_1, window_bounds = array<i64: 3, 768, 256>}, {pipeline_mode = #tpu.pipeline_mode<synchronous>, transform_indices = @transform_2, window_bounds = array<i64: 1, 256>}, {transform_indices = @transform_3, window_bounds = array<i64: 1, 24, 256>}]} {
    %c24_i32 = arith.constant 24 : i32
    %0 = arith.muli %arg1, %c24_i32 : i32
    %1 = tpu.assume_multiple %0, 8 : i32
    %c0 = arith.constant 0 : index
    %2 = arith.index_cast %1 : i32 to index
    %c0_0 = arith.constant 0 : index
    %3 = vector.load %arg2[%c0, %2, %c0_0] : memref<1x40x768xbf16, #tpu.memory_space<vmem>>, vector<1x24x768xbf16>
    %4 = vector.shape_cast %3 : vector<1x24x768xbf16> to vector<24x768xbf16>
    %c0_1 = arith.constant 0 : index
    %c0_2 = arith.constant 0 : index
    %c0_3 = arith.constant 0 : index
    %5 = vector.load %arg3[%c0_1, %c0_2, %c0_3] : memref<3x768x256xbf16, #tpu.memory_space<vmem>>, vector<1x768x256xbf16>
    %6 = vector.shape_cast %5 : vector<1x768x256xbf16> to vector<768x256xbf16>
    %cst = arith.constant dense<0.000000e+00> : vector<24x256xf32>
    %7 = tpu.matmul %4, %6, %cst {dimension_numbers = #tpu.dot_dimension_numbers<[1], [0], [0], [1], [0, 0, 1, 1], [], []>} : vector<24x768xbf16>, vector<768x256xbf16>, vector<24x256xf32> -> vector<24x256xf32>
    %c0_4 = arith.constant 0 : index
    %c0_5 = arith.constant 0 : index
    %8 = vector.load %arg6[%c0_4, %c0_5] : memref<24x256xf32, #tpu.memory_space<vmem>>, vector<24x256xf32>
    tpu.vector_store %arg6[%c0_4, %c0_5], %7 {strides = array<i32>} : memref<24x256xf32, #tpu.memory_space<vmem>>, vector<24x256xf32>,
    %c8_i32 = arith.constant 8 : i32
    %9 = arith.addi %0, %c8_i32 : i32
    %10 = tpu.assume_multiple %9, 8 : i32
    %c0_6 = arith.constant 0 : index
    %c0_7 = arith.constant 0 : index
    %11 = vector.load %arg6[%c0_6, %c0_7] : memref<24x256xf32, #tpu.memory_space<vmem>>, vector<24x256xf32>
    %c0_8 = arith.constant 0 : index
    %12 = arith.index_cast %10 : i32 to index
    %c0_9 = arith.constant 0 : index
    %13 = vector.load %arg2[%c0_8, %12, %c0_9] : memref<1x40x768xbf16, #tpu.memory_space<vmem>>, vector<1x24x768xbf16>
    %14 = vector.shape_cast %13 : vector<1x24x768xbf16> to vector<24x768xbf16>
    %c1 = arith.constant 1 : index
    %c0_10 = arith.constant 0 : index
    %c0_11 = arith.constant 0 : index
    %15 = vector.load %arg3[%c1, %c0_10, %c0_11] : memref<3x768x256xbf16, #tpu.memory_space<vmem>>, vector<1x768x256xbf16>
    %16 = vector.shape_cast %15 : vector<1x768x256xbf16> to vector<768x256xbf16>
    %cst_12 = arith.constant dense<0.000000e+00> : vector<24x256xf32>
    %17 = tpu.matmul %14, %16, %cst_12 {dimension_numbers = #tpu.dot_dimension_numbers<[1], [0], [0], [1], [0, 0, 1, 1], [], []>} : vector<24x768xbf16>, vector<768x256xbf16>, vector<24x256xf32> -> vector<24x256xf32>
    %18 = arith.addf %11, %17 : vector<24x256xf32>
    %c0_13 = arith.constant 0 : index
    %c0_14 = arith.constant 0 : index
    %19 = vector.load %arg6[%c0_13, %c0_14] : memref<24x256xf32, #tpu.memory_space<vmem>>, vector<24x256xf32>
    tpu.vector_store %arg6[%c0_13, %c0_14], %18 {strides = array<i32>} : memref<24x256xf32, #tpu.memory_space<vmem>>, vector<24x256xf32>,
    %c16_i32 = arith.constant 16 : i32
    %20 = arith.addi %0, %c16_i32 : i32
    %21 = tpu.assume_multiple %20, 8 : i32
    %c0_15 = arith.constant 0 : index
    %c0_16 = arith.constant 0 : index
    %22 = vector.load %arg6[%c0_15, %c0_16] : memref<24x256xf32, #tpu.memory_space<vmem>>, vector<24x256xf32>
    %c0_17 = arith.constant 0 : index
    %23 = arith.index_cast %21 : i32 to index
    %c0_18 = arith.constant 0 : index
    %24 = vector.load %arg2[%c0_17, %23, %c0_18] : memref<1x40x768xbf16, #tpu.memory_space<vmem>>, vector<1x24x768xbf16>
    %25 = vector.shape_cast %24 : vector<1x24x768xbf16> to vector<24x768xbf16>
    %c2 = arith.constant 2 : index
    %c0_19 = arith.constant 0 : index
    %c0_20 = arith.constant 0 : index
    %26 = vector.load %arg3[%c2, %c0_19, %c0_20] : memref<3x768x256xbf16, #tpu.memory_space<vmem>>, vector<1x768x256xbf16>
    %27 = vector.shape_cast %26 : vector<1x768x256xbf16> to vector<768x256xbf16>
    %cst_21 = arith.constant dense<0.000000e+00> : vector<24x256xf32>
    %28 = tpu.matmul %25, %27, %cst_21 {dimension_numbers = #tpu.dot_dimension_numbers<[1], [0], [0], [1], [0, 0, 1, 1], [], []>} : vector<24x768xbf16>, vector<768x256xbf16>, vector<24x256xf32> -> vector<24x256xf32>
    %29 = arith.addf %22, %28 : vector<24x256xf32>
    %c0_22 = arith.constant 0 : index
    %c0_23 = arith.constant 0 : index
    %30 = vector.load %arg6[%c0_22, %c0_23] : memref<24x256xf32, #tpu.memory_space<vmem>>, vector<24x256xf32>
    tpu.vector_store %arg6[%c0_22, %c0_23], %29 {strides = array<i32>} : memref<24x256xf32, #tpu.memory_space<vmem>>, vector<24x256xf32>,
    %c0_24 = arith.constant 0 : index
    %c0_25 = arith.constant 0 : index
    %31 = vector.load %arg6[%c0_24, %c0_25] : memref<24x256xf32, #tpu.memory_space<vmem>>, vector<24x256xf32>
    %c0_26 = arith.constant 0 : index
    %c0_27 = arith.constant 0 : index
    %32 = vector.load %arg4[%c0_26, %c0_27] : memref<1x256xf32, #tpu.memory_space<vmem>>, vector<1x256xf32>
    %33 = vector.broadcast %32 : vector<1x256xf32> to vector<24x256xf32>
    %34 = arith.addf %31, %33 : vector<24x256xf32>
    %cst_28 = arith.constant 0.000000e+00 : f32
    %35 = vector.broadcast %cst_28 : f32 to vector<24x256xf32>
    %36 = arith.maximumf %34, %35 : vector<24x256xf32>
    %37 = arith.truncf %36 : vector<24x256xf32> to vector<24x256xbf16>
    %c0_29 = arith.constant 0 : index
    %c0_30 = arith.constant 0 : index
    %c0_31 = arith.constant 0 : index
    %38 = vector.load %arg5[%c0_29, %c0_30, %c0_31] : memref<1x24x256xbf16, #tpu.memory_space<vmem>>, vector<1x24x256xbf16>
    %39 = vector.shape_cast %38 : vector<1x24x256xbf16> to vector<24x256xbf16>
    %40 = vector.shape_cast %37 : vector<24x256xbf16> to vector<1x24x256xbf16>
    tpu.vector_store %arg5[%c0_29, %c0_30, %c0_31], %40 {strides = array<i32>} : memref<1x24x256xbf16, #tpu.memory_space<vmem>>, vector<1x24x256xbf16>,
    return
  }
  func.func @transform_0(%arg0: i32, %arg1: i32) -> (i32, i32, i32) {
    %c0_i32 = arith.constant 0 : i32
    %c0_i32_0 = arith.constant 0 : i32
    %c0_i32_1 = arith.constant 0 : i32
    return %arg0, %c0_i32, %c0_i32_0 : i32, i32, i32
  }
  func.func @transform_1(%arg0: i32, %arg1: i32) -> (i32, i32, i32) {
    %c0_i32 = arith.constant 0 : i32
    %c0_i32_0 = arith.constant 0 : i32
    %c0_i32_1 = arith.constant 0 : i32
    %c0_i32_2 = arith.constant 0 : i32
    return %c0_i32, %c0_i32_0, %c0_i32_1 : i32, i32, i32
  }
  func.func @transform_2(%arg0: i32, %arg1: i32) -> (i32, i32) {
    %c0_i32 = arith.constant 0 : i32
    %c0_i32_0 = arith.constant 0 : i32
    %c0_i32_1 = arith.constant 0 : i32
    return %c0_i32, %c0_i32_0 : i32, i32
  }
  func.func @transform_3(%arg0: i32, %arg1: i32) -> (i32, i32, i32) {
    %c0_i32 = arith.constant 0 : i32
    %c0_i32_0 = arith.constant 0 : i32
    return %arg0, %arg1, %c0_i32 : i32, i32, i32
  }
}

</mosaic_0001>

<bundles_post_ra>
// kernel: alexnet_forward.7
= control target key start
LH: loop header
LB: loop body
LE: loop exit
PB: predicated region body
PF: predicated region fallthrough
CT: control target
= control target key end

     0   :  { %s1835_s12 = smov 0   ;;  %s2063_s0 = inlined_call_operand.vmem [shape: bf16[512,384], index: 0, kind: input, shape index: {}]   ;;  %s2064_s1 = inlined_call_operand.vmem [shape: bf16[384,128], index: 1, kind: input, shape index: {}]   ;;  %s2065_s2 = inlined_call_operand.vmem [shape: f32[1,128], index: 2, kind: input, shape index: {}]   ;;  %s2066_s3 = inlined_call_operand.vmem [shape: bf16[512,128], index: 3, kind: output, shape index: {}]  }
   0x1 LB: > { %s1267_s13 = sadd.s32 4294967295, %s1813_s12   ;;  %p1271_p0 = scmp.ge.s32.totalorder %s1813_s12, 1  ;;  %s1813_s12 = sphi %s1835_s12, %s13_s12  }
   0x2   : > { %p139_p1 = scmp.lt.s32.totalorder %s1813_s12, 3 }
   0x4   : > { %p140_p2 = pnand %p1271_p0, %p139_p1 }
   0x5   : > { %v1719_v0 = vld [vmem:[%s2064_s1 + $0x40] sm:$0xff] (!%p140_p2)   ;;  %s1272_s16 = sshll.u32 (!%p140_p2), %s1267_s13, 5  ;;  %v1721_v2 = vld [vmem:[%s2064_s1 + $0x48] sm:$0xff] (!%p140_p2)   ;;  %v1723_v4 = vld [vmem:[%s2064_s1 + $0x50] sm:$0xff] (!%p140_p2)  }
   0x6   : > { %143 = sbr.rel (%p140_p2) target bundleno = 352 (0x160), region = 32  ;;  %v1720_v1 = vld [vmem:[%s2064_s1] sm:$0xff] (!%p140_p2)   ;;  %1510 = vmatprep.subr.bf16.mxu0 (!%p140_p2), %v1719_v0  ;;  %1694 = vmatprep.subr.bf16.mxu1 (!%p140_p2), %v1719_v0  ;;  %p165_p3 = scmp.lt.s32.totalorder (!%p140_p2), %s1272_s16, 63  ;;  %v1722_v3 = vld [vmem:[%s2064_s1 + $0x8] sm:$0xff] (!%p140_p2)   ;;  %v1724_v5 = vld [vmem:[%s2064_s1 + $0x10] sm:$0xff] (!%p140_p2)  }
   0x7   : > { %1511 = vmatpush3.bf16.msra.mxu0 (!%p140_p2), %v1720_v1  ;;  %1702 = vmatpush3.bf16.msra.mxu1 (!%p140_p2), %v1720_v1  ;;  %v1725_v6 = vld [vmem:[%s2064_s1 + $0x58] sm:$0xff] (!%p140_p2)   ;;  %v1727_v8 = vld [vmem:[%s2064_s1 + $0x60] sm:$0xff] (!%p140_p2)   ;;  %v1729_v10 = vld [vmem:[%s2064_s1 + $0x68] sm:$0xff] (!%p140_p2)  }
   0x8   : > { %1512 = vmatprep.subr.bf16.mxu0 (!%p140_p2), %v1721_v2  ;;  %1695 = vmatprep.subr.bf16.mxu1 (!%p140_p2), %v1721_v2  ;;  %v1726_v7 = vld [vmem:[%s2064_s1 + $0x18] sm:$0xff] (!%p140_p2)   ;;  %v1728_v9 = vld [vmem:[%s2064_s1 + $0x20] sm:$0xff] (!%p140_p2)   ;;  %v1730_v13 = vld [vmem:[%s2064_s1 + $0x28] sm:$0xff] (!%p140_p2)  }
   0x9   : > { %v1731_v14 = vld [vmem:[%s2064_s1 + $0x70] sm:$0xff] (!%p140_p2)   ;;  %v1733_v16 = vld [vmem:[%s2064_s1 + $0x78] sm:$0xff] (!%p140_p2)   ;;  %v1741_v18 = vld [vmem:[%s2064_s1 + $0x80] sm:$0xff] (!%p140_p2)  }
   0xa   : > { %v1732_v15 = vld [vmem:[%s2064_s1 + $0x30] sm:$0xff] (!%p140_p2)   ;;  %v1734_v17 = vld [vmem:[%s2064_s1 + $0x38] sm:$0xff] (!%p140_p2)   ;;  %v1742_v22 = vld [vmem:[%s2064_s1 + $0x88] sm:$0xff] (!%p140_p2)  }
   0xb   : > { %1513 = vmatpush3.bf16.msra.mxu0 (!%p140_p2), %v1722_v3  ;;  %1703 = vmatpush3.bf16.msra.mxu1 (!%p140_p2), %v1722_v3  ;;  %v1749_v25 = vld [vmem:[%s2064_s1 + $0x90] sm:$0xff] (!%p140_p2)   ;;  %v1750_v27 = vld [vmem:[%s2064_s1 + $0x98] sm:$0xff] (!%p140_p2)   ;;  %v1757_v30 = vld [vmem:[%s2064_s1 + $0xa0] sm:$0xff] (!%p140_p2)  }
   0xc   : > { %1514 = vmatprep.subr.bf16.mxu0 (!%p140_p2), %v1723_v4  ;;  %1696 = vmatprep.subr.bf16.mxu1 (!%p140_p2), %v1723_v4  ;;  %v1758_v33 = vld [vmem:[%s2064_s1 + $0xa8] sm:$0xff] (!%p140_p2)   ;;  %v1765_v36 = vld [vmem:[%s2064_s1 + $0xb0] sm:$0xff] (!%p140_p2)   ;;  %v1766_v40 = vld [vmem:[%s2064_s1 + $0xb8] sm:$0xff] (!%p140_p2)  }
   0xd   : > { %s2068_s16 = smov (!%p165_p3, %s1272_s16), 63 }
   0xe   : > { %s1710_s29 = smul.u32 12, %s2068_s16  ;;  %s1275_s19 = sshll.u32 %s2068_s16, 2 }
   0xf   : > { %1515 = vmatpush3.bf16.msra.mxu0 %v1724_v5  ;;  %1704 = vmatpush3.bf16.msra.mxu1 %v1724_v5  ;;  %s2000_s22 = scalar_lea.vmem %s2066_s3, %s1275_s19 }
  0x10   : > { %1516 = vmatprep.subr.bf16.mxu0 %v1725_v6  ;;  %1697 = vmatprep.subr.bf16.mxu1 %v1725_v6  ;;  %s1876_s9 = scalar_lea.vmem %s2063_s0, %s1710_s29 }
  0x11   : > { %v1737_v11 = vld [vmem:[%s1876_s9 + $0x4] ss:$12 sps:$4 sm:$0xff]   ;;  %v1735_v19 = vld [vmem:[%s1876_s9] ss:$12 sps:$4 sm:$0xff]   ;;  %v1743_v21 = vld [vmem:[%s1876_s9 + $0x1c] ss:$12 sps:$4 sm:$0xff]  }
  0x12   : > { %v1740_v12 = vld [vmem:[%s1876_s9 + $0x124] ss:$12 sps:$4 sm:$0xff]   ;;  %729 = vmatprep.mubr.bf16.mxu0 %v1737_v11  ;;  %v1738_v20 = vld [vmem:[%s1876_s9 + $0x120] ss:$12 sps:$4 sm:$0xff]   ;;  %v1745_v23 = vld [vmem:[%s1876_s9 + $0x13c] ss:$12 sps:$4 sm:$0xff]  }
  0x13   : > { %1517 = vmatpush3.bf16.msra.mxu0 %v1726_v7  ;;  %1705 = vmatpush3.bf16.msra.mxu1 %v1726_v7  ;;  %v1747_v24 = vld [vmem:[%s1876_s9 + $0x18] ss:$12 sps:$4 sm:$0xff]   ;;  %v1751_v28 = vld [vmem:[%s1876_s9 + $0x34] ss:$12 sps:$4 sm:$0xff]   ;;  %v1755_v31 = vld [vmem:[%s1876_s9 + $0x30] ss:$12 sps:$4 sm:$0xff]  }
  0x14   : > { %1518 = vmatprep.subr.bf16.mxu0 %v1727_v8  ;;  %1698 = vmatprep.subr.bf16.mxu1 %v1727_v8  ;;  %v1748_v26 = vld [vmem:[%s1876_s9 + $0x138] ss:$12 sps:$4 sm:$0xff]   ;;  %v1753_v29 = vld [vmem:[%s1876_s9 + $0x154] ss:$12 sps:$4 sm:$0xff]   ;;  %v1756_v32 = vld [vmem:[%s1876_s9 + $0x150] ss:$12 sps:$4 sm:$0xff]  }
  0x15   : > { %825 = vmatprep.mubr.bf16.mxu1 %v1740_v12  ;;  %v1759_v34 = vld [vmem:[%s1876_s9 + $0x4c] ss:$12 sps:$4 sm:$0xff]   ;;  %v1763_v37 = vld [vmem:[%s1876_s9 + $0x48] ss:$12 sps:$4 sm:$0xff]   ;;  %v1767_v39 = vld [vmem:[%s1876_s9 + $0x64] ss:$12 sps:$4 sm:$0xff]  }
  0x16   : > { %v1761_v35 = vld [vmem:[%s1876_s9 + $0x16c] ss:$12 sps:$4 sm:$0xff]   ;;  %v1764_v38 = vld [vmem:[%s1876_s9 + $0x168] ss:$12 sps:$4 sm:$0xff]   ;;  %v1776_v47 = vld [vmem:[%s1876_s9 + $0x50] ss:$12 sps:$4 sm:$0xff]  }
  0x17   : > { %1519 = vmatpush3.bf16.msra.mxu0 %v1728_v9  ;;  %1706 = vmatpush3.bf16.msra.mxu1 %v1728_v9  ;;  %v1769_v41 = vld [vmem:[%s1876_s9 + $0x8] ss:$12 sps:$4 sm:$0xff]   ;;  %v1770_v42 = vld [vmem:[%s1876_s9 + $0x60] ss:$12 sps:$4 sm:$0xff]   ;;  %v1774_v45 = vld [vmem:[%s1876_s9 + $0x38] ss:$12 sps:$4 sm:$0xff]  }
  0x18   : > { %1520 = vmatprep.subr.bf16.mxu0 %v1729_v10  ;;  %1699 = vmatprep.subr.bf16.mxu1 %v1729_v10  ;;  %v1771_v43 = vld [vmem:[%s1876_s9 + $0x20] ss:$12 sps:$4 sm:$0xff]   ;;  %v1772_v44 = vld [vmem:[%s1876_s9 + $0x7c] ss:$12 sps:$4 sm:$0xff]   ;;  %v1775_v46 = vld [vmem:[%s1876_s9 + $0x78] ss:$12 sps:$4 sm:$0xff]  }
  0x19   : > { %v1777_v48 = vld [vmem:[%s1876_s9 + $0x94] ss:$12 sps:$4 sm:$0xff]   ;;  %v1780_v50 = vld [vmem:[%s1876_s9 + $0x90] ss:$12 sps:$4 sm:$0xff]   ;;  %v1782_v52 = vld [vmem:[%s1876_s9 + $0xac] ss:$12 sps:$4 sm:$0xff]  }
  0x1a   : > { %v1779_v49 = vld [vmem:[%s1876_s9 + $0x68] ss:$12 sps:$4 sm:$0xff]   ;;  %v1781_v51 = vld [vmem:[%s1876_s9 + $0x80] ss:$12 sps:$4 sm:$0xff]   ;;  %v1784_v53 = vld [vmem:[%s1876_s9 + $0x98] ss:$12 sps:$4 sm:$0xff]  }
  0x1b   : > { %1521 = vmatpush3.bf16.msra.mxu0 %v1730_v13  ;;  %1707 = vmatpush3.bf16.msra.mxu1 %v1730_v13  ;;  %v1785_v54 = vld [vmem:[%s1876_s9 + $0xa8] ss:$12 sps:$4 sm:$0xff]   ;;  %v1786_v55 = vld [vmem:[%s1876_s9 + $0xb0] ss:$12 sps:$4 sm:$0xff]   ;;  %v1790_v58 = vld [vmem:[%s1876_s9 + $0xc0] ss:$12 sps:$4 sm:$0xff]  }
  0x1c   : > { %1522 = vmatprep.subr.bf16.mxu0 %v1731_v14  ;;  %1700 = vmatprep.subr.bf16.mxu1 %v1731_v14  ;;  %v1787_v56 = vld [vmem:[%s1876_s9 + $0xc4] ss:$12 sps:$4 sm:$0xff]   ;;  %v1789_v57 = vld [vmem:[%s1876_s9 + $0xc8] ss:$12 sps:$4 sm:$0xff]   ;;  %v1791_v59 = vld [vmem:[%s1876_s9 + $0xe0] ss:$12 sps:$4 sm:$0xff]  }
  0x1d   : > { %v1792_v60 = vld [vmem:[%s1876_s9 + $0xdc] ss:$12 sps:$4 sm:$0xff]   ;;  %v1794_v61 = vld [vmem:[%s1876_s9 + $0xf8] ss:$12 sps:$4 sm:$0xff]   ;;  %v1797_v0 = vld [vmem:[%s1876_s9 + $0xf4] ss:$12 sps:$4 sm:$0xff]  }
  0x1e   : > { %v1795_v62 = vld [vmem:[%s1876_s9 + $0xd8] ss:$12 sps:$4 sm:$0xff]   ;;  %v1796_v63 = vld [vmem:[%s1876_s9 + $0x110] ss:$12 sps:$4 sm:$0xff]   ;;  %v1799_v1 = vld [vmem:[%s1876_s9 + $0x128] ss:$12 sps:$4 sm:$0xff]  }
  0x1f   : > { %1523 = vmatpush3.bf16.msra.mxu0 %v1732_v15  ;;  %1708 = vmatpush3.bf16.msra.mxu1 %v1732_v15  ;;  %v1800_v2 = vld [vmem:[%s1876_s9 + $0xf0] ss:$12 sps:$4 sm:$0xff]   ;;  %v1801_v3 = vld [vmem:[%s1876_s9 + $0x140] ss:$12 sps:$4 sm:$0xff]   ;;  %v1804_v5 = vld [vmem:[%s1876_s9 + $0x158] ss:$12 sps:$4 sm:$0xff]  }
  0x20   : > { %1524 = vmatprep.subr.bf16.mxu0 %v1733_v16  ;;  %1701 = vmatprep.subr.bf16.mxu1 %v1733_v16  ;;  %v1802_v4 = vld [vmem:[%s1876_s9 + $0x10c] ss:$12 sps:$4 sm:$0xff]   ;;  %v1805_v6 = vld [vmem:[%s1876_s9 + $0x108] ss:$12 sps:$4 sm:$0xff]   ;;  %v1806_v7 = vld [vmem:[%s1876_s9 + $0x170] ss:$12 sps:$4 sm:$0xff]  }
  0x23   : > { %1525 = vmatpush3.bf16.msra.mxu0 %v1734_v17  ;;  %1709 = vmatpush3.bf16.msra.mxu1 %v1734_v17 }
  0x24   : > { %1646 = vmatprep.subr.bf16.mxu1 %v1741_v18 }
  0x26   : > { %730 = vmatmul.mubr.bf16.vlgmr.msra.gmra.mrb[0].mxu0 %v1735_v19  ;;  %826 = vmatmul.mubr.bf16.vlgmr.msra.gmra.mrb[0].mxu1 %v1738_v20 }
  0x27   : > { %1647 = vmatpush3.bf16.msra.mxu1 %v1741_v18  ;;  %737 = vmatprep.mubr.bf16.mxu0 %v1743_v21 }
  0x28   : > { %1648 = vmatprep.subr.bf16.mxu1 %v1742_v22  ;;  %833 = vmatprep.mubr.bf16.mxu1 %v1745_v23 }
  0x2b   : > { %1649 = vmatpush3.bf16.msra.mxu1 %v1742_v22 }
  0x2c   : > { %1650 = vmatprep.subr.bf16.mxu1 %v1749_v25 }
  0x2e   : > { %738 = vmatmul.mubr.bf16.gmra.mrb[4].mxu0 %v1747_v24  ;;  %834 = vmatmul.mubr.bf16.gmra.mrb[4].mxu1 %v1748_v26 }
  0x2f   : > { %1651 = vmatpush3.bf16.msra.mxu1 %v1749_v25  ;;  %745 = vmatprep.mubr.bf16.mxu0 %v1751_v28 }
  0x30   : > { %1652 = vmatprep.subr.bf16.mxu1 %v1750_v27  ;;  %841 = vmatprep.mubr.bf16.mxu1 %v1753_v29 }
  0x33   : > { %1653 = vmatpush3.bf16.msra.mxu1 %v1750_v27 }
  0x34   : > { %1654 = vmatprep.subr.bf16.mxu1 %v1757_v30 }
  0x36   : > { %746 = vmatmul.mubr.bf16.gmra.mrb[8].mxu0 %v1755_v31  ;;  %842 = vmatmul.mubr.bf16.gmra.mrb[8].mxu1 %v1756_v32 }
  0x37   : > { %1655 = vmatpush3.bf16.msra.mxu1 %v1757_v30  ;;  %753 = vmatprep.mubr.bf16.mxu0 %v1759_v34 }
  0x38   : > { %1656 = vmatprep.subr.bf16.mxu1 %v1758_v33  ;;  %849 = vmatprep.mubr.bf16.mxu1 %v1761_v35 }
  0x3b   : > { %1657 = vmatpush3.bf16.msra.mxu1 %v1758_v33 }
  0x3c   : > { %1658 = vmatprep.subr.bf16.mxu1 %v1765_v36 }
  0x3e   : > { %754 = vmatmul.mubr.bf16.gmra.mrb[12].mxu0 %v1763_v37  ;;  %850 = vmatmul.mubr.bf16.gmra.mrb[12].mxu1 %v1764_v38 }
  0x3f   : > { %1659 = vmatpush3.bf16.msra.mxu1 %v1765_v36  ;;  %761 = vmatprep.mubr.bf16.mxu0 %v1767_v39 }
  0x40   : > { %1660 = vmatprep.subr.bf16.mxu1 %v1766_v40  ;;  %1662 = vmatprep.mubr.bf16.mxu1 %v1769_v41 }
  0x43   : > { %1661 = vmatpush3.bf16.msra.mxu1 %v1766_v40 }
  0x46   : > { %762 = vmatmul.mubr.bf16.gmra.mrb[16].mxu0 %v1770_v42  ;;  %1663 = vmatmul.mubr.bf16.vlgmr.msra.gmra.mrb[16].mxu1 %v1771_v43 }
  0x47   : > { %769 = vmatprep.mubr.bf16.mxu0 %v1772_v44  ;;  %1666 = vmatprep.mubr.bf16.mxu1 %v1774_v45 }
  0x4e   : > { %770 = vmatmul.mubr.bf16.gmra.mrb[20].mxu0 %v1775_v46  ;;  %1667 = vmatmul.mubr.bf16.gmra.mrb[20].mxu1 %v1776_v47 }
  0x4f   : > { %777 = vmatprep.mubr.bf16.mxu0 %v1777_v48  ;;  %1670 = vmatprep.mubr.bf16.mxu1 %v1779_v49 }
  0x56   : > { %778 = vmatmul.mubr.bf16.gmra.mrb[24].mxu0 %v1780_v50  ;;  %1671 = vmatmul.mubr.bf16.gmra.mrb[24].mxu1 %v1781_v51 }
  0x57   : > { %785 = vmatprep.mubr.bf16.mxu0 %v1782_v52  ;;  %1674 = vmatprep.mubr.bf16.mxu1 %v1784_v53 }
  0x5e   : > { %786 = vmatmul.mubr.bf16.gmra.mrb[28].mxu0 %v1785_v54  ;;  %1675 = vmatmul.mubr.bf16.gmra.mrb[28].mxu1 %v1786_v55 }
  0x5f   : > { %793 = vmatprep.mubr.bf16.mxu0 %v1787_v56  ;;  %1678 = vmatprep.mubr.bf16.mxu1 %v1789_v57  ;;  %v1990_v56 = vld [vmem:[%s2065_s2] ss:$0 sm:$0xff] }
  0x66   : > { %794 = vmatmul.mubr.bf16.gmra.mrb[32].mxu0 %v1790_v58  ;;  %1679 = vmatmul.mubr.bf16.gmra.mrb[32].mxu1 %v1791_v59 }
  0x67   : > { %801 = vmatprep.mubr.bf16.mxu0 %v1792_v60  ;;  %1682 = vmatprep.mubr.bf16.mxu1 %v1794_v61 }
  0x6e   : > { %802 = vmatmul.mubr.bf16.gmra.mrb[36].mxu0 %v1795_v62  ;;  %1683 = vmatmul.mubr.bf16.gmra.mrb[36].mxu1 %v1796_v63 }
  0x6f   : > { %809 = vmatprep.mubr.bf16.mxu0 %v1797_v0  ;;  %1686 = vmatprep.mubr.bf16.mxu1 %v1799_v1 }
  0x76   : > { %810 = vmatmul.mubr.bf16.gmra.mrb[40].mxu0 %v1800_v2  ;;  %1687 = vmatmul.mubr.bf16.gmra.mrb[40].mxu1 %v1801_v3 }
  0x77   : > { %817 = vmatprep.mubr.bf16.mxu0 %v1802_v4  ;;  %1690 = vmatprep.mubr.bf16.mxu1 %v1804_v5 }
  0x7e   : > { %818 = vmatmul.mubr.bf16.gmra.mrb[44].mxu0 %v1805_v6  ;;  %1691 = vmatmul.mubr.bf16.gmra.mrb[44].mxu1 %v1806_v7 }
  0xf9   : > { %v1526_v8 = vpop.f32.mrb[0].mxu0  ;;  %v1598_v9 = vpop.f32.mrb[0].mxu1 }
  0xfa   : > { %v1527_v10 = vpop.f32.mrb[1].mxu0  ;;  %v1599_v11 = vpop.f32.mrb[1].mxu1 }
  0xfb   : > { %v1528_v12 = vadd.f32 %v1527_v10, %v1526_v8  ;;  %v1529_v13 = vpop.f32.mrb[2].mxu0  ;;  %v1971_v14 = vadd.f32 %v1599_v11, %v1598_v9  ;;  %v1601_v15 = vpop.f32.mrb[2].mxu1 }
  0xfc   : > { %v1530_v16 = vpop.f32.mrb[3].mxu0  ;;  %v1602_v17 = vpop.f32.mrb[3].mxu1 }
  0xfd   : > { %v1531_v18 = vadd.f32 %v1530_v16, %v1529_v13  ;;  %v1973_v19 = vadd.f32 %v1602_v17, %v1601_v15  ;;  %v732_v60 = vadd.f32 %v1528_v12, %v1990_v56 }
  0xff   : > { %v735_v5 = vadd.f32 %v1531_v18, %v1990_v56 }
 0x101   : > { %v1532_v20 = vpop.f32.mrb[4].mxu0  ;;  %v1604_v21 = vpop.f32.mrb[4].mxu1 }
 0x102   : > { %v1533_v22 = vpop.f32.mrb[5].mxu0  ;;  %v1605_v23 = vpop.f32.mrb[5].mxu1 }
 0x103   : > { %v1534_v24 = vadd.f32 %v1533_v22, %v1532_v20  ;;  %v1535_v25 = vpop.f32.mrb[6].mxu0  ;;  %v1975_v26 = vadd.f32 %v1605_v23, %v1604_v21  ;;  %v1607_v27 = vpop.f32.mrb[6].mxu1 }
 0x104   : > { %v1536_v28 = vpop.f32.mrb[7].mxu0  ;;  %v1608_v29 = vpop.f32.mrb[7].mxu1 }
 0x105   : > { %v1537_v30 = vadd.f32 %v1536_v28, %v1535_v25  ;;  %v1977_v31 = vadd.f32 %v1608_v29, %v1607_v27  ;;  %v740_v57 = vadd.f32 %v1534_v24, %v1990_v56 }
 0x107   : > { %v743_v0 = vadd.f32 %v1537_v30, %v1990_v56 }
 0x109   : > { %v1538_v32 = vpop.f32.mrb[8].mxu0  ;;  %v1610_v33 = vpop.f32.mrb[8].mxu1 }
 0x10a   : > { %v1539_v34 = vpop.f32.mrb[9].mxu0  ;;  %v1611_v35 = vpop.f32.mrb[9].mxu1 }
 0x10b   : > { %v1540_v36 = vadd.f32 %v1539_v34, %v1538_v32  ;;  %v1541_v37 = vpop.f32.mrb[10].mxu0  ;;  %v1979_v38 = vadd.f32 %v1611_v35, %v1610_v33  ;;  %v1613_v39 = vpop.f32.mrb[10].mxu1 }
 0x10c   : > { %v1542_v40 = vpop.f32.mrb[11].mxu0  ;;  %v1614_v41 = vpop.f32.mrb[11].mxu1 }
 0x10d   : > { %v1543_v42 = vadd.f32 %v1542_v40, %v1541_v37  ;;  %v1981_v43 = vadd.f32 %v1614_v41, %v1613_v39  ;;  %v748_v22 = vadd.f32 %v1540_v36, %v1990_v56 }
 0x10f   : > { %v751_v33 = vadd.f32 %v1543_v42, %v1990_v56 }
 0x111   : > { %v1544_v44 = vpop.f32.mrb[12].mxu0  ;;  %v1616_v45 = vpop.f32.mrb[12].mxu1 }
 0x112   : > { %v1545_v46 = vpop.f32.mrb[13].mxu0  ;;  %v1617_v47 = vpop.f32.mrb[13].mxu1 }
 0x113   : > { %v1546_v48 = vadd.f32 %v1545_v46, %v1544_v44  ;;  %v1547_v49 = vpop.f32.mrb[14].mxu0  ;;  %v1983_v50 = vadd.f32 %v1617_v47, %v1616_v45  ;;  %v1619_v51 = vpop.f32.mrb[14].mxu1 }
 0x114   : > { %v1548_v52 = vpop.f32.mrb[15].mxu0  ;;  %v1620_v53 = vpop.f32.mrb[15].mxu1 }
 0x115   : > { %v1549_v54 = vadd.f32 %v1548_v52, %v1547_v49  ;;  %v1985_v55 = vadd.f32 %v1620_v53, %v1619_v51  ;;  %v756_v17 = vadd.f32 %v1546_v48, %v1990_v56 }
 0x117   : > { %v759_v27 = vadd.f32 %v1549_v54, %v1990_v56 }
 0x119   : > { %v1550_v58 = vpop.f32.mrb[16].mxu0  ;;  %v1664_v59 = vpop.f32.mrb[16].mxu1 }
 0x11a   : > { %v901_v61 = vadd.f32 %v1664_v59, %v740_v57  ;;  %v1551_v62 = vpop.f32.mrb[17].mxu0  ;;  %v892_v63 = vpop.f32.mrb[17].mxu1 }
 0x11b   : > { %v1552_v1 = vadd.f32 %v1551_v62, %v1550_v58  ;;  %v893_v2 = vadd.f32 %v892_v63, %v732_v60  ;;  %v1553_v3 = vpop.f32.mrb[18].mxu0  ;;  %v1665_v4 = vpop.f32.mrb[18].mxu1 }
 0x11c   : > { %v904_v6 = vadd.f32 %v1665_v4, %v743_v0  ;;  %v1554_v7 = vpop.f32.mrb[19].mxu0  ;;  %v895_v8 = vpop.f32.mrb[19].mxu1  ;;  %v1021_v11 = vmax.f32 %v901_v61, 0.0 }
 0x11d   : > { %v1555_v9 = vadd.f32 %v1554_v7, %v1553_v3  ;;  %v896_v10 = vadd.f32 %v895_v8, %v735_v5  ;;  %v1019_v12 = vmax.f32 %v893_v2, 0.0  ;;  %v764_v52 = vadd.f32 %v1552_v1, %v1990_v56 }
 0x11e   : > { %v1022_v13 = vmax.f32 %v904_v6, 0.0 }
 0x11f   : > { %v1020_v15 = vmax.f32 %v896_v10, 0.0  ;;  %v767_v62 = vadd.f32 %v1555_v9, %v1990_v56 }
 0x120   : > { %v1423_v16 = vpack.c.bf16 %v1022_v13, %v1021_v11 }
 0x121   : > { %v1418_v18 = vpack.c.bf16 %v1020_v15, %v1019_v12  ;;  %v1556_v20 = vpop.f32.mrb[20].mxu0  ;;  %v1668_v21 = vpop.f32.mrb[20].mxu1 }
 0x122   : > { %1495 = vst [vmem:[%s2000_s22 + $0x8] sm:$0xff] %v1423_v16   ;;  %v917_v23 = vadd.f32 %v1668_v21, %v756_v17  ;;  %v1557_v24 = vpop.f32.mrb[21].mxu0  ;;  %v908_v25 = vpop.f32.mrb[21].mxu1 }
 0x123   : > { %1419 = vst [vmem:[%s2000_s22] sm:$0xff] %v1418_v18   ;;  %v1558_v28 = vadd.f32 %v1557_v24, %v1556_v20  ;;  %v909_v29 = vadd.f32 %v908_v25, %v748_v22  ;;  %v1559_v30 = vpop.f32.mrb[22].mxu0  ;;  %v1669_v32 = vpop.f32.mrb[22].mxu1 }
 0x124   : > { %v920_v34 = vadd.f32 %v1669_v32, %v759_v27  ;;  %v1560_v35 = vpop.f32.mrb[23].mxu0  ;;  %v911_v37 = vpop.f32.mrb[23].mxu1  ;;  %v1025_v36 = vmax.f32 %v917_v23, 0.0 }
 0x125   : > { %v1561_v39 = vadd.f32 %v1560_v35, %v1559_v30  ;;  %v912_v40 = vadd.f32 %v911_v37, %v751_v33  ;;  %v1023_v44 = vmax.f32 %v909_v29, 0.0  ;;  %v772_v47 = vadd.f32 %v1558_v28, %v1990_v56 }
 0x126   : > { %v1026_v41 = vmax.f32 %v920_v34, 0.0 }
 0x127   : > { %v1024_v45 = vmax.f32 %v912_v40, 0.0  ;;  %v775_v57 = vadd.f32 %v1561_v39, %v1990_v56 }
 0x128   : > { %v1433_v46 = vpack.c.bf16 %v1026_v41, %v1025_v36 }
 0x129   : > { %v1428_v48 = vpack.c.bf16 %v1024_v45, %v1023_v44  ;;  %v1562_v49 = vpop.f32.mrb[24].mxu0  ;;  %v1672_v51 = vpop.f32.mrb[24].mxu1 }
 0x12a   : > { %1497 = vst [vmem:[%s2000_s22 + $0x18] sm:$0xff] %v1433_v46   ;;  %v933_v42 = vadd.f32 %v1672_v51, %v772_v47  ;;  %v1563_v53 = vpop.f32.mrb[25].mxu0  ;;  %v924_v54 = vpop.f32.mrb[25].mxu1 }
 0x12b   : > { %1496 = vst [vmem:[%s2000_s22 + $0x10] sm:$0xff] %v1428_v48   ;;  %v1564_v58 = vadd.f32 %v1563_v53, %v1562_v49  ;;  %v925_v59 = vadd.f32 %v924_v54, %v764_v52  ;;  %v1565_v60 = vpop.f32.mrb[26].mxu0  ;;  %v1673_v61 = vpop.f32.mrb[26].mxu1 }
 0x12c   : > { %v936_v63 = vadd.f32 %v1673_v61, %v775_v57  ;;  %v1566_v0 = vpop.f32.mrb[27].mxu0  ;;  %v927_v2 = vpop.f32.mrb[27].mxu1  ;;  %v1029_v4 = vmax.f32 %v933_v42, 0.0 }
 0x12d   : > { %v1567_v3 = vadd.f32 %v1566_v0, %v1565_v60  ;;  %v928_v1 = vadd.f32 %v927_v2, %v767_v62  ;;  %v1027_v6 = vmax.f32 %v925_v59, 0.0  ;;  %v780_v12 = vadd.f32 %v1564_v58, %v1990_v56 }
 0x12e   : > { %v1030_v5 = vmax.f32 %v936_v63, 0.0 }
 0x12f   : > { %v1028_v7 = vmax.f32 %v928_v1, 0.0  ;;  %v783_v21 = vadd.f32 %v1567_v3, %v1990_v56 }
 0x130   : > { %v1443_v8 = vpack.c.bf16 %v1030_v5, %v1029_v4 }
 0x131   : > { %v1438_v10 = vpack.c.bf16 %v1028_v7, %v1027_v6  ;;  %v1568_v11 = vpop.f32.mrb[28].mxu0  ;;  %v1676_v13 = vpop.f32.mrb[28].mxu1 }
 0x132   : > { %1499 = vst [vmem:[%s2000_s22 + $0x28] sm:$0xff] %v1443_v8   ;;  %v1569_v15 = vpop.f32.mrb[29].mxu0  ;;  %v940_v16 = vpop.f32.mrb[29].mxu1 }
 0x133   : > { %1498 = vst [vmem:[%s2000_s22 + $0x20] sm:$0xff] %v1438_v10   ;;  %v1570_v9 = vadd.f32 %v1569_v15, %v1568_v11  ;;  %v941_v17 = vadd.f32 %v940_v16, %v780_v12  ;;  %v1571_v18 = vpop.f32.mrb[30].mxu0  ;;  %v1677_v20 = vpop.f32.mrb[30].mxu1  ;;  %v836_v10 = vadd.f32 %v1975_v26, %v1990_v56  ;;  %v828_v15 = vadd.f32 %v1971_v14, %v1990_v56 }
 0x134   : > { %v1572_v22 = vpop.f32.mrb[31].mxu0  ;;  %v943_v23 = vpop.f32.mrb[31].mxu1 }
 0x135   : > { %v788_v24 = vadd.f32 %v1570_v9, %v1990_v56  ;;  %v1573_v25 = vadd.f32 %v1572_v22, %v1571_v18  ;;  %v944_v27 = vadd.f32 %v943_v23, %v783_v21  ;;  %v1031_v29 = vmax.f32 %v941_v17, 0.0 }
 0x136   : > { %v839_v18 = vadd.f32 %v1977_v31, %v1990_v56 }
 0x137   : > { %v949_v28 = vadd.f32 %v1676_v13, %v788_v24  ;;  %v791_v30 = vadd.f32 %v1573_v25, %v1990_v56  ;;  %v1032_v32 = vmax.f32 %v944_v27, 0.0 }
 0x139   : > { %v952_v33 = vadd.f32 %v1677_v20, %v791_v30  ;;  %v1448_v34 = vpack.c.bf16 %v1032_v32, %v1031_v29  ;;  %v1574_v35 = vpop.f32.mrb[32].mxu0  ;;  %v1680_v37 = vpop.f32.mrb[32].mxu1  ;;  %v1033_v36 = vmax.f32 %v949_v28, 0.0  ;;  %v831_v28 = vadd.f32 %v1973_v19, %v1990_v56 }
 0x13a   : > { %v1575_v39 = vpop.f32.mrb[33].mxu0  ;;  %v956_v40 = vpop.f32.mrb[33].mxu1 }
 0x13b   : > { %v1034_v41 = vmax.f32 %v952_v33, 0.0  ;;  %1500 = vst [vmem:[%s2000_s22 + $0x30] sm:$0xff] %v1448_v34   ;;  %v1576_v44 = vadd.f32 %v1575_v39, %v1574_v35  ;;  %v1577_v45 = vpop.f32.mrb[34].mxu0  ;;  %v1681_v46 = vpop.f32.mrb[34].mxu1 }
 0x13c   : > { %v1578_v47 = vpop.f32.mrb[35].mxu0  ;;  %v959_v48 = vpop.f32.mrb[35].mxu1 }
 0x13d   : > { %v1453_v49 = vpack.c.bf16 %v1034_v41, %v1033_v36  ;;  %v796_v51 = vadd.f32 %v1576_v44, %v1990_v56  ;;  %v1579_v52 = vadd.f32 %v1578_v47, %v1577_v45  ;;  %v852_v41 = vadd.f32 %v1983_v50, %v1990_v56 }
 0x13f   : > { %1501 = vst [vmem:[%s2000_s22 + $0x38] sm:$0xff] %v1453_v49   ;;  %v957_v42 = vadd.f32 %v956_v40, %v796_v51  ;;  %v799_v53 = vadd.f32 %v1579_v52, %v1990_v56  ;;  %v855_v52 = vadd.f32 %v1985_v55, %v1990_v56 }
 0x141   : > { %v960_v54 = vadd.f32 %v959_v48, %v799_v53  ;;  %v1580_v57 = vpop.f32.mrb[36].mxu0  ;;  %v2024_v58 = vpop.f32.mrb[36].mxu1  ;;  %v1035_v61 = vmax.f32 %v957_v42, 0.0 }
 0x142   : > { %v1581_v59 = vpop.f32.mrb[37].mxu0  ;;  %v972_v60 = vpop.f32.mrb[37].mxu1 }
 0x143   : > { %v1036_v62 = vmax.f32 %v960_v54, 0.0  ;;  %v1582_v63 = vadd.f32 %v1581_v59, %v1580_v57  ;;  %v1583_v0 = vpop.f32.mrb[38].mxu0  ;;  %v2026_v2 = vpop.f32.mrb[38].mxu1 }
 0x144   : > { %v1584_v3 = vpop.f32.mrb[39].mxu0  ;;  %v975_v1 = vpop.f32.mrb[39].mxu1 }
 0x145   : > { %v1458_v4 = vpack.c.bf16 %v1036_v62, %v1035_v61  ;;  %v804_v5 = vadd.f32 %v1582_v63, %v1990_v56  ;;  %v1585_v6 = vadd.f32 %v1584_v3, %v1583_v0 }
 0x147   : > { %1502 = vst [vmem:[%s2000_s22 + $0x40] sm:$0xff] %v1458_v4   ;;  %v965_v7 = vadd.f32 %v1680_v37, %v804_v5  ;;  %v807_v8 = vadd.f32 %v1585_v6, %v1990_v56 }
 0x149   : > { %v968_v11 = vadd.f32 %v1681_v46, %v807_v8  ;;  %v1586_v13 = vpop.f32.mrb[40].mxu0  ;;  %v1688_v12 = vpop.f32.mrb[40].mxu1  ;;  %v1037_v20 = vmax.f32 %v965_v7, 0.0  ;;  %v844_v46 = vadd.f32 %v1979_v38, %v1990_v56  ;;  %v847_v38 = vadd.f32 %v1981_v43, %v1990_v56 }
 0x14a   : > { %v997_v16 = vadd.f32 %v1688_v12, %v836_v10  ;;  %v1587_v9 = vpop.f32.mrb[41].mxu0  ;;  %v988_v17 = vpop.f32.mrb[41].mxu1 }
 0x14b   : > { %v1038_v21 = vmax.f32 %v968_v11, 0.0  ;;  %v1588_v22 = vadd.f32 %v1587_v9, %v1586_v13  ;;  %v989_v23 = vadd.f32 %v988_v17, %v828_v15  ;;  %v1589_v24 = vpop.f32.mrb[42].mxu0  ;;  %v1689_v25 = vpop.f32.mrb[42].mxu1 }
 0x14c   : > { %v1000_v26 = vadd.f32 %v1689_v25, %v839_v18  ;;  %v1590_v27 = vpop.f32.mrb[43].mxu0  ;;  %v991_v29 = vpop.f32.mrb[43].mxu1  ;;  %v1045_v33 = vmax.f32 %v997_v16, 0.0 }
 0x14d   : > { %v1463_v14 = vpack.c.bf16 %v1038_v21, %v1037_v20  ;;  %v812_v30 = vadd.f32 %v1588_v22, %v1990_v56  ;;  %v1591_v32 = vadd.f32 %v1590_v27, %v1589_v24  ;;  %v992_v34 = vadd.f32 %v991_v29, %v831_v28 }
 0x14e   : > { %v1046_v31 = vmax.f32 %v1000_v26, 0.0  ;;  %v1043_v39 = vmax.f32 %v989_v23, 0.0 }
 0x14f   : > { %1503 = vst [vmem:[%s2000_s22 + $0x48] sm:$0xff] %v1463_v14   ;;  %v973_v35 = vadd.f32 %v972_v60, %v812_v30  ;;  %v815_v37 = vadd.f32 %v1591_v32, %v1990_v56  ;;  %v1044_v36 = vmax.f32 %v992_v34, 0.0 }
 0x150   : > { %v1483_v40 = vpack.c.bf16 %v1046_v31, %v1045_v33 }
 0x151   : > { %v976_v19 = vadd.f32 %v975_v1, %v815_v37  ;;  %v1592_v44 = vpop.f32.mrb[44].mxu0  ;;  %v1692_v45 = vpop.f32.mrb[44].mxu1  ;;  %v1478_v47 = vpack.c.bf16 %v1044_v36, %v1043_v39  ;;  %v1039_v42 = vmax.f32 %v973_v35, 0.0 }
 0x152   : > { %1507 = vst [vmem:[%s2000_s22 + $0x68] sm:$0xff] %v1483_v40   ;;  %v1013_v48 = vadd.f32 %v1692_v45, %v852_v41  ;;  %v1593_v49 = vpop.f32.mrb[45].mxu0  ;;  %v1004_v51 = vpop.f32.mrb[45].mxu1 }
 0x153   : > { %v1040_v53 = vmax.f32 %v976_v19, 0.0  ;;  %v1594_v54 = vadd.f32 %v1593_v49, %v1592_v44  ;;  %v1005_v50 = vadd.f32 %v1004_v51, %v844_v46  ;;  %v1595_v57 = vpop.f32.mrb[46].mxu0  ;;  %v1693_v59 = vpop.f32.mrb[46].mxu1  ;;  %1506 = vst [vmem:[%s2000_s22 + $0x60] sm:$0xff] %v1478_v47  }
 0x154   : > { %v1016_v60 = vadd.f32 %v1693_v59, %v855_v52  ;;  %v1596_v61 = vpop.f32.mrb[47].mxu0  ;;  %v1007_v62 = vpop.f32.mrb[47].mxu1  ;;  %v1049_v3 = vmax.f32 %v1013_v48, 0.0 }
 0x155   : > { %v1468_v63 = vpack.c.bf16 %v1040_v53, %v1039_v42  ;;  %v820_v0 = vadd.f32 %v1594_v54, %v1990_v56  ;;  %v1597_v55 = vadd.f32 %v1596_v61, %v1595_v57  ;;  %v1008_v4 = vadd.f32 %v1007_v62, %v847_v38 }
 0x156   : > { %v1050_v1 = vmax.f32 %v1016_v60, 0.0  ;;  %v1047_v7 = vmax.f32 %v1005_v50, 0.0 }
 0x157   : > { %1504 = vst [vmem:[%s2000_s22 + $0x50] sm:$0xff] %v1468_v63   ;;  %v981_v5 = vadd.f32 %v2024_v58, %v820_v0  ;;  %v823_v6 = vadd.f32 %v1597_v55, %v1990_v56  ;;  %v1048_v10 = vmax.f32 %v1008_v4, 0.0 }
 0x158   : > { %v1493_v8 = vpack.c.bf16 %v1050_v1, %v1049_v3 }
 0x159   : > { %v984_v43 = vadd.f32 %v2026_v2, %v823_v6  ;;  %v1488_v11 = vpack.c.bf16 %v1048_v10, %v1047_v7  ;;  %v1041_v13 = vmax.f32 %v981_v5, 0.0 }
 0x15a   : > { %1509 = vst [vmem:[%s2000_s22 + $0x78] sm:$0xff] %v1493_v8  }
 0x15b   : > { %v1042_v12 = vmax.f32 %v984_v43, 0.0  ;;  %1508 = vst [vmem:[%s2000_s22 + $0x70] sm:$0xff] %v1488_v11  }
 0x15d   : > { %v1473_v15 = vpack.c.bf16 %v1042_v12, %v1041_v13 }
 0x15f   : > { %1505 = vst [vmem:[%s2000_s22 + $0x58] sm:$0xff] %v1473_v15  }
 0x160 PF: > { %s13_s12 = sadd.s32 1, %s1813_s12  }
 0x161   : > { %p10_p4 = scmp.ge.s32.totalorder %s13_s12, 4  }
 0x163   :  { %12 = sbr.rel (!%p10_p4) target bundleno = 1 (0x1), region = 62 }

// kernel: alexnet_forward.8
= control target key start
LH: loop header
LB: loop body
LE: loop exit
PB: predicated region body
PF: predicated region fallthrough
CT: control target
= control target key end

     0   :  { %s661_s15 = smov 0   ;;  %s820_s0 = inlined_call_operand.vmem [shape: bf16[2,8,8,64], index: 0, kind: input, shape index: {}]   ;;  %s821_s1 = inlined_call_operand.vmem [shape: bf16[2,8,7,64], index: 1, kind: input, shape index: {}]   ;;  %s822_s2 = inlined_call_operand.vmem [shape: bf16[2,7,8,64], index: 2, kind: input, shape index: {}]   ;;  %s823_s3 = inlined_call_operand.vmem [shape: bf16[2,7,7,64], index: 3, kind: input, shape index: {}]   ;;  %s824_s4 = inlined_call_operand.vmem [shape: bf16[2,7,7,64], index: 4, kind: output, shape index: {}]  }
   0x1 LB: > { %s603_s16 = sadd.s32 4294967295, %s634_s15   ;;  %p607_p0 = scmp.ge.s32.totalorder %s634_s15, 1  ;;  %s634_s15 = sphi %s661_s15, %s14_s15  }
   0x2   : > { %p192_p1 = scmp.lt.s32.totalorder %s634_s15, 3 }
   0x4   : > { %p193_p2 = pnand %p607_p0, %p192_p1 }
   0x5   : > { %p233_p3 = scmp.lt.s32.totalorder (!%p193_p2), %s603_s16, 1  ;;  %vm488_vm0 = vcmask (!%p193_p2), 519168   ;;  %vm489_vm1 = vsmask.f32 (!%p193_p2), 3328 }
   0x6   : > { %196 = sbr.rel (%p193_p2) target bundleno = 64 (0x40), region = 36  ;;  %vm754_vm2 = vmand (!%p193_p2), %vm488_vm0, %vm489_vm1 }
   0xd   : > { %s828_s16 = smov (!%p233_p3, %s603_s16), 1 }
   0xe   : > { %s617_s17 = sshll.u32 %s828_s16, 5  ;;  %s669_s18 = smul.u32 28, %s828_s16 }
   0xf   : > { %s674_s21 = scalar_lea.vmem %s820_s0, %s617_s17  ;;  %s679_s24 = scalar_lea.vmem %s821_s1, %s617_s17 }
  0x10   : > { %s685_s27 = scalar_lea.vmem %s822_s2, %s669_s18  ;;  %v258_v0 = vld [vmem:[%s674_s21] sm:$0xf]  ;;  %v259_v1 = vld [vmem:[%s674_s21 + $0x4] sm:$0xf]  ;;  %v260_v12 = vld [vmem:[%s674_s21 + $0x8] sm:$0xf]  ;;  %s728_s30 = scalar_lea.vmem %s823_s3, %s669_s18 }
  0x11   : > { %v690_v2 = vld [vmem:[%s679_s24] sm:$0xf]  ;;  %v693_v3 = vld [vmem:[%s679_s24 + $0x4] sm:$0xf]  ;;  %v289_v5 = vshrl.u32 %v258_v0, 16  ;;  %v292_v6 = vshll.u32 %v258_v0, 16  ;;  %s742_s7 = scalar_lea.vmem %s824_s4, %s669_s18 }
  0x12   : > { %v696_v4 = vld [vmem:[%s685_s27] sm:$0xf]  ;;  %v298_v7 = vshrl.u32 %v259_v1, 16  ;;  %v301_v8 = vshll.u32 %v259_v1, 16  ;;  %v383_v9 = vmax.bf16 %v693_v3, %v690_v2  ;;  %v704_v13 = vld [vmem:[%s679_s24 + $0x8] sm:$0xf] }
  0x13   : > { %v398_v10 = vshrl.u32 %v696_v4, 16  ;;  %v401_v11 = vshll.u32 %v696_v4, 16  ;;  %v291_v14 = vrot.slane %v289_v5, 4  ;;  %v294_v15 = vrot.slane %v292_v6, 5  ;;  %v707_v18 = vld [vmem:[%s685_s27 + $0x4] sm:$0xf] }
  0x14   : > { %v300_v16 = vrot.slane %v298_v7, 4  ;;  %v303_v17 = vrot.slane %v301_v8, 5  ;;  %v307_v21 = vshrl.u32 %v260_v12, 16  ;;  %v310_v22 = vshll.u32 %v260_v12, 16  ;;  %v261_v27 = vld [vmem:[%s674_s21 + $0xc] sm:$0xf] }
  0x15   : > { %v400_v19 = vrot.slane %v398_v10, 4  ;;  %v403_v20 = vrot.slane %v401_v11, 5  ;;  %v295_v23 = vor.u32 %v294_v15, %v291_v14  ;;  %v384_v25 = vmax.bf16 %v704_v13, %v693_v3  ;;  %v715_v32 = vld [vmem:[%s679_s24 + $0xc] sm:$0xf]  ;;  %v718_v40 = vld [vmem:[%s685_s27 + $0x8] sm:$0xf] }
  0x16   : > { %v304_v24 = vor.u32 %v303_v17, %v300_v16  ;;  %v407_v26 = vshrl.u32 %v707_v18, 16  ;;  %v309_v29 = vrot.slane %v307_v21, 4  ;;  %v312_v30 = vrot.slane %v310_v22, 5  ;;  %v262_v46 = vld [vmem:[%s674_s21 + $0x10] sm:$0xf] }
  0x17   : > { %v404_v28 = vor.u32 %v403_v20, %v400_v19  ;;  %v410_v31 = vshll.u32 %v707_v18, 16  ;;  %v296_v33 = vrot.slane %v295_v23, 4  ;;  %v316_v36 = vshrl.u32 %v261_v27, 16  ;;  %v733_v58 = vld [vmem:[%s679_s24 + $0x10] sm:$0xf] }
  0x18   : > { %v305_v34 = vrot.slane %v304_v24, 4  ;;  %v409_v35 = vrot.slane %v407_v26, 4  ;;  %v313_v38 = vor.u32 %v312_v30, %v309_v29  ;;  %v319_v41 = vshll.u32 %v261_v27, 16  ;;  %v736_v59 = vld [vmem:[%s685_s27 + $0xc] sm:$0xf] }
  0x19   : > { %v405_v37 = vrot.slane %v404_v28, 4  ;;  %v412_v39 = vrot.slane %v410_v31, 5  ;;  %v358_v42 = vmax.bf16 %v296_v33, %v258_v0  ;;  %v318_v44 = vrot.slane %v316_v36, 4  ;;  %v747_v6 = vld [vmem:[%s674_s21 + $0x14] sm:$0xf] }
  0x1a   : > { %v359_v43 = vmax.bf16 %v305_v34, %v259_v1  ;;  %v385_v45 = vmax.bf16 %v715_v32, %v704_v13  ;;  %v314_v48 = vrot.slane %v313_v38, 4  ;;  %v321_v50 = vrot.slane %v319_v41, 5  ;;  %v281_v1 = vld [vmem:[%s728_s30] sm:$0xf]  ;;  %v763_v28 = vld [vmem:[%s685_s27 + $0x10] sm:$0xf] }
  0x1b   : > { %v467_v47 = vmax.bf16 %v405_v37, %v696_v4  ;;  %v413_v49 = vor.u32 %v412_v39, %v409_v35  ;;  %v416_v52 = vshrl.u32 %v718_v40, 16  ;;  %v419_v53 = vshll.u32 %v718_v40, 16  ;;  %v264_v36 = vld [vmem:[%s674_s21 + $0x18] sm:$0xf]  ;;  %v283_v37 = vld [vmem:[%s728_s30 + $0x8] sm:$0xf] }
  0x1c   : > { %v376_v51 = vmax.bf16 %v359_v43, %v358_v42  ;;  %v325_v54 = vshrl.u32 %v262_v46, 16  ;;  %v360_v55 = vmax.bf16 %v314_v48, %v260_v12  ;;  %v322_v57 = vor.u32 %v321_v50, %v318_v44  ;;  %v491_v12 = vld [vmem:[%s742_s7] sm:$0xf]  ;;  %v781_v50 = vld [vmem:[%s685_s27 + $0x14] sm:$0xf] }
  0x1d   : > { %v414_v56 = vrot.slane %v413_v49, 4  ;;  %v328_v60 = vshll.u32 %v262_v46, 16  ;;  %v418_v62 = vrot.slane %v416_v52, 4  ;;  %v421_v63 = vrot.slane %v419_v53, 5 }
  0x1e   : > { %v390_v61 = vmax.bf16 %v383_v9, %v376_v51  ;;  %v327_v0 = vrot.slane %v325_v54, 4  ;;  %v377_v2 = vmax.bf16 %v360_v55, %v359_v43  ;;  %v323_v4 = vrot.slane %v322_v57, 4  ;;  %v497_v43 = vld [vmem:[%s742_s7 + $0x8] sm:$0xf]  ;;  %v284_v57 = vld [vmem:[%s728_s30 + $0xc] sm:$0xf] }
  0x1f   : > { %v468_v3 = vmax.bf16 %v414_v56, %v707_v18  ;;  %v330_v5 = vrot.slane %v328_v60, 5  ;;  %v422_v8 = vor.u32 %v421_v63, %v418_v62  ;;  %v386_v10 = vmax.bf16 %v733_v58, %v715_v32  ;;  %v282_v18 = vld [vmem:[%s728_s30 + $0x4] sm:$0xf]  ;;  %v265_v56 = vld [vmem:[%s674_s21 + $0x1c] sm:$0xf] }
  0x20   : > { %v474_v7 = vmax.bf16 %v467_v47, %v390_v61  ;;  %v425_v11 = vshrl.u32 %v736_v59, 16  ;;  %v391_v13 = vmax.bf16 %v384_v25, %v377_v2  ;;  %v361_v14 = vmax.bf16 %v323_v4, %v261_v27  ;;  %v494_v27 = vld [vmem:[%s742_s7 + $0x4] sm:$0xf]  ;;  %v500_v4 = vld [vmem:[%s742_s7 + $0xc] sm:$0xf] }
  0x21   : > { %v331_v15 = vor.u32 %v330_v5, %v327_v0  ;;  %v428_v16 = vshll.u32 %v736_v59, 16  ;;  %v423_v19 = vrot.slane %v422_v8, 4  ;;  %v334_v21 = vshrl.u32 %v747_v6, 16 }
  0x22   : > { %v481_v17 = vmax.bf16 %v474_v7, %v281_v1  ;;  %v427_v20 = vrot.slane %v425_v11, 4  ;;  %v475_v22 = vmax.bf16 %v468_v3, %v391_v13  ;;  %v378_v23 = vmax.bf16 %v361_v14, %v360_v55 }
  0x23   : > { %v332_v24 = vrot.slane %v331_v15, 4  ;;  %v430_v26 = vrot.slane %v428_v16, 5  ;;  %v469_v29 = vmax.bf16 %v423_v19, %v718_v40  ;;  %v336_v30 = vrot.slane %v334_v21, 4  ;;  %v272_v16 = vld [vmem:[%s679_s24 + $0x18] sm:$0xf] }
  0x24   : > { %v492_v25 = vsel %vm754_vm2, %v481_v17, %v491_v12  ;;  %v337_v31 = vshll.u32 %v747_v6, 16  ;;  %v482_v32 = vmax.bf16 %v475_v22, %v282_v18  ;;  %v392_v33 = vmax.bf16 %v385_v45, %v378_v23  ;;  %v271_v45 = vld [vmem:[%s679_s24 + $0x14] sm:$0xf]  ;;  %v280_v12 = vld [vmem:[%s685_s27 + $0x18] sm:$0xf] }
  0x25   : > { %493 = vst [vmem:[%s742_s7] sm:$0xf] %v492_v25  ;;  %v362_v34 = vmax.bf16 %v332_v24, %v262_v46  ;;  %v431_v35 = vor.u32 %v430_v26, %v427_v20  ;;  %v434_v39 = vshrl.u32 %v763_v28, 16  ;;  %v437_v41 = vshll.u32 %v763_v28, 16  ;;  %v285_v26 = vld [vmem:[%s728_s30 + $0x10] sm:$0xf] }
  0x26   : > { %v339_v38 = vrot.slane %v337_v31, 5  ;;  %v495_v40 = vsel %vm754_vm2, %v482_v32, %v494_v27  ;;  %v476_v42 = vmax.bf16 %v469_v29, %v392_v33  ;;  %v343_v51 = vshrl.u32 %v264_v36, 16  ;;  %v273_v31 = vld [vmem:[%s679_s24 + $0x1c] sm:$0xf] }
  0x27   : > { %v379_v44 = vmax.bf16 %v362_v34, %v361_v14  ;;  %v432_v47 = vrot.slane %v431_v35, 4  ;;  %496 = vst [vmem:[%s742_s7 + $0x4] sm:$0xf] %v495_v40  ;;  %v436_v48 = vrot.slane %v434_v39, 4  ;;  %v439_v49 = vrot.slane %v437_v41, 5 }
  0x28   : > { %v340_v46 = vor.u32 %v339_v38, %v336_v30  ;;  %v483_v52 = vmax.bf16 %v476_v42, %v283_v37  ;;  %v346_v55 = vshll.u32 %v264_v36, 16  ;;  %v387_v61 = vmax.bf16 %v271_v45, %v733_v58 }
  0x29   : > { %v393_v53 = vmax.bf16 %v386_v10, %v379_v44  ;;  %v470_v54 = vmax.bf16 %v432_v47, %v736_v59  ;;  %v440_v62 = vor.u32 %v439_v49, %v436_v48  ;;  %v345_v63 = vrot.slane %v343_v51, 4  ;;  %v286_v44 = vld [vmem:[%s728_s30 + $0x14] sm:$0xf] }
  0x2a   : > { %v341_v60 = vrot.slane %v340_v46, 4  ;;  %v498_v0 = vsel %vm754_vm2, %v483_v52, %v497_v43  ;;  %v348_v2 = vrot.slane %v346_v55, 5  ;;  %v443_v3 = vshrl.u32 %v781_v50, 16  ;;  %v506_v48 = vld [vmem:[%s742_s7 + $0x14] sm:$0xf] }
  0x2b   : > { %v477_v1 = vmax.bf16 %v470_v54, %v393_v53  ;;  %499 = vst [vmem:[%s742_s7 + $0x8] sm:$0xf] %v498_v0  ;;  %v441_v5 = vrot.slane %v440_v62, 4  ;;  %v446_v7 = vshll.u32 %v781_v50, 16  ;;  %v366_v58 = vshrl.u32 %v265_v56, 16 }
  0x2c   : > { %v363_v59 = vmax.bf16 %v341_v60, %v747_v6  ;;  %v349_v10 = vor.u32 %v348_v2, %v345_v63  ;;  %v445_v11 = vrot.slane %v443_v3, 4  ;;  %v369_v13 = vshll.u32 %v265_v56, 16  ;;  %v509_v55 = vld [vmem:[%s742_s7 + $0x18] sm:$0xf] }
  0x2d   : > { %v484_v8 = vmax.bf16 %v477_v1, %v284_v57  ;;  %v471_v15 = vmax.bf16 %v441_v5, %v763_v28  ;;  %v448_v17 = vrot.slane %v446_v7, 5  ;;  %v368_v18 = vrot.slane %v366_v58, 4 }
  0x2e   : > { %v380_v14 = vmax.bf16 %v363_v59, %v362_v34  ;;  %v350_v19 = vrot.slane %v349_v10, 4  ;;  %v371_v20 = vrot.slane %v369_v13, 5  ;;  %v452_v23 = vshrl.u32 %v280_v12, 16  ;;  %v503_v34 = vld [vmem:[%s742_s7 + $0x10] sm:$0xf] }
  0x2f   : > { %v501_v6 = vsel %vm754_vm2, %v484_v8, %v500_v4  ;;  %v449_v22 = vor.u32 %v448_v17, %v445_v11  ;;  %v455_v24 = vshll.u32 %v280_v12, 16  ;;  %v388_v27 = vmax.bf16 %v272_v16, %v271_v45 }
  0x30   : > { %502 = vst [vmem:[%s742_s7 + $0xc] sm:$0xf] %v501_v6  ;;  %v394_v21 = vmax.bf16 %v387_v61, %v380_v14  ;;  %v364_v25 = vmax.bf16 %v350_v19, %v264_v36  ;;  %v372_v29 = vor.u32 %v371_v20, %v368_v18  ;;  %v454_v32 = vrot.slane %v452_v23, 4 }
  0x31   : > { %v450_v30 = vrot.slane %v449_v22, 4  ;;  %v457_v33 = vrot.slane %v455_v24, 5  ;;  %v389_v42 = vmax.bf16 %v273_v31, %v272_v16 }
  0x32   : > { %v478_v28 = vmax.bf16 %v471_v15, %v394_v21  ;;  %v381_v35 = vmax.bf16 %v364_v25, %v363_v59  ;;  %v373_v37 = vrot.slane %v372_v29, 4 }
  0x33   : > { %v472_v39 = vmax.bf16 %v450_v30, %v781_v50  ;;  %v458_v41 = vor.u32 %v457_v33, %v454_v32  ;;  %v287_v50 = vld [vmem:[%s728_s30 + $0x18] sm:$0xf] }
  0x34   : > { %v485_v38 = vmax.bf16 %v478_v28, %v285_v26  ;;  %v395_v40 = vmax.bf16 %v388_v27, %v381_v35  ;;  %v375_v36 = vmax.bf16 %v373_v37, %v265_v56 }
  0x35   : > { %v459_v47 = vrot.slane %v458_v41, 4 }
  0x36   : > { %v504_v43 = vsel %vm754_vm2, %v485_v38, %v503_v34  ;;  %v479_v45 = vmax.bf16 %v472_v39, %v395_v40  ;;  %v382_v46 = vmax.bf16 %v375_v36, %v364_v25 }
  0x37   : > { %505 = vst [vmem:[%s742_s7 + $0x10] sm:$0xf] %v504_v43  ;;  %v473_v49 = vmax.bf16 %v459_v47, %v280_v12 }
  0x38   : > { %v486_v51 = vmax.bf16 %v479_v45, %v286_v44  ;;  %v396_v52 = vmax.bf16 %v389_v42, %v382_v46 }
  0x3a   : > { %v507_v53 = vsel %vm754_vm2, %v486_v51, %v506_v48  ;;  %v480_v54 = vmax.bf16 %v473_v49, %v396_v52 }
  0x3b   : > { %508 = vst [vmem:[%s742_s7 + $0x14] sm:$0xf] %v507_v53 }
  0x3c   : > { %v487_v56 = vmax.bf16 %v480_v54, %v287_v50 }
  0x3e   : > { %v510_v57 = vsel %vm754_vm2, %v487_v56, %v509_v55 }
  0x3f   : > { %511 = vst [vmem:[%s742_s7 + $0x18] sm:$0xf] %v510_v57 }
  0x40 PF: > { %s14_s15 = sadd.s32 1, %s634_s15  }
  0x41   : > { %p11_p4 = scmp.ge.s32.totalorder %s14_s15, 4  }
  0x43   :  { %13 = sbr.rel (!%p11_p4) target bundleno = 1 (0x1), region = 75 }

// kernel: alexnet_forward.10
= control target key start
LH: loop header
LB: loop body
LE: loop exit
PB: predicated region body
PF: predicated region fallthrough
CT: control target
= control target key end

     0   :  { %s529_s15 = smov 0   ;;  %s614_s0 = inlined_call_operand.vmem [shape: bf16[2,4,4,192], index: 0, kind: input, shape index: {}]   ;;  %s615_s1 = inlined_call_operand.vmem [shape: bf16[2,4,3,192], index: 1, kind: input, shape index: {}]   ;;  %s616_s2 = inlined_call_operand.vmem [shape: bf16[2,3,4,192], index: 2, kind: input, shape index: {}]   ;;  %s617_s3 = inlined_call_operand.vmem [shape: bf16[2,3,3,192], index: 3, kind: input, shape index: {}]   ;;  %s618_s4 = inlined_call_operand.vmem [shape: bf16[2,3,3,192], index: 4, kind: output, shape index: {}]  }
   0x1 LB: > { %s471_s16 = sadd.s32 4294967295, %s502_s15   ;;  %p475_p0 = scmp.ge.s32.totalorder %s502_s15, 1  ;;  %s502_s15 = sphi %s529_s15, %s14_s15  }
   0x2   : > { %p192_p1 = scmp.lt.s32.totalorder %s502_s15, 3 }
   0x4   : > { %p193_p2 = pnand %p475_p0, %p192_p1 }
   0x5   : > { %p233_p3 = scmp.lt.s32.totalorder (!%p193_p2), %s471_s16, 1  ;;  %vm364_vm0 = vcmask (!%p193_p2), 1041408   ;;  %vm365_vm1 = vsmask.f32 (!%p193_p2), 1280  ;;  %vm367_vm2 = vcmask (!%p193_p2), 519170  }
   0x6   : > { %196 = sbr.rel (%p193_p2) target bundleno = 43 (0x2b), region = 36  ;;  %vm368_vm3 = vsmask.f32 (!%p193_p2), 3328  ;;  %vm576_vm4 = vmand (!%p193_p2), %vm364_vm0, %vm365_vm1 }
   0x7   : > { %vm369_vm5 = vmand (!%p193_p2), %vm367_vm2, %vm368_vm3 }
   0x8   : > { %vm593_vm6 = vmor (!%p193_p2), %vm369_vm5, %vm576_vm4 }
   0xd   : > { %s624_s16 = smov (!%p233_p3, %s471_s16), 1 }
   0xe   : > { %s485_s17 = sshll.u32 %s624_s16, 4  ;;  %s537_s18 = smul.u32 12, %s624_s16 }
   0xf   : > { %s237_s21 = scalar_lea.vmem %s614_s0, %s485_s17  ;;  %s554_s27 = scalar_lea.vmem %s615_s1, %s485_s17 }
  0x10   : > { %s546_s24 = scalar_lea.vmem %s616_s2, %s537_s18  ;;  %v258_v0 = vld [vmem:[%s237_s21] sm:$0xf]  ;;  %v259_v1 = vld [vmem:[%s237_s21 + $0x4] sm:$0xf]  ;;  %v260_v9 = vld [vmem:[%s237_s21 + $0x8] sm:$0xf]  ;;  %s571_s30 = scalar_lea.vmem %s617_s3, %s537_s18 }
  0x11   : > { %v549_v2 = vld [vmem:[%s546_s24] sm:$0xf]  ;;  %v273_v3 = vshrl.u32 %v258_v0, 16  ;;  %v276_v4 = vshll.u32 %v258_v0, 16  ;;  %v282_v5 = vshrl.u32 %v259_v1, 16  ;;  %v285_v6 = vshll.u32 %v259_v1, 16  ;;  %s584_s7 = scalar_lea.vmem %s618_s4, %s537_s18 }
  0x12   : > { %v326_v7 = vshrl.u32 %v549_v2, 16  ;;  %v329_v8 = vshll.u32 %v549_v2, 16  ;;  %v559_v14 = vld [vmem:[%s546_s24 + $0x4] sm:$0xf]  ;;  %v291_v17 = vshrl.u32 %v260_v9, 16  ;;  %v294_v18 = vshll.u32 %v260_v9, 16 }
  0x13   : > { %v275_v10 = vrot.slane %v273_v3, 6  ;;  %v278_v11 = vrot.slane %v276_v4, 7  ;;  %v284_v12 = vrot.slane %v282_v5, 6  ;;  %v287_v13 = vrot.slane %v285_v6, 7  ;;  %v262_v19 = vld [vmem:[%s554_s27] sm:$0xf] }
  0x14   : > { %v328_v15 = vrot.slane %v326_v7, 6  ;;  %v331_v16 = vrot.slane %v329_v8, 7  ;;  %v335_v22 = vshrl.u32 %v559_v14, 16  ;;  %v261_v23 = vld [vmem:[%s237_s21 + $0xc] sm:$0xf]  ;;  %v293_v26 = vrot.slane %v291_v17, 6 }
  0x15   : > { %v279_v20 = vor.u32 %v278_v11, %v275_v10  ;;  %v288_v21 = vor.u32 %v287_v13, %v284_v12  ;;  %v263_v24 = vld [vmem:[%s554_s27 + $0x4] sm:$0xf]  ;;  %v296_v27 = vrot.slane %v294_v18, 7  ;;  %v338_v28 = vshll.u32 %v559_v14, 16  ;;  %v268_v36 = vld [vmem:[%s546_s24 + $0x8] sm:$0xf] }
  0x16   : > { %v332_v25 = vor.u32 %v331_v16, %v328_v15  ;;  %v337_v31 = vrot.slane %v335_v22, 6  ;;  %v306_v32 = vshrl.u32 %v261_v23, 16  ;;  %v309_v37 = vshll.u32 %v261_v23, 16  ;;  %v264_v41 = vld [vmem:[%s554_s27 + $0x8] sm:$0xf] }
  0x17   : > { %v280_v29 = vrot.slane %v279_v20, 2  ;;  %v289_v30 = vrot.slane %v288_v21, 2  ;;  %v297_v34 = vor.u32 %v296_v27, %v293_v26  ;;  %v340_v35 = vrot.slane %v338_v28, 7  ;;  %v265_v56 = vld [vmem:[%s554_s27 + $0xc] sm:$0xf] }
  0x18   : > { %v333_v33 = vrot.slane %v332_v25, 2  ;;  %v319_v40 = vmax.bf16 %v263_v24, %v262_v19  ;;  %v308_v42 = vrot.slane %v306_v32, 6  ;;  %v311_v45 = vrot.slane %v309_v37, 7  ;;  %v269_v59 = vld [vmem:[%s571_s30] sm:$0xf] }
  0x19   : > { %v302_v38 = vmax.bf16 %v280_v29, %v258_v0  ;;  %v303_v39 = vmax.bf16 %v289_v30, %v259_v1  ;;  %v298_v43 = vrot.slane %v297_v34, 2  ;;  %v341_v44 = vor.u32 %v340_v35, %v337_v31  ;;  %v270_v7 = vld [vmem:[%s571_s30 + $0x4] sm:$0xf]  ;;  %v271_v16 = vld [vmem:[%s571_s30 + $0x8] sm:$0xf] }
  0x1a   : > { %v355_v47 = vmax.bf16 %v333_v33, %v549_v2  ;;  %v344_v48 = vshrl.u32 %v268_v36, 16  ;;  %v347_v49 = vshll.u32 %v268_v36, 16  ;;  %v320_v52 = vmax.bf16 %v264_v41, %v263_v24  ;;  %v371_v2 = vld [vmem:[%s584_s7] sm:$0xf]  ;;  %v374_v12 = vld [vmem:[%s584_s7 + $0x4] sm:$0xf] }
  0x1b   : > { %v316_v46 = vmax.bf16 %v303_v39, %v302_v38  ;;  %v304_v51 = vmax.bf16 %v298_v43, %v260_v9  ;;  %v342_v53 = vrot.slane %v341_v44, 2  ;;  %v312_v54 = vor.u32 %v311_v45, %v308_v42  ;;  %v377_v19 = vld [vmem:[%s584_s7 + $0x8] sm:$0xf] }
  0x1c   : > { %v346_v57 = vrot.slane %v344_v48, 6  ;;  %v349_v58 = vrot.slane %v347_v49, 7  ;;  %v321_v5 = vmax.bf16 %v265_v56, %v264_v41 }
  0x1d   : > { %v322_v55 = vmax.bf16 %v319_v40, %v316_v46  ;;  %v317_v60 = vmax.bf16 %v304_v51, %v303_v39  ;;  %v356_v61 = vmax.bf16 %v342_v53, %v559_v14  ;;  %v313_v62 = vrot.slane %v312_v54, 2 }
  0x1e   : > { %v350_v0 = vor.u32 %v349_v58, %v346_v57 }
  0x1f   : > { %v358_v63 = vmax.bf16 %v355_v47, %v322_v55  ;;  %v323_v3 = vmax.bf16 %v320_v52, %v317_v60  ;;  %v315_v4 = vmax.bf16 %v313_v62, %v261_v23 }
  0x20   : > { %v351_v8 = vrot.slane %v350_v0, 2 }
  0x21   : > { %v361_v6 = vmax.bf16 %v358_v63, %v269_v59  ;;  %v359_v9 = vmax.bf16 %v356_v61, %v323_v3  ;;  %v318_v10 = vmax.bf16 %v315_v4, %v304_v51 }
  0x22   : > { %v357_v13 = vmax.bf16 %v351_v8, %v268_v36 }
  0x23   : > { %v372_v11 = vsel %vm593_vm6, %v361_v6, %v371_v2  ;;  %v362_v14 = vmax.bf16 %v359_v9, %v270_v7  ;;  %v324_v15 = vmax.bf16 %v321_v5, %v318_v10 }
  0x24   : > { %373 = vst [vmem:[%s584_s7] sm:$0xf] %v372_v11 }
  0x25   : > { %v375_v17 = vsel %vm593_vm6, %v362_v14, %v374_v12  ;;  %v360_v18 = vmax.bf16 %v357_v13, %v324_v15 }
  0x26   : > { %376 = vst [vmem:[%s584_s7 + $0x4] sm:$0xf] %v375_v17 }
  0x27   : > { %v363_v20 = vmax.bf16 %v360_v18, %v271_v16 }
  0x29   : > { %v378_v21 = vsel %vm593_vm6, %v363_v20, %v377_v19 }
  0x2a   : > { %379 = vst [vmem:[%s584_s7 + $0x8] sm:$0xf] %v378_v21 }
  0x2b PF: > { %s14_s15 = sadd.s32 1, %s502_s15  }
  0x2c   : > { %p11_p4 = scmp.ge.s32.totalorder %s14_s15, 4  }
  0x2e   :  { %13 = sbr.rel (!%p11_p4) target bundleno = 1 (0x1), region = 75 }

// kernel: alexnet_forward.9
= control target key start
LH: loop header
LB: loop body
LE: loop exit
PB: predicated region body
PF: predicated region fallthrough
CT: control target
= control target key end

     0   :  { %s4311_s12 = smov 0   ;;  %s4313_s13 = smov 0   ;;  %s5285_s0 = inlined_call_operand.vmem [shape: bf16[2,88,384], index: 0, kind: input, shape index: {}]   ;;  %s5286_s1 = inlined_call_operand.vmem [shape: bf16[5,384,256], index: 1, kind: input, shape index: {}]   ;;  %s5287_s2 = inlined_call_operand.vmem [shape: f32[1,256], index: 2, kind: input, shape index: {}]   ;;  %s5288_s3 = inlined_call_operand.vmem [shape: bf16[2,56,256], index: 3, kind: output, shape index: {}]  }
   0x1   :  { %s4315_s14 = smov 0  }
   0x2 LB: > { %s25_s15 = sadd.s32 1, %s4284_s13  ;;  %p3134_p0 = scmp.ge.s32.totalorder %s4288_s14, 1  ;;  %s4288_s14 = sphi %s4315_s14, %s13_s14   ;;  %s4284_s13 = sphi %s4313_s13, %s5290_s13   ;;  %s4280_s12 = sphi %s4311_s12, %s5289_s12  }
   0x3   : > { %p27_p1 = scmp.ge.s32.totalorder %s25_s15, 2  ;;  %p151_p2 = scmp.lt.s32.totalorder %s4288_s14, 3 }
   0x5   : > { %s5292_s15 = smov (%p27_p1, %s25_s15), 0  ;;  %p152_p3 = pnand %p3134_p0, %p151_p2 }
   0x6   : > { %v3852_v0 = vld [vmem:[%s5286_s1 + $0x4] ss:$8 sps:$4 sm:$0xff] (!%p152_p3)   ;;  %v4290_v2 = vmov (!%p152_p3), 0   ;;  %v3856_v3 = vld [vmem:[%s5286_s1] ss:$8 sps:$4 sm:$0xff] (!%p152_p3)   ;;  %p180_p4 = scmp.lt.s32.totalorder (!%p152_p3), %s4280_s12, 1 }
   0x7   : > { %155 = sbr.rel (%p152_p3) target bundleno = 496 (0x1f0), region = 32  ;;  %v3854_v1 = vld [vmem:[%s5286_s1 + $0x284] ss:$8 sps:$4 sm:$0xff] (!%p152_p3)   ;;  %1205 = vmatprep.mubr.bf16.mxu0 (!%p152_p3), %v4290_v2  ;;  %564 = vmatprep.subr.bf16.mxu1 (!%p152_p3), %v3852_v0  ;;  %v3857_v4 = vld [vmem:[%s5286_s1 + $0x280] ss:$8 sps:$4 sm:$0xff] (!%p152_p3)  }
   0x8   : > { %1173 = vmatprep.subr.bf16.mxu0 (!%p152_p3), %v3854_v1  ;;  %v3858_v5 = vld [vmem:[%s5286_s1 + $0x14] ss:$8 sps:$4 sm:$0xff] (!%p152_p3)   ;;  %565 = vmatpush1.bf16.msra.mxu1 (!%p152_p3), %v3856_v3  ;;  %v3862_v7 = vld [vmem:[%s5286_s1 + $0x10] ss:$8 sps:$4 sm:$0xff] (!%p152_p3)   ;;  %v3864_v9 = vld [vmem:[%s5286_s1 + $0x24] ss:$8 sps:$4 sm:$0xff] (!%p152_p3)  }
   0x9   : > { %1174 = vmatpush1.bf16.msra.mxu0 (!%p152_p3), %v3857_v4  ;;  %v3860_v6 = vld [vmem:[%s5286_s1 + $0x294] ss:$8 sps:$4 sm:$0xff] (!%p152_p3)   ;;  %566 = vmatprep.subr.bf16.mxu1 (!%p152_p3), %v3858_v5  ;;  %v3863_v8 = vld [vmem:[%s5286_s1 + $0x290] ss:$8 sps:$4 sm:$0xff] (!%p152_p3)   ;;  %v3866_v10 = vld [vmem:[%s5286_s1 + $0x2a4] ss:$8 sps:$4 sm:$0xff] (!%p152_p3)  }
   0xa   : > { %1175 = vmatprep.subr.bf16.mxu0 (!%p152_p3), %v3860_v6  ;;  %v3868_v11 = vld [vmem:[%s5286_s1 + $0x20] ss:$8 sps:$4 sm:$0xff] (!%p152_p3)   ;;  %v3870_v13 = vld [vmem:[%s5286_s1 + $0x34] ss:$8 sps:$4 sm:$0xff] (!%p152_p3)   ;;  %v3874_v15 = vld [vmem:[%s5286_s1 + $0x30] ss:$8 sps:$4 sm:$0xff] (!%p152_p3)  }
   0xb   : > { %v3869_v12 = vld [vmem:[%s5286_s1 + $0x2a0] ss:$8 sps:$4 sm:$0xff] (!%p152_p3)   ;;  %v3872_v14 = vld [vmem:[%s5286_s1 + $0x2b4] ss:$8 sps:$4 sm:$0xff] (!%p152_p3)   ;;  %v3875_v16 = vld [vmem:[%s5286_s1 + $0x2b0] ss:$8 sps:$4 sm:$0xff] (!%p152_p3)  }
   0xc   : > { %567 = vmatpush1.bf16.msra.mxu1 (!%p152_p3), %v3862_v7  ;;  %v3876_v17 = vld [vmem:[%s5286_s1 + $0x44] ss:$8 sps:$4 sm:$0xff] (!%p152_p3)   ;;  %v3880_v19 = vld [vmem:[%s5286_s1 + $0x40] ss:$8 sps:$4 sm:$0xff] (!%p152_p3)   ;;  %v3882_v21 = vld [vmem:[%s5286_s1 + $0x54] ss:$8 sps:$4 sm:$0xff] (!%p152_p3)  }
   0xd   : > { %1176 = vmatpush1.bf16.msra.mxu0 (!%p152_p3), %v3863_v8  ;;  %568 = vmatprep.subr.bf16.mxu1 (!%p152_p3), %v3864_v9  ;;  %v3878_v18 = vld [vmem:[%s5286_s1 + $0x2c4] ss:$8 sps:$4 sm:$0xff] (!%p152_p3)   ;;  %v3881_v20 = vld [vmem:[%s5286_s1 + $0x2c0] ss:$8 sps:$4 sm:$0xff] (!%p152_p3)   ;;  %v3884_v22 = vld [vmem:[%s5286_s1 + $0x2d4] ss:$8 sps:$4 sm:$0xff] (!%p152_p3)  }
   0xe   : > { %1177 = vmatprep.subr.bf16.mxu0 %v3866_v10  ;;  %s5294_s12 = smov (!%p180_p4, %s4280_s12), 1  ;;  %v3886_v23 = vld [vmem:[%s5286_s1 + $0x50] ss:$8 sps:$4 sm:$0xff]   ;;  %v3888_v25 = vld [vmem:[%s5286_s1 + $0x64] ss:$8 sps:$4 sm:$0xff]  }
   0xf   : > { %s3825_s10 = smul.u32 132, %s5294_s12  ;;  %v3887_v24 = vld [vmem:[%s5286_s1 + $0x2d0] ss:$8 sps:$4 sm:$0xff]   ;;  %v3890_v26 = vld [vmem:[%s5286_s1 + $0x2e4] ss:$8 sps:$4 sm:$0xff]  }
  0x10   : > { %569 = vmatpush1.bf16.msra.mxu1 %v3868_v11  ;;  %v3892_v27 = vld [vmem:[%s5286_s1 + $0x60] ss:$8 sps:$4 sm:$0xff]   ;;  %v3894_v29 = vld [vmem:[%s5286_s1 + $0x74] ss:$8 sps:$4 sm:$0xff]   ;;  %v3898_v31 = vld [vmem:[%s5286_s1 + $0x70] ss:$8 sps:$4 sm:$0xff]  }
  0x11   : > { %1178 = vmatpush1.bf16.msra.mxu0 %v3869_v12  ;;  %570 = vmatprep.subr.bf16.mxu1 %v3870_v13  ;;  %s4418_s25 = scalar_lea.vmem %s5285_s0, %s3825_s10  ;;  %v3893_v28 = vld [vmem:[%s5286_s1 + $0x2e0] ss:$8 sps:$4 sm:$0xff]   ;;  %v3896_v30 = vld [vmem:[%s5286_s1 + $0x2f4] ss:$8 sps:$4 sm:$0xff]   ;;  %v3899_v32 = vld [vmem:[%s5286_s1 + $0x2f0] ss:$8 sps:$4 sm:$0xff]  }
  0x12   : > { %1179 = vmatprep.subr.bf16.mxu0 %v3872_v14  ;;  %v3900_v33 = vld [vmem:[%s5286_s1 + $0x84] ss:$8 sps:$4 sm:$0xff]   ;;  %v3902_v35 = vld [vmem:[%s4418_s25 + $0x14] ss:$12 sps:$4 sm:$0xff]   ;;  %v3909_v40 = vld [vmem:[%s5286_s1 + $0x410] ss:$8 sps:$4 sm:$0xff]  }
  0x13   : > { %v3905_v34 = vld [vmem:[%s5286_s1 + $0x404] ss:$8 sps:$4 sm:$0xff]   ;;  %v3903_v36 = vld [vmem:[%s5286_s1 + $0x400] ss:$8 sps:$4 sm:$0xff]   ;;  %v3907_v38 = vld [vmem:[%s5286_s1 + $0x94] ss:$8 sps:$4 sm:$0xff]  }
  0x14   : > { %571 = vmatpush1.bf16.msra.mxu1 %v3874_v15  ;;  %v3906_v37 = vld [vmem:[%s5286_s1 + $0x80] ss:$8 sps:$4 sm:$0xff]   ;;  %v3911_v39 = vld [vmem:[%s5286_s1 + $0x414] ss:$8 sps:$4 sm:$0xff]   ;;  %v3912_v41 = vld [vmem:[%s5286_s1 + $0x90] ss:$8 sps:$4 sm:$0xff]  }
  0x15   : > { %1180 = vmatpush1.bf16.msra.mxu0 %v3875_v16  ;;  %572 = vmatprep.subr.bf16.mxu1 %v3876_v17  ;;  %v3913_v42 = vld [vmem:[%s5286_s1 + $0xa4] ss:$8 sps:$4 sm:$0xff]   ;;  %v3916_v45 = vld [vmem:[%s5286_s1 + $0x420] ss:$8 sps:$4 sm:$0xff]   ;;  %v3920_v47 = vld [vmem:[%s5286_s1 + $0xb4] ss:$8 sps:$4 sm:$0xff]  }
  0x16   : > { %1181 = vmatprep.subr.bf16.mxu0 %v3878_v18  ;;  %v3918_v43 = vld [vmem:[%s5286_s1 + $0x424] ss:$8 sps:$4 sm:$0xff]   ;;  %v3919_v46 = vld [vmem:[%s5286_s1 + $0xa0] ss:$8 sps:$4 sm:$0xff]   ;;  %v3924_v48 = vld [vmem:[%s5286_s1 + $0x434] ss:$8 sps:$4 sm:$0xff]  }
  0x17   : > { %v3915_v44 = vld [vmem:[%s4418_s25 + $0x2c] ss:$12 sps:$4 sm:$0xff]   ;;  %v3928_v53 = vld [vmem:[%s4418_s25 + $0x44] ss:$12 sps:$4 sm:$0xff]   ;;  %v3929_v56 = vld [vmem:[%s5286_s1 + $0x440] ss:$8 sps:$4 sm:$0xff]  }
  0x18   : > { %573 = vmatpush1.bf16.msra.mxu1 %v3880_v19  ;;  %v3922_v49 = vld [vmem:[%s5286_s1 + $0x430] ss:$8 sps:$4 sm:$0xff]   ;;  %v3926_v51 = vld [vmem:[%s5286_s1 + $0xc4] ss:$8 sps:$4 sm:$0xff]   ;;  %v3932_v58 = vld [vmem:[%s5286_s1 + $0xc0] ss:$8 sps:$4 sm:$0xff]  }
  0x19   : > { %1182 = vmatpush1.bf16.msra.mxu0 %v3881_v20  ;;  %574 = vmatprep.subr.bf16.mxu1 %v3882_v21  ;;  %v3925_v50 = vld [vmem:[%s5286_s1 + $0xb0] ss:$8 sps:$4 sm:$0xff]   ;;  %v3931_v52 = vld [vmem:[%s5286_s1 + $0x444] ss:$8 sps:$4 sm:$0xff]   ;;  %v3933_v59 = vld [vmem:[%s5286_s1 + $0xd4] ss:$8 sps:$4 sm:$0xff]  }
  0x1a   : > { %1183 = vmatprep.subr.bf16.mxu0 %v3884_v22  ;;  %v203_v54 = vld [vmem:[%s4418_s25] sm:$0xff]  ;;  %v4499_v55 = vld [vmem:[%s4418_s25 + $0xc] sm:$0xff]  ;;  %v3937_v60 = vld [vmem:[%s5286_s1 + $0x454] ss:$8 sps:$4 sm:$0xff]   ;;  %s3826_s10 = smul.u32 56, %s5294_s12 }
  0x1b   : > { %v3138_v57 = vcombine.high %v203_v54, %v4499_v55  ;;  %v3935_v61 = vld [vmem:[%s5286_s1 + $0x450] ss:$8 sps:$4 sm:$0xff]   ;;  %v3939_v63 = vld [vmem:[%s5286_s1 + $0xe4] ss:$8 sps:$4 sm:$0xff]   ;;  %v3941_v4 = vld [vmem:[%s4418_s25 + $0x5c] ss:$0 sps:$4 sm:$0xff]   ;;  %v3137_v14 = vcombine.low %v203_v54, %v4499_v55 }
  0x1c   : > { %575 = vmatpush1.bf16.msra.mxu1 %v3886_v23  ;;  %v3938_v62 = vld [vmem:[%s5286_s1 + $0xd0] ss:$8 sps:$4 sm:$0xff]   ;;  %v3944_v0 = vld [vmem:[%s5286_s1 + $0x464] ss:$8 sps:$4 sm:$0xff]   ;;  %v3942_v5 = vld [vmem:[%s5286_s1 + $0x460] ss:$8 sps:$4 sm:$0xff]   ;;  %s5257_s16 = scalar_lea.vmem %s5288_s3, %s3826_s10 }
  0x1d   : > { %1184 = vmatpush1.bf16.msra.mxu0 %v3887_v24  ;;  %576 = vmatprep.subr.bf16.mxu1 %v3888_v25  ;;  %v4527_v1 = vld [vmem:[%s4418_s25 + $0x18] sm:$0xff]  ;;  %v3945_v6 = vld [vmem:[%s5286_s1 + $0xe0] ss:$8 sps:$4 sm:$0xff]   ;;  %v3956_v11 = vld [vmem:[%s5286_s1 + $0x104] ss:$8 sps:$4 sm:$0xff]  }
  0x1e   : > { %1185 = vmatprep.subr.bf16.mxu0 %v3890_v26  ;;  %596 = vmatprep.mubr.bf16.mxu1 %v3138_v57  ;;  %v3259_v3 = vcombine.low %v4499_v55, %v4527_v1  ;;  %v3946_v7 = vld [vmem:[%s5286_s1 + $0xf4] ss:$8 sps:$4 sm:$0xff]   ;;  %v3948_v9 = vld [vmem:[%s5286_s1 + $0x470] ss:$8 sps:$4 sm:$0xff]   ;;  %v3959_v12 = vld [vmem:[%s5286_s1 + $0x484] ss:$8 sps:$4 sm:$0xff]  }
  0x1f   : > { %v3950_v8 = vld [vmem:[%s5286_s1 + $0x474] ss:$8 sps:$4 sm:$0xff]   ;;  %v3951_v10 = vld [vmem:[%s5286_s1 + $0xf0] ss:$8 sps:$4 sm:$0xff]   ;;  %v3954_v13 = vld [vmem:[%s5286_s1 + $0x100] ss:$8 sps:$4 sm:$0xff]  }
  0x20   : > { %577 = vmatpush1.bf16.msra.mxu1 %v3892_v27  ;;  %v3960_v15 = vld [vmem:[%s4418_s25 + $0x20] ss:$12 sps:$4 sm:$0xff]   ;;  %v4564_v16 = vld [vmem:[%s4418_s25 + $0x24] sm:$0xff]  ;;  %v3963_v18 = vld [vmem:[%s5286_s1 + $0x114] ss:$8 sps:$4 sm:$0xff]  }
  0x21   : > { %1186 = vmatpush1.bf16.msra.mxu0 %v3893_v28  ;;  %578 = vmatprep.subr.bf16.mxu1 %v3894_v29  ;;  %v3957_v17 = vld [vmem:[%s5286_s1 + $0x480] ss:$8 sps:$4 sm:$0xff]   ;;  %v3966_v19 = vld [vmem:[%s5286_s1 + $0x494] ss:$8 sps:$4 sm:$0xff]   ;;  %v3141_v20 = vcombine.high %v4527_v1, %v4564_v16  ;;  %v3961_v21 = vld [vmem:[%s5286_s1 + $0x110] ss:$8 sps:$4 sm:$0xff]   ;;  %v3140_v28 = vcombine.low %v4527_v1, %v4564_v16 }
  0x22   : > { %1187 = vmatprep.subr.bf16.mxu0 %v3896_v30  ;;  %v3964_v22 = vld [vmem:[%s5286_s1 + $0x490] ss:$8 sps:$4 sm:$0xff]   ;;  %v3971_v23 = vld [vmem:[%s5286_s1 + $0x124] ss:$8 sps:$4 sm:$0xff]   ;;  %v3969_v25 = vld [vmem:[%s5286_s1 + $0x120] ss:$8 sps:$4 sm:$0xff]  }
  0x23   : > { %v3974_v24 = vld [vmem:[%s5286_s1 + $0x4a4] ss:$8 sps:$4 sm:$0xff]   ;;  %v3972_v26 = vld [vmem:[%s5286_s1 + $0x4a0] ss:$8 sps:$4 sm:$0xff]   ;;  %v4596_v27 = vld [vmem:[%s4418_s25 + $0x30] sm:$0xff] }
  0x24   : > { %579 = vmatpush1.bf16.msra.mxu1 %v3898_v31  ;;  %v4602_v29 = vld [vmem:[%s4418_s25 + $0x3c] sm:$0xff]  ;;  %v4006_v57 = vld [vmem:[%s5286_s1 + $0x4f0] ss:$8 sps:$4 sm:$0xff]  }
  0x25   : > { %1188 = vmatpush1.bf16.msra.mxu0 %v3899_v32  ;;  %580 = vmatprep.subr.bf16.mxu1 %v3900_v33  ;;  %v3977_v30 = vld [vmem:[%s5286_s1 + $0x134] ss:$8 sps:$4 sm:$0xff]   ;;  %v3144_v32 = vcombine.high %v4596_v27, %v4602_v29  ;;  %v3975_v33 = vld [vmem:[%s5286_s1 + $0x130] ss:$8 sps:$4 sm:$0xff]  }
  0x26   : > { %1725 = vmatprep.subr.bf16.mxu0 %v3905_v34  ;;  %v3980_v31 = vld [vmem:[%s5286_s1 + $0x4b4] ss:$8 sps:$4 sm:$0xff]   ;;  %v3978_v34 = vld [vmem:[%s5286_s1 + $0x4b0] ss:$8 sps:$4 sm:$0xff]  }
  0x27   : > { %v4008_v54 = vld [vmem:[%s5286_s1 + $0x4f4] ss:$8 sps:$4 sm:$0xff]  }
  0x28   : > { %1206 = vmatmul.mubr.bf16.vlgmr.msra.gmra.mrb[0].mxu0 %v3902_v35  ;;  %581 = vmatpush1.bf16.msra.mxu1 %v3906_v37  ;;  %v3985_v35 = vld [vmem:[%s5286_s1 + $0x144] ss:$8 sps:$4 sm:$0xff]  }
  0x29   : > { %1726 = vmatpush1.bf16.msra.mxu0 %v3903_v36  ;;  %582 = vmatprep.subr.bf16.mxu1 %v3907_v38  ;;  %v3988_v36 = vld [vmem:[%s5286_s1 + $0x4c4] ss:$8 sps:$4 sm:$0xff]   ;;  %v3143_v38 = vcombine.low %v4596_v27, %v4602_v29 }
  0x2a   : > { %1727 = vmatprep.subr.bf16.mxu0 %v3911_v39  ;;  %1215 = vmatprep.mubr.bf16.mxu0 %v4290_v2  ;;  %v4022_v37 = vld [vmem:[%s4418_s25 + $0x38] ss:$12 sps:$4 sm:$0xff]   ;;  %v4628_v39 = vld [vmem:[%s4418_s25 + $0x48] sm:$0xff] }
  0x2c   : > { %583 = vmatpush1.bf16.msra.mxu1 %v3912_v41  ;;  %v3986_v41 = vld [vmem:[%s5286_s1 + $0x4c0] ss:$8 sps:$4 sm:$0xff]  }
  0x2d   : > { %1728 = vmatpush1.bf16.msra.mxu0 %v3909_v40  ;;  %584 = vmatprep.subr.bf16.mxu1 %v3913_v42  ;;  %v3983_v40 = vld [vmem:[%s5286_s1 + $0x140] ss:$8 sps:$4 sm:$0xff]   ;;  %v3991_v42 = vld [vmem:[%s5286_s1 + $0x154] ss:$8 sps:$4 sm:$0xff]  }
  0x2e   : > { %1729 = vmatprep.subr.bf16.mxu0 %v3918_v43  ;;  %v3994_v43 = vld [vmem:[%s5286_s1 + $0x4d4] ss:$8 sps:$4 sm:$0xff]  }
  0x30   : > { %1216 = vmatmul.mubr.bf16.gmra.mrb[4].mxu0 %v3915_v44  ;;  %585 = vmatpush1.bf16.msra.mxu1 %v3919_v46  ;;  %v3147_v44 = vcombine.high %v4628_v39, %v4628_v39  ;;  %v3992_v46 = vld [vmem:[%s5286_s1 + $0x4d0] ss:$8 sps:$4 sm:$0xff]  }
  0x31   : > { %1730 = vmatpush1.bf16.msra.mxu0 %v3916_v45  ;;  %586 = vmatprep.subr.bf16.mxu1 %v3920_v47  ;;  %v3989_v45 = vld [vmem:[%s5286_s1 + $0x150] ss:$8 sps:$4 sm:$0xff]   ;;  %v3999_v47 = vld [vmem:[%s5286_s1 + $0x164] ss:$8 sps:$4 sm:$0xff]  }
  0x32   : > { %1731 = vmatprep.subr.bf16.mxu0 %v3924_v48  ;;  %1225 = vmatprep.mubr.bf16.mxu0 %v4290_v2  ;;  %v4002_v48 = vld [vmem:[%s5286_s1 + $0x4e4] ss:$8 sps:$4 sm:$0xff]  }
  0x34   : > { %587 = vmatpush1.bf16.msra.mxu1 %v3925_v50  ;;  %v3146_v50 = vcombine.low %v4628_v39, %v4628_v39 }
  0x35   : > { %1732 = vmatpush1.bf16.msra.mxu0 %v3922_v49  ;;  %588 = vmatprep.subr.bf16.mxu1 %v3926_v51  ;;  %v4036_v49 = vld [vmem:[%s4418_s25 + $0x50] ss:$12 sps:$4 sm:$0xff]   ;;  %v3997_v51 = vld [vmem:[%s5286_s1 + $0x160] ss:$8 sps:$4 sm:$0xff]  }
  0x36   : > { %1733 = vmatprep.subr.bf16.mxu0 %v3931_v52  ;;  %v4000_v52 = vld [vmem:[%s5286_s1 + $0x4e0] ss:$8 sps:$4 sm:$0xff]  }
  0x38   : > { %1226 = vmatmul.mubr.bf16.gmra.mrb[8].mxu0 %v3928_v53  ;;  %589 = vmatpush1.bf16.msra.mxu1 %v3932_v58  ;;  %v4005_v53 = vld [vmem:[%s5286_s1 + $0x174] ss:$8 sps:$4 sm:$0xff]   ;;  %v4012_v58 = vld [vmem:[%s5286_s1 + $0x184] ss:$8 sps:$4 sm:$0xff]  }
  0x39   : > { %1734 = vmatpush1.bf16.msra.mxu0 %v3929_v56  ;;  %590 = vmatprep.subr.bf16.mxu1 %v3933_v59  ;;  %v4003_v56 = vld [vmem:[%s5286_s1 + $0x170] ss:$8 sps:$4 sm:$0xff]   ;;  %v4015_v59 = vld [vmem:[%s5286_s1 + $0x504] ss:$8 sps:$4 sm:$0xff]  }
  0x3a   : > { %1735 = vmatprep.subr.bf16.mxu0 %v3937_v60  ;;  %1235 = vmatprep.mubr.bf16.mxu0 %v4290_v2  ;;  %v4009_v60 = vld [vmem:[%s4418_s25 + $0x8] ss:$12 sps:$4 sm:$0xff]  }
  0x3c   : > { %591 = vmatpush1.bf16.msra.mxu1 %v3938_v62  ;;  %v4010_v62 = vld [vmem:[%s5286_s1 + $0x180] ss:$8 sps:$4 sm:$0xff]  }
  0x3d   : > { %1736 = vmatpush1.bf16.msra.mxu0 %v3935_v61  ;;  %592 = vmatprep.subr.bf16.mxu1 %v3939_v63  ;;  %v4050_v61 = vld [vmem:[%s4418_s25 + $0x68] ss:$0 sps:$4 sm:$0xff]  }
  0x3e   : > { %1737 = vmatprep.subr.bf16.mxu0 %v3944_v0  ;;  %v4013_v63 = vld [vmem:[%s5286_s1 + $0x500] ss:$8 sps:$4 sm:$0xff]   ;;  %v4696_v0 = vcombine.high %v4564_v16, %v4596_v27 }
  0x40   : > { %1236 = vmatmul.mubr.bf16.gmra.mrb[12].mxu0 %v3941_v4  ;;  %593 = vmatpush1.bf16.msra.mxu1 %v3945_v6  ;;  %v4018_v4 = vld [vmem:[%s5286_s1 + $0x194] ss:$8 sps:$4 sm:$0xff]   ;;  %v4016_v6 = vld [vmem:[%s5286_s1 + $0x190] ss:$8 sps:$4 sm:$0xff]  }
  0x41   : > { %1738 = vmatpush1.bf16.msra.mxu0 %v3942_v5  ;;  %594 = vmatprep.subr.bf16.mxu1 %v3946_v7  ;;  %v4021_v5 = vld [vmem:[%s5286_s1 + $0x514] ss:$8 sps:$4 sm:$0xff]   ;;  %v4019_v7 = vld [vmem:[%s5286_s1 + $0x510] ss:$8 sps:$4 sm:$0xff]  }
  0x42   : > { %1739 = vmatprep.subr.bf16.mxu0 %v3950_v8  ;;  %1757 = vmatprep.mubr.bf16.mxu0 %v4290_v2  ;;  %v4026_v8 = vld [vmem:[%s5286_s1 + $0x1a4] ss:$8 sps:$4 sm:$0xff]  }
  0x44   : > { %595 = vmatpush1.bf16.msra.mxu1 %v3951_v10  ;;  %v4023_v10 = vld [vmem:[%s4418_s25 + $0x20] ss:$12 sps:$4 sm:$0xff]  }
  0x45   : > { %1740 = vmatpush1.bf16.msra.mxu0 %v3948_v9  ;;  %635 = vmatprep.subr.bf16.mxu1 %v3956_v11  ;;  %v4029_v9 = vld [vmem:[%s5286_s1 + $0x524] ss:$8 sps:$4 sm:$0xff]   ;;  %v4024_v11 = vld [vmem:[%s5286_s1 + $0x1a0] ss:$8 sps:$4 sm:$0xff]  }
  0x46   : > { %2206 = vmatprep.subr.bf16.mxu0 %v3959_v12  ;;  %v4027_v12 = vld [vmem:[%s5286_s1 + $0x520] ss:$8 sps:$4 sm:$0xff]  }
  0x47   : > { %597 = vmatmul.mubr.bf16.vlgmr.msra.gmra.mrb[0].mxu1 %v3137_v14  ;;  %v4035_v14 = vld [vmem:[%s5286_s1 + $0x534] ss:$8 sps:$4 sm:$0xff]  }
  0x48   : > { %1758 = vmatmul.mubr.bf16.vlgmr.msra.gmra.mrb[16].mxu0 %v3960_v15  ;;  %636 = vmatpush1.bf16.msra.mxu1 %v3954_v13  ;;  %v4032_v13 = vld [vmem:[%s5286_s1 + $0x1b4] ss:$8 sps:$4 sm:$0xff]   ;;  %v4030_v15 = vld [vmem:[%s5286_s1 + $0x1b0] ss:$8 sps:$4 sm:$0xff]  }
  0x49   : > { %2207 = vmatpush1.bf16.msra.mxu0 %v3957_v17  ;;  %637 = vmatprep.subr.bf16.mxu1 %v3963_v18  ;;  %v4033_v17 = vld [vmem:[%s5286_s1 + $0x530] ss:$8 sps:$4 sm:$0xff]   ;;  %v4040_v18 = vld [vmem:[%s5286_s1 + $0x1c4] ss:$8 sps:$4 sm:$0xff]  }
  0x4a   : > { %2208 = vmatprep.subr.bf16.mxu0 %v3966_v19  ;;  %606 = vmatprep.mubr.bf16.mxu1 %v3141_v20  ;;  %v4043_v19 = vld [vmem:[%s5286_s1 + $0x544] ss:$8 sps:$4 sm:$0xff]  }
  0x4b   : > { %1767 = vmatprep.mubr.bf16.mxu0 %v4290_v2  ;;  %v4037_v20 = vld [vmem:[%s4418_s25 + $0x38] ss:$12 sps:$4 sm:$0xff]  }
  0x4c   : > { %638 = vmatpush1.bf16.msra.mxu1 %v3961_v21  ;;  %v4038_v21 = vld [vmem:[%s5286_s1 + $0x1c0] ss:$8 sps:$4 sm:$0xff]  }
  0x4d   : > { %2209 = vmatpush1.bf16.msra.mxu0 %v3964_v22  ;;  %639 = vmatprep.subr.bf16.mxu1 %v3971_v23  ;;  %v4041_v22 = vld [vmem:[%s5286_s1 + $0x540] ss:$8 sps:$4 sm:$0xff]   ;;  %v4046_v23 = vld [vmem:[%s5286_s1 + $0x1d4] ss:$8 sps:$4 sm:$0xff]  }
  0x4e   : > { %2210 = vmatprep.subr.bf16.mxu0 %v3974_v24  ;;  %v4049_v24 = vld [vmem:[%s5286_s1 + $0x554] ss:$8 sps:$4 sm:$0xff]  }
  0x4f   : > { %607 = vmatmul.mubr.bf16.gmra.mrb[4].mxu1 %v3140_v28  ;;  %v4764_v28 = vld [vmem:[%s4418_s25 + $0x6c] sm:$0xff] }
  0x50   : > { %640 = vmatpush1.bf16.msra.mxu1 %v3969_v25  ;;  %616 = vmatprep.mubr.bf16.mxu1 %v3144_v32  ;;  %v4044_v25 = vld [vmem:[%s5286_s1 + $0x1d0] ss:$8 sps:$4 sm:$0xff]  }
  0x51   : > { %2211 = vmatpush1.bf16.msra.mxu0 %v3972_v26  ;;  %641 = vmatprep.subr.bf16.mxu1 %v3977_v30  ;;  %v4761_v26 = vld [vmem:[%s4418_s25 + $0x60] sm:$0xff]  ;;  %v4047_v30 = vld [vmem:[%s5286_s1 + $0x550] ss:$8 sps:$4 sm:$0xff]  }
  0x52   : > { %2212 = vmatprep.subr.bf16.mxu0 %v3980_v31  ;;  %1768 = vmatmul.mubr.bf16.gmra.mrb[20].mxu0 %v4022_v37  ;;  %v4054_v31 = vld [vmem:[%s5286_s1 + $0x1e4] ss:$8 sps:$4 sm:$0xff]   ;;  %v3632_v32 = vcombine.high %v4761_v26, %v4764_v28  ;;  %v4055_v37 = vld [vmem:[%s5286_s1 + $0x560] ss:$8 sps:$4 sm:$0xff]  }
  0x53   : > { %1777 = vmatprep.mubr.bf16.mxu0 %v4290_v2 }
  0x54   : > { %642 = vmatpush1.bf16.msra.mxu1 %v3975_v33  ;;  %v4057_v33 = vld [vmem:[%s5286_s1 + $0x564] ss:$8 sps:$4 sm:$0xff]  }
  0x55   : > { %2213 = vmatpush1.bf16.msra.mxu0 %v3978_v34  ;;  %643 = vmatprep.subr.bf16.mxu1 %v3985_v35  ;;  %v3631_v34 = vcombine.low %v4761_v26, %v4764_v28  ;;  %v4051_v35 = vld [vmem:[%s4418_s25 + $0x50] ss:$0 sps:$4 sm:$0xff]  }
  0x56   : > { %2214 = vmatprep.subr.bf16.mxu0 %v3988_v36  ;;  %v4052_v36 = vld [vmem:[%s5286_s1 + $0x1e0] ss:$8 sps:$4 sm:$0xff]  }
  0x57   : > { %617 = vmatmul.mubr.bf16.gmra.mrb[8].mxu1 %v3143_v38  ;;  %v4060_v38 = vld [vmem:[%s5286_s1 + $0x1f4] ss:$8 sps:$4 sm:$0xff]  }
  0x58   : > { %644 = vmatpush1.bf16.msra.mxu1 %v3983_v40  ;;  %626 = vmatprep.mubr.bf16.mxu1 %v3147_v44  ;;  %v4063_v40 = vld [vmem:[%s5286_s1 + $0x574] ss:$8 sps:$4 sm:$0xff]   ;;  %v4068_v44 = vld [vmem:[%s5286_s1 + $0x204] ss:$8 sps:$4 sm:$0xff]  }
  0x59   : > { %2215 = vmatpush1.bf16.msra.mxu0 %v3986_v41  ;;  %645 = vmatprep.subr.bf16.mxu1 %v3991_v42  ;;  %v3260_v41 = vcombine.high %v4499_v55, %v4527_v1  ;;  %v4058_v42 = vld [vmem:[%s5286_s1 + $0x1f0] ss:$8 sps:$4 sm:$0xff]   ;;  %v4141_v55 = vld [vmem:[%s5286_s1 + $0x624] ss:$8 sps:$4 sm:$0xff]  }
  0x5a   : > { %2216 = vmatprep.subr.bf16.mxu0 %v3994_v43  ;;  %1778 = vmatmul.mubr.bf16.gmra.mrb[24].mxu0 %v4036_v49  ;;  %v4061_v43 = vld [vmem:[%s5286_s1 + $0x570] ss:$8 sps:$4 sm:$0xff]   ;;  %v4074_v49 = vld [vmem:[%s5286_s1 + $0x214] ss:$8 sps:$4 sm:$0xff]  }
  0x5b   : > { %1787 = vmatprep.mubr.bf16.mxu0 %v4290_v2  ;;  %v4138_v1 = vld [vmem:[%s4418_s25 + $0x44] ss:$12 sps:$4 sm:$0xff]  }
  0x5c   : > { %646 = vmatpush1.bf16.msra.mxu1 %v3989_v45  ;;  %v4071_v45 = vld [vmem:[%s5286_s1 + $0x584] ss:$8 sps:$4 sm:$0xff]  }
  0x5d   : > { %2217 = vmatpush1.bf16.msra.mxu0 %v3992_v46  ;;  %647 = vmatprep.subr.bf16.mxu1 %v3999_v47  ;;  %v4809_v46 = vcombine.low %v4564_v16, %v4596_v27  ;;  %v4066_v47 = vld [vmem:[%s5286_s1 + $0x200] ss:$8 sps:$4 sm:$0xff]   ;;  %v4077_v16 = vld [vmem:[%s5286_s1 + $0x594] ss:$8 sps:$4 sm:$0xff]   ;;  %v4825_v27 = vcombine.high %v4602_v29, %v4628_v39 }
  0x5e   : > { %2218 = vmatprep.subr.bf16.mxu0 %v4002_v48  ;;  %v4069_v48 = vld [vmem:[%s5286_s1 + $0x580] ss:$8 sps:$4 sm:$0xff]  }
  0x5f   : > { %627 = vmatmul.mubr.bf16.gmra.mrb[12].mxu1 %v3146_v50  ;;  %v4072_v50 = vld [vmem:[%s5286_s1 + $0x210] ss:$8 sps:$4 sm:$0xff]  }
  0x60   : > { %648 = vmatpush1.bf16.msra.mxu1 %v3997_v51  ;;  %667 = vmatprep.mubr.bf16.mxu1 %v4290_v2  ;;  %v4075_v51 = vld [vmem:[%s5286_s1 + $0x590] ss:$8 sps:$4 sm:$0xff]  }
  0x61   : > { %2219 = vmatpush1.bf16.msra.mxu0 %v4000_v52  ;;  %649 = vmatprep.subr.bf16.mxu1 %v4005_v53  ;;  %v4081_v52 = vld [vmem:[%s5286_s1 + $0x224] ss:$8 sps:$4 sm:$0xff]  }
  0x62   : > { %2220 = vmatprep.subr.bf16.mxu0 %v4008_v54  ;;  %1788 = vmatmul.mubr.bf16.gmra.mrb[28].mxu0 %v4050_v61  ;;  %v4085_v53 = vld [vmem:[%s5286_s1 + $0x5a4] ss:$8 sps:$4 sm:$0xff]   ;;  %v4079_v54 = vld [vmem:[%s5286_s1 + $0x220] ss:$8 sps:$4 sm:$0xff]  }
  0x63   : > { %2238 = vmatprep.mubr.bf16.mxu0 %v4696_v0 }
  0x64   : > { %650 = vmatpush1.bf16.msra.mxu1 %v4003_v56  ;;  %v4083_v56 = vld [vmem:[%s5286_s1 + $0x5a0] ss:$8 sps:$4 sm:$0xff]  }
  0x65   : > { %2221 = vmatpush1.bf16.msra.mxu0 %v4006_v57  ;;  %1102 = vmatprep.subr.bf16.mxu1 %v4012_v58  ;;  %v4849_v57 = vcombine.low %v4602_v29, %v4628_v39  ;;  %v4852_v58 = vld [vmem:[%s4418_s25 + $0x54] sm:$0xff] }
  0x66   : > { %2222 = vmatprep.subr.bf16.mxu0 %v4015_v59  ;;  %v4088_v59 = vld [vmem:[%s5286_s1 + $0x234] ss:$8 sps:$4 sm:$0xff]   ;;  %v3510_v61 = vcombine.high %v4852_v58, %v4761_v26  ;;  %v4086_v29 = vld [vmem:[%s5286_s1 + $0x230] ss:$8 sps:$4 sm:$0xff]  }
  0x67   : > { %668 = vmatmul.mubr.bf16.vlgmr.msra.gmra.mrb[0].mxu1 %v4009_v60  ;;  %v4091_v60 = vld [vmem:[%s5286_s1 + $0x5b4] ss:$8 sps:$4 sm:$0xff]   ;;  %v4089_v39 = vld [vmem:[%s5286_s1 + $0x5b0] ss:$8 sps:$4 sm:$0xff]  }
  0x68   : > { %1103 = vmatpush1.bf16.msra.mxu1 %v4010_v62  ;;  %677 = vmatprep.mubr.bf16.mxu1 %v4290_v2  ;;  %v4095_v62 = vld [vmem:[%s5286_s1 + $0x244] ss:$8 sps:$4 sm:$0xff]  }
  0x69   : > { %2223 = vmatpush1.bf16.msra.mxu0 %v4013_v63  ;;  %1104 = vmatprep.subr.bf16.mxu1 %v4018_v4  ;;  %v4099_v63 = vld [vmem:[%s5286_s1 + $0x5c4] ss:$8 sps:$4 sm:$0xff]   ;;  %v3509_v4 = vcombine.low %v4852_v58, %v4761_v26 }
  0x6a   : > { %2224 = vmatprep.subr.bf16.mxu0 %v4021_v5  ;;  %v4093_v5 = vld [vmem:[%s5286_s1 + $0x240] ss:$8 sps:$4 sm:$0xff]  }
  0x6c   : > { %1105 = vmatpush1.bf16.msra.mxu1 %v4016_v6  ;;  %v4097_v6 = vld [vmem:[%s5286_s1 + $0x5c0] ss:$8 sps:$4 sm:$0xff]  }
  0x6d   : > { %2225 = vmatpush1.bf16.msra.mxu0 %v4019_v7  ;;  %1106 = vmatprep.subr.bf16.mxu1 %v4026_v8  ;;  %v4102_v7 = vld [vmem:[%s5286_s1 + $0x254] ss:$8 sps:$4 sm:$0xff]  }
  0x6e   : > { %2226 = vmatprep.subr.bf16.mxu0 %v4029_v9  ;;  %v4105_v8 = vld [vmem:[%s5286_s1 + $0x5d4] ss:$8 sps:$4 sm:$0xff]   ;;  %v3513_v9 = vcombine.high %v4764_v28, %v4764_v28 }
  0x6f   : > { %678 = vmatmul.mubr.bf16.gmra.mrb[4].mxu1 %v4023_v10  ;;  %v4100_v10 = vld [vmem:[%s5286_s1 + $0x250] ss:$8 sps:$4 sm:$0xff]  }
  0x70   : > { %1107 = vmatpush1.bf16.msra.mxu1 %v4024_v11  ;;  %687 = vmatprep.mubr.bf16.mxu1 %v4290_v2  ;;  %v4103_v11 = vld [vmem:[%s5286_s1 + $0x5d0] ss:$8 sps:$4 sm:$0xff]  }
  0x71   : > { %2227 = vmatpush1.bf16.msra.mxu0 %v4027_v12  ;;  %1108 = vmatprep.subr.bf16.mxu1 %v4032_v13  ;;  %v4109_v12 = vld [vmem:[%s5286_s1 + $0x264] ss:$8 sps:$4 sm:$0xff]  }
  0x72   : > { %2228 = vmatprep.subr.bf16.mxu0 %v4035_v14  ;;  %v4113_v13 = vld [vmem:[%s5286_s1 + $0x5e4] ss:$8 sps:$4 sm:$0xff]   ;;  %v3512_v14 = vcombine.low %v4764_v28, %v4764_v28  ;;  %v3390_v28 = vcombine.low %v4761_v26, %v4761_v26 }
  0x74   : > { %1109 = vmatpush1.bf16.msra.mxu1 %v4030_v15  ;;  %v4107_v15 = vld [vmem:[%s5286_s1 + $0x260] ss:$8 sps:$4 sm:$0xff]  }
  0x75   : > { %2229 = vmatpush1.bf16.msra.mxu0 %v4033_v17  ;;  %1110 = vmatprep.subr.bf16.mxu1 %v4040_v18  ;;  %v4111_v17 = vld [vmem:[%s5286_s1 + $0x5e0] ss:$8 sps:$4 sm:$0xff]   ;;  %v4116_v18 = vld [vmem:[%s5286_s1 + $0x274] ss:$8 sps:$4 sm:$0xff]  }
  0x76   : > { %2230 = vmatprep.subr.bf16.mxu0 %v4043_v19  ;;  %v4119_v19 = vld [vmem:[%s5286_s1 + $0x5f4] ss:$8 sps:$4 sm:$0xff]  }
  0x77   : > { %688 = vmatmul.mubr.bf16.gmra.mrb[8].mxu1 %v4037_v20  ;;  %v4114_v20 = vld [vmem:[%s5286_s1 + $0x270] ss:$8 sps:$4 sm:$0xff]  }
  0x78   : > { %1111 = vmatpush1.bf16.msra.mxu1 %v4038_v21  ;;  %697 = vmatprep.mubr.bf16.mxu1 %v4290_v2  ;;  %v4117_v21 = vld [vmem:[%s5286_s1 + $0x5f0] ss:$8 sps:$4 sm:$0xff]  }
  0x79   : > { %2231 = vmatpush1.bf16.msra.mxu0 %v4041_v22  ;;  %1112 = vmatprep.subr.bf16.mxu1 %v4046_v23  ;;  %v4124_v22 = vld [vmem:[%s5286_s1 + $0x304] ss:$8 sps:$4 sm:$0xff]  }
  0x7a   : > { %2232 = vmatprep.subr.bf16.mxu0 %v4049_v24  ;;  %v4128_v23 = vld [vmem:[%s5286_s1 + $0x604] ss:$8 sps:$4 sm:$0xff]  }
  0x7b   : > { %v4125_v24 = vld [vmem:[%s4418_s25 + $0x2c] ss:$12 sps:$4 sm:$0xff]  }
  0x7c   : > { %1113 = vmatpush1.bf16.msra.mxu1 %v4044_v25  ;;  %v4122_v25 = vld [vmem:[%s5286_s1 + $0x300] ss:$8 sps:$4 sm:$0xff]  }
  0x7d   : > { %2233 = vmatpush1.bf16.msra.mxu0 %v4047_v30  ;;  %1114 = vmatprep.subr.bf16.mxu1 %v4054_v31  ;;  %v4126_v30 = vld [vmem:[%s5286_s1 + $0x600] ss:$8 sps:$4 sm:$0xff]   ;;  %v4131_v31 = vld [vmem:[%s5286_s1 + $0x314] ss:$8 sps:$4 sm:$0xff]  }
  0x7e   : > { %2234 = vmatprep.subr.bf16.mxu0 %v4057_v33  ;;  %v4134_v33 = vld [vmem:[%s5286_s1 + $0x614] ss:$8 sps:$4 sm:$0xff]  }
  0x7f   : > { %698 = vmatmul.mubr.bf16.gmra.mrb[16].mxu1 %v4051_v35  ;;  %v4129_v35 = vld [vmem:[%s5286_s1 + $0x310] ss:$8 sps:$4 sm:$0xff]  }
  0x80   : > { %1115 = vmatpush1.bf16.msra.mxu1 %v4052_v36  ;;  %1134 = vmatprep.mubr.bf16.mxu1 %v3260_v41  ;;  %v4132_v36 = vld [vmem:[%s5286_s1 + $0x610] ss:$8 sps:$4 sm:$0xff]  }
  0x81   : > { %2235 = vmatpush1.bf16.msra.mxu0 %v4055_v37  ;;  %1116 = vmatprep.subr.bf16.mxu1 %v4060_v38  ;;  %v4137_v37 = vld [vmem:[%s5286_s1 + $0x324] ss:$8 sps:$4 sm:$0xff]   ;;  %v4139_v38 = vld [vmem:[%s5286_s1 + $0x620] ss:$8 sps:$4 sm:$0xff]   ;;  %v4142_v41 = vld [vmem:[%s5286_s1 + $0x330] ss:$8 sps:$4 sm:$0xff]  }
  0x82   : > { %2236 = vmatprep.subr.bf16.mxu0 %v4063_v40  ;;  %v4147_v40 = vld [vmem:[%s5286_s1 + $0x634] ss:$8 sps:$4 sm:$0xff]  }
  0x84   : > { %1117 = vmatpush1.bf16.msra.mxu1 %v4058_v42  ;;  %v4145_v42 = vld [vmem:[%s5286_s1 + $0x630] ss:$8 sps:$4 sm:$0xff]  }
  0x85   : > { %2237 = vmatpush1.bf16.msra.mxu0 %v4061_v43  ;;  %1118 = vmatprep.subr.bf16.mxu1 %v4068_v44  ;;  %v4150_v43 = vld [vmem:[%s5286_s1 + $0x344] ss:$8 sps:$4 sm:$0xff]  }
  0x86   : > { %2277 = vmatprep.subr.bf16.mxu0 %v4071_v45  ;;  %v4154_v44 = vld [vmem:[%s5286_s1 + $0x644] ss:$8 sps:$4 sm:$0xff]   ;;  %v4148_v45 = vld [vmem:[%s5286_s1 + $0x340] ss:$8 sps:$4 sm:$0xff]  }
  0x88   : > { %2239 = vmatmul.mubr.bf16.vlgmr.msra.gmra.mrb[16].mxu0 %v4809_v46  ;;  %1119 = vmatpush1.bf16.msra.mxu1 %v4066_v47  ;;  %v4152_v47 = vld [vmem:[%s5286_s1 + $0x640] ss:$8 sps:$4 sm:$0xff]  }
  0x89   : > { %2278 = vmatpush1.bf16.msra.mxu0 %v4069_v48  ;;  %1120 = vmatprep.subr.bf16.mxu1 %v4074_v49  ;;  %v4157_v48 = vld [vmem:[%s5286_s1 + $0x354] ss:$8 sps:$4 sm:$0xff]  }
  0x8a   : > { %2279 = vmatprep.subr.bf16.mxu0 %v4077_v16  ;;  %2248 = vmatprep.mubr.bf16.mxu0 %v4825_v27  ;;  %v4160_v49 = vld [vmem:[%s5286_s1 + $0x654] ss:$8 sps:$4 sm:$0xff]   ;;  %v3269_v16 = vcombine.high %v4852_v58, %v4852_v58 }
  0x8c   : > { %1121 = vmatpush1.bf16.msra.mxu1 %v4072_v50  ;;  %v4158_v50 = vld [vmem:[%s5286_s1 + $0x650] ss:$8 sps:$4 sm:$0xff]  }
  0x8d   : > { %2280 = vmatpush1.bf16.msra.mxu0 %v4075_v51  ;;  %1122 = vmatprep.subr.bf16.mxu1 %v4081_v52  ;;  %v4165_v51 = vld [vmem:[%s5286_s1 + $0x364] ss:$8 sps:$4 sm:$0xff]  }
  0x8e   : > { %2281 = vmatprep.subr.bf16.mxu0 %v4085_v53  ;;  %v4169_v52 = vld [vmem:[%s5286_s1 + $0x664] ss:$8 sps:$4 sm:$0xff]   ;;  %v3268_v53 = vcombine.low %v4852_v58, %v4852_v58 }
  0x90   : > { %2249 = vmatmul.mubr.bf16.gmra.mrb[20].mxu0 %v4849_v57  ;;  %1123 = vmatpush1.bf16.msra.mxu1 %v4079_v54  ;;  %v4166_v54 = vld [vmem:[%s4418_s25 + $0x74] ss:$0 sps:$4 sm:$0xff]  }
  0x91   : > { %2282 = vmatpush1.bf16.msra.mxu0 %v4083_v56  ;;  %1124 = vmatprep.subr.bf16.mxu1 %v4088_v59  ;;  %v4163_v56 = vld [vmem:[%s5286_s1 + $0x360] ss:$8 sps:$4 sm:$0xff]   ;;  %v4172_v59 = vld [vmem:[%s5286_s1 + $0x374] ss:$8 sps:$4 sm:$0xff]  }
  0x92   : > { %2283 = vmatprep.subr.bf16.mxu0 %v4091_v60  ;;  %2258 = vmatprep.mubr.bf16.mxu0 %v3510_v61  ;;  %v4175_v60 = vld [vmem:[%s5286_s1 + $0x674] ss:$8 sps:$4 sm:$0xff]  }
  0x93   : > { %v4226_v61 = vld [vmem:[%s4418_s25 + $0x1c] ss:$12 sps:$4 sm:$0xff]  }
  0x94   : > { %1125 = vmatpush1.bf16.msra.mxu1 %v4086_v29  ;;  %v5034_v29 = vld [vmem:[%s4418_s25 + $0x34] ss:$12 sps:$4 sm:$0xff]  }
  0x95   : > { %2284 = vmatpush1.bf16.msra.mxu0 %v4089_v39  ;;  %1126 = vmatprep.subr.bf16.mxu1 %v4095_v62  ;;  %v4170_v39 = vld [vmem:[%s5286_s1 + $0x370] ss:$8 sps:$4 sm:$0xff]  }
  0x96   : > { %2285 = vmatprep.subr.bf16.mxu0 %v4099_v63  ;;  %v4173_v62 = vld [vmem:[%s5286_s1 + $0x670] ss:$8 sps:$4 sm:$0xff]   ;;  %v4178_v63 = vld [vmem:[%s5286_s1 + $0x384] ss:$8 sps:$4 sm:$0xff]  }
  0x98   : > { %2259 = vmatmul.mubr.bf16.gmra.mrb[24].mxu0 %v3509_v4  ;;  %1127 = vmatpush1.bf16.msra.mxu1 %v4093_v5  ;;  %v4181_v4 = vld [vmem:[%s5286_s1 + $0x684] ss:$8 sps:$4 sm:$0xff]   ;;  %v4176_v5 = vld [vmem:[%s5286_s1 + $0x380] ss:$8 sps:$4 sm:$0xff]  }
  0x99   : > { %2286 = vmatpush1.bf16.msra.mxu0 %v4097_v6  ;;  %1128 = vmatprep.subr.bf16.mxu1 %v4102_v7  ;;  %v4179_v6 = vld [vmem:[%s5286_s1 + $0x680] ss:$8 sps:$4 sm:$0xff]   ;;  %v4184_v7 = vld [vmem:[%s5286_s1 + $0x394] ss:$8 sps:$4 sm:$0xff]  }
  0x9a   : > { %2287 = vmatprep.subr.bf16.mxu0 %v4105_v8  ;;  %2268 = vmatprep.mubr.bf16.mxu0 %v3513_v9  ;;  %v4187_v8 = vld [vmem:[%s5286_s1 + $0x694] ss:$8 sps:$4 sm:$0xff]   ;;  %v4182_v9 = vld [vmem:[%s5286_s1 + $0x390] ss:$8 sps:$4 sm:$0xff]  }
  0x9c   : > { %1129 = vmatpush1.bf16.msra.mxu1 %v4100_v10  ;;  %v4185_v10 = vld [vmem:[%s5286_s1 + $0x690] ss:$8 sps:$4 sm:$0xff]  }
  0x9d   : > { %2288 = vmatpush1.bf16.msra.mxu0 %v4103_v11  ;;  %1130 = vmatprep.subr.bf16.mxu1 %v4109_v12  ;;  %v4190_v11 = vld [vmem:[%s5286_s1 + $0x3a4] ss:$8 sps:$4 sm:$0xff]  }
  0x9e   : > { %2289 = vmatprep.subr.bf16.mxu0 %v4113_v13  ;;  %v4193_v12 = vld [vmem:[%s5286_s1 + $0x6a4] ss:$8 sps:$4 sm:$0xff]   ;;  %v4188_v13 = vld [vmem:[%s5286_s1 + $0x3a0] ss:$8 sps:$4 sm:$0xff]  }
  0xa0   : > { %2269 = vmatmul.mubr.bf16.gmra.mrb[32].mxu0 %v3512_v14  ;;  %1131 = vmatpush1.bf16.msra.mxu1 %v4107_v15  ;;  %v4191_v14 = vld [vmem:[%s5286_s1 + $0x6a0] ss:$8 sps:$4 sm:$0xff]   ;;  %v4196_v15 = vld [vmem:[%s5286_s1 + $0x3b4] ss:$8 sps:$4 sm:$0xff]  }
  0xa1   : > { %2290 = vmatpush1.bf16.msra.mxu0 %v4111_v17  ;;  %1132 = vmatprep.subr.bf16.mxu1 %v4116_v18  ;;  %v4199_v17 = vld [vmem:[%s5286_s1 + $0x6b4] ss:$8 sps:$4 sm:$0xff]   ;;  %v4194_v18 = vld [vmem:[%s5286_s1 + $0x3b0] ss:$8 sps:$4 sm:$0xff]  }
  0xa2   : > { %2291 = vmatprep.subr.bf16.mxu0 %v4119_v19  ;;  %2309 = vmatprep.mubr.bf16.mxu0 %v4290_v2  ;;  %v4197_v19 = vld [vmem:[%s5286_s1 + $0x6b0] ss:$8 sps:$4 sm:$0xff]  }
  0xa4   : > { %1133 = vmatpush1.bf16.msra.mxu1 %v4114_v20  ;;  %v4202_v20 = vld [vmem:[%s5286_s1 + $0x3c4] ss:$8 sps:$4 sm:$0xff]  }
  0xa5   : > { %2292 = vmatpush1.bf16.msra.mxu0 %v4117_v21  ;;  %1654 = vmatprep.subr.bf16.mxu1 %v4124_v22  ;;  %v4205_v21 = vld [vmem:[%s5286_s1 + $0x6c4] ss:$8 sps:$4 sm:$0xff]   ;;  %v4200_v22 = vld [vmem:[%s5286_s1 + $0x3c0] ss:$8 sps:$4 sm:$0xff]  }
  0xa6   : > { %2758 = vmatprep.subr.bf16.mxu0 %v4128_v23  ;;  %v4203_v23 = vld [vmem:[%s5286_s1 + $0x6c0] ss:$8 sps:$4 sm:$0xff]  }
  0xa7   : > { %1135 = vmatmul.mubr.bf16.vlgmr.msra.gmra.mrb[0].mxu1 %v3259_v3  ;;  %v4135_v3 = vld [vmem:[%s5286_s1 + $0x320] ss:$8 sps:$4 sm:$0xff]  }
  0xa8   : > { %2310 = vmatmul.mubr.bf16.vlgmr.msra.gmra.mrb[16].mxu0 %v4125_v24  ;;  %1655 = vmatpush1.bf16.msra.mxu1 %v4122_v25  ;;  %v4208_v24 = vld [vmem:[%s5286_s1 + $0x3d4] ss:$8 sps:$4 sm:$0xff]  }
  0xa9   : > { %2759 = vmatpush1.bf16.msra.mxu0 %v4126_v30  ;;  %1656 = vmatprep.subr.bf16.mxu1 %v4131_v31  ;;  %v4211_v25 = vld [vmem:[%s5286_s1 + $0x6d4] ss:$8 sps:$4 sm:$0xff]   ;;  %v4206_v30 = vld [vmem:[%s5286_s1 + $0x3d0] ss:$8 sps:$4 sm:$0xff]  }
  0xaa   : > { %2760 = vmatprep.subr.bf16.mxu0 %v4134_v33  ;;  %1144 = vmatprep.mubr.bf16.mxu1 %v4696_v0  ;;  %v4144_v0 = vld [vmem:[%s5286_s1 + $0x334] ss:$8 sps:$4 sm:$0xff]   ;;  %v4209_v31 = vld [vmem:[%s5286_s1 + $0x6d0] ss:$8 sps:$4 sm:$0xff]   ;;  %v4214_v33 = vld [vmem:[%s5286_s1 + $0x3e4] ss:$8 sps:$4 sm:$0xff]  }
  0xab   : > { %2319 = vmatprep.mubr.bf16.mxu0 %v4290_v2 }
  0xac   : > { %1657 = vmatpush1.bf16.msra.mxu1 %v4129_v35  ;;  %v4217_v35 = vld [vmem:[%s5286_s1 + $0x6e4] ss:$8 sps:$4 sm:$0xff]  }
  0xad   : > { %2761 = vmatpush1.bf16.msra.mxu0 %v4132_v36  ;;  %1658 = vmatprep.subr.bf16.mxu1 %v4137_v37  ;;  %v4212_v36 = vld [vmem:[%s5286_s1 + $0x3e0] ss:$8 sps:$4 sm:$0xff]  }
  0xae   : > { %2762 = vmatprep.subr.bf16.mxu0 %v4141_v55  ;;  %v4215_v37 = vld [vmem:[%s5286_s1 + $0x6e0] ss:$8 sps:$4 sm:$0xff]   ;;  %v4220_v55 = vld [vmem:[%s5286_s1 + $0x3f4] ss:$8 sps:$4 sm:$0xff]  }
  0xaf   : > { %1145 = vmatmul.mubr.bf16.gmra.mrb[4].mxu1 %v4809_v46  ;;  %v4151_v46 = vld [vmem:[%s4418_s25 + $0x5c] ss:$12 sps:$4 sm:$0xff]  }
  0xb0   : > { %2320 = vmatmul.mubr.bf16.gmra.mrb[20].mxu0 %v4138_v1  ;;  %1659 = vmatpush1.bf16.msra.mxu1 %v4135_v3  ;;  %v4223_v1 = vld [vmem:[%s5286_s1 + $0x6f4] ss:$8 sps:$4 sm:$0xff]   ;;  %v4218_v3 = vld [vmem:[%s5286_s1 + $0x3f0] ss:$8 sps:$4 sm:$0xff]  }
  0xb1   : > { %2763 = vmatpush1.bf16.msra.mxu0 %v4139_v38  ;;  %1660 = vmatprep.subr.bf16.mxu1 %v4144_v0  ;;  %v4221_v38 = vld [vmem:[%s5286_s1 + $0x6f0] ss:$8 sps:$4 sm:$0xff]   ;;  %v4232_v0 = vld [vmem:[%s5286_s1 + $0x704] ss:$8 sps:$4 sm:$0xff]  }
  0xb2   : > { %2764 = vmatprep.subr.bf16.mxu0 %v4147_v40  ;;  %1154 = vmatprep.mubr.bf16.mxu1 %v4825_v27  ;;  %v4155_v27 = vld [vmem:[%s5286_s1 + $0x350] ss:$8 sps:$4 sm:$0xff]  }
  0xb3   : > { %2329 = vmatprep.mubr.bf16.mxu0 %v4290_v2  ;;  %v4224_v40 = vld [vmem:[%s4418_s25 + $0x18] ss:$12 sps:$4 sm:$0xff]  }
  0xb4   : > { %1661 = vmatpush1.bf16.msra.mxu1 %v4142_v41  ;;  %v4227_v41 = vld [vmem:[%s4418_s25 + $0x30] ss:$12 sps:$4 sm:$0xff]  }
  0xb5   : > { %2765 = vmatpush1.bf16.msra.mxu0 %v4145_v42  ;;  %1662 = vmatprep.subr.bf16.mxu1 %v4150_v43  ;;  %v3567_v42 = vld [vmem:[%s4418_s25 + $0x48] sm:$0xff] }
  0xb6   : > { %2766 = vmatprep.subr.bf16.mxu0 %v4154_v44  ;;  %v4230_v43 = vld [vmem:[%s5286_s1 + $0x700] ss:$8 sps:$4 sm:$0xff]   ;;  %v4235_v44 = vld [vmem:[%s5286_s1 + $0x714] ss:$8 sps:$4 sm:$0xff]  }
  0xb7   : > { %1155 = vmatmul.mubr.bf16.gmra.mrb[8].mxu1 %v4849_v57  ;;  %v4167_v57 = vld [vmem:[%s5286_s1 + $0x660] ss:$8 sps:$4 sm:$0xff]  }
  0xb8   : > { %2330 = vmatmul.mubr.bf16.gmra.mrb[24].mxu0 %v4151_v46  ;;  %1663 = vmatpush1.bf16.msra.mxu1 %v4148_v45  ;;  %v3629_v45 = vcombine.high %v3567_v42, %v4852_v58  ;;  %v4233_v46 = vld [vmem:[%s5286_s1 + $0x710] ss:$8 sps:$4 sm:$0xff]  }
  0xb9   : > { %2767 = vmatpush1.bf16.msra.mxu0 %v4152_v47  ;;  %1664 = vmatprep.subr.bf16.mxu1 %v4157_v48  ;;  %v4240_v47 = vld [vmem:[%s5286_s1 + $0x724] ss:$8 sps:$4 sm:$0xff]   ;;  %v3628_v48 = vcombine.low %v3567_v42, %v4852_v58  ;;  %v4241_v58 = vld [vmem:[%s5286_s1 + $0x730] ss:$8 sps:$4 sm:$0xff]  }
  0xba   : > { %2768 = vmatprep.subr.bf16.mxu0 %v4160_v49  ;;  %1164 = vmatprep.mubr.bf16.mxu1 %v3269_v16  ;;  %v4238_v49 = vld [vmem:[%s5286_s1 + $0x720] ss:$8 sps:$4 sm:$0xff]   ;;  %v4243_v16 = vld [vmem:[%s5286_s1 + $0x734] ss:$8 sps:$4 sm:$0xff]  }
  0xbb   : > { %2339 = vmatprep.mubr.bf16.mxu0 %v4290_v2 }
  0xbc   : > { %1665 = vmatpush1.bf16.msra.mxu1 %v4155_v27  ;;  %v4248_v27 = vld [vmem:[%s5286_s1 + $0x744] ss:$8 sps:$4 sm:$0xff]  }
  0xbd   : > { %2769 = vmatpush1.bf16.msra.mxu0 %v4158_v50  ;;  %1666 = vmatprep.subr.bf16.mxu1 %v4165_v51  ;;  %v3575_v50 = vld [vmem:[%s4418_s25 + $0x78] sm:$0xff]  ;;  %v4246_v51 = vld [vmem:[%s5286_s1 + $0x740] ss:$8 sps:$4 sm:$0xff]  }
  0xbe   : > { %2770 = vmatprep.subr.bf16.mxu0 %v4169_v52  ;;  %v4251_v52 = vld [vmem:[%s5286_s1 + $0x754] ss:$8 sps:$4 sm:$0xff]  }
  0xbf   : > { %1165 = vmatmul.mubr.bf16.gmra.mrb[20].mxu1 %v3268_v53  ;;  %v3391_v53 = vcombine.high %v4761_v26, %v4761_v26  ;;  %v4259_v26 = vld [vmem:[%s5286_s1 + $0x770] ss:$8 sps:$4 sm:$0xff]  }
  0xc0   : > { %2340 = vmatmul.mubr.bf16.gmra.mrb[36].mxu0 %v4166_v54  ;;  %1667 = vmatpush1.bf16.msra.mxu1 %v4163_v56  ;;  %v3635_v54 = vcombine.high %v3575_v50, %v3575_v50  ;;  %v4258_v56 = vld [vmem:[%s5286_s1 + $0x764] ss:$8 sps:$4 sm:$0xff]  }
  0xc1   : > { %2771 = vmatpush1.bf16.msra.mxu0 %v4167_v57  ;;  %1668 = vmatprep.subr.bf16.mxu1 %v4172_v59 }
  0xc2   : > { %2772 = vmatprep.subr.bf16.mxu0 %v4175_v60  ;;  %1686 = vmatprep.mubr.bf16.mxu1 %v4226_v61  ;;  %v4256_v61 = vld [vmem:[%s5286_s1 + $0x760] ss:$8 sps:$4 sm:$0xff]  }
  0xc3   : > { %2790 = vmatprep.mubr.bf16.mxu0 %v5034_v29 }
  0xc4   : > { %1669 = vmatpush1.bf16.msra.mxu1 %v4170_v39  ;;  %v4261_v39 = vld [vmem:[%s5286_s1 + $0x774] ss:$8 sps:$4 sm:$0xff]  }
  0xc5   : > { %2773 = vmatpush1.bf16.msra.mxu0 %v4173_v62  ;;  %1670 = vmatprep.subr.bf16.mxu1 %v4178_v63 }
  0xc6   : > { %2774 = vmatprep.subr.bf16.mxu0 %v4181_v4  ;;  %v4262_v4 = vld [vmem:[%s4418_s25 + $0x38] ss:$12 sps:$4 sm:$0xff]  }
  0xc8   : > { %1671 = vmatpush1.bf16.msra.mxu1 %v4176_v5  ;;  %v4263_v5 = vld [vmem:[%s4418_s25 + $0x68] ss:$12 sps:$4 sm:$0xff]  }
  0xc9   : > { %2775 = vmatpush1.bf16.msra.mxu0 %v4179_v6  ;;  %1672 = vmatprep.subr.bf16.mxu1 %v4184_v7 }
  0xca   : > { %2776 = vmatprep.subr.bf16.mxu0 %v4187_v8 }
  0xcc   : > { %1673 = vmatpush1.bf16.msra.mxu1 %v4182_v9 }
  0xcd   : > { %2777 = vmatpush1.bf16.msra.mxu0 %v4185_v10  ;;  %1674 = vmatprep.subr.bf16.mxu1 %v4190_v11  ;;  %v4264_v10 = vld [vmem:[%s4418_s25 + $0x50] ss:$12 sps:$4 sm:$0xff]   ;;  %v4265_v11 = vld [vmem:[%s4418_s25 + $0x80] ss:$0 sps:$4 sm:$0xff]  }
  0xce   : > { %2778 = vmatprep.subr.bf16.mxu0 %v4193_v12 }
  0xd0   : > { %1675 = vmatpush1.bf16.msra.mxu1 %v4188_v13 }
  0xd1   : > { %2779 = vmatpush1.bf16.msra.mxu0 %v4191_v14  ;;  %1676 = vmatprep.subr.bf16.mxu1 %v4196_v15 }
  0xd2   : > { %2780 = vmatprep.subr.bf16.mxu0 %v4199_v17 }
  0xd4   : > { %1677 = vmatpush1.bf16.msra.mxu1 %v4194_v18 }
  0xd5   : > { %2781 = vmatpush1.bf16.msra.mxu0 %v4197_v19  ;;  %1678 = vmatprep.subr.bf16.mxu1 %v4202_v20 }
  0xd6   : > { %2782 = vmatprep.subr.bf16.mxu0 %v4205_v21 }
  0xd8   : > { %1679 = vmatpush1.bf16.msra.mxu1 %v4200_v22 }
  0xd9   : > { %2783 = vmatpush1.bf16.msra.mxu0 %v4203_v23  ;;  %1680 = vmatprep.subr.bf16.mxu1 %v4208_v24 }
  0xda   : > { %2784 = vmatprep.subr.bf16.mxu0 %v4211_v25 }
  0xdc   : > { %1681 = vmatpush1.bf16.msra.mxu1 %v4206_v30 }
  0xdd   : > { %2785 = vmatpush1.bf16.msra.mxu0 %v4209_v31  ;;  %1682 = vmatprep.subr.bf16.mxu1 %v4214_v33 }
  0xde   : > { %2786 = vmatprep.subr.bf16.mxu0 %v4217_v35 }
  0xe0   : > { %1683 = vmatpush1.bf16.msra.mxu1 %v4212_v36 }
  0xe1   : > { %2787 = vmatpush1.bf16.msra.mxu0 %v4215_v37  ;;  %1684 = vmatprep.subr.bf16.mxu1 %v4220_v55 }
  0xe2   : > { %2788 = vmatprep.subr.bf16.mxu0 %v4223_v1 }
  0xe4   : > { %1685 = vmatpush1.bf16.msra.mxu1 %v4218_v3 }
  0xe5   : > { %2789 = vmatpush1.bf16.msra.mxu0 %v4221_v38  ;;  %3701 = vmatprep.subr.bf16.mxu1 %v4232_v0 }
  0xe6   : > { %2829 = vmatprep.subr.bf16.mxu0 %v4232_v0 }
  0xe7   : > { %1687 = vmatmul.mubr.bf16.vlgmr.msra.gmra.mrb[24].mxu1 %v4224_v40 }
  0xe8   : > { %2791 = vmatmul.mubr.bf16.vlgmr.msra.gmra.mrb[16].mxu0 %v4227_v41  ;;  %3709 = vmatpush1.bf16.msra.mxu1 %v4230_v43 }
  0xe9   : > { %2830 = vmatpush1.bf16.msra.mxu0 %v4230_v43  ;;  %3702 = vmatprep.subr.bf16.mxu1 %v4235_v44 }
  0xea   : > { %2831 = vmatprep.subr.bf16.mxu0 %v4235_v44  ;;  %1696 = vmatprep.mubr.bf16.mxu1 %v5034_v29 }
  0xeb   : > { %2800 = vmatprep.mubr.bf16.mxu0 %v3629_v45 }
  0xec   : > { %3710 = vmatpush1.bf16.msra.mxu1 %v4233_v46 }
  0xed   : > { %2832 = vmatpush1.bf16.msra.mxu0 %v4233_v46  ;;  %3703 = vmatprep.subr.bf16.mxu1 %v4240_v47 }
  0xee   : > { %2833 = vmatprep.subr.bf16.mxu0 %v4240_v47 }
  0xef   : > { %1697 = vmatmul.mubr.bf16.gmra.mrb[28].mxu1 %v4227_v41 }
  0xf0   : > { %2801 = vmatmul.mubr.bf16.gmra.mrb[20].mxu0 %v3628_v48  ;;  %3711 = vmatpush1.bf16.msra.mxu1 %v4238_v49 }
  0xf1   : > { %2834 = vmatpush1.bf16.msra.mxu0 %v4238_v49  ;;  %3704 = vmatprep.subr.bf16.mxu1 %v4243_v16 }
  0xf2   : > { %2835 = vmatprep.subr.bf16.mxu0 %v4243_v16  ;;  %1706 = vmatprep.mubr.bf16.mxu1 %v3629_v45 }
  0xf3   : > { %2810 = vmatprep.mubr.bf16.mxu0 %v3632_v32  ;;  %v4249_v32 = vld [vmem:[%s5286_s1 + $0x750] ss:$8 sps:$4 sm:$0xff]  }
  0xf4   : > { %3712 = vmatpush1.bf16.msra.mxu1 %v4241_v58 }
  0xf5   : > { %2836 = vmatpush1.bf16.msra.mxu0 %v4241_v58  ;;  %3705 = vmatprep.subr.bf16.mxu1 %v4248_v27 }
  0xf6   : > { %2837 = vmatprep.subr.bf16.mxu0 %v4248_v27 }
  0xf7   : > { %1707 = vmatmul.mubr.bf16.gmra.mrb[32].mxu1 %v3628_v48 }
  0xf8   : > { %2811 = vmatmul.mubr.bf16.gmra.mrb[24].mxu0 %v3631_v34  ;;  %3713 = vmatpush1.bf16.msra.mxu1 %v4246_v51  ;;  %v3634_v34 = vcombine.low %v3575_v50, %v3575_v50 }
  0xf9   : > { %2838 = vmatpush1.bf16.msra.mxu0 %v4246_v51  ;;  %3706 = vmatprep.subr.bf16.mxu1 %v4251_v52 }
  0xfa   : > { %2839 = vmatprep.subr.bf16.mxu0 %v4251_v52  ;;  %1716 = vmatprep.mubr.bf16.mxu1 %v3391_v53 }
  0xfb   : > { %v5193_v57 = vpop.f32.mrb[0].mxu0  ;;  %2820 = vmatprep.mubr.bf16.mxu0 %v3635_v54 }
  0xfc   : > { %v5195_v59 = vpop.f32.mrb[1].mxu0  ;;  %3714 = vmatpush1.bf16.msra.mxu1 %v4249_v32 }
  0xfd   : > { %v5199_v60 = vpop.f32.mrb[2].mxu0  ;;  %2840 = vmatpush1.bf16.msra.mxu0 %v4249_v32  ;;  %3707 = vmatprep.subr.bf16.mxu1 %v4258_v56 }
  0xfe   : > { %v1213_v29 = vpop.f32.mrb[3].mxu0  ;;  %2841 = vmatprep.subr.bf16.mxu0 %v4258_v56 }
  0xff   : > { %1717 = vmatmul.mubr.bf16.gmra.mrb[36].mxu1 %v3390_v28 }
 0x100   : > { %2821 = vmatmul.mubr.bf16.gmra.mrb[40].mxu0 %v3634_v34  ;;  %3715 = vmatpush1.bf16.msra.mxu1 %v4256_v61 }
 0x101   : > { %2842 = vmatpush1.bf16.msra.mxu0 %v4256_v61  ;;  %3708 = vmatprep.subr.bf16.mxu1 %v4261_v39 }
 0x102   : > { %2843 = vmatprep.subr.bf16.mxu0 %v4261_v39  ;;  %2861 = vmatprep.mubr.bf16.mxu0 %v4290_v2 }
 0x103   : > { %v1217_v62 = vpop.f32.mrb[4].mxu0  ;;  %2881 = vmatprep.mubr.bf16.mxu1 %v4290_v2 }
 0x104   : > { %v1219_v63 = vpop.f32.mrb[5].mxu0  ;;  %3716 = vmatpush1.bf16.msra.mxu1 %v4259_v26 }
 0x105   : > { %v1221_v6 = vpop.f32.mrb[6].mxu0  ;;  %2844 = vmatpush1.bf16.msra.mxu0 %v4259_v26 }
 0x106   : > { %v1223_v7 = vpop.f32.mrb[7].mxu0 }
 0x107   : > { %2882 = vmatmul.mubr.bf16.vlgmr.msra.gmra.mrb[40].mxu1 %v4263_v5 }
 0x108   : > { %2862 = vmatmul.mubr.bf16.vlgmr.msra.gmra.mrb[16].mxu0 %v4262_v4  ;;  %2891 = vmatprep.mubr.bf16.mxu1 %v4290_v2 }
 0x109   : > { %2871 = vmatprep.mubr.bf16.mxu0 %v4290_v2 }
 0x10b   : > { %v1227_v8 = vpop.f32.mrb[8].mxu0 }
 0x10c   : > { %v1229_v9 = vpop.f32.mrb[9].mxu0 }
 0x10d   : > { %v1231_v12 = vpop.f32.mrb[10].mxu0 }
 0x10e   : > { %v1233_v13 = vpop.f32.mrb[11].mxu0 }
 0x10f   : > { %2892 = vmatmul.mubr.bf16.gmra.mrb[44].mxu1 %v4265_v11 }
 0x110   : > { %2872 = vmatmul.mubr.bf16.gmra.mrb[20].mxu0 %v4264_v10 }
 0x113   : > { %v1237_v14 = vpop.f32.mrb[12].mxu0 }
 0x114   : > { %v1239_v15 = vpop.f32.mrb[13].mxu0 }
 0x115   : > { %v1241_v17 = vpop.f32.mrb[14].mxu0 }
 0x116   : > { %v1242_v18 = vpop.f32.mrb[15].mxu0 }
 0x132   : > { %v628_v19 = vpop.f32.mrb[12].mxu1 }
 0x133   : > { %v630_v20 = vpop.f32.mrb[13].mxu1 }
 0x134   : > { %v632_v21 = vpop.f32.mrb[14].mxu1 }
 0x135   : > { %v633_v22 = vpop.f32.mrb[15].mxu1  ;;  %v5218_v23 = vpop.f32.mrb[28].mxu0 }
 0x136   : > { %v5220_v24 = vpop.f32.mrb[29].mxu0 }
 0x137   : > { %v1793_v2 = vpop.f32.mrb[30].mxu0 }
 0x138   : > { %v1794_v25 = vpop.f32.mrb[31].mxu0 }
 0x152   : > { %v699_v30 = vpop.f32.mrb[16].mxu1 }
 0x153   : > { %v700_v31 = vadd.f32 %v699_v30, %v628_v19  ;;  %v701_v33 = vpop.f32.mrb[17].mxu1 }
 0x154   : > { %v702_v35 = vadd.f32 %v701_v33, %v630_v20  ;;  %v703_v36 = vpop.f32.mrb[18].mxu1 }
 0x155   : > { %v704_v37 = vpop.f32.mrb[19].mxu1 }
 0x173   : > { %v2270_v55 = vpop.f32.mrb[32].mxu0 }
 0x174   : > { %v2272_v1 = vpop.f32.mrb[33].mxu0 }
 0x175   : > { %v2274_v3 = vpop.f32.mrb[34].mxu0 }
 0x176   : > { %v2275_v38 = vpop.f32.mrb[35].mxu0 }
 0x17a   : > { %v1136_v0 = vpop.f32.mrb[0].mxu1 }
 0x17b   : > { %v1208_v40 = vadd.f32 %v5193_v57, %v1136_v0  ;;  %v1138_v41 = vpop.f32.mrb[1].mxu1 }
 0x17c   : > { %v1210_v42 = vadd.f32 %v5195_v59, %v1138_v41  ;;  %v1140_v43 = vpop.f32.mrb[2].mxu1 }
 0x17d   : > { %v1212_v44 = vadd.f32 %v5199_v60, %v1140_v43  ;;  %v1142_v45 = vpop.f32.mrb[3].mxu1  ;;  %v2944_v43 = vlaneseq }
 0x17e   : > { %v1214_v46 = vadd.f32 %v1213_v29, %v1142_v45 }
 0x182   : > { %v1146_v47 = vpop.f32.mrb[4].mxu1 }
 0x183   : > { %v1218_v48 = vadd.f32 %v1217_v62, %v1146_v47  ;;  %v1148_v49 = vpop.f32.mrb[5].mxu1 }
 0x184   : > { %v1220_v16 = vadd.f32 %v1219_v63, %v1148_v49  ;;  %v1150_v58 = vpop.f32.mrb[6].mxu1 }
 0x185   : > { %v1222_v27 = vadd.f32 %v1221_v6, %v1150_v58  ;;  %v1152_v50 = vpop.f32.mrb[7].mxu1 }
 0x186   : > { %v1224_v51 = vadd.f32 %v1223_v7, %v1152_v50 }
 0x18a   : > { %v1156_v52 = vpop.f32.mrb[8].mxu1 }
 0x18b   : > { %v1228_v53 = vadd.f32 %v1227_v8, %v1156_v52  ;;  %v1158_v54 = vpop.f32.mrb[9].mxu1 }
 0x18c   : > { %v1230_v32 = vadd.f32 %v1229_v9, %v1158_v54  ;;  %v1160_v56 = vpop.f32.mrb[10].mxu1 }
 0x18d   : > { %v1232_v57 = vadd.f32 %v1231_v12, %v1160_v56  ;;  %v1162_v59 = vpop.f32.mrb[11].mxu1 }
 0x18e   : > { %v1234_v28 = vadd.f32 %v1233_v13, %v1162_v59 }
 0x192   : > { %v1166_v34 = vpop.f32.mrb[20].mxu1 }
 0x193   : > { %v2341_v60 = vpop.f32.mrb[36].mxu0  ;;  %v1238_v61 = vadd.f32 %v1237_v14, %v1166_v34  ;;  %v1168_v39 = vpop.f32.mrb[21].mxu1 }
 0x194   : > { %v2342_v29 = vadd.f32 %v2341_v60, %v2270_v55  ;;  %v2343_v26 = vpop.f32.mrb[37].mxu0  ;;  %v1240_v62 = vadd.f32 %v1239_v15, %v1168_v39  ;;  %v1170_v4 = vpop.f32.mrb[22].mxu1 }
 0x195   : > { %v2344_v63 = vadd.f32 %v2343_v26, %v2272_v1  ;;  %v2345_v5 = vpop.f32.mrb[38].mxu0  ;;  %v1256_v6 = vadd.f32 %v1238_v61, %v700_v31  ;;  %v1171_v7 = vpop.f32.mrb[23].mxu1 }
 0x196   : > { %v2346_v10 = vpop.f32.mrb[39].mxu0  ;;  %v1257_v8 = vadd.f32 %v1240_v62, %v702_v35 }
 0x1ba   : > { %v1688_v11 = vpop.f32.mrb[24].mxu1 }
 0x1bb   : > { %v3718_v9 = vadd.f32 %v1688_v11, %v1208_v40  ;;  %v1690_v17 = vpop.f32.mrb[25].mxu1 }
 0x1bc   : > { %v3721_v12 = vadd.f32 %v1690_v17, %v1210_v42  ;;  %v1692_v18 = vpop.f32.mrb[26].mxu1 }
 0x1bd   : > { %v3724_v13 = vadd.f32 %v1692_v18, %v1212_v44  ;;  %v1694_v19 = vpop.f32.mrb[27].mxu1 }
 0x1be   : > { %v5225_v20 = vadd.f32 %v1694_v19, %v1214_v46 }
 0x1c2   : > { %v1698_v14 = vpop.f32.mrb[28].mxu1 }
 0x1c3   : > { %v5227_v21 = vadd.f32 %v1698_v14, %v1218_v48  ;;  %v1700_v15 = vpop.f32.mrb[29].mxu1  ;;  %v2945_v48 = vshrl.u32 %v2944_v43, 7 }
 0x1c4   : > { %v5229_v22 = vadd.f32 %v1700_v15, %v1220_v16  ;;  %v1702_v2 = vpop.f32.mrb[30].mxu1 }
 0x1c5   : > { %v5231_v25 = vadd.f32 %v1702_v2, %v1222_v27  ;;  %v1704_v30 = vpop.f32.mrb[31].mxu1  ;;  %v2950_v34 = vsub.s32 1, %v2945_v48 }
 0x1c6   : > { %v5233_v31 = vadd.f32 %v1704_v30, %v1224_v51 }
 0x1ca   : > { %v1708_v33 = vpop.f32.mrb[32].mxu1 }
 0x1cb   : > { %v2812_v35 = vpop.f32.mrb[24].mxu0  ;;  %v3742_v36 = vadd.f32 %v1708_v33, %v1228_v53  ;;  %v1710_v37 = vpop.f32.mrb[33].mxu1 }
 0x1cc   : > { %v2814_v55 = vpop.f32.mrb[25].mxu0  ;;  %v3746_v1 = vadd.f32 %v1710_v37, %v1230_v32  ;;  %v1712_v3 = vpop.f32.mrb[34].mxu1 }
 0x1cd   : > { %v2816_v38 = vpop.f32.mrb[26].mxu0  ;;  %v3743_v0 = vadd.f32 %v3742_v36, %v2812_v35  ;;  %v3750_v40 = vadd.f32 %v1712_v3, %v1232_v57  ;;  %v1714_v41 = vpop.f32.mrb[35].mxu1  ;;  %v2946_v57 = vsub.s32 0, %v2945_v48 }
 0x1ce   : > { %v2818_v42 = vpop.f32.mrb[27].mxu0  ;;  %v3747_v44 = vadd.f32 %v3746_v1, %v2814_v55  ;;  %v3754_v45 = vadd.f32 %v1714_v41, %v1234_v28  ;;  %v2942_v28 = vld [vmem:[%s5287_s2] sm:$0x3] }
 0x1cf   : > { %v3751_v46 = vadd.f32 %v3750_v40, %v2816_v38 }
 0x1d0   : > { %v3755_v47 = vadd.f32 %v3754_v45, %v2818_v42 }
 0x1d2   : > { %v1718_v49 = vpop.f32.mrb[36].mxu1 }
 0x1d3   : > { %v2822_v16 = vpop.f32.mrb[40].mxu0  ;;  %v1790_v58 = vadd.f32 %v5218_v23, %v1718_v49  ;;  %v1720_v27 = vpop.f32.mrb[37].mxu1  ;;  %v5240_v23 = vrot.slane %v2942_v28, %v2946_v57 }
 0x1d4   : > { %v2824_v50 = vpop.f32.mrb[41].mxu0  ;;  %v1792_v51 = vadd.f32 %v5220_v24, %v1720_v27  ;;  %v1722_v52 = vpop.f32.mrb[38].mxu1  ;;  %v5242_v24 = vrot.slane %v2942_v28, %v2950_v34 }
 0x1d5   : > { %v2826_v53 = vpop.f32.mrb[42].mxu0  ;;  %v1808_v54 = vadd.f32 %v1790_v58, %v1256_v6  ;;  %v1723_v32 = vpop.f32.mrb[39].mxu1 }
 0x1d6   : > { %v2827_v56 = vpop.f32.mrb[43].mxu0  ;;  %v1809_v59 = vadd.f32 %v1792_v51, %v1257_v8 }
 0x1d7   : > { %v2360_v60 = vadd.f32 %v2342_v29, %v1808_v54 }
 0x1d8   : > { %v2361_v61 = vadd.f32 %v2344_v63, %v1809_v59 }
 0x1da   : > { %v2883_v26 = vpop.f32.mrb[40].mxu1 }
 0x1db   : > { %v2863_v39 = vpop.f32.mrb[16].mxu0  ;;  %v3744_v4 = vadd.f32 %v3743_v0, %v2883_v26  ;;  %v2885_v6 = vpop.f32.mrb[41].mxu1 }
 0x1dc   : > { %v3719_v62 = vadd.f32 %v3718_v9, %v2863_v39  ;;  %v2865_v5 = vpop.f32.mrb[17].mxu0  ;;  %v3748_v10 = vadd.f32 %v3747_v44, %v2885_v6  ;;  %v2887_v11 = vpop.f32.mrb[42].mxu1 }
 0x1dd   : > { %v3722_v7 = vadd.f32 %v3721_v12, %v2865_v5  ;;  %v2867_v8 = vpop.f32.mrb[18].mxu0  ;;  %v2962_v29 = vadd.f32 %v3744_v4, %v5240_v23  ;;  %v3752_v18 = vadd.f32 %v3751_v46, %v2887_v11  ;;  %v2889_v14 = vpop.f32.mrb[43].mxu1 }
 0x1de   : > { %v2954_v17 = vadd.f32 %v3719_v62, %v5240_v23  ;;  %v3725_v63 = vadd.f32 %v3724_v13, %v2867_v8  ;;  %v2869_v19 = vpop.f32.mrb[19].mxu0  ;;  %v2963_v9 = vadd.f32 %v3748_v10, %v5242_v24  ;;  %v3756_v30 = vadd.f32 %v3755_v47, %v2889_v14 }
 0x1df   : > { %v2955_v15 = vadd.f32 %v3722_v7, %v5242_v24  ;;  %v3728_v2 = vadd.f32 %v5225_v20, %v2869_v19  ;;  %v2976_v33 = vmax.f32 %v2962_v29, 0.0  ;;  %v2964_v36 = vadd.f32 %v3752_v18, %v5240_v23 }
 0x1e0   : > { %v2968_v12 = vmax.f32 %v2954_v17, 0.0  ;;  %v2956_v35 = vadd.f32 %v3725_v63, %v5240_v23  ;;  %v2977_v55 = vmax.f32 %v2963_v9, 0.0  ;;  %v2965_v1 = vadd.f32 %v3756_v30, %v5242_v24 }
 0x1e1   : > { %v2969_v37 = vmax.f32 %v2955_v15, 0.0  ;;  %v2957_v13 = vadd.f32 %v3728_v2, %v5242_v24  ;;  %v2978_v3 = vmax.f32 %v2964_v36, 0.0 }
 0x1e2   : > { %v2970_v20 = vmax.f32 %v2956_v35, 0.0  ;;  %v3698_v0 = vpack.c.bf16 %v2977_v55, %v2976_v33  ;;  %v2979_v41 = vmax.f32 %v2965_v1, 0.0  ;;  %v2893_v43 = vpop.f32.mrb[44].mxu1 }
 0x1e3   : > { %v3694_v38 = vpack.c.bf16 %v2969_v37, %v2968_v12  ;;  %v2971_v40 = vmax.f32 %v2957_v13, 0.0  ;;  %v2873_v42 = vpop.f32.mrb[20].mxu0  ;;  %v2894_v45 = vadd.f32 %v2893_v43, %v2822_v16  ;;  %v2895_v47 = vpop.f32.mrb[45].mxu1 }
 0x1e4   : > { %v3731_v44 = vadd.f32 %v5227_v21, %v2873_v42  ;;  %v2875_v46 = vpop.f32.mrb[21].mxu0  ;;  %3030 = vst [vmem:[%s5257_s16 + $0x20] sm:$0xff] %v3698_v0  ;;  %v3699_v49 = vpack.c.bf16 %v2979_v41, %v2978_v3  ;;  %v2896_v27 = vadd.f32 %v2895_v47, %v2824_v50  ;;  %v2897_v52 = vpop.f32.mrb[46].mxu1 }
 0x1e5   : > { %3026 = vst [vmem:[%s5257_s16] sm:$0xff] %v3694_v38  ;;  %v3695_v48 = vpack.c.bf16 %v2971_v40, %v2970_v20  ;;  %v3734_v58 = vadd.f32 %v5229_v22, %v2875_v46  ;;  %v2877_v51 = vpop.f32.mrb[22].mxu0  ;;  %v2912_v54 = vadd.f32 %v2894_v45, %v2360_v60  ;;  %v2898_v16 = vpop.f32.mrb[47].mxu1 }
 0x1e6   : > { %v2958_v53 = vadd.f32 %v3731_v44, %v5240_v23  ;;  %v3737_v32 = vadd.f32 %v5231_v25, %v2877_v51  ;;  %v2879_v21 = vpop.f32.mrb[23].mxu0  ;;  %3031 = vst [vmem:[%s5257_s16 + $0x28] sm:$0xff] %v3699_v49  ;;  %v2913_v57 = vadd.f32 %v2896_v27, %v2361_v61 }
 0x1e7   : > { %3027 = vst [vmem:[%s5257_s16 + $0x8] sm:$0xff] %v3695_v48  ;;  %v2959_v56 = vadd.f32 %v3734_v58, %v5242_v24  ;;  %v3740_v59 = vadd.f32 %v5233_v31, %v2879_v21  ;;  %v2966_v50 = vadd.f32 %v5240_v23, %v2912_v54 }
 0x1e8   : > { %v2972_v22 = vmax.f32 %v2958_v53, 0.0  ;;  %v2960_v28 = vadd.f32 %v3737_v32, %v5240_v23  ;;  %v2967_v25 = vadd.f32 %v5242_v24, %v2913_v57 }
 0x1e9   : > { %v2973_v34 = vmax.f32 %v2959_v56, 0.0  ;;  %v2961_v60 = vadd.f32 %v3740_v59, %v5242_v24  ;;  %v2980_v39 = vmax.f32 %v2966_v50, 0.0 }
 0x1ea   : > { %v2974_v26 = vmax.f32 %v2960_v28, 0.0  ;;  %v2981_v4 = vmax.f32 %v2967_v25, 0.0 }
 0x1eb   : > { %v3696_v62 = vpack.c.bf16 %v2973_v34, %v2972_v22  ;;  %v2975_v5 = vmax.f32 %v2961_v60, 0.0 }
 0x1ec   : > { %v3700_v61 = vpack.c.bf16 %v2981_v4, %v2980_v39 }
 0x1ed   : > { %3028 = vst [vmem:[%s5257_s16 + $0x10] sm:$0xff] %v3696_v62  ;;  %v3697_v6 = vpack.c.bf16 %v2975_v5, %v2974_v26 }
 0x1ee   : > { %3032 = vst [vmem:[%s5257_s16 + $0x30] sm:$0xff] %v3700_v61 }
 0x1ef   : > { %3029 = vst [vmem:[%s5257_s16 + $0x18] sm:$0xff] %v3697_v6 }
 0x1f0 PF: > { %s13_s14 = sadd.s32 1, %s4288_s14   ;;  %s5289_s12 = smov %s4284_s13 }
 0x1f1   : > { %p10_p5 = scmp.ge.s32.totalorder %s13_s14, 4   ;;  %s5290_s13 = smov %s5292_s15 }
 0x1f3   :  { %12 = sbr.rel (!%p10_p5) target bundleno = 2 (0x2), region = 71 }

// kernel: alexnet_forward.11
= control target key start
LH: loop header
LB: loop body
LE: loop exit
PB: predicated region body
PF: predicated region fallthrough
CT: control target
= control target key end

     0   :  { %s5529_s12 = smov 0   ;;  %s5531_s13 = smov 0   ;;  %s6869_s0 = inlined_call_operand.vmem [shape: bf16[2,40,640], index: 0, kind: input, shape index: {}]   ;;  %s6870_s1 = inlined_call_operand.vmem [shape: bf16[3,640,384], index: 1, kind: input, shape index: {}]   ;;  %s6871_s2 = inlined_call_operand.vmem [shape: f32[1,384], index: 2, kind: input, shape index: {}]   ;;  %s6872_s3 = inlined_call_operand.vmem [shape: bf16[2,24,384], index: 3, kind: output, shape index: {}]  }
   0x1   :  { %s5533_s14 = smov 0  }
   0x2 LB: > { %s25_s15 = sadd.s32 1, %s5502_s13  ;;  %p3910_p0 = scmp.ge.s32.totalorder %s5506_s14, 1  ;;  %s5506_s14 = sphi %s5533_s14, %s13_s14   ;;  %s5502_s13 = sphi %s5531_s13, %s6874_s13   ;;  %s5498_s12 = sphi %s5529_s12, %s6873_s12  }
   0x3   : > { %p27_p1 = scmp.ge.s32.totalorder %s25_s15, 2  ;;  %p151_p2 = scmp.lt.s32.totalorder %s5506_s14, 3 }
   0x5   : > { %s6876_s15 = smov (%p27_p1, %s25_s15), 0  ;;  %p152_p3 = pnand %p3910_p0, %p151_p2 }
   0x6   : > { %v4972_v0 = vld [vmem:[%s6870_s1 + $0x4] ss:$12 sps:$4 sm:$0xff] (!%p152_p3)   ;;  %v4976_v2 = vld [vmem:[%s6870_s1] ss:$12 sps:$4 sm:$0xff] (!%p152_p3)   ;;  %v4978_v4 = vld [vmem:[%s6870_s1 + $0x1c] ss:$12 sps:$4 sm:$0xff] (!%p152_p3)  }
   0x7   : > { %155 = sbr.rel (%p152_p3) target bundleno = 624 (0x270), region = 32  ;;  %v4974_v1 = vld [vmem:[%s6870_s1 + $0x184] ss:$12 sps:$4 sm:$0xff] (!%p152_p3)   ;;  %1056 = vmatprep.subr.bf16.mxu1 (!%p152_p3), %v4972_v0  ;;  %v4977_v3 = vld [vmem:[%s6870_s1 + $0x180] ss:$12 sps:$4 sm:$0xff] (!%p152_p3)   ;;  %p180_p4 = scmp.lt.s32.totalorder (!%p152_p3), %s5498_s12, 1 }
   0x8   : > { %1107 = vmatprep.subr.bf16.mxu0 (!%p152_p3), %v4974_v1  ;;  %1057 = vmatpush1.bf16.msra.mxu1 (!%p152_p3), %v4976_v2  ;;  %v4980_v5 = vld [vmem:[%s6870_s1 + $0x19c] ss:$12 sps:$4 sm:$0xff] (!%p152_p3)   ;;  %v4982_v6 = vld [vmem:[%s6870_s1 + $0x18] ss:$12 sps:$4 sm:$0xff] (!%p152_p3)   ;;  %v4984_v8 = vld [vmem:[%s6870_s1 + $0x34] ss:$12 sps:$4 sm:$0xff] (!%p152_p3)  }
   0x9   : > { %1108 = vmatpush1.bf16.msra.mxu0 (!%p152_p3), %v4977_v3  ;;  %1058 = vmatprep.subr.bf16.mxu1 (!%p152_p3), %v4978_v4  ;;  %v4983_v7 = vld [vmem:[%s6870_s1 + $0x198] ss:$12 sps:$4 sm:$0xff] (!%p152_p3)   ;;  %v4986_v9 = vld [vmem:[%s6870_s1 + $0x1b4] ss:$12 sps:$4 sm:$0xff] (!%p152_p3)   ;;  %v4988_v10 = vld [vmem:[%s6870_s1 + $0x30] ss:$12 sps:$4 sm:$0xff] (!%p152_p3)  }
   0xa   : > { %1109 = vmatprep.subr.bf16.mxu0 (!%p152_p3), %v4980_v5  ;;  %v4989_v11 = vld [vmem:[%s6870_s1 + $0x1b0] ss:$12 sps:$4 sm:$0xff] (!%p152_p3)   ;;  %v4990_v12 = vld [vmem:[%s6870_s1 + $0x4c] ss:$12 sps:$4 sm:$0xff] (!%p152_p3)   ;;  %v4994_v14 = vld [vmem:[%s6870_s1 + $0x48] ss:$12 sps:$4 sm:$0xff] (!%p152_p3)  }
   0xb   : > { %v4992_v13 = vld [vmem:[%s6870_s1 + $0x1cc] ss:$12 sps:$4 sm:$0xff] (!%p152_p3)   ;;  %v4995_v15 = vld [vmem:[%s6870_s1 + $0x1c8] ss:$12 sps:$4 sm:$0xff] (!%p152_p3)   ;;  %v4996_v16 = vld [vmem:[%s6870_s1 + $0x64] ss:$12 sps:$4 sm:$0xff] (!%p152_p3)  }
   0xc   : > { %1059 = vmatpush1.bf16.msra.mxu1 (!%p152_p3), %v4982_v6  ;;  %v4998_v17 = vld [vmem:[%s6870_s1 + $0x1e4] ss:$12 sps:$4 sm:$0xff] (!%p152_p3)   ;;  %v5000_v18 = vld [vmem:[%s6870_s1 + $0x60] ss:$12 sps:$4 sm:$0xff] (!%p152_p3)   ;;  %v5002_v20 = vld [vmem:[%s6870_s1 + $0x7c] ss:$12 sps:$4 sm:$0xff] (!%p152_p3)  }
   0xd   : > { %1110 = vmatpush1.bf16.msra.mxu0 (!%p152_p3), %v4983_v7  ;;  %1060 = vmatprep.subr.bf16.mxu1 (!%p152_p3), %v4984_v8  ;;  %v5001_v19 = vld [vmem:[%s6870_s1 + $0x1e0] ss:$12 sps:$4 sm:$0xff] (!%p152_p3)   ;;  %v5004_v21 = vld [vmem:[%s6870_s1 + $0x1fc] ss:$12 sps:$4 sm:$0xff] (!%p152_p3)   ;;  %v5006_v22 = vld [vmem:[%s6870_s1 + $0x78] ss:$12 sps:$4 sm:$0xff] (!%p152_p3)  }
   0xe   : > { %1111 = vmatprep.subr.bf16.mxu0 %v4986_v9  ;;  %v5007_v23 = vld [vmem:[%s6870_s1 + $0x1f8] ss:$12 sps:$4 sm:$0xff]   ;;  %v5008_v24 = vld [vmem:[%s6870_s1 + $0x94] ss:$12 sps:$4 sm:$0xff]   ;;  %v5012_v26 = vld [vmem:[%s6870_s1 + $0x90] ss:$12 sps:$4 sm:$0xff]  }
   0xf   : > { %v5010_v25 = vld [vmem:[%s6870_s1 + $0x214] ss:$12 sps:$4 sm:$0xff]   ;;  %v5013_v27 = vld [vmem:[%s6870_s1 + $0x210] ss:$12 sps:$4 sm:$0xff]   ;;  %v5014_v28 = vld [vmem:[%s6870_s1 + $0xac] ss:$12 sps:$4 sm:$0xff]  }
  0x10   : > { %1061 = vmatpush1.bf16.msra.mxu1 %v4988_v10  ;;  %v5016_v29 = vld [vmem:[%s6870_s1 + $0x22c] ss:$12 sps:$4 sm:$0xff]   ;;  %v5018_v30 = vld [vmem:[%s6870_s1 + $0xa8] ss:$12 sps:$4 sm:$0xff]   ;;  %v5020_v32 = vld [vmem:[%s6870_s1 + $0xc4] ss:$12 sps:$4 sm:$0xff]  }
  0x11   : > { %1112 = vmatpush1.bf16.msra.mxu0 %v4989_v11  ;;  %1062 = vmatprep.subr.bf16.mxu1 %v4990_v12  ;;  %v5019_v31 = vld [vmem:[%s6870_s1 + $0x228] ss:$12 sps:$4 sm:$0xff]   ;;  %v5022_v33 = vld [vmem:[%s6870_s1 + $0x244] ss:$12 sps:$4 sm:$0xff]   ;;  %v5024_v34 = vld [vmem:[%s6870_s1 + $0xc0] ss:$12 sps:$4 sm:$0xff]  }
  0x12   : > { %1113 = vmatprep.subr.bf16.mxu0 %v4992_v13  ;;  %v5025_v35 = vld [vmem:[%s6870_s1 + $0x240] ss:$12 sps:$4 sm:$0xff]   ;;  %s6878_s12 = smov (!%p180_p4, %s5498_s12), 1  ;;  %v5026_v36 = vld [vmem:[%s6870_s1 + $0xdc] ss:$12 sps:$4 sm:$0xff]  }
  0x13   : > { %v5028_v37 = vld [vmem:[%s6870_s1 + $0x25c] ss:$12 sps:$4 sm:$0xff]   ;;  %v5030_v38 = vld [vmem:[%s6870_s1 + $0xd8] ss:$12 sps:$4 sm:$0xff]   ;;  %s4945_s25 = smul.u32 100, %s6878_s12 }
  0x14   : > { %1063 = vmatpush1.bf16.msra.mxu1 %v4994_v14  ;;  %v5031_v39 = vld [vmem:[%s6870_s1 + $0x258] ss:$12 sps:$4 sm:$0xff]   ;;  %v5032_v40 = vld [vmem:[%s6870_s1 + $0xf4] ss:$12 sps:$4 sm:$0xff]   ;;  %v5036_v42 = vld [vmem:[%s6870_s1 + $0xf0] ss:$12 sps:$4 sm:$0xff]  }
  0x15   : > { %1114 = vmatpush1.bf16.msra.mxu0 %v4995_v15  ;;  %1064 = vmatprep.subr.bf16.mxu1 %v4996_v16  ;;  %v5034_v41 = vld [vmem:[%s6870_s1 + $0x274] ss:$12 sps:$4 sm:$0xff]   ;;  %v5037_v43 = vld [vmem:[%s6870_s1 + $0x270] ss:$12 sps:$4 sm:$0xff]   ;;  %s5689_s11 = scalar_lea.vmem %s6869_s0, %s4945_s25  ;;  %v5038_v44 = vld [vmem:[%s6870_s1 + $0x10c] ss:$12 sps:$4 sm:$0xff]  }
  0x16   : > { %1115 = vmatprep.subr.bf16.mxu0 %v4998_v17  ;;  %v5040_v45 = vld [vmem:[%s6870_s1 + $0x28c] ss:$12 sps:$4 sm:$0xff]   ;;  %v5042_v46 = vld [vmem:[%s6870_s1 + $0x108] ss:$12 sps:$4 sm:$0xff]   ;;  %v203_v48 = vld [vmem:[%s5689_s11] sm:$0xff]  ;;  %s4946_s6 = smul.u32 36, %s6878_s12 }
  0x17   : > { %v5043_v47 = vld [vmem:[%s6870_s1 + $0x288] ss:$12 sps:$4 sm:$0xff]   ;;  %v207_v51 = vld [vmem:[%s5689_s11 + $0x1c] sm:$0xff]  ;;  %v5044_v52 = vld [vmem:[%s6870_s1 + $0x124] ss:$12 sps:$4 sm:$0xff]  }
  0x18   : > { %1065 = vmatpush1.bf16.msra.mxu1 %v5000_v18  ;;  %v5705_v49 = vld [vmem:[%s5689_s11 + $0x14] sm:$0xff]  ;;  %v204_v50 = vld [vmem:[%s5689_s11 + $0x8] sm:$0xff]  ;;  %v5046_v54 = vld [vmem:[%s6870_s1 + $0x2a4] ss:$12 sps:$4 sm:$0xff]   ;;  %s194_s8 = scalar_lea.vmem %s6872_s3, %s4946_s6 }
  0x19   : > { %1116 = vmatpush1.bf16.msra.mxu0 %v5001_v19  ;;  %1066 = vmatprep.subr.bf16.mxu1 %v5002_v20  ;;  %v5713_v53 = vcombine.high %v203_v48, %v5705_v49  ;;  %v5718_v55 = vcombine.high %v204_v50, %v207_v51  ;;  %v5048_v56 = vld [vmem:[%s6870_s1 + $0x120] ss:$12 sps:$4 sm:$0xff]   ;;  %v5050_v58 = vld [vmem:[%s6870_s1 + $0x13c] ss:$12 sps:$4 sm:$0xff]   ;;  %v5054_v60 = vld [vmem:[%s6870_s1 + $0x138] ss:$12 sps:$4 sm:$0xff]   ;;  %v5774_v9 = vcombine.low %v203_v48, %v5705_v49 }
  0x1a   : > { %1117 = vmatprep.subr.bf16.mxu0 %v5004_v21  ;;  %v5049_v57 = vld [vmem:[%s6870_s1 + $0x2a0] ss:$12 sps:$4 sm:$0xff]   ;;  %v5052_v59 = vld [vmem:[%s6870_s1 + $0x2bc] ss:$12 sps:$4 sm:$0xff]   ;;  %v5055_v61 = vld [vmem:[%s6870_s1 + $0x2b8] ss:$12 sps:$4 sm:$0xff]   ;;  %v5776_v10 = vcombine.low %v204_v50, %v207_v51 }
  0x1b   : > { %1088 = vmatprep.mubr.bf16.mxu1 %v5713_v53  ;;  %1139 = vmatprep.mubr.bf16.mxu0 %v5718_v55  ;;  %v5056_v62 = vld [vmem:[%s6870_s1 + $0x154] ss:$12 sps:$4 sm:$0xff]   ;;  %v5060_v0 = vld [vmem:[%s6870_s1 + $0x150] ss:$12 sps:$4 sm:$0xff]   ;;  %v5062_v2 = vld [vmem:[%s6870_s1 + $0x16c] ss:$12 sps:$4 sm:$0xff]  }
  0x1c   : > { %1067 = vmatpush1.bf16.msra.mxu1 %v5006_v22  ;;  %v5058_v63 = vld [vmem:[%s6870_s1 + $0x2d4] ss:$12 sps:$4 sm:$0xff]   ;;  %v5061_v1 = vld [vmem:[%s6870_s1 + $0x2d0] ss:$12 sps:$4 sm:$0xff]   ;;  %v5064_v3 = vld [vmem:[%s6870_s1 + $0x2ec] ss:$12 sps:$4 sm:$0xff]  }
  0x1d   : > { %1118 = vmatpush1.bf16.msra.mxu0 %v5007_v23  ;;  %1068 = vmatprep.subr.bf16.mxu1 %v5008_v24  ;;  %v5066_v4 = vld [vmem:[%s6870_s1 + $0x168] ss:$12 sps:$4 sm:$0xff]   ;;  %v5074_v6 = vld [vmem:[%s6870_s1 + $0x304] ss:$12 sps:$4 sm:$0xff]   ;;  %v5072_v8 = vld [vmem:[%s6870_s1 + $0x300] ss:$12 sps:$4 sm:$0xff]  }
  0x1e   : > { %1119 = vmatprep.subr.bf16.mxu0 %v5010_v25  ;;  %v5067_v5 = vld [vmem:[%s6870_s1 + $0x2e8] ss:$12 sps:$4 sm:$0xff]   ;;  %v5077_v7 = vld [vmem:[%s6870_s1 + $0x3c4] ss:$12 sps:$4 sm:$0xff]   ;;  %v5075_v12 = vld [vmem:[%s6870_s1 + $0x3c0] ss:$12 sps:$4 sm:$0xff]  }
  0x1f   : > { %v5779_v11 = vld [vmem:[%s5689_s11 + $0x28] sm:$0xff]  ;;  %v210_v15 = vld [vmem:[%s5689_s11 + $0x30] sm:$0xff]  ;;  %v5078_v16 = vld [vmem:[%s6870_s1 + $0x318] ss:$12 sps:$4 sm:$0xff]  }
  0x20   : > { %1069 = vmatpush1.bf16.msra.mxu1 %v5012_v26  ;;  %v5080_v13 = vld [vmem:[%s6870_s1 + $0x31c] ss:$12 sps:$4 sm:$0xff]   ;;  %v5796_v17 = vcombine.high %v5779_v11, %v5779_v11  ;;  %v5798_v18 = vcombine.high %v210_v15, %v210_v15  ;;  %v5800_v19 = vcombine.low %v207_v51, %v210_v15  ;;  %v5802_v20 = vcombine.high %v207_v51, %v210_v15  ;;  %v5081_v21 = vld [vmem:[%s6870_s1 + $0x3d8] ss:$12 sps:$4 sm:$0xff]   ;;  %v5086_v22 = vld [vmem:[%s6870_s1 + $0x334] ss:$12 sps:$4 sm:$0xff]  }
  0x21   : > { %1120 = vmatpush1.bf16.msra.mxu0 %v5013_v27  ;;  %1070 = vmatprep.subr.bf16.mxu1 %v5014_v28  ;;  %v5083_v14 = vld [vmem:[%s6870_s1 + $0x3dc] ss:$12 sps:$4 sm:$0xff]   ;;  %v5089_v23 = vld [vmem:[%s6870_s1 + $0x3f4] ss:$12 sps:$4 sm:$0xff]   ;;  %v5822_v25 = vcombine.low %v5779_v11, %v5779_v11  ;;  %v5824_v26 = vcombine.low %v210_v15, %v210_v15  ;;  %v5092_v28 = vld [vmem:[%s6870_s1 + $0x34c] ss:$12 sps:$4 sm:$0xff]  }
  0x22   : > { %1121 = vmatprep.subr.bf16.mxu0 %v5016_v29  ;;  %v5084_v24 = vld [vmem:[%s6870_s1 + $0x330] ss:$12 sps:$4 sm:$0xff]   ;;  %v5095_v29 = vld [vmem:[%s6870_s1 + $0x40c] ss:$12 sps:$4 sm:$0xff]   ;;  %v5116_v48 = vld [vmem:[%s6870_s1 + $0x3a8] ss:$12 sps:$4 sm:$0xff]  }
  0x23   : > { %v5087_v27 = vld [vmem:[%s6870_s1 + $0x3f0] ss:$12 sps:$4 sm:$0xff]   ;;  %v5119_v50 = vld [vmem:[%s6870_s1 + $0x468] ss:$12 sps:$4 sm:$0xff]  }
  0x24   : > { %1071 = vmatpush1.bf16.msra.mxu1 %v5018_v30  ;;  %v5837_v30 = vcombine.high %v5705_v49, %v5779_v11  ;;  %v5125_v51 = vld [vmem:[%s6870_s1 + $0xc8] ss:$12 sps:$4 sm:$0xff]  }
  0x25   : > { %1122 = vmatpush1.bf16.msra.mxu0 %v5019_v31  ;;  %1072 = vmatprep.subr.bf16.mxu1 %v5020_v32  ;;  %v5090_v31 = vld [vmem:[%s6870_s1 + $0x348] ss:$12 sps:$4 sm:$0xff]  }
  0x26   : > { %1123 = vmatprep.subr.bf16.mxu0 %v5022_v33  ;;  %v5093_v32 = vld [vmem:[%s6870_s1 + $0x408] ss:$12 sps:$4 sm:$0xff]   ;;  %v5098_v33 = vld [vmem:[%s6870_s1 + $0x364] ss:$12 sps:$4 sm:$0xff]  }
  0x27   : > { %v5154_v15 = vld [vmem:[%s6870_s1 + $0x4fc] ss:$12 sps:$4 sm:$0xff]  }
  0x28   : > { %1073 = vmatpush1.bf16.msra.mxu1 %v5024_v34  ;;  %v5101_v34 = vld [vmem:[%s6870_s1 + $0x424] ss:$12 sps:$4 sm:$0xff]  }
  0x29   : > { %1124 = vmatpush1.bf16.msra.mxu0 %v5025_v35  ;;  %1074 = vmatprep.subr.bf16.mxu1 %v5026_v36  ;;  %v5508_v35 = vmov 0   ;;  %v5096_v36 = vld [vmem:[%s6870_s1 + $0x360] ss:$12 sps:$4 sm:$0xff]  }
  0x2a   : > { %1125 = vmatprep.subr.bf16.mxu0 %v5028_v37  ;;  %v5099_v37 = vld [vmem:[%s6870_s1 + $0x420] ss:$12 sps:$4 sm:$0xff]  }
  0x2c   : > { %1075 = vmatpush1.bf16.msra.mxu1 %v5030_v38  ;;  %v5104_v38 = vld [vmem:[%s6870_s1 + $0x37c] ss:$12 sps:$4 sm:$0xff]  }
  0x2d   : > { %1126 = vmatpush1.bf16.msra.mxu0 %v5031_v39  ;;  %1076 = vmatprep.subr.bf16.mxu1 %v5032_v40  ;;  %v5107_v39 = vld [vmem:[%s6870_s1 + $0x43c] ss:$12 sps:$4 sm:$0xff]   ;;  %v5102_v40 = vld [vmem:[%s6870_s1 + $0x378] ss:$12 sps:$4 sm:$0xff]  }
  0x2e   : > { %1127 = vmatprep.subr.bf16.mxu0 %v5034_v41  ;;  %v5105_v41 = vld [vmem:[%s6870_s1 + $0x438] ss:$12 sps:$4 sm:$0xff]  }
  0x30   : > { %1077 = vmatpush1.bf16.msra.mxu1 %v5036_v42  ;;  %v5112_v42 = vld [vmem:[%s6870_s1 + $0x394] ss:$12 sps:$4 sm:$0xff]  }
  0x31   : > { %1128 = vmatpush1.bf16.msra.mxu0 %v5037_v43  ;;  %1078 = vmatprep.subr.bf16.mxu1 %v5038_v44  ;;  %v5115_v43 = vld [vmem:[%s6870_s1 + $0x454] ss:$12 sps:$4 sm:$0xff]   ;;  %v5110_v44 = vld [vmem:[%s6870_s1 + $0x390] ss:$12 sps:$4 sm:$0xff]  }
  0x32   : > { %1129 = vmatprep.subr.bf16.mxu0 %v5040_v45  ;;  %v5113_v45 = vld [vmem:[%s6870_s1 + $0x450] ss:$12 sps:$4 sm:$0xff]  }
  0x34   : > { %1079 = vmatpush1.bf16.msra.mxu1 %v5042_v46  ;;  %v5118_v46 = vld [vmem:[%s6870_s1 + $0x3ac] ss:$12 sps:$4 sm:$0xff]  }
  0x35   : > { %1130 = vmatpush1.bf16.msra.mxu0 %v5043_v47  ;;  %1080 = vmatprep.subr.bf16.mxu1 %v5044_v52  ;;  %v5121_v47 = vld [vmem:[%s6870_s1 + $0x46c] ss:$12 sps:$4 sm:$0xff]   ;;  %v5128_v52 = vld [vmem:[%s6870_s1 + $0x484] ss:$12 sps:$4 sm:$0xff]  }
  0x36   : > { %1131 = vmatprep.subr.bf16.mxu0 %v5046_v54  ;;  %v5904_v54 = vld [vmem:[%s5689_s11 + $0x10] ss:$20 sps:$4 sm:$0xff]  }
  0x38   : > { %1081 = vmatpush1.bf16.msra.mxu1 %v5048_v56  ;;  %v5126_v56 = vld [vmem:[%s6870_s1 + $0x480] ss:$12 sps:$4 sm:$0xff]  }
  0x39   : > { %1132 = vmatpush1.bf16.msra.mxu0 %v5049_v57  ;;  %1082 = vmatprep.subr.bf16.mxu1 %v5050_v58  ;;  %v5129_v57 = vld [vmem:[%s6870_s1 + $0x8] ss:$12 sps:$4 sm:$0xff]   ;;  %v5130_v58 = vld [vmem:[%s6870_s1 + $0xe0] ss:$12 sps:$4 sm:$0xff]  }
  0x3a   : > { %1133 = vmatprep.subr.bf16.mxu0 %v5052_v59  ;;  %v5133_v59 = vld [vmem:[%s6870_s1 + $0x49c] ss:$12 sps:$4 sm:$0xff]  }
  0x3c   : > { %1083 = vmatpush1.bf16.msra.mxu1 %v5054_v60  ;;  %v5131_v60 = vld [vmem:[%s6870_s1 + $0x498] ss:$12 sps:$4 sm:$0xff]  }
  0x3d   : > { %1134 = vmatpush1.bf16.msra.mxu0 %v5055_v61  ;;  %1084 = vmatprep.subr.bf16.mxu1 %v5056_v62  ;;  %v5134_v61 = vld [vmem:[%s6870_s1 + $0x20] ss:$12 sps:$4 sm:$0xff]   ;;  %v5136_v62 = vld [vmem:[%s6870_s1 + $0xf8] ss:$12 sps:$4 sm:$0xff]  }
  0x3e   : > { %1135 = vmatprep.subr.bf16.mxu0 %v5058_v63  ;;  %v5929_v63 = vld [vmem:[%s5689_s11 + $0x38] ss:$0 sps:$4 sm:$0xff]  }
  0x40   : > { %1085 = vmatpush1.bf16.msra.mxu1 %v5060_v0  ;;  %v5139_v0 = vld [vmem:[%s6870_s1 + $0x4b4] ss:$12 sps:$4 sm:$0xff]  }
  0x41   : > { %1136 = vmatpush1.bf16.msra.mxu0 %v5061_v1  ;;  %1086 = vmatprep.subr.bf16.mxu1 %v5062_v2  ;;  %v5137_v1 = vld [vmem:[%s6870_s1 + $0x4b0] ss:$12 sps:$4 sm:$0xff]   ;;  %v5140_v2 = vld [vmem:[%s6870_s1 + $0x38] ss:$12 sps:$4 sm:$0xff]  }
  0x42   : > { %1137 = vmatprep.subr.bf16.mxu0 %v5064_v3  ;;  %v5141_v3 = vld [vmem:[%s6870_s1 + $0x110] ss:$12 sps:$4 sm:$0xff]  }
  0x44   : > { %1087 = vmatpush1.bf16.msra.mxu1 %v5066_v4  ;;  %v5144_v4 = vld [vmem:[%s6870_s1 + $0x4cc] ss:$12 sps:$4 sm:$0xff]  }
  0x45   : > { %1138 = vmatpush1.bf16.msra.mxu0 %v5067_v5  ;;  %1158 = vmatprep.subr.bf16.mxu1 %v5074_v6  ;;  %v5142_v5 = vld [vmem:[%s6870_s1 + $0x4c8] ss:$12 sps:$4 sm:$0xff]   ;;  %v5145_v6 = vld [vmem:[%s6870_s1 + $0x50] ss:$12 sps:$4 sm:$0xff]  }
  0x46   : > { %2231 = vmatprep.subr.bf16.mxu0 %v5077_v7  ;;  %v5146_v7 = vld [vmem:[%s6870_s1 + $0x128] ss:$12 sps:$4 sm:$0xff]  }
  0x47   : > { %1089 = vmatmul.mubr.bf16.vlgmr.msra.gmra.mrb[0].mxu1 %v5774_v9 }
  0x48   : > { %1140 = vmatmul.mubr.bf16.vlgmr.msra.gmra.mrb[0].mxu0 %v5776_v10  ;;  %1159 = vmatpush1.bf16.msra.mxu1 %v5072_v8  ;;  %v5149_v8 = vld [vmem:[%s6870_s1 + $0x4e4] ss:$12 sps:$4 sm:$0xff]  }
  0x49   : > { %2232 = vmatpush1.bf16.msra.mxu0 %v5075_v12  ;;  %1160 = vmatprep.subr.bf16.mxu1 %v5080_v13  ;;  %v5147_v12 = vld [vmem:[%s6870_s1 + $0x4e0] ss:$12 sps:$4 sm:$0xff]   ;;  %v5150_v13 = vld [vmem:[%s6870_s1 + $0x68] ss:$12 sps:$4 sm:$0xff]  }
  0x4a   : > { %2233 = vmatprep.subr.bf16.mxu0 %v5083_v14  ;;  %1098 = vmatprep.mubr.bf16.mxu1 %v5796_v17  ;;  %v5151_v14 = vld [vmem:[%s6870_s1 + $0x140] ss:$12 sps:$4 sm:$0xff]  }
  0x4b   : > { %1149 = vmatprep.mubr.bf16.mxu0 %v5798_v18 }
  0x4c   : > { %1161 = vmatpush1.bf16.msra.mxu1 %v5078_v16  ;;  %v5155_v16 = vld [vmem:[%s6870_s1 + $0x80] ss:$12 sps:$4 sm:$0xff]  }
  0x4d   : > { %2234 = vmatpush1.bf16.msra.mxu0 %v5081_v21  ;;  %1162 = vmatprep.subr.bf16.mxu1 %v5086_v22  ;;  %v5156_v21 = vld [vmem:[%s6870_s1 + $0x158] ss:$12 sps:$4 sm:$0xff]   ;;  %v5159_v22 = vld [vmem:[%s6870_s1 + $0x514] ss:$12 sps:$4 sm:$0xff]  }
  0x4e   : > { %2235 = vmatprep.subr.bf16.mxu0 %v5089_v23  ;;  %v5157_v23 = vld [vmem:[%s6870_s1 + $0x510] ss:$12 sps:$4 sm:$0xff]  }
  0x4f   : > { %1099 = vmatmul.mubr.bf16.gmra.mrb[4].mxu1 %v5822_v25 }
  0x50   : > { %1150 = vmatmul.mubr.bf16.gmra.mrb[4].mxu0 %v5824_v26  ;;  %1163 = vmatpush1.bf16.msra.mxu1 %v5084_v24  ;;  %v5160_v24 = vld [vmem:[%s6870_s1 + $0x98] ss:$12 sps:$4 sm:$0xff]  }
  0x51   : > { %2236 = vmatpush1.bf16.msra.mxu0 %v5087_v27  ;;  %1164 = vmatprep.subr.bf16.mxu1 %v5092_v28  ;;  %v5161_v27 = vld [vmem:[%s6870_s1 + $0x170] ss:$12 sps:$4 sm:$0xff]   ;;  %v5164_v28 = vld [vmem:[%s6870_s1 + $0x52c] ss:$12 sps:$4 sm:$0xff]  }
  0x52   : > { %2237 = vmatprep.subr.bf16.mxu0 %v5095_v29  ;;  %1190 = vmatprep.mubr.bf16.mxu1 %v5508_v35  ;;  %v5162_v29 = vld [vmem:[%s6870_s1 + $0x528] ss:$12 sps:$4 sm:$0xff]  }
  0x53   : > { %2263 = vmatprep.mubr.bf16.mxu0 %v5837_v30 }
  0x54   : > { %1165 = vmatpush1.bf16.msra.mxu1 %v5090_v31  ;;  %v5165_v31 = vld [vmem:[%s6870_s1 + $0xb0] ss:$12 sps:$4 sm:$0xff]  }
  0x55   : > { %2238 = vmatpush1.bf16.msra.mxu0 %v5093_v32  ;;  %1166 = vmatprep.subr.bf16.mxu1 %v5098_v33  ;;  %v5166_v32 = vld [vmem:[%s6870_s1 + $0x248] ss:$12 sps:$4 sm:$0xff]   ;;  %v5171_v33 = vld [vmem:[%s6870_s1 + $0x544] ss:$12 sps:$4 sm:$0xff]  }
  0x56   : > { %2239 = vmatprep.subr.bf16.mxu0 %v5101_v34  ;;  %v6011_v34 = vcombine.low %v5705_v49, %v5779_v11  ;;  %v5176_v49 = vld [vmem:[%s6870_s1 + $0x55c] ss:$12 sps:$4 sm:$0xff]   ;;  %v5174_v11 = vld [vmem:[%s6870_s1 + $0x558] ss:$12 sps:$4 sm:$0xff]  }
  0x58   : > { %1167 = vmatpush1.bf16.msra.mxu1 %v5096_v36  ;;  %v5169_v36 = vld [vmem:[%s6870_s1 + $0x540] ss:$12 sps:$4 sm:$0xff]  }
  0x59   : > { %2240 = vmatpush1.bf16.msra.mxu0 %v5099_v37  ;;  %1168 = vmatprep.subr.bf16.mxu1 %v5104_v38  ;;  %v5172_v37 = vld [vmem:[%s6870_s1 + $0x188] ss:$12 sps:$4 sm:$0xff]   ;;  %v5173_v38 = vld [vmem:[%s6870_s1 + $0x260] ss:$12 sps:$4 sm:$0xff]  }
  0x5a   : > { %2241 = vmatprep.subr.bf16.mxu0 %v5107_v39  ;;  %v5177_v39 = vld [vmem:[%s6870_s1 + $0x1a0] ss:$12 sps:$4 sm:$0xff]  }
  0x5c   : > { %1169 = vmatpush1.bf16.msra.mxu1 %v5102_v40  ;;  %v5178_v40 = vld [vmem:[%s6870_s1 + $0x278] ss:$12 sps:$4 sm:$0xff]  }
  0x5d   : > { %2242 = vmatpush1.bf16.msra.mxu0 %v5105_v41  ;;  %1170 = vmatprep.subr.bf16.mxu1 %v5112_v42  ;;  %v5179_v41 = vld [vmem:[%s6870_s1 + $0x570] ss:$12 sps:$4 sm:$0xff]  }
  0x5e   : > { %2243 = vmatprep.subr.bf16.mxu0 %v5115_v43  ;;  %v6044_v42 = vld [vmem:[%s5689_s11 + $0x3c] sm:$0xff]  ;;  %v5182_v43 = vld [vmem:[%s6870_s1 + $0x1b8] ss:$12 sps:$4 sm:$0xff]  }
  0x60   : > { %1171 = vmatpush1.bf16.msra.mxu1 %v5110_v44  ;;  %v6051_v44 = vcombine.high %v6044_v42, %v6044_v42 }
  0x61   : > { %2244 = vmatpush1.bf16.msra.mxu0 %v5113_v45  ;;  %1172 = vmatprep.subr.bf16.mxu1 %v5118_v46  ;;  %v6055_v45 = vcombine.low %v6044_v42, %v6044_v42  ;;  %v5186_v46 = vld [vmem:[%s6870_s1 + $0x58c] ss:$12 sps:$4 sm:$0xff]  }
  0x62   : > { %2245 = vmatprep.subr.bf16.mxu0 %v5121_v47  ;;  %v5184_v47 = vld [vmem:[%s6870_s1 + $0x588] ss:$12 sps:$4 sm:$0xff]  }
  0x64   : > { %1173 = vmatpush1.bf16.msra.mxu1 %v5116_v48  ;;  %v5187_v48 = vld [vmem:[%s6870_s1 + $0x1d0] ss:$12 sps:$4 sm:$0xff]  }
  0x65   : > { %2246 = vmatpush1.bf16.msra.mxu0 %v5119_v50  ;;  %4655 = vmatprep.subr.bf16.mxu1 %v5125_v51  ;;  %v5188_v50 = vld [vmem:[%s6870_s1 + $0x2a8] ss:$12 sps:$4 sm:$0xff]   ;;  %v5191_v51 = vld [vmem:[%s6870_s1 + $0x5a4] ss:$12 sps:$4 sm:$0xff]  }
  0x66   : > { %2247 = vmatprep.subr.bf16.mxu0 %v5128_v52  ;;  %v5192_v52 = vld [vmem:[%s6870_s1 + $0x1e8] ss:$12 sps:$4 sm:$0xff]  }
  0x67   : > { %1191 = vmatmul.mubr.bf16.vlgmr.msra.gmra.mrb[8].mxu1 %v5904_v54 }
  0x68   : > { %4656 = vmatpush3.bf16.msra.mxu1 %v5129_v57  ;;  %1200 = vmatprep.mubr.bf16.mxu1 %v5508_v35  ;;  %v5194_v57 = vld [vmem:[%s6870_s1 + $0x5b8] ss:$12 sps:$4 sm:$0xff]  }
  0x69   : > { %2248 = vmatpush1.bf16.msra.mxu0 %v5126_v56  ;;  %4657 = vmatprep.subr.bf16.mxu1 %v5130_v58  ;;  %v5193_v56 = vld [vmem:[%s6870_s1 + $0x2c0] ss:$12 sps:$4 sm:$0xff]  }
  0x6a   : > { %2249 = vmatprep.subr.bf16.mxu0 %v5133_v59  ;;  %v5197_v58 = vld [vmem:[%s6870_s1 + $0x200] ss:$12 sps:$4 sm:$0xff]   ;;  %v5198_v59 = vld [vmem:[%s6870_s1 + $0x2d8] ss:$12 sps:$4 sm:$0xff]  }
  0x6c   : > { %4658 = vmatpush3.bf16.msra.mxu1 %v5134_v61  ;;  %v5199_v61 = vld [vmem:[%s6870_s1 + $0x5d0] ss:$12 sps:$4 sm:$0xff]  }
  0x6d   : > { %2250 = vmatpush1.bf16.msra.mxu0 %v5131_v60  ;;  %4659 = vmatprep.subr.bf16.mxu1 %v5136_v62  ;;  %v5201_v60 = vld [vmem:[%s6870_s1 + $0x5d4] ss:$12 sps:$4 sm:$0xff]   ;;  %v5202_v62 = vld [vmem:[%s6870_s1 + $0x218] ss:$12 sps:$4 sm:$0xff]  }
  0x6e   : > { %2251 = vmatprep.subr.bf16.mxu0 %v5139_v0  ;;  %v5203_v0 = vld [vmem:[%s6870_s1 + $0x2f0] ss:$12 sps:$4 sm:$0xff]  }
  0x6f   : > { %1201 = vmatmul.mubr.bf16.gmra.mrb[12].mxu1 %v5929_v63 }
  0x70   : > { %4660 = vmatpush3.bf16.msra.mxu1 %v5140_v2  ;;  %1241 = vmatprep.mubr.bf16.mxu1 %v5713_v53  ;;  %v5152_v53 = vld [vmem:[%s6870_s1 + $0x4f8] ss:$12 sps:$4 sm:$0xff]   ;;  %v5204_v2 = vld [vmem:[%s6870_s1 + $0x5e8] ss:$12 sps:$4 sm:$0xff]  }
  0x71   : > { %2252 = vmatpush1.bf16.msra.mxu0 %v5137_v1  ;;  %4661 = vmatprep.subr.bf16.mxu1 %v5141_v3  ;;  %v5206_v1 = vld [vmem:[%s6870_s1 + $0x5ec] ss:$12 sps:$4 sm:$0xff]   ;;  %v5207_v3 = vld [vmem:[%s6870_s1 + $0x230] ss:$12 sps:$4 sm:$0xff]  }
  0x72   : > { %2253 = vmatprep.subr.bf16.mxu0 %v5144_v4  ;;  %v5208_v4 = vld [vmem:[%s6870_s1 + $0x308] ss:$12 sps:$4 sm:$0xff]  }
  0x74   : > { %4662 = vmatpush3.bf16.msra.mxu1 %v5145_v6  ;;  %v5209_v6 = vld [vmem:[%s6870_s1 + $0x600] ss:$12 sps:$4 sm:$0xff]  }
  0x75   : > { %2254 = vmatpush1.bf16.msra.mxu0 %v5142_v5  ;;  %4663 = vmatprep.subr.bf16.mxu1 %v5146_v7  ;;  %v5211_v5 = vld [vmem:[%s6870_s1 + $0x604] ss:$12 sps:$4 sm:$0xff]   ;;  %v5212_v7 = vld [vmem:[%s6870_s1 + $0x320] ss:$12 sps:$4 sm:$0xff]  }
  0x76   : > { %2255 = vmatprep.subr.bf16.mxu0 %v5149_v8  ;;  %v5215_v8 = vld [vmem:[%s6870_s1 + $0x61c] ss:$12 sps:$4 sm:$0xff]  }
  0x78   : > { %4664 = vmatpush3.bf16.msra.mxu1 %v5150_v13  ;;  %v5216_v13 = vld [vmem:[%s6870_s1 + $0x338] ss:$12 sps:$4 sm:$0xff]  }
  0x79   : > { %2256 = vmatpush1.bf16.msra.mxu0 %v5147_v12  ;;  %4665 = vmatprep.subr.bf16.mxu1 %v5151_v14  ;;  %v5213_v12 = vld [vmem:[%s6870_s1 + $0x618] ss:$12 sps:$4 sm:$0xff]   ;;  %v5219_v14 = vld [vmem:[%s6870_s1 + $0x634] ss:$12 sps:$4 sm:$0xff]  }
  0x7a   : > { %2257 = vmatprep.subr.bf16.mxu0 %v5154_v15  ;;  %v5220_v15 = vld [vmem:[%s6870_s1 + $0x350] ss:$12 sps:$4 sm:$0xff]  }
  0x7c   : > { %4666 = vmatpush3.bf16.msra.mxu1 %v5155_v16  ;;  %v5224_v16 = vld [vmem:[%s6870_s1 + $0x368] ss:$12 sps:$4 sm:$0xff]  }
  0x7d   : > { %2258 = vmatpush1.bf16.msra.mxu0 %v5152_v53  ;;  %4667 = vmatprep.subr.bf16.mxu1 %v5156_v21  ;;  %v5223_v53 = vld [vmem:[%s6870_s1 + $0x64c] ss:$12 sps:$4 sm:$0xff]   ;;  %v5227_v21 = vld [vmem:[%s6870_s1 + $0x664] ss:$12 sps:$4 sm:$0xff]  }
  0x7e   : > { %2259 = vmatprep.subr.bf16.mxu0 %v5159_v22  ;;  %v5228_v22 = vld [vmem:[%s6870_s1 + $0x380] ss:$12 sps:$4 sm:$0xff]  }
  0x80   : > { %4668 = vmatpush3.bf16.msra.mxu1 %v5160_v24  ;;  %v5234_v24 = vld [vmem:[%s6870_s1 + $0x398] ss:$12 sps:$4 sm:$0xff]  }
  0x81   : > { %2260 = vmatpush1.bf16.msra.mxu0 %v5157_v23  ;;  %4669 = vmatprep.subr.bf16.mxu1 %v5161_v27  ;;  %v5231_v23 = vld [vmem:[%s6870_s1 + $0x67c] ss:$12 sps:$4 sm:$0xff]   ;;  %v5237_v27 = vld [vmem:[%s6870_s1 + $0x694] ss:$12 sps:$4 sm:$0xff]  }
  0x82   : > { %2261 = vmatprep.subr.bf16.mxu0 %v5164_v28  ;;  %v5235_v28 = vld [vmem:[%s6870_s1 + $0x690] ss:$12 sps:$4 sm:$0xff]  }
  0x84   : > { %4670 = vmatpush3.bf16.msra.mxu1 %v5165_v31  ;;  %v5241_v31 = vld [vmem:[%s6870_s1 + $0x6ac] ss:$12 sps:$4 sm:$0xff]  }
  0x85   : > { %2262 = vmatpush1.bf16.msra.mxu0 %v5162_v29  ;;  %4683 = vmatprep.subr.bf16.mxu1 %v5166_v32  ;;  %v5238_v29 = vld [vmem:[%s6870_s1 + $0x3b0] ss:$12 sps:$4 sm:$0xff]   ;;  %v5239_v32 = vld [vmem:[%s6870_s1 + $0x6a8] ss:$12 sps:$4 sm:$0xff]  }
  0x86   : > { %2282 = vmatprep.subr.bf16.mxu0 %v5171_v33  ;;  %v5246_v33 = vld [vmem:[%s6870_s1 + $0x6c4] ss:$12 sps:$4 sm:$0xff]  }
  0x87   : > { %1242 = vmatmul.mubr.bf16.vlgmr.msra.gmra.mrb[16].mxu1 %v5774_v9  ;;  %v5181_v9 = vld [vmem:[%s6870_s1 + $0x574] ss:$12 sps:$4 sm:$0xff]  }
  0x88   : > { %2264 = vmatmul.mubr.bf16.vlgmr.msra.gmra.mrb[8].mxu0 %v6011_v34  ;;  %4684 = vmatpush3.bf16.msra.mxu1 %v5172_v37  ;;  %v5244_v37 = vld [vmem:[%s6870_s1 + $0x6c0] ss:$12 sps:$4 sm:$0xff]  }
  0x89   : > { %2283 = vmatpush1.bf16.msra.mxu0 %v5169_v36  ;;  %4685 = vmatprep.subr.bf16.mxu1 %v5173_v38  ;;  %v5247_v36 = vld [vmem:[%s6870_s1 + $0x488] ss:$12 sps:$4 sm:$0xff]  }
  0x8a   : > { %2284 = vmatprep.subr.bf16.mxu0 %v5176_v49  ;;  %1249 = vmatprep.mubr.bf16.mxu1 %v5796_v17  ;;  %v5183_v17 = vld [vmem:[%s6870_s1 + $0x290] ss:$12 sps:$4 sm:$0xff]   ;;  %v5248_v38 = vld [vmem:[%s6870_s1 + $0x3c8] ss:$12 sps:$4 sm:$0xff]  }
  0x8b   : > { %2273 = vmatprep.mubr.bf16.mxu0 %v6051_v44  ;;  %v4050_v49 = vld [vmem:[%s5689_s11 + $0x44] sm:$0xff] }
  0x8c   : > { %4686 = vmatpush3.bf16.msra.mxu1 %v5177_v39  ;;  %v5252_v39 = vld [vmem:[%s6870_s1 + $0x4a0] ss:$12 sps:$4 sm:$0xff]  }
  0x8d   : > { %2285 = vmatpush1.bf16.msra.mxu0 %v5174_v11  ;;  %4687 = vmatprep.subr.bf16.mxu1 %v5178_v40  ;;  %v5251_v11 = vld [vmem:[%s6870_s1 + $0x6dc] ss:$12 sps:$4 sm:$0xff]   ;;  %v6217_v40 = vcombine.high %v4050_v49, %v4050_v49 }
  0x8e   : > { %2286 = vmatprep.subr.bf16.mxu0 %v5181_v9  ;;  %v5249_v9 = vld [vmem:[%s6870_s1 + $0x6d8] ss:$12 sps:$4 sm:$0xff]  }
  0x8f   : > { %1250 = vmatmul.mubr.bf16.gmra.mrb[20].mxu1 %v5822_v25  ;;  %v5189_v25 = vld [vmem:[%s6870_s1 + $0x5a0] ss:$12 sps:$4 sm:$0xff]  }
  0x90   : > { %2274 = vmatmul.mubr.bf16.gmra.mrb[12].mxu0 %v6055_v45  ;;  %4688 = vmatpush3.bf16.msra.mxu1 %v5182_v43  ;;  %v5258_v43 = vld [vmem:[%s6870_s1 + $0x6f4] ss:$12 sps:$4 sm:$0xff]  }
  0x91   : > { %2287 = vmatpush1.bf16.msra.mxu0 %v5179_v41  ;;  %4689 = vmatprep.subr.bf16.mxu1 %v5183_v17  ;;  %v5253_v41 = vld [vmem:[%s6870_s1 + $0x3e0] ss:$12 sps:$4 sm:$0xff]   ;;  %v6235_v17 = vcombine.low %v4050_v49, %v4050_v49  ;;  %v5322_v49 = vld [vmem:[%s6870_s1 + $0x5d8] ss:$12 sps:$4 sm:$0xff]  }
  0x92   : > { %2288 = vmatprep.subr.bf16.mxu0 %v5186_v46  ;;  %1289 = vmatprep.mubr.bf16.mxu1 %v5718_v55  ;;  %v5196_v55 = vld [vmem:[%s6870_s1 + $0x5bc] ss:$12 sps:$4 sm:$0xff]  }
  0x93   : > { %2314 = vmatprep.mubr.bf16.mxu0 %v5802_v20  ;;  %v5256_v46 = vld [vmem:[%s6870_s1 + $0x6f0] ss:$12 sps:$4 sm:$0xff]  }
  0x94   : > { %4690 = vmatpush3.bf16.msra.mxu1 %v5187_v48  ;;  %v5263_v48 = vld [vmem:[%s6870_s1 + $0x70c] ss:$12 sps:$4 sm:$0xff]  }
  0x95   : > { %2289 = vmatpush1.bf16.msra.mxu0 %v5184_v47  ;;  %4691 = vmatprep.subr.bf16.mxu1 %v5188_v50  ;;  %v5260_v47 = vld [vmem:[%s6870_s1 + $0x3f8] ss:$12 sps:$4 sm:$0xff]   ;;  %v5261_v50 = vld [vmem:[%s6870_s1 + $0x708] ss:$12 sps:$4 sm:$0xff]  }
  0x96   : > { %2290 = vmatprep.subr.bf16.mxu0 %v5191_v51  ;;  %v5265_v51 = vld [vmem:[%s6870_s1 + $0x410] ss:$12 sps:$4 sm:$0xff]  }
  0x98   : > { %4692 = vmatpush3.bf16.msra.mxu1 %v5192_v52  ;;  %v5269_v52 = vld [vmem:[%s6870_s1 + $0x4e8] ss:$12 sps:$4 sm:$0xff]  }
  0x99   : > { %2291 = vmatpush1.bf16.msra.mxu0 %v5189_v25  ;;  %4693 = vmatprep.subr.bf16.mxu1 %v5193_v56  ;;  %v5268_v25 = vld [vmem:[%s6870_s1 + $0x724] ss:$12 sps:$4 sm:$0xff]   ;;  %v5266_v56 = vld [vmem:[%s6870_s1 + $0x720] ss:$12 sps:$4 sm:$0xff]  }
  0x9a   : > { %2292 = vmatprep.subr.bf16.mxu0 %v5196_v55  ;;  %v5270_v55 = vld [vmem:[%s6870_s1 + $0x428] ss:$12 sps:$4 sm:$0xff]  }
  0x9c   : > { %4694 = vmatpush3.bf16.msra.mxu1 %v5197_v58  ;;  %v5274_v58 = vld [vmem:[%s6870_s1 + $0x500] ss:$12 sps:$4 sm:$0xff]  }
  0x9d   : > { %2293 = vmatpush1.bf16.msra.mxu0 %v5194_v57  ;;  %4695 = vmatprep.subr.bf16.mxu1 %v5198_v59  ;;  %v5273_v57 = vld [vmem:[%s6870_s1 + $0x73c] ss:$12 sps:$4 sm:$0xff]   ;;  %v5271_v59 = vld [vmem:[%s6870_s1 + $0x738] ss:$12 sps:$4 sm:$0xff]  }
  0x9e   : > { %2294 = vmatprep.subr.bf16.mxu0 %v5201_v60  ;;  %v5275_v60 = vld [vmem:[%s6870_s1 + $0x440] ss:$12 sps:$4 sm:$0xff]  }
  0xa0   : > { %4696 = vmatpush3.bf16.msra.mxu1 %v5202_v62  ;;  %v5279_v62 = vld [vmem:[%s6870_s1 + $0x518] ss:$12 sps:$4 sm:$0xff]  }
  0xa1   : > { %2295 = vmatpush1.bf16.msra.mxu0 %v5199_v61  ;;  %4697 = vmatprep.subr.bf16.mxu1 %v5203_v0  ;;  %v5278_v61 = vld [vmem:[%s6870_s1 + $0x754] ss:$12 sps:$4 sm:$0xff]   ;;  %v5276_v0 = vld [vmem:[%s6870_s1 + $0x750] ss:$12 sps:$4 sm:$0xff]  }
  0xa2   : > { %2296 = vmatprep.subr.bf16.mxu0 %v5206_v1  ;;  %v5280_v1 = vld [vmem:[%s6870_s1 + $0x458] ss:$12 sps:$4 sm:$0xff]  }
  0xa4   : > { %4698 = vmatpush3.bf16.msra.mxu1 %v5207_v3  ;;  %v5284_v3 = vld [vmem:[%s6870_s1 + $0x530] ss:$12 sps:$4 sm:$0xff]  }
  0xa5   : > { %2297 = vmatpush1.bf16.msra.mxu0 %v5204_v2  ;;  %4853 = vmatprep.subr.bf16.mxu1 %v5208_v4  ;;  %v5283_v2 = vld [vmem:[%s6870_s1 + $0x76c] ss:$12 sps:$4 sm:$0xff]  }
  0xa6   : > { %2298 = vmatprep.subr.bf16.mxu0 %v5211_v5  ;;  %v5285_v5 = vld [vmem:[%s6870_s1 + $0x470] ss:$12 sps:$4 sm:$0xff]  }
  0xa7   : > { %1290 = vmatmul.mubr.bf16.vlgmr.msra.gmra.mrb[24].mxu1 %v5776_v10  ;;  %v5217_v10 = vld [vmem:[%s6870_s1 + $0x630] ss:$12 sps:$4 sm:$0xff]  }
  0xa8   : > { %4854 = vmatpush3.bf16.msra.mxu1 %v5208_v4  ;;  %1297 = vmatprep.mubr.bf16.mxu1 %v5798_v18  ;;  %v5221_v18 = vld [vmem:[%s6870_s1 + $0x648] ss:$12 sps:$4 sm:$0xff]  }
  0xa9   : > { %2299 = vmatpush1.bf16.msra.mxu0 %v5209_v6  ;;  %4855 = vmatprep.subr.bf16.mxu1 %v5212_v7  ;;  %v5281_v4 = vld [vmem:[%s6870_s1 + $0x768] ss:$12 sps:$4 sm:$0xff]  }
  0xaa   : > { %2300 = vmatprep.subr.bf16.mxu0 %v5215_v8  ;;  %v5287_v6 = vld [vmem:[%s6870_s1 + $0x608] ss:$12 sps:$4 sm:$0xff]   ;;  %v6312_v8 = vld [vmem:[%s5689_s11 + $0x24] ss:$20 sps:$4 sm:$0xff]  }
  0xac   : > { %4856 = vmatpush3.bf16.msra.mxu1 %v5212_v7  ;;  %v5290_v7 = vld [vmem:[%s6870_s1 + $0x784] ss:$12 sps:$4 sm:$0xff]  }
  0xad   : > { %2301 = vmatpush1.bf16.msra.mxu0 %v5213_v12  ;;  %4857 = vmatprep.subr.bf16.mxu1 %v5216_v13  ;;  %v5288_v12 = vld [vmem:[%s6870_s1 + $0x780] ss:$12 sps:$4 sm:$0xff]  }
  0xae   : > { %2302 = vmatprep.subr.bf16.mxu0 %v5219_v14  ;;  %v5292_v14 = vld [vmem:[%s6870_s1 + $0x620] ss:$12 sps:$4 sm:$0xff]  }
  0xaf   : > { %1298 = vmatmul.mubr.bf16.gmra.mrb[28].mxu1 %v5824_v26  ;;  %v5225_v26 = vld [vmem:[%s6870_s1 + $0x660] ss:$12 sps:$4 sm:$0xff]  }
  0xb0   : > { %4858 = vmatpush3.bf16.msra.mxu1 %v5216_v13  ;;  %4869 = vmatprep.mubr.bf16.mxu1 %v5904_v54  ;;  %v5229_v54 = vld [vmem:[%s6870_s1 + $0x678] ss:$12 sps:$4 sm:$0xff]   ;;  %v5291_v13 = vld [vmem:[%s6870_s1 + $0x548] ss:$12 sps:$4 sm:$0xff]  }
  0xb1   : > { %2303 = vmatpush1.bf16.msra.mxu0 %v5217_v10  ;;  %4859 = vmatprep.subr.bf16.mxu1 %v5220_v15  ;;  %v5295_v10 = vld [vmem:[%s6870_s1 + $0x79c] ss:$12 sps:$4 sm:$0xff]  }
  0xb2   : > { %2304 = vmatprep.subr.bf16.mxu0 %v5223_v53  ;;  %v5296_v53 = vld [vmem:[%s6870_s1 + $0x560] ss:$12 sps:$4 sm:$0xff]  }
  0xb4   : > { %4860 = vmatpush3.bf16.msra.mxu1 %v5220_v15  ;;  %v5293_v15 = vld [vmem:[%s6870_s1 + $0x798] ss:$12 sps:$4 sm:$0xff]  }
  0xb5   : > { %2305 = vmatpush1.bf16.msra.mxu0 %v5221_v18  ;;  %4861 = vmatprep.subr.bf16.mxu1 %v5224_v16  ;;  %v5298_v18 = vld [vmem:[%s6870_s1 + $0x638] ss:$12 sps:$4 sm:$0xff]  }
  0xb6   : > { %2306 = vmatprep.subr.bf16.mxu0 %v5227_v21  ;;  %v5299_v21 = vld [vmem:[%s6870_s1 + $0x7b0] ss:$12 sps:$4 sm:$0xff]  }
  0xb8   : > { %4862 = vmatpush3.bf16.msra.mxu1 %v5224_v16  ;;  %v6338_v16 = vld [vmem:[%s5689_s11 + $0x4c] ss:$0 sps:$4 sm:$0xff]  }
  0xb9   : > { %2307 = vmatpush1.bf16.msra.mxu0 %v5225_v26  ;;  %4863 = vmatprep.subr.bf16.mxu1 %v5228_v22  ;;  %v5302_v26 = vld [vmem:[%s6870_s1 + $0x578] ss:$12 sps:$4 sm:$0xff]  }
  0xba   : > { %2308 = vmatprep.subr.bf16.mxu0 %v5231_v23  ;;  %v5303_v23 = vld [vmem:[%s6870_s1 + $0x650] ss:$12 sps:$4 sm:$0xff]  }
  0xbc   : > { %4864 = vmatpush3.bf16.msra.mxu1 %v5228_v22  ;;  %v6352_v22 = vld [vmem:[%s5689_s11 + $0x28] sm:$0xff] }
  0xbd   : > { %2309 = vmatpush1.bf16.msra.mxu0 %v5229_v54  ;;  %4865 = vmatprep.subr.bf16.mxu1 %v5234_v24  ;;  %v5306_v54 = vld [vmem:[%s6870_s1 + $0x7cc] ss:$12 sps:$4 sm:$0xff]  }
  0xbe   : > { %2310 = vmatprep.subr.bf16.mxu0 %v5237_v27  ;;  %v5307_v27 = vld [vmem:[%s6870_s1 + $0x590] ss:$12 sps:$4 sm:$0xff]  }
  0xc0   : > { %4866 = vmatpush3.bf16.msra.mxu1 %v5234_v24  ;;  %v6362_v24 = vcombine.high %v6352_v22, %v6044_v42  ;;  %v5311_v42 = vld [vmem:[%s6870_s1 + $0x7e4] ss:$12 sps:$4 sm:$0xff]  }
  0xc1   : > { %2311 = vmatpush1.bf16.msra.mxu0 %v5235_v28  ;;  %4867 = vmatprep.subr.bf16.mxu1 %v5238_v29  ;;  %v5308_v28 = vld [vmem:[%s6870_s1 + $0x668] ss:$12 sps:$4 sm:$0xff]  }
  0xc2   : > { %2312 = vmatprep.subr.bf16.mxu0 %v5241_v31  ;;  %v5313_v31 = vld [vmem:[%s6870_s1 + $0x680] ss:$12 sps:$4 sm:$0xff]  }
  0xc4   : > { %4868 = vmatpush3.bf16.msra.mxu1 %v5238_v29  ;;  %v5309_v29 = vld [vmem:[%s6870_s1 + $0x7e0] ss:$12 sps:$4 sm:$0xff]  }
  0xc5   : > { %2313 = vmatpush1.bf16.msra.mxu0 %v5239_v32  ;;  %4721 = vmatprep.subr.bf16.mxu1 %v5247_v36  ;;  %v5316_v32 = vld [vmem:[%s6870_s1 + $0x7fc] ss:$12 sps:$4 sm:$0xff]   ;;  %v5318_v36 = vld [vmem:[%s6870_s1 + $0x698] ss:$12 sps:$4 sm:$0xff]  }
  0xc6   : > { %2333 = vmatprep.subr.bf16.mxu0 %v5246_v33  ;;  %v5317_v33 = vld [vmem:[%s6870_s1 + $0x5c0] ss:$12 sps:$4 sm:$0xff]  }
  0xc7   : > { %4870 = vmatmul.mubr.bf16.vlgmr.msra.gmra.mrb[32].mxu1 %v5929_v63  ;;  %v5259_v63 = vld [vmem:[%s6870_s1 + $0x4b8] ss:$12 sps:$4 sm:$0xff]  }
  0xc8   : > { %2315 = vmatmul.mubr.bf16.vlgmr.msra.gmra.mrb[8].mxu0 %v5800_v19  ;;  %4722 = vmatpush3.bf16.msra.mxu1 %v5248_v38  ;;  %v5319_v38 = vld [vmem:[%s6870_s1 + $0x810] ss:$12 sps:$4 sm:$0xff]  }
  0xc9   : > { %2334 = vmatpush1.bf16.msra.mxu0 %v5244_v37  ;;  %4723 = vmatprep.subr.bf16.mxu1 %v5252_v39  ;;  %v5321_v37 = vld [vmem:[%s6870_s1 + $0x814] ss:$12 sps:$4 sm:$0xff]   ;;  %v5326_v39 = vld [vmem:[%s6870_s1 + $0x82c] ss:$12 sps:$4 sm:$0xff]  }
  0xca   : > { %2335 = vmatprep.subr.bf16.mxu0 %v5251_v11  ;;  %2324 = vmatprep.mubr.bf16.mxu0 %v6217_v40  ;;  %v5323_v11 = vld [vmem:[%s6870_s1 + $0x6b0] ss:$12 sps:$4 sm:$0xff]  }
  0xcb   : > { %2416 = vmatprep.mubr.bf16.mxu1 %v5837_v30  ;;  %v5264_v30 = vld [vmem:[%s6870_s1 + $0x4d0] ss:$12 sps:$4 sm:$0xff]  }
  0xcc   : > { %4724 = vmatpush3.bf16.msra.mxu1 %v5253_v41  ;;  %v5327_v41 = vld [vmem:[%s6870_s1 + $0x5f0] ss:$12 sps:$4 sm:$0xff]  }
  0xcd   : > { %2336 = vmatpush1.bf16.msra.mxu0 %v5249_v9  ;;  %4725 = vmatprep.subr.bf16.mxu1 %v5259_v63  ;;  %v5324_v9 = vld [vmem:[%s6870_s1 + $0x828] ss:$12 sps:$4 sm:$0xff]   ;;  %v5331_v63 = vld [vmem:[%s6870_s1 + $0x844] ss:$12 sps:$4 sm:$0xff]  }
  0xce   : > { %2337 = vmatprep.subr.bf16.mxu0 %v5258_v43  ;;  %v5328_v43 = vld [vmem:[%s6870_s1 + $0x6c8] ss:$12 sps:$4 sm:$0xff]  }
  0xd0   : > { %2325 = vmatmul.mubr.bf16.gmra.mrb[16].mxu0 %v6235_v17  ;;  %4726 = vmatpush3.bf16.msra.mxu1 %v5260_v47  ;;  %v5332_v47 = vld [vmem:[%s6870_s1 + $0x6e0] ss:$12 sps:$4 sm:$0xff]  }
  0xd1   : > { %2338 = vmatpush1.bf16.msra.mxu0 %v5256_v46  ;;  %4727 = vmatprep.subr.bf16.mxu1 %v5264_v30  ;;  %v5329_v46 = vld [vmem:[%s6870_s1 + $0x840] ss:$12 sps:$4 sm:$0xff]   ;;  %v5333_v30 = vld [vmem:[%s6870_s1 + $0x858] ss:$12 sps:$4 sm:$0xff]  }
  0xd2   : > { %2339 = vmatprep.subr.bf16.mxu0 %v5263_v48  ;;  %2365 = vmatprep.mubr.bf16.mxu0 %v5508_v35  ;;  %v5335_v48 = vld [vmem:[%s6870_s1 + $0x85c] ss:$12 sps:$4 sm:$0xff]  }
  0xd4   : > { %4728 = vmatpush3.bf16.msra.mxu1 %v5265_v51  ;;  %v5339_v51 = vld [vmem:[%s6870_s1 + $0x874] ss:$12 sps:$4 sm:$0xff]  }
  0xd5   : > { %2340 = vmatpush1.bf16.msra.mxu0 %v5261_v50  ;;  %4729 = vmatprep.subr.bf16.mxu1 %v5269_v52  ;;  %v5336_v50 = vld [vmem:[%s6870_s1 + $0x6f8] ss:$12 sps:$4 sm:$0xff]  }
  0xd6   : > { %2341 = vmatprep.subr.bf16.mxu0 %v5268_v25  ;;  %v5340_v25 = vld [vmem:[%s6870_s1 + $0x710] ss:$12 sps:$4 sm:$0xff]   ;;  %v5343_v52 = vld [vmem:[%s6870_s1 + $0x88c] ss:$12 sps:$4 sm:$0xff]  }
  0xd8   : > { %4730 = vmatpush3.bf16.msra.mxu1 %v5270_v55  ;;  %v5347_v55 = vld [vmem:[%s6870_s1 + $0x8a4] ss:$12 sps:$4 sm:$0xff]  }
  0xd9   : > { %2342 = vmatpush1.bf16.msra.mxu0 %v5266_v56  ;;  %4731 = vmatprep.subr.bf16.mxu1 %v5274_v58  ;;  %v5344_v56 = vld [vmem:[%s6870_s1 + $0x728] ss:$12 sps:$4 sm:$0xff]  }
  0xda   : > { %2343 = vmatprep.subr.bf16.mxu0 %v5273_v57  ;;  %v5348_v57 = vld [vmem:[%s6870_s1 + $0x740] ss:$12 sps:$4 sm:$0xff]   ;;  %v5351_v58 = vld [vmem:[%s6870_s1 + $0x8bc] ss:$12 sps:$4 sm:$0xff]  }
  0xdc   : > { %4732 = vmatpush3.bf16.msra.mxu1 %v5275_v60  ;;  %v5352_v60 = vld [vmem:[%s6870_s1 + $0x758] ss:$12 sps:$4 sm:$0xff]  }
  0xdd   : > { %2344 = vmatpush1.bf16.msra.mxu0 %v5271_v59  ;;  %4733 = vmatprep.subr.bf16.mxu1 %v5279_v62  ;;  %v5349_v59 = vld [vmem:[%s6870_s1 + $0x8b8] ss:$12 sps:$4 sm:$0xff]  }
  0xde   : > { %2345 = vmatprep.subr.bf16.mxu0 %v5278_v61  ;;  %v5355_v61 = vld [vmem:[%s6870_s1 + $0x8d4] ss:$12 sps:$4 sm:$0xff]  }
  0xe0   : > { %4734 = vmatpush3.bf16.msra.mxu1 %v5280_v1 }
  0xe1   : > { %2346 = vmatpush1.bf16.msra.mxu0 %v5276_v0  ;;  %4735 = vmatprep.subr.bf16.mxu1 %v5284_v3 }
  0xe2   : > { %2347 = vmatprep.subr.bf16.mxu0 %v5283_v2 }
  0xe4   : > { %4736 = vmatpush3.bf16.msra.mxu1 %v5285_v5 }
  0xe5   : > { %2348 = vmatpush1.bf16.msra.mxu0 %v5281_v4  ;;  %4749 = vmatprep.subr.bf16.mxu1 %v5287_v6  ;;  %v5353_v4 = vld [vmem:[%s6870_s1 + $0x8d0] ss:$12 sps:$4 sm:$0xff]  }
  0xe6   : > { %3415 = vmatprep.subr.bf16.mxu0 %v5290_v7 }
  0xe7   : > { %2417 = vmatmul.mubr.bf16.vlgmr.msra.gmra.mrb[36].mxu1 %v6011_v34  ;;  %v5301_v34 = vld [vmem:[%s6870_s1 + $0x7b4] ss:$12 sps:$4 sm:$0xff]  }
  0xe8   : > { %2366 = vmatmul.mubr.bf16.vlgmr.msra.gmra.mrb[8].mxu0 %v6312_v8  ;;  %4750 = vmatpush3.bf16.msra.mxu1 %v5291_v13 }
  0xe9   : > { %3416 = vmatpush1.bf16.msra.mxu0 %v5288_v12  ;;  %4751 = vmatprep.subr.bf16.mxu1 %v5292_v14  ;;  %v5359_v12 = vld [vmem:[%s6870_s1 + $0x8ec] ss:$12 sps:$4 sm:$0xff]  }
  0xea   : > { %3417 = vmatprep.subr.bf16.mxu0 %v5295_v10  ;;  %2375 = vmatprep.mubr.bf16.mxu0 %v5508_v35 }
  0xeb   : > { %2424 = vmatprep.mubr.bf16.mxu1 %v6051_v44  ;;  %v5304_v44 = vld [vmem:[%s6870_s1 + $0x7c8] ss:$12 sps:$4 sm:$0xff]  }
  0xec   : > { %4752 = vmatpush3.bf16.msra.mxu1 %v5296_v53  ;;  %v5357_v53 = vld [vmem:[%s6870_s1 + $0x8e8] ss:$12 sps:$4 sm:$0xff]  }
  0xed   : > { %3418 = vmatpush1.bf16.msra.mxu0 %v5293_v15  ;;  %4753 = vmatprep.subr.bf16.mxu1 %v5298_v18  ;;  %v5364_v18 = vld [vmem:[%s6870_s1 + $0x904] ss:$12 sps:$4 sm:$0xff]  }
  0xee   : > { %3419 = vmatprep.subr.bf16.mxu0 %v5301_v34  ;;  %v5365_v34 = vld [vmem:[%s6870_s1 + $0x848] ss:$12 sps:$4 sm:$0xff]  }
  0xef   : > { %2425 = vmatmul.mubr.bf16.gmra.mrb[40].mxu1 %v6055_v45  ;;  %v5312_v45 = vld [vmem:[%s6870_s1 + $0x5a8] ss:$12 sps:$4 sm:$0xff]  }
  0xf0   : > { %2376 = vmatmul.mubr.bf16.gmra.mrb[20].mxu0 %v6338_v16  ;;  %4754 = vmatpush3.bf16.msra.mxu1 %v5302_v26  ;;  %v5366_v26 = vld [vmem:[%s6870_s1 + $0x788] ss:$12 sps:$4 sm:$0xff]  }
  0xf1   : > { %3420 = vmatpush1.bf16.msra.mxu0 %v5299_v21  ;;  %4755 = vmatprep.subr.bf16.mxu1 %v5303_v23  ;;  %v5362_v21 = vld [vmem:[%s6870_s1 + $0x900] ss:$12 sps:$4 sm:$0xff]  }
  0xf2   : > { %3421 = vmatprep.subr.bf16.mxu0 %v5306_v54  ;;  %2464 = vmatprep.mubr.bf16.mxu1 %v5802_v20  ;;  %v5314_v20 = vld [vmem:[%s6870_s1 + $0x7f8] ss:$12 sps:$4 sm:$0xff]  }
  0xf3   : > { %3447 = vmatprep.mubr.bf16.mxu0 %v6362_v24 }
  0xf4   : > { %4756 = vmatpush3.bf16.msra.mxu1 %v5307_v27 }
  0xf5   : > { %3422 = vmatpush1.bf16.msra.mxu0 %v5304_v44  ;;  %4757 = vmatprep.subr.bf16.mxu1 %v5308_v28  ;;  %v5483_v44 = vld [vmem:[%s5689_s11 + $0x3c] sm:$0xff] }
  0xf6   : > { %3423 = vmatprep.subr.bf16.mxu0 %v5311_v42  ;;  %v6520_v27 = vcombine.low %v6352_v22, %v5483_v44  ;;  %v5411_v44 = vld [vmem:[%s6870_s1 + $0x920] ss:$12 sps:$4 sm:$0xff]  }
  0xf8   : > { %4758 = vmatpush3.bf16.msra.mxu1 %v5312_v45  ;;  %v4348_v45 = vld [vmem:[%s5689_s11 + $0x50] sm:$0xff] }
  0xf9   : > { %3424 = vmatpush1.bf16.msra.mxu0 %v5309_v29  ;;  %4759 = vmatprep.subr.bf16.mxu1 %v5313_v31  ;;  %v5369_v31 = vld [vmem:[%s6870_s1 + $0x91c] ss:$12 sps:$4 sm:$0xff]  }
  0xfa   : > { %3425 = vmatprep.subr.bf16.mxu0 %v5316_v32  ;;  %v5370_v32 = vld [vmem:[%s6870_s1 + $0x860] ss:$12 sps:$4 sm:$0xff]  }
  0xfc   : > { %4760 = vmatpush3.bf16.msra.mxu1 %v5317_v33 }
  0xfd   : > { %3426 = vmatpush1.bf16.msra.mxu0 %v5314_v20  ;;  %4761 = vmatprep.subr.bf16.mxu1 %v5318_v36 }
  0xfe   : > { %3427 = vmatprep.subr.bf16.mxu0 %v5321_v37 }
 0x100   : > { %4762 = vmatpush3.bf16.msra.mxu1 %v5322_v49  ;;  %v5367_v49 = vld [vmem:[%s6870_s1 + $0x918] ss:$12 sps:$4 sm:$0xff]  }
 0x101   : > { %3428 = vmatpush1.bf16.msra.mxu0 %v5319_v38  ;;  %4763 = vmatprep.subr.bf16.mxu1 %v5323_v11  ;;  %v6533_v38 = vcombine.high %v4348_v45, %v4348_v45  ;;  %v5371_v11 = vld [vmem:[%s6870_s1 + $0x7a0] ss:$12 sps:$4 sm:$0xff]  }
 0x102   : > { %3429 = vmatprep.subr.bf16.mxu0 %v5326_v39  ;;  %v5374_v39 = vld [vmem:[%s6870_s1 + $0x934] ss:$12 sps:$4 sm:$0xff]  }
 0x104   : > { %4764 = vmatpush3.bf16.msra.mxu1 %v5327_v41  ;;  %v5372_v41 = vld [vmem:[%s6870_s1 + $0x930] ss:$12 sps:$4 sm:$0xff]  }
 0x105   : > { %3430 = vmatpush1.bf16.msra.mxu0 %v5324_v9  ;;  %4873 = vmatprep.subr.bf16.mxu1 %v5328_v43  ;;  %v6551_v9 = vcombine.low %v4348_v45, %v4348_v45  ;;  %v5419_v45 = vld [vmem:[%s6870_s1 + $0xa0c] ss:$12 sps:$4 sm:$0xff]  }
 0x106   : > { %3431 = vmatprep.subr.bf16.mxu0 %v5331_v63  ;;  %v5380_v63 = vld [vmem:[%s6870_s1 + $0x890] ss:$12 sps:$4 sm:$0xff]  }
 0x107   : > { %2465 = vmatmul.mubr.bf16.vlgmr.msra.gmra.mrb[44].mxu1 %v5800_v19  ;;  %v5337_v19 = vld [vmem:[%s6870_s1 + $0x870] ss:$12 sps:$4 sm:$0xff]  }
 0x108   : > { %4874 = vmatpush3.bf16.msra.mxu1 %v5328_v43  ;;  %2472 = vmatprep.mubr.bf16.mxu1 %v6217_v40  ;;  %v5341_v40 = vld [vmem:[%s6870_s1 + $0x888] ss:$12 sps:$4 sm:$0xff]   ;;  %v5376_v43 = vld [vmem:[%s6870_s1 + $0x7b8] ss:$12 sps:$4 sm:$0xff]  }
 0x109   : > { %3432 = vmatpush1.bf16.msra.mxu0 %v5329_v46  ;;  %4875 = vmatprep.subr.bf16.mxu1 %v5332_v47  ;;  %v6566_v46 = vld [vmem:[%s5689_s11 + $0x34] ss:$20 sps:$4 sm:$0xff]  }
 0x10a   : > { %3433 = vmatprep.subr.bf16.mxu0 %v5335_v48  ;;  %v5381_v48 = vld [vmem:[%s6870_s1 + $0x7d0] ss:$12 sps:$4 sm:$0xff]  }
 0x10c   : > { %4876 = vmatpush3.bf16.msra.mxu1 %v5332_v47  ;;  %v5377_v47 = vld [vmem:[%s6870_s1 + $0x948] ss:$12 sps:$4 sm:$0xff]  }
 0x10d   : > { %3434 = vmatpush1.bf16.msra.mxu0 %v5333_v30  ;;  %4877 = vmatprep.subr.bf16.mxu1 %v5336_v50  ;;  %v5384_v30 = vld [vmem:[%s6870_s1 + $0x964] ss:$12 sps:$4 sm:$0xff]  }
 0x10e   : > { %3435 = vmatprep.subr.bf16.mxu0 %v5339_v51  ;;  %v5382_v51 = vld [vmem:[%s6870_s1 + $0x960] ss:$12 sps:$4 sm:$0xff]  }
 0x10f   : > { %2473 = vmatmul.mubr.bf16.gmra.mrb[48].mxu1 %v6235_v17  ;;  %v5345_v17 = vld [vmem:[%s6870_s1 + $0x8a0] ss:$12 sps:$4 sm:$0xff]  }
 0x110   : > { %4878 = vmatpush3.bf16.msra.mxu1 %v5336_v50  ;;  %4889 = vmatprep.mubr.bf16.mxu1 %v6312_v8  ;;  %v5356_v8 = vld [vmem:[%s6870_s1 + $0x770] ss:$12 sps:$4 sm:$0xff]   ;;  %v5385_v50 = vld [vmem:[%s6870_s1 + $0x8a8] ss:$12 sps:$4 sm:$0xff]  }
 0x111   : > { %3436 = vmatpush1.bf16.msra.mxu0 %v5337_v19  ;;  %4879 = vmatprep.subr.bf16.mxu1 %v5340_v25  ;;  %v5386_v19 = vld [vmem:[%s6870_s1 + $0x7e8] ss:$12 sps:$4 sm:$0xff]  }
 0x112   : > { %3437 = vmatprep.subr.bf16.mxu0 %v5343_v52  ;;  %v5390_v52 = vld [vmem:[%s6870_s1 + $0x8c0] ss:$12 sps:$4 sm:$0xff]  }
 0x114   : > { %4880 = vmatpush3.bf16.msra.mxu1 %v5340_v25  ;;  %v5389_v25 = vld [vmem:[%s6870_s1 + $0x97c] ss:$12 sps:$4 sm:$0xff]  }
 0x115   : > { %3438 = vmatpush1.bf16.msra.mxu0 %v5341_v40  ;;  %4881 = vmatprep.subr.bf16.mxu1 %v5344_v56  ;;  %v5387_v40 = vld [vmem:[%s6870_s1 + $0x978] ss:$12 sps:$4 sm:$0xff]  }
 0x116   : > { %3439 = vmatprep.subr.bf16.mxu0 %v5347_v55  ;;  %v5394_v55 = vld [vmem:[%s6870_s1 + $0x994] ss:$12 sps:$4 sm:$0xff]  }
 0x118   : > { %4882 = vmatpush3.bf16.msra.mxu1 %v5344_v56  ;;  %v5391_v56 = vld [vmem:[%s6870_s1 + $0x800] ss:$12 sps:$4 sm:$0xff]  }
 0x119   : > { %3440 = vmatpush1.bf16.msra.mxu0 %v5345_v17  ;;  %4883 = vmatprep.subr.bf16.mxu1 %v5348_v57  ;;  %v5395_v17 = vld [vmem:[%s6870_s1 + $0x8d8] ss:$12 sps:$4 sm:$0xff]  }
 0x11a   : > { %3441 = vmatprep.subr.bf16.mxu0 %v5351_v58  ;;  %v1090_v62 = vpop.f32.mrb[0].mxu1 }
 0x11b   : > { %v1141_v0 = vpop.f32.mrb[0].mxu0  ;;  %v1092_v2 = vpop.f32.mrb[1].mxu1 }
 0x11c   : > { %v6486_v1 = vadd.f32 %v1141_v0, %v1090_v62  ;;  %v1143_v3 = vpop.f32.mrb[1].mxu0  ;;  %v1094_v6 = vpop.f32.mrb[2].mxu1  ;;  %4884 = vmatpush3.bf16.msra.mxu1 %v5348_v57  ;;  %v5392_v62 = vld [vmem:[%s6870_s1 + $0x990] ss:$12 sps:$4 sm:$0xff]   ;;  %v5396_v0 = vld [vmem:[%s6870_s1 + $0x818] ss:$12 sps:$4 sm:$0xff]  }
 0x11d   : > { %v6491_v5 = vadd.f32 %v1143_v3, %v1092_v2  ;;  %v1145_v7 = vpop.f32.mrb[2].mxu0  ;;  %3442 = vmatpush1.bf16.msra.mxu0 %v5349_v59  ;;  %v1096_v14 = vpop.f32.mrb[3].mxu1  ;;  %4885 = vmatprep.subr.bf16.mxu1 %v5352_v60  ;;  %v5399_v3 = vld [vmem:[%s6870_s1 + $0x9ac] ss:$12 sps:$4 sm:$0xff]  }
 0x11e   : > { %v6499_v13 = vadd.f32 %v1145_v7, %v1094_v6  ;;  %v1147_v10 = vpop.f32.mrb[3].mxu0  ;;  %3443 = vmatprep.subr.bf16.mxu0 %v5355_v61  ;;  %v5397_v6 = vld [vmem:[%s6870_s1 + $0x9a8] ss:$12 sps:$4 sm:$0xff]   ;;  %v5401_v7 = vld [vmem:[%s6870_s1 + $0x830] ss:$12 sps:$4 sm:$0xff]  }
 0x11f   : > { %v6501_v15 = vadd.f32 %v1147_v10, %v1096_v14 }
 0x120   : > { %4886 = vmatpush3.bf16.msra.mxu1 %v5352_v60 }
 0x121   : > { %3444 = vmatpush1.bf16.msra.mxu0 %v5353_v4  ;;  %4887 = vmatprep.subr.bf16.mxu1 %v5356_v8  ;;  %v5400_v4 = vld [vmem:[%s6870_s1 + $0x8f0] ss:$12 sps:$4 sm:$0xff]  }
 0x122   : > { %3445 = vmatprep.subr.bf16.mxu0 %v5359_v12  ;;  %v1100_v23 = vpop.f32.mrb[4].mxu1  ;;  %v5405_v12 = vld [vmem:[%s6870_s1 + $0x9c8] ss:$12 sps:$4 sm:$0xff]  }
 0x123   : > { %v1151_v54 = vpop.f32.mrb[4].mxu0  ;;  %v1102_v28 = vpop.f32.mrb[5].mxu1 }
 0x124   : > { %v6522_v42 = vadd.f32 %v1151_v54, %v1100_v23  ;;  %v1153_v29 = vpop.f32.mrb[5].mxu0  ;;  %4888 = vmatpush3.bf16.msra.mxu1 %v5356_v8  ;;  %v1104_v20 = vpop.f32.mrb[6].mxu1  ;;  %v5404_v8 = vld [vmem:[%s6870_s1 + $0x9c4] ss:$12 sps:$4 sm:$0xff]  }
 0x125   : > { %3446 = vmatpush1.bf16.msra.mxu0 %v5357_v53  ;;  %v6531_v33 = vadd.f32 %v1153_v29, %v1102_v28  ;;  %v1155_v22 = vpop.f32.mrb[6].mxu0  ;;  %4787 = vmatprep.subr.bf16.mxu1 %v5365_v34  ;;  %v1105_v36 = vpop.f32.mrb[7].mxu1  ;;  %v5402_v53 = vld [vmem:[%s6870_s1 + $0x9c0] ss:$12 sps:$4 sm:$0xff]   ;;  %v5407_v54 = vld [vmem:[%s6870_s1 + $0x9d8] ss:$12 sps:$4 sm:$0xff]  }
 0x126   : > { %3466 = vmatprep.subr.bf16.mxu0 %v5364_v18  ;;  %v1156_v37 = vpop.f32.mrb[7].mxu0  ;;  %v5406_v18 = vld [vmem:[%s6870_s1 + $0x908] ss:$12 sps:$4 sm:$0xff]   ;;  %v5416_v29 = vld [vmem:[%s6870_s1 + $0x938] ss:$12 sps:$4 sm:$0xff]  }
 0x127   : > { %4890 = vmatmul.mubr.bf16.vlgmr.msra.gmra.mrb[52].mxu1 %v6338_v16  ;;  %v5375_v16 = vld [vmem:[%s6870_s1 + $0x878] ss:$12 sps:$4 sm:$0xff]   ;;  %v5414_v28 = vld [vmem:[%s6870_s1 + $0x9f4] ss:$12 sps:$4 sm:$0xff]   ;;  %v5421_v20 = vld [vmem:[%s6870_s1 + $0x950] ss:$12 sps:$4 sm:$0xff]  }
 0x128   : > { %3448 = vmatmul.mubr.bf16.vlgmr.msra.gmra.mrb[8].mxu0 %v6520_v27  ;;  %4788 = vmatpush3.bf16.msra.mxu1 %v5366_v26  ;;  %v5410_v26 = vld [vmem:[%s6870_s1 + $0x9e0] ss:$12 sps:$4 sm:$0xff]   ;;  %v5425_v22 = vld [vmem:[%s6870_s1 + $0xa28] ss:$12 sps:$4 sm:$0xff]  }
 0x129   : > { %3467 = vmatpush1.bf16.msra.mxu0 %v5362_v21  ;;  %4789 = vmatprep.subr.bf16.mxu1 %v5370_v32  ;;  %v5409_v21 = vld [vmem:[%s6870_s1 + $0x9dc] ss:$12 sps:$4 sm:$0xff]   ;;  %v5422_v36 = vld [vmem:[%s6870_s1 + $0xa20] ss:$12 sps:$4 sm:$0xff]  }
 0x12a   : > { %3468 = vmatprep.subr.bf16.mxu0 %v5369_v31  ;;  %3600 = vmatprep.mubr.bf16.mxu1 %v6362_v24  ;;  %v5379_v24 = vld [vmem:[%s6870_s1 + $0x94c] ss:$12 sps:$4 sm:$0xff]   ;;  %v5420_v31 = vld [vmem:[%s6870_s1 + $0xa10] ss:$12 sps:$4 sm:$0xff]   ;;  %v5417_v32 = vld [vmem:[%s6870_s1 + $0xa08] ss:$12 sps:$4 sm:$0xff]  }
 0x12b   : > { %3457 = vmatprep.mubr.bf16.mxu0 %v6533_v38  ;;  %v5426_v37 = vld [vmem:[%s6870_s1 + $0x968] ss:$12 sps:$4 sm:$0xff]  }
 0x12c   : > { %4790 = vmatpush3.bf16.msra.mxu1 %v5371_v11  ;;  %v5427_v11 = vld [vmem:[%s6870_s1 + $0xa38] ss:$12 sps:$4 sm:$0xff]  }
 0x12d   : > { %3469 = vmatpush1.bf16.msra.mxu0 %v5367_v49  ;;  %4791 = vmatprep.subr.bf16.mxu1 %v5375_v16  ;;  %v5430_v49 = vld [vmem:[%s6870_s1 + $0xa40] ss:$12 sps:$4 sm:$0xff]  }
 0x12e   : > { %3470 = vmatprep.subr.bf16.mxu0 %v5374_v39  ;;  %v5432_v39 = vld [vmem:[%s6870_s1 + $0x980] ss:$12 sps:$4 sm:$0xff]  }
 0x12f   : > { %v5436_v16 = vld [vmem:[%s6870_s1 + $0xa54] ss:$12 sps:$4 sm:$0xff]  }
 0x130   : > { %3458 = vmatmul.mubr.bf16.gmra.mrb[24].mxu0 %v6551_v9  ;;  %4792 = vmatpush3.bf16.msra.mxu1 %v5376_v43 }
 0x131   : > { %3471 = vmatpush1.bf16.msra.mxu0 %v5372_v41  ;;  %4793 = vmatprep.subr.bf16.mxu1 %v5380_v63  ;;  %v5434_v63 = vld [vmem:[%s6870_s1 + $0xa50] ss:$12 sps:$4 sm:$0xff]  }
 0x132   : > { %3472 = vmatprep.subr.bf16.mxu0 %v5379_v24  ;;  %3498 = vmatprep.mubr.bf16.mxu0 %v6566_v46 }
 0x134   : > { %4794 = vmatpush3.bf16.msra.mxu1 %v5381_v48 }
 0x135   : > { %3473 = vmatpush1.bf16.msra.mxu0 %v5377_v47  ;;  %4795 = vmatprep.subr.bf16.mxu1 %v5385_v50  ;;  %v5438_v47 = vld [vmem:[%s6870_s1 + $0x998] ss:$12 sps:$4 sm:$0xff]   ;;  %v5442_v50 = vld [vmem:[%s6870_s1 + $0xa70] ss:$12 sps:$4 sm:$0xff]  }
 0x136   : > { %3474 = vmatprep.subr.bf16.mxu0 %v5384_v30  ;;  %v5441_v30 = vld [vmem:[%s6870_s1 + $0xa6c] ss:$12 sps:$4 sm:$0xff]  }
 0x138   : > { %4796 = vmatpush3.bf16.msra.mxu1 %v5386_v19  ;;  %v5439_v19 = vld [vmem:[%s6870_s1 + $0xa68] ss:$12 sps:$4 sm:$0xff]  }
 0x139   : > { %3475 = vmatpush1.bf16.msra.mxu0 %v5382_v51  ;;  %4797 = vmatprep.subr.bf16.mxu1 %v5390_v52  ;;  %v5449_v52 = vld [vmem:[%s6870_s1 + $0xa84] ss:$12 sps:$4 sm:$0xff]  }
 0x13a   : > { %3476 = vmatprep.subr.bf16.mxu0 %v5389_v25  ;;  %v1192_v57 = vpop.f32.mrb[8].mxu1  ;;  %v5443_v25 = vld [vmem:[%s6870_s1 + $0x9b0] ss:$12 sps:$4 sm:$0xff]  }
 0x13b   : > { %v6607_v58 = vadd.f32 %v1192_v57, %v6486_v1  ;;  %v1194_v59 = vpop.f32.mrb[9].mxu1  ;;  %v4349_v57 = vld [vmem:[%s5689_s11 + $0x58] sm:$0xff] }
 0x13c   : > { %v6610_v60 = vadd.f32 %v1194_v59, %v6491_v5  ;;  %v1196_v61 = vpop.f32.mrb[10].mxu1  ;;  %4798 = vmatpush3.bf16.msra.mxu1 %v5391_v56 }
 0x13d   : > { %3477 = vmatpush1.bf16.msra.mxu0 %v5387_v40  ;;  %v6619_v2 = vadd.f32 %v1196_v61, %v6499_v13  ;;  %v1198_v1 = vpop.f32.mrb[11].mxu1  ;;  %4799 = vmatprep.subr.bf16.mxu1 %v5395_v17  ;;  %v5450_v40 = vld [vmem:[%s6870_s1 + $0xa88] ss:$12 sps:$4 sm:$0xff]   ;;  %v5444_v17 = vld [vmem:[%s5689_s11 + $0x30] ss:$20 sps:$4 sm:$0xff]  }
 0x13e   : > { %3478 = vmatprep.subr.bf16.mxu0 %v5394_v55  ;;  %v6628_v5 = vadd.f32 %v1198_v1, %v6501_v15 }
 0x140   : > { %4800 = vmatpush3.bf16.msra.mxu1 %v5396_v0 }
 0x141   : > { %3479 = vmatpush1.bf16.msra.mxu0 %v5392_v62  ;;  %4801 = vmatprep.subr.bf16.mxu1 %v5400_v4  ;;  %v5447_v62 = vld [vmem:[%s6870_s1 + $0xa80] ss:$12 sps:$4 sm:$0xff]   ;;  %v5453_v4 = vld [vmem:[%s6870_s1 + $0xa9c] ss:$12 sps:$4 sm:$0xff]  }
 0x142   : > { %3480 = vmatprep.subr.bf16.mxu0 %v5399_v3  ;;  %v1202_v13 = vpop.f32.mrb[12].mxu1 }
 0x143   : > { %v6643_v14 = vadd.f32 %v1202_v13, %v6522_v42  ;;  %v1204_v10 = vpop.f32.mrb[13].mxu1  ;;  %v5412_v42 = vld [vmem:[%s6870_s1 + $0x9f0] ss:$12 sps:$4 sm:$0xff]   ;;  %v5451_v13 = vld [vmem:[%s6870_s1 + $0xa98] ss:$12 sps:$4 sm:$0xff]  }
 0x144   : > { %v6646_v15 = vadd.f32 %v1204_v10, %v6531_v33  ;;  %4802 = vmatpush3.bf16.msra.mxu1 %v5401_v7  ;;  %v1206_v34 = vpop.f32.mrb[14].mxu1  ;;  %v5424_v33 = vld [vmem:[%s6870_s1 + $0xa24] ss:$12 sps:$4 sm:$0xff]   ;;  %v5459_v10 = vld [vmem:[%s6870_s1 + $0xab4] ss:$12 sps:$4 sm:$0xff]  }
 0x145   : > { %3481 = vmatpush1.bf16.msra.mxu0 %v5397_v6  ;;  %4815 = vmatprep.subr.bf16.mxu1 %v5405_v12  ;;  %v1207_v23 = vpop.f32.mrb[15].mxu1  ;;  %v5454_v6 = vld [vmem:[%s6870_s1 + $0xaa0] ss:$12 sps:$4 sm:$0xff]   ;;  %v4519_v12 = vcombine.high %v4349_v57, %v4349_v57  ;;  %v5457_v34 = vld [vmem:[%s6870_s1 + $0xab0] ss:$12 sps:$4 sm:$0xff]  }
 0x146   : > { %3482 = vmatprep.subr.bf16.mxu0 %v5404_v8  ;;  %v5481_v23 = vld [vmem:[%s5689_s11 + $0x38] ss:$20 sps:$4 sm:$0xff]  }
 0x147   : > { %3601 = vmatmul.mubr.bf16.vlgmr.msra.gmra.mrb[56].mxu1 %v6520_v27  ;;  %v5415_v27 = vld [vmem:[%s6870_s1 + $0x9f8] ss:$12 sps:$4 sm:$0xff]  }
 0x148   : > { %4816 = vmatpush3.bf16.msra.mxu1 %v5406_v18  ;;  %3608 = vmatprep.mubr.bf16.mxu1 %v6533_v38  ;;  %v5429_v38 = vld [vmem:[%s6870_s1 + $0xa3c] ss:$12 sps:$4 sm:$0xff]   ;;  %v4518_v18 = vcombine.low %v4349_v57, %v4349_v57 }
 0x149   : > { %3483 = vmatpush1.bf16.msra.mxu0 %v5402_v53  ;;  %4817 = vmatprep.subr.bf16.mxu1 %v5410_v26  ;;  %v5460_v53 = vld [vmem:[%s6870_s1 + $0xab8] ss:$12 sps:$4 sm:$0xff]   ;;  %v5464_v26 = vld [vmem:[%s6870_s1 + $0xad0] ss:$12 sps:$4 sm:$0xff]  }
 0x14a   : > { %3484 = vmatprep.subr.bf16.mxu0 %v5409_v21  ;;  %v5463_v21 = vld [vmem:[%s6870_s1 + $0xacc] ss:$12 sps:$4 sm:$0xff]  }
 0x14c   : > { %4818 = vmatpush3.bf16.msra.mxu1 %v5411_v44  ;;  %v5467_v44 = vld [vmem:[%s6870_s1 + $0xae4] ss:$12 sps:$4 sm:$0xff]  }
 0x14d   : > { %3485 = vmatpush1.bf16.msra.mxu0 %v5407_v54  ;;  %4819 = vmatprep.subr.bf16.mxu1 %v5415_v27  ;;  %v5461_v54 = vld [vmem:[%s6870_s1 + $0xac8] ss:$12 sps:$4 sm:$0xff]   ;;  %v5465_v27 = vld [vmem:[%s6870_s1 + $0xae0] ss:$12 sps:$4 sm:$0xff]  }
 0x14e   : > { %3486 = vmatprep.subr.bf16.mxu0 %v5414_v28  ;;  %v5468_v28 = vld [vmem:[%s6870_s1 + $0xae8] ss:$12 sps:$4 sm:$0xff]  }
 0x14f   : > { %3609 = vmatmul.mubr.bf16.gmra.mrb[60].mxu1 %v6551_v9  ;;  %v5437_v9 = vld [vmem:[%s6870_s1 + $0xa58] ss:$12 sps:$4 sm:$0xff]  }
 0x150   : > { %4820 = vmatpush3.bf16.msra.mxu1 %v5416_v29  ;;  %3648 = vmatprep.mubr.bf16.mxu1 %v6566_v46  ;;  %v5472_v29 = vld [vmem:[%s6870_s1 + $0xb00] ss:$12 sps:$4 sm:$0xff]  }
 0x151   : > { %3487 = vmatpush1.bf16.msra.mxu0 %v5412_v42  ;;  %4821 = vmatprep.subr.bf16.mxu1 %v5420_v31  ;;  %v5471_v42 = vld [vmem:[%s6870_s1 + $0xafc] ss:$12 sps:$4 sm:$0xff]   ;;  %v5475_v31 = vld [vmem:[%s6870_s1 + $0xb14] ss:$12 sps:$4 sm:$0xff]  }
 0x152   : > { %3488 = vmatprep.subr.bf16.mxu0 %v5419_v45  ;;  %v5469_v45 = vld [vmem:[%s6870_s1 + $0xaf8] ss:$12 sps:$4 sm:$0xff]  }
 0x154   : > { %4822 = vmatpush3.bf16.msra.mxu1 %v5421_v20 }
 0x155   : > { %3489 = vmatpush1.bf16.msra.mxu0 %v5417_v32  ;;  %4823 = vmatprep.subr.bf16.mxu1 %v5425_v22  ;;  %v5476_v32 = vld [vmem:[%s6870_s1 + $0xb18] ss:$12 sps:$4 sm:$0xff]  }
 0x156   : > { %3490 = vmatprep.subr.bf16.mxu0 %v5424_v33 }
 0x158   : > { %4824 = vmatpush3.bf16.msra.mxu1 %v5426_v37  ;;  %v5473_v37 = vld [vmem:[%s6870_s1 + $0xb10] ss:$12 sps:$4 sm:$0xff]  }
 0x159   : > { %3491 = vmatpush1.bf16.msra.mxu0 %v5422_v36  ;;  %4825 = vmatprep.subr.bf16.mxu1 %v5430_v49  ;;  %v5479_v49 = vld [vmem:[%s6870_s1 + $0xb2c] ss:$12 sps:$4 sm:$0xff]  }
 0x15a   : > { %3492 = vmatprep.subr.bf16.mxu0 %v5429_v38  ;;  %v4671_v41 = vpop.f32.mrb[16].mxu1 }
 0x15b   : > { %v4672_v43 = vpop.f32.mrb[17].mxu1 }
 0x15c   : > { %4826 = vmatpush3.bf16.msra.mxu1 %v5432_v39  ;;  %v6724_v24 = vadd.f32 %v4672_v43, %v4671_v41  ;;  %v4674_v46 = vpop.f32.mrb[18].mxu1 }
 0x15d   : > { %3493 = vmatpush1.bf16.msra.mxu0 %v5427_v11  ;;  %4827 = vmatprep.subr.bf16.mxu1 %v5437_v9  ;;  %v4675_v48 = vpop.f32.mrb[19].mxu1  ;;  %v5480_v11 = vld [vmem:[%s6870_s1 + $0xb30] ss:$12 sps:$4 sm:$0xff]   ;;  %v5477_v9 = vld [vmem:[%s6870_s1 + $0xb28] ss:$12 sps:$4 sm:$0xff]  }
 0x15e   : > { %3494 = vmatprep.subr.bf16.mxu0 %v5436_v16  ;;  %v6738_v51 = vadd.f32 %v4675_v48, %v4674_v46  ;;  %v5482_v46 = vld [vmem:[%s5689_s11 + $0x60] ss:$0 sps:$4 sm:$0xff]  }
 0x160   : > { %4828 = vmatpush3.bf16.msra.mxu1 %v5438_v47 }
 0x161   : > { %3495 = vmatpush1.bf16.msra.mxu0 %v5434_v63  ;;  %4829 = vmatprep.subr.bf16.mxu1 %v5442_v50 }
 0x162   : > { %3496 = vmatprep.subr.bf16.mxu0 %v5441_v30  ;;  %v4677_v56 = vpop.f32.mrb[20].mxu1 }
 0x163   : > { %v6752_v55 = vpop.f32.mrb[12].mxu0  ;;  %v4678_v59 = vpop.f32.mrb[21].mxu1 }
 0x164   : > { %v6756_v61 = vpop.f32.mrb[13].mxu0  ;;  %4830 = vmatpush3.bf16.msra.mxu1 %v5443_v25  ;;  %v6761_v0 = vadd.f32 %v4678_v59, %v4677_v56  ;;  %v4680_v1 = vpop.f32.mrb[22].mxu1 }
 0x165   : > { %3497 = vmatpush1.bf16.msra.mxu0 %v5439_v19  ;;  %v2279_v3 = vpop.f32.mrb[14].mxu0  ;;  %4893 = vmatprep.subr.bf16.mxu1 %v5450_v40  ;;  %v4681_v7 = vpop.f32.mrb[23].mxu1 }
 0x166   : > { %3517 = vmatprep.subr.bf16.mxu0 %v5449_v52  ;;  %v2280_v8 = vpop.f32.mrb[15].mxu0 }
 0x167   : > { %3649 = vmatmul.mubr.bf16.vlgmr.msra.gmra.mrb[64].mxu1 %v5444_v17 }
 0x168   : > { %3499 = vmatmul.mubr.bf16.vlgmr.msra.gmra.mrb[8].mxu0 %v5444_v17  ;;  %4894 = vmatpush3.bf16.msra.mxu1 %v5450_v40 }
 0x169   : > { %3518 = vmatpush1.bf16.msra.mxu0 %v5447_v62  ;;  %4895 = vmatprep.subr.bf16.mxu1 %v5454_v6 }
 0x16a   : > { %3519 = vmatprep.subr.bf16.mxu0 %v5453_v4  ;;  %3508 = vmatprep.mubr.bf16.mxu0 %v4519_v12 }
 0x16b   : > { %3656 = vmatprep.mubr.bf16.mxu1 %v4519_v12 }
 0x16c   : > { %4896 = vmatpush3.bf16.msra.mxu1 %v5454_v6 }
 0x16d   : > { %3520 = vmatpush1.bf16.msra.mxu0 %v5451_v13  ;;  %4897 = vmatprep.subr.bf16.mxu1 %v5460_v53 }
 0x16e   : > { %3521 = vmatprep.subr.bf16.mxu0 %v5459_v10 }
 0x16f   : > { %3657 = vmatmul.mubr.bf16.gmra.mrb[68].mxu1 %v4518_v18 }
 0x170   : > { %3509 = vmatmul.mubr.bf16.gmra.mrb[28].mxu0 %v4518_v18  ;;  %4898 = vmatpush3.bf16.msra.mxu1 %v5460_v53 }
 0x171   : > { %3522 = vmatpush1.bf16.msra.mxu0 %v5457_v34  ;;  %4899 = vmatprep.subr.bf16.mxu1 %v5464_v26 }
 0x172   : > { %3523 = vmatprep.subr.bf16.mxu0 %v5463_v21  ;;  %3549 = vmatprep.mubr.bf16.mxu0 %v5508_v35 }
 0x173   : > { %4909 = vmatprep.mubr.bf16.mxu1 %v5481_v23 }
 0x174   : > { %4900 = vmatpush3.bf16.msra.mxu1 %v5464_v26 }
 0x175   : > { %3524 = vmatpush1.bf16.msra.mxu0 %v5461_v54  ;;  %4901 = vmatprep.subr.bf16.mxu1 %v5468_v28 }
 0x176   : > { %3525 = vmatprep.subr.bf16.mxu0 %v5467_v44 }
 0x178   : > { %4902 = vmatpush3.bf16.msra.mxu1 %v5468_v28 }
 0x179   : > { %3526 = vmatpush1.bf16.msra.mxu0 %v5465_v27  ;;  %4903 = vmatprep.subr.bf16.mxu1 %v5472_v29 }
 0x17a   : > { %3527 = vmatprep.subr.bf16.mxu0 %v5471_v42  ;;  %v4699_v20 = vpop.f32.mrb[24].mxu1 }
 0x17b   : > { %v4700_v33 = vpop.f32.mrb[25].mxu1 }
 0x17c   : > { %v4701_v22 = vadd.f32 %v4700_v33, %v4699_v20  ;;  %v4702_v36 = vpop.f32.mrb[26].mxu1  ;;  %4904 = vmatpush3.bf16.msra.mxu1 %v5472_v29 }
 0x17d   : > { %3528 = vmatpush1.bf16.msra.mxu0 %v5469_v45  ;;  %v4703_v38 = vpop.f32.mrb[27].mxu1  ;;  %4905 = vmatprep.subr.bf16.mxu1 %v5476_v32 }
 0x17e   : > { %3529 = vmatprep.subr.bf16.mxu0 %v5475_v31  ;;  %v4704_v39 = vadd.f32 %v4703_v38, %v4702_v36  ;;  %v1292_v16 = vadd.f32 %v4701_v22, %v6724_v24 }
 0x180   : > { %4906 = vmatpush3.bf16.msra.mxu1 %v5476_v32  ;;  %v1295_v41 = vadd.f32 %v4704_v39, %v6738_v51 }
 0x181   : > { %3530 = vmatpush1.bf16.msra.mxu0 %v5473_v37  ;;  %4907 = vmatprep.subr.bf16.mxu1 %v5480_v11 }
 0x182   : > { %3531 = vmatprep.subr.bf16.mxu0 %v5479_v49  ;;  %v4705_v43 = vpop.f32.mrb[28].mxu1 }
 0x183   : > { %v4706_v63 = vpop.f32.mrb[29].mxu1 }
 0x184   : > { %v4707_v47 = vadd.f32 %v4706_v63, %v4705_v43  ;;  %4908 = vmatpush3.bf16.msra.mxu1 %v5480_v11  ;;  %v4708_v48 = vpop.f32.mrb[30].mxu1 }
 0x185   : > { %3532 = vmatpush1.bf16.msra.mxu0 %v5477_v9  ;;  %v4709_v30 = vpop.f32.mrb[31].mxu1 }
 0x186   : > { %v1300_v24 = vadd.f32 %v4707_v47, %v6761_v0 }
 0x187   : > { %4910 = vmatmul.mubr.bf16.vlgmr.msra.gmra.mrb[72].mxu1 %v5482_v46 }
 0x188   : > { %3550 = vmatmul.mubr.bf16.vlgmr.msra.gmra.mrb[8].mxu0 %v5481_v23 }
 0x189   : > { %3559 = vmatprep.mubr.bf16.mxu0 %v5508_v35 }
 0x190   : > { %3560 = vmatmul.mubr.bf16.gmra.mrb[32].mxu0 %v5482_v46 }
 0x19a   : > { %v4871_v50 = vpop.f32.mrb[32].mxu1 }
 0x19b   : > { %v1348_v19 = vadd.f32 %v4871_v50, %v1300_v24  ;;  %v1339_v51 = vpop.f32.mrb[33].mxu1 }
 0x19c   : > { %v1340_v25 = vadd.f32 %v1339_v51, %v1292_v16  ;;  %v4872_v52 = vpop.f32.mrb[34].mxu1 }
 0x19d   : > { %v1342_v40 = vpop.f32.mrb[35].mxu1 }
 0x19e   : > { %v1343_v56 = vadd.f32 %v1342_v40, %v1295_v41 }
 0x1a3   : > { %v2326_v17 = vpop.f32.mrb[16].mxu0 }
 0x1a4   : > { %v2327_v57 = vadd.f32 %v2326_v17, %v6752_v55  ;;  %v2328_v59 = vpop.f32.mrb[17].mxu0 }
 0x1a5   : > { %v2329_v62 = vadd.f32 %v2328_v59, %v6756_v61  ;;  %v2330_v1 = vpop.f32.mrb[18].mxu0 }
 0x1a6   : > { %v2331_v0 = vpop.f32.mrb[19].mxu0 }
 0x1ba   : > { %v4737_v3 = vpop.f32.mrb[36].mxu1 }
 0x1bb   : > { %v4738_v4 = vpop.f32.mrb[37].mxu1 }
 0x1bc   : > { %v4739_v6 = vadd.f32 %v4738_v4, %v4737_v3  ;;  %v4740_v35 = vpop.f32.mrb[38].mxu1 }
 0x1bd   : > { %v4741_v7 = vpop.f32.mrb[39].mxu1 }
 0x1be   : > { %v4742_v8 = vadd.f32 %v4741_v7, %v4740_v35 }
 0x1c2   : > { %v4743_v13 = vpop.f32.mrb[40].mxu1 }
 0x1c3   : > { %v2377_v12 = vpop.f32.mrb[20].mxu0  ;;  %v4744_v18 = vpop.f32.mrb[41].mxu1 }
 0x1c4   : > { %v2378_v10 = vadd.f32 %v2377_v12, %v2327_v57  ;;  %v2379_v53 = vpop.f32.mrb[21].mxu0  ;;  %v4745_v21 = vadd.f32 %v4744_v18, %v4743_v13  ;;  %v4746_v26 = vpop.f32.mrb[42].mxu1 }
 0x1c5   : > { %v2380_v34 = vadd.f32 %v2379_v53, %v2329_v62  ;;  %v2381_v55 = vpop.f32.mrb[22].mxu0  ;;  %v4747_v61 = vpop.f32.mrb[43].mxu1 }
 0x1c6   : > { %v6836_v23 = vadd.f32 %v2378_v10, %v6643_v14  ;;  %v2382_v54 = vpop.f32.mrb[23].mxu0 }
 0x1c7   : > { %v6839_v44 = vadd.f32 %v2380_v34, %v6646_v15 }
 0x1da   : > { %v4765_v28 = vpop.f32.mrb[44].mxu1 }
 0x1db   : > { %v4766_v27 = vpop.f32.mrb[45].mxu1 }
 0x1dc   : > { %v4767_v42 = vadd.f32 %v4766_v27, %v4765_v28  ;;  %v4768_v29 = vpop.f32.mrb[46].mxu1  ;;  %v3741_v27 = vlaneseq }
 0x1dd   : > { %v4769_v45 = vpop.f32.mrb[47].mxu1 }
 0x1de   : > { %v4770_v31 = vadd.f32 %v4769_v45, %v4768_v29  ;;  %v2467_v32 = vadd.f32 %v4767_v42, %v4739_v6  ;;  %v3742_v42 = vshrl.u32 %v3741_v27, 7  ;;  %v3739_v45 = vld [vmem:[%s6871_s2] sm:$0x7] }
 0x1e0   : > { %v2470_v20 = vadd.f32 %v4770_v31, %v4742_v8  ;;  %v3743_v29 = vsub.s32 0, %v3742_v42  ;;  %v3747_v31 = vsub.s32 1, %v3742_v42 }
 0x1e2   : > { %v4771_v33 = vpop.f32.mrb[48].mxu1 }
 0x1e3   : > { %v4772_v22 = vpop.f32.mrb[49].mxu1 }
 0x1e4   : > { %v4773_v36 = vadd.f32 %v4772_v22, %v4771_v33  ;;  %v4774_v37 = vpop.f32.mrb[50].mxu1 }
 0x1e5   : > { %v4775_v38 = vpop.f32.mrb[51].mxu1 }
 0x1e6   : > { %v2475_v14 = vadd.f32 %v4773_v36, %v4745_v21  ;;  %v3748_v36 = vrot.slane %v3739_v45, %v3747_v31 }
 0x1fa   : > { %v4891_v49 = vpop.f32.mrb[52].mxu1 }
 0x1fb   : > { %v2523_v11 = vadd.f32 %v4891_v49, %v2475_v14  ;;  %v2514_v39 = vpop.f32.mrb[53].mxu1 }
 0x1fc   : > { %v2515_v16 = vadd.f32 %v2514_v39, %v2467_v32  ;;  %v4892_v15 = vpop.f32.mrb[54].mxu1  ;;  %v3751_v32 = vsub.s32 2, %v3742_v42 }
 0x1fd   : > { %v2536_v9 = vadd.f32 %v2523_v11, %v1348_v19  ;;  %v2517_v41 = vpop.f32.mrb[55].mxu1 }
 0x1fe   : > { %v6841_v43 = vadd.f32 %v2515_v16, %v1340_v25  ;;  %v2518_v63 = vadd.f32 %v2517_v41, %v2470_v20  ;;  %v3744_v20 = vrot.slane %v3739_v45, %v3743_v29  ;;  %v3752_v14 = vrot.slane %v3739_v45, %v3751_v32 }
 0x200   : > { %v6843_v46 = vadd.f32 %v2518_v63, %v1343_v56 }
 0x203   : > { %v3459_v47 = vpop.f32.mrb[24].mxu0 }
 0x204   : > { %v3461_v48 = vpop.f32.mrb[25].mxu0 }
 0x205   : > { %v3463_v30 = vpop.f32.mrb[26].mxu0 }
 0x206   : > { %v3464_v24 = vpop.f32.mrb[27].mxu0 }
 0x21a   : > { %v4803_v50 = vpop.f32.mrb[56].mxu1 }
 0x21b   : > { %v4804_v51 = vpop.f32.mrb[57].mxu1 }
 0x21c   : > { %v4805_v52 = vadd.f32 %v4804_v51, %v4803_v50  ;;  %v4806_v40 = vpop.f32.mrb[58].mxu1 }
 0x21d   : > { %v4807_v17 = vpop.f32.mrb[59].mxu1 }
 0x21e   : > { %v4808_v57 = vadd.f32 %v4807_v17, %v4806_v40 }
 0x222   : > { %v4809_v59 = vpop.f32.mrb[60].mxu1 }
 0x223   : > { %v4810_v62 = vpop.f32.mrb[61].mxu1 }
 0x224   : > { %v4811_v1 = vadd.f32 %v4810_v62, %v4809_v59  ;;  %v4812_v19 = vpop.f32.mrb[62].mxu1 }
 0x225   : > { %v4813_v0 = vpop.f32.mrb[63].mxu1 }
 0x23a   : > { %v4831_v25 = vpop.f32.mrb[64].mxu1 }
 0x23b   : > { %v4832_v3 = vpop.f32.mrb[65].mxu1 }
 0x23c   : > { %v4833_v4 = vadd.f32 %v4832_v3, %v4831_v25  ;;  %v4834_v56 = vpop.f32.mrb[66].mxu1 }
 0x23d   : > { %v4835_v6 = vpop.f32.mrb[67].mxu1 }
 0x23e   : > { %v4836_v35 = vadd.f32 %v4835_v6, %v4834_v56  ;;  %v3651_v7 = vadd.f32 %v4833_v4, %v4805_v52 }
 0x240   : > { %v3654_v8 = vadd.f32 %v4836_v35, %v4808_v57 }
 0x242   : > { %v4837_v13 = vpop.f32.mrb[68].mxu1 }
 0x243   : > { %v3510_v12 = vpop.f32.mrb[28].mxu0  ;;  %v4838_v18 = vpop.f32.mrb[69].mxu1 }
 0x244   : > { %v3511_v10 = vadd.f32 %v3510_v12, %v3459_v47  ;;  %v3512_v53 = vpop.f32.mrb[29].mxu0  ;;  %v4839_v21 = vadd.f32 %v4838_v18, %v4837_v13  ;;  %v4840_v55 = vpop.f32.mrb[70].mxu1 }
 0x245   : > { %v3513_v34 = vadd.f32 %v3512_v53, %v3461_v48  ;;  %v3514_v26 = vpop.f32.mrb[30].mxu0  ;;  %v4841_v54 = vpop.f32.mrb[71].mxu1 }
 0x246   : > { %v3515_v61 = vpop.f32.mrb[31].mxu0  ;;  %v3659_v28 = vadd.f32 %v4839_v21, %v4811_v1 }
 0x25a   : > { %v4911_v22 = vpop.f32.mrb[72].mxu1 }
 0x25b   : > { %v3551_v33 = vpop.f32.mrb[8].mxu0  ;;  %v3707_v38 = vadd.f32 %v4911_v22, %v3659_v28  ;;  %v3698_v11 = vpop.f32.mrb[73].mxu1 }
 0x25c   : > { %v4915_v37 = vadd.f32 %v3551_v33, %v6607_v58  ;;  %v3553_v49 = vpop.f32.mrb[9].mxu0  ;;  %v3699_v16 = vadd.f32 %v3698_v11, %v3651_v7  ;;  %v4912_v41 = vpop.f32.mrb[74].mxu1 }
 0x25d   : > { %v4918_v39 = vadd.f32 %v3553_v49, %v6610_v60  ;;  %v3555_v15 = vpop.f32.mrb[10].mxu0  ;;  %v3720_v47 = vadd.f32 %v3707_v38, %v2536_v9  ;;  %v3701_v24 = vpop.f32.mrb[75].mxu1 }
 0x25e   : > { %v3756_v63 = vadd.f32 %v4915_v37, %v3744_v20  ;;  %v4921_v48 = vadd.f32 %v3555_v15, %v6619_v2  ;;  %v3557_v30 = vpop.f32.mrb[11].mxu0  ;;  %v3714_v51 = vadd.f32 %v3699_v16, %v6841_v43  ;;  %v3702_v52 = vadd.f32 %v3701_v24, %v3654_v8 }
 0x25f   : > { %v3757_v50 = vadd.f32 %v4918_v39, %v3748_v36  ;;  %v4924_v58 = vadd.f32 %v3557_v30, %v6628_v5  ;;  %v3764_v17 = vadd.f32 %v3752_v14, %v3720_v47 }
 0x260   : > { %v3765_v40 = vmax.f32 %v3756_v63, 0.0  ;;  %v3759_v57 = vadd.f32 %v4921_v48, %v3744_v20  ;;  %v3758_v59 = vadd.f32 %v3752_v14, %v3714_v51  ;;  %v3717_v1 = vadd.f32 %v3702_v52, %v6843_v46 }
 0x261   : > { %v3766_v60 = vmax.f32 %v3757_v50, 0.0  ;;  %v3760_v62 = vadd.f32 %v4924_v58, %v3748_v36  ;;  %v3773_v2 = vmax.f32 %v3764_v17, 0.0 }
 0x262   : > { %v3768_v9 = vmax.f32 %v3759_v57, 0.0  ;;  %v3767_v0 = vmax.f32 %v3758_v59, 0.0  ;;  %v3761_v25 = vadd.f32 %v3752_v14, %v3717_v1 }
 0x263   : > { %v4649_v19 = vpack.c.bf16 %v3766_v60, %v3765_v40  ;;  %v3769_v43 = vmax.f32 %v3760_v62, 0.0  ;;  %v3561_v5 = vpop.f32.mrb[32].mxu0  ;;  %v4654_v3 = vpack.c.bf16 %v3773_v2, %v3773_v2 }
 0x264   : > { %v3562_v4 = vadd.f32 %v3561_v5, %v3511_v10  ;;  %v3563_v56 = vpop.f32.mrb[33].mxu0  ;;  %v4650_v6 = vpack.c.bf16 %v3767_v0, %v3767_v0  ;;  %v3770_v7 = vmax.f32 %v3761_v25, 0.0 }
 0x265   : > { %3807 = vst [vmem:[%s194_s8] sm:$0xff] %v4649_v19  ;;  %v4651_v35 = vpack.c.bf16 %v3769_v43, %v3768_v9  ;;  %v3564_v8 = vadd.f32 %v3563_v56, %v3513_v34  ;;  %v3565_v46 = vpop.f32.mrb[34].mxu0  ;;  %3812 = vst [vmem:[%s194_s8 + $0x20] sm:$0xf] %v4654_v3 }
 0x266   : > { %v3718_v12 = vadd.f32 %v3562_v4, %v6836_v23  ;;  %v3566_v13 = vpop.f32.mrb[35].mxu0  ;;  %3808 = vst [vmem:[%s194_s8 + $0x8] sm:$0xf] %v4650_v6  ;;  %v4652_v53 = vpack.c.bf16 %v3770_v7, %v3770_v7 }
 0x267   : > { %3809 = vst [vmem:[%s194_s8 + $0xc] sm:$0xff] %v4651_v35  ;;  %v3719_v18 = vadd.f32 %v3564_v8, %v6839_v44 }
 0x268   : > { %v3762_v21 = vadd.f32 %v3744_v20, %v3718_v12  ;;  %3810 = vst [vmem:[%s194_s8 + $0x14] sm:$0xf] %v4652_v53 }
 0x269   : > { %v3763_v26 = vadd.f32 %v3748_v36, %v3719_v18 }
 0x26a   : > { %v3771_v10 = vmax.f32 %v3762_v21, 0.0 }
 0x26b   : > { %v3772_v55 = vmax.f32 %v3763_v26, 0.0 }
 0x26d   : > { %v4653_v61 = vpack.c.bf16 %v3772_v55, %v3771_v10 }
 0x26f   : > { %3811 = vst [vmem:[%s194_s8 + $0x18] sm:$0xff] %v4653_v61 }
 0x270 PF: > { %s13_s14 = sadd.s32 1, %s5506_s14   ;;  %s6873_s12 = smov %s5502_s13 }
 0x271   : > { %p10_p5 = scmp.ge.s32.totalorder %s13_s14, 4   ;;  %s6874_s13 = smov %s6876_s15 }
 0x273   :  { %12 = sbr.rel (!%p10_p5) target bundleno = 2 (0x2), region = 67 }

// kernel: alexnet_forward.12
= control target key start
LH: loop header
LB: loop body
LE: loop exit
PB: predicated region body
PF: predicated region fallthrough
CT: control target
= control target key end

     0   :  { %s5719_s12 = smov 0   ;;  %s5721_s13 = smov 0   ;;  %s7189_s0 = inlined_call_operand.vmem [shape: bf16[2,40,1152], index: 0, kind: input, shape index: {}]   ;;  %s7190_s1 = inlined_call_operand.vmem [shape: bf16[3,1152,256], index: 1, kind: input, shape index: {}]   ;;  %s7191_s2 = inlined_call_operand.vmem [shape: f32[1,256], index: 2, kind: input, shape index: {}]   ;;  %s7192_s3 = inlined_call_operand.vmem [shape: bf16[2,24,256], index: 3, kind: output, shape index: {}]  }
   0x1   :  { %s5723_s14 = smov 0  }
   0x2 LB: > { %s25_s15 = sadd.s32 1, %s5692_s13  ;;  %p4045_p0 = scmp.ge.s32.totalorder %s5696_s14, 1  ;;  %s5696_s14 = sphi %s5723_s14, %s13_s14   ;;  %s5692_s13 = sphi %s5721_s13, %s7194_s13   ;;  %s5688_s12 = sphi %s5719_s12, %s7193_s12  }
   0x3   : > { %p27_p1 = scmp.ge.s32.totalorder %s25_s15, 2  ;;  %p151_p2 = scmp.lt.s32.totalorder %s5696_s14, 3 }
   0x5   : > { %s7196_s15 = smov (%p27_p1, %s25_s15), 0  ;;  %p152_p3 = pnand %p4045_p0, %p151_p2 }
   0x6   : > { %v4959_v0 = vld [vmem:[%s7190_s1 + $0x4] ss:$8 sps:$4 sm:$0xff] (!%p152_p3)   ;;  %v4963_v2 = vld [vmem:[%s7190_s1] ss:$8 sps:$4 sm:$0xff] (!%p152_p3)   ;;  %v4965_v4 = vld [vmem:[%s7190_s1 + $0x14] ss:$8 sps:$4 sm:$0xff] (!%p152_p3)  }
   0x7   : > { %155 = sbr.rel (%p152_p3) target bundleno = 680 (0x2a8), region = 32  ;;  %v4961_v1 = vld [vmem:[%s7190_s1 + $0x684] ss:$8 sps:$4 sm:$0xff] (!%p152_p3)   ;;  %1160 = vmatprep.subr.bf16.mxu1 (!%p152_p3), %v4959_v0  ;;  %v4964_v3 = vld [vmem:[%s7190_s1 + $0x680] ss:$8 sps:$4 sm:$0xff] (!%p152_p3)   ;;  %p180_p4 = scmp.lt.s32.totalorder (!%p152_p3), %s5688_s12, 1 }
   0x8   : > { %2493 = vmatprep.subr.bf16.mxu0 (!%p152_p3), %v4961_v1  ;;  %1161 = vmatpush1.bf16.msra.mxu1 (!%p152_p3), %v4963_v2  ;;  %v4967_v5 = vld [vmem:[%s7190_s1 + $0x694] ss:$8 sps:$4 sm:$0xff] (!%p152_p3)   ;;  %v4969_v6 = vld [vmem:[%s7190_s1 + $0x10] ss:$8 sps:$4 sm:$0xff] (!%p152_p3)   ;;  %v4971_v8 = vld [vmem:[%s7190_s1 + $0x24] ss:$8 sps:$4 sm:$0xff] (!%p152_p3)  }
   0x9   : > { %2494 = vmatpush1.bf16.msra.mxu0 (!%p152_p3), %v4964_v3  ;;  %1162 = vmatprep.subr.bf16.mxu1 (!%p152_p3), %v4965_v4  ;;  %v4970_v7 = vld [vmem:[%s7190_s1 + $0x690] ss:$8 sps:$4 sm:$0xff] (!%p152_p3)   ;;  %v4973_v9 = vld [vmem:[%s7190_s1 + $0x6a4] ss:$8 sps:$4 sm:$0xff] (!%p152_p3)   ;;  %v4975_v10 = vld [vmem:[%s7190_s1 + $0x20] ss:$8 sps:$4 sm:$0xff] (!%p152_p3)  }
   0xa   : > { %2495 = vmatprep.subr.bf16.mxu0 (!%p152_p3), %v4967_v5  ;;  %v4976_v11 = vld [vmem:[%s7190_s1 + $0x6a0] ss:$8 sps:$4 sm:$0xff] (!%p152_p3)   ;;  %v4977_v12 = vld [vmem:[%s7190_s1 + $0x34] ss:$8 sps:$4 sm:$0xff] (!%p152_p3)   ;;  %v4981_v14 = vld [vmem:[%s7190_s1 + $0x30] ss:$8 sps:$4 sm:$0xff] (!%p152_p3)  }
   0xb   : > { %v4979_v13 = vld [vmem:[%s7190_s1 + $0x6b4] ss:$8 sps:$4 sm:$0xff] (!%p152_p3)   ;;  %v4982_v15 = vld [vmem:[%s7190_s1 + $0x6b0] ss:$8 sps:$4 sm:$0xff] (!%p152_p3)   ;;  %v4983_v16 = vld [vmem:[%s7190_s1 + $0x44] ss:$8 sps:$4 sm:$0xff] (!%p152_p3)  }
   0xc   : > { %1163 = vmatpush1.bf16.msra.mxu1 (!%p152_p3), %v4969_v6  ;;  %v4985_v17 = vld [vmem:[%s7190_s1 + $0x6c4] ss:$8 sps:$4 sm:$0xff] (!%p152_p3)   ;;  %v4987_v18 = vld [vmem:[%s7190_s1 + $0x40] ss:$8 sps:$4 sm:$0xff] (!%p152_p3)   ;;  %v4989_v20 = vld [vmem:[%s7190_s1 + $0x54] ss:$8 sps:$4 sm:$0xff] (!%p152_p3)  }
   0xd   : > { %2496 = vmatpush1.bf16.msra.mxu0 (!%p152_p3), %v4970_v7  ;;  %1164 = vmatprep.subr.bf16.mxu1 (!%p152_p3), %v4971_v8  ;;  %v4988_v19 = vld [vmem:[%s7190_s1 + $0x6c0] ss:$8 sps:$4 sm:$0xff] (!%p152_p3)   ;;  %v4991_v21 = vld [vmem:[%s7190_s1 + $0x6d4] ss:$8 sps:$4 sm:$0xff] (!%p152_p3)   ;;  %v4993_v22 = vld [vmem:[%s7190_s1 + $0x50] ss:$8 sps:$4 sm:$0xff] (!%p152_p3)  }
   0xe   : > { %2497 = vmatprep.subr.bf16.mxu0 %v4973_v9  ;;  %v4994_v23 = vld [vmem:[%s7190_s1 + $0x6d0] ss:$8 sps:$4 sm:$0xff]   ;;  %v4995_v24 = vld [vmem:[%s7190_s1 + $0x64] ss:$8 sps:$4 sm:$0xff]   ;;  %v4999_v26 = vld [vmem:[%s7190_s1 + $0x60] ss:$8 sps:$4 sm:$0xff]  }
   0xf   : > { %v4997_v25 = vld [vmem:[%s7190_s1 + $0x6e4] ss:$8 sps:$4 sm:$0xff]   ;;  %v5000_v27 = vld [vmem:[%s7190_s1 + $0x6e0] ss:$8 sps:$4 sm:$0xff]   ;;  %v5001_v28 = vld [vmem:[%s7190_s1 + $0x74] ss:$8 sps:$4 sm:$0xff]  }
  0x10   : > { %1165 = vmatpush1.bf16.msra.mxu1 %v4975_v10  ;;  %v5003_v29 = vld [vmem:[%s7190_s1 + $0x6f4] ss:$8 sps:$4 sm:$0xff]   ;;  %v5005_v30 = vld [vmem:[%s7190_s1 + $0x70] ss:$8 sps:$4 sm:$0xff]   ;;  %v5007_v32 = vld [vmem:[%s7190_s1 + $0x84] ss:$8 sps:$4 sm:$0xff]  }
  0x11   : > { %2498 = vmatpush1.bf16.msra.mxu0 %v4976_v11  ;;  %1166 = vmatprep.subr.bf16.mxu1 %v4977_v12  ;;  %v5006_v31 = vld [vmem:[%s7190_s1 + $0x6f0] ss:$8 sps:$4 sm:$0xff]   ;;  %v5009_v33 = vld [vmem:[%s7190_s1 + $0x704] ss:$8 sps:$4 sm:$0xff]   ;;  %v5011_v34 = vld [vmem:[%s7190_s1 + $0x80] ss:$8 sps:$4 sm:$0xff]  }
  0x12   : > { %2499 = vmatprep.subr.bf16.mxu0 %v4979_v13  ;;  %v5012_v35 = vld [vmem:[%s7190_s1 + $0x700] ss:$8 sps:$4 sm:$0xff]   ;;  %v5013_v36 = vld [vmem:[%s7190_s1 + $0x94] ss:$8 sps:$4 sm:$0xff]   ;;  %s7198_s12 = smov (!%p180_p4, %s5688_s12), 1 }
  0x13   : > { %v5015_v37 = vld [vmem:[%s7190_s1 + $0x714] ss:$8 sps:$4 sm:$0xff]   ;;  %v5017_v38 = vld [vmem:[%s7190_s1 + $0x90] ss:$8 sps:$4 sm:$0xff]   ;;  %v5019_v40 = vld [vmem:[%s7190_s1 + $0xa4] ss:$8 sps:$4 sm:$0xff]  }
  0x14   : > { %1167 = vmatpush1.bf16.msra.mxu1 %v4981_v14  ;;  %v5018_v39 = vld [vmem:[%s7190_s1 + $0x710] ss:$8 sps:$4 sm:$0xff]   ;;  %s4932_s29 = smul.u32 180, %s7198_s12  ;;  %v5021_v41 = vld [vmem:[%s7190_s1 + $0x724] ss:$8 sps:$4 sm:$0xff]  }
  0x15   : > { %2500 = vmatpush1.bf16.msra.mxu0 %v4982_v15  ;;  %1168 = vmatprep.subr.bf16.mxu1 %v4983_v16  ;;  %v5023_v42 = vld [vmem:[%s7190_s1 + $0xa0] ss:$8 sps:$4 sm:$0xff]   ;;  %v5025_v44 = vld [vmem:[%s7190_s1 + $0xb4] ss:$8 sps:$4 sm:$0xff]   ;;  %v5029_v46 = vld [vmem:[%s7190_s1 + $0xb0] ss:$8 sps:$4 sm:$0xff]  }
  0x16   : > { %2501 = vmatprep.subr.bf16.mxu0 %v4985_v17  ;;  %v5024_v43 = vld [vmem:[%s7190_s1 + $0x720] ss:$8 sps:$4 sm:$0xff]   ;;  %s5882_s17 = scalar_lea.vmem %s7189_s0, %s4932_s29  ;;  %v5027_v45 = vld [vmem:[%s7190_s1 + $0x734] ss:$8 sps:$4 sm:$0xff]   ;;  %v5030_v47 = vld [vmem:[%s7190_s1 + $0x730] ss:$8 sps:$4 sm:$0xff]  }
  0x17   : > { %v5057_v48 = vld [vmem:[%s5882_s17 + $0x4] ss:$36 sps:$4 sm:$0xff]   ;;  %v5901_v51 = vld [vmem:[%s5882_s17 + $0x34] sm:$0xff]  ;;  %s4933_s23 = smul.u32 24, %s7198_s12 }
  0x18   : > { %1169 = vmatpush1.bf16.msra.mxu1 %v4987_v18  ;;  %v5031_v49 = vld [vmem:[%s7190_s1 + $0xc4] ss:$8 sps:$4 sm:$0xff]   ;;  %v4217_v52 = vld [vmem:[%s5882_s17 + $0x58] sm:$0xff]  ;;  %1192 = vmatprep.mubr.bf16.mxu1 %v5057_v48  ;;  %v5035_v54 = vld [vmem:[%s7190_s1 + $0xc0] ss:$8 sps:$4 sm:$0xff]  }
  0x19   : > { %2502 = vmatpush1.bf16.msra.mxu0 %v4988_v19  ;;  %1170 = vmatprep.subr.bf16.mxu1 %v4989_v20  ;;  %v5033_v50 = vld [vmem:[%s7190_s1 + $0x744] ss:$8 sps:$4 sm:$0xff]   ;;  %v4374_v53 = vcombine.high %v5901_v51, %v4217_v52  ;;  %v5036_v55 = vld [vmem:[%s7190_s1 + $0x740] ss:$8 sps:$4 sm:$0xff]   ;;  %v5037_v56 = vld [vmem:[%s7190_s1 + $0xd4] ss:$8 sps:$4 sm:$0xff]   ;;  %v4373_v7 = vcombine.low %v5901_v51, %v4217_v52  ;;  %s194_s26 = scalar_lea.vmem %s7192_s3, %s4933_s23 }
  0x1a   : > { %2503 = vmatprep.subr.bf16.mxu0 %v4991_v21  ;;  %v5039_v57 = vld [vmem:[%s7190_s1 + $0x754] ss:$8 sps:$4 sm:$0xff]   ;;  %v5041_v58 = vld [vmem:[%s7190_s1 + $0xd0] ss:$8 sps:$4 sm:$0xff]   ;;  %v5043_v60 = vld [vmem:[%s7190_s1 + $0xe4] ss:$8 sps:$4 sm:$0xff]  }
  0x1b   : > { %2525 = vmatprep.mubr.bf16.mxu0 %v4374_v53  ;;  %v5042_v59 = vld [vmem:[%s7190_s1 + $0x750] ss:$8 sps:$4 sm:$0xff]   ;;  %v5045_v61 = vld [vmem:[%s7190_s1 + $0x764] ss:$8 sps:$4 sm:$0xff]   ;;  %v5047_v62 = vld [vmem:[%s7190_s1 + $0xe0] ss:$8 sps:$4 sm:$0xff]  }
  0x1c   : > { %1171 = vmatpush1.bf16.msra.mxu1 %v4993_v22  ;;  %v5048_v63 = vld [vmem:[%s7190_s1 + $0x760] ss:$8 sps:$4 sm:$0xff]   ;;  %v5049_v0 = vld [vmem:[%s7190_s1 + $0xf4] ss:$8 sps:$4 sm:$0xff]   ;;  %v5053_v2 = vld [vmem:[%s7190_s1 + $0xf0] ss:$8 sps:$4 sm:$0xff]  }
  0x1d   : > { %2504 = vmatpush1.bf16.msra.mxu0 %v4994_v23  ;;  %1172 = vmatprep.subr.bf16.mxu1 %v4995_v24  ;;  %v5051_v1 = vld [vmem:[%s7190_s1 + $0x774] ss:$8 sps:$4 sm:$0xff]   ;;  %v5054_v3 = vld [vmem:[%s7190_s1 + $0x770] ss:$8 sps:$4 sm:$0xff]   ;;  %v5060_v4 = vld [vmem:[%s7190_s1 + $0x104] ss:$8 sps:$4 sm:$0xff]  }
  0x1e   : > { %2505 = vmatprep.subr.bf16.mxu0 %v4997_v25  ;;  %v5065_v5 = vld [vmem:[%s7190_s1 + $0x784] ss:$8 sps:$4 sm:$0xff]   ;;  %v5058_v8 = vld [vmem:[%s7190_s1 + $0x100] ss:$8 sps:$4 sm:$0xff]   ;;  %v5068_v10 = vld [vmem:[%s7190_s1 + $0x114] ss:$8 sps:$4 sm:$0xff]  }
  0x1f   : > { %v5055_v6 = vld [vmem:[%s5882_s17] ss:$36 sps:$4 sm:$0xff]   ;;  %v5071_v11 = vld [vmem:[%s7190_s1 + $0x794] ss:$8 sps:$4 sm:$0xff]   ;;  %v5066_v12 = vld [vmem:[%s7190_s1 + $0x110] ss:$8 sps:$4 sm:$0xff]  }
  0x20   : > { %1173 = vmatpush1.bf16.msra.mxu1 %v4999_v26  ;;  %v5063_v9 = vld [vmem:[%s7190_s1 + $0x780] ss:$8 sps:$4 sm:$0xff]   ;;  %v5069_v13 = vld [vmem:[%s7190_s1 + $0x790] ss:$8 sps:$4 sm:$0xff]   ;;  %v5074_v14 = vld [vmem:[%s7190_s1 + $0x124] ss:$8 sps:$4 sm:$0xff]  }
  0x21   : > { %2506 = vmatpush1.bf16.msra.mxu0 %v5000_v27  ;;  %1174 = vmatprep.subr.bf16.mxu1 %v5001_v28  ;;  %v5077_v15 = vld [vmem:[%s7190_s1 + $0x7a4] ss:$8 sps:$4 sm:$0xff]   ;;  %v5072_v16 = vld [vmem:[%s7190_s1 + $0x120] ss:$8 sps:$4 sm:$0xff]   ;;  %v5080_v18 = vld [vmem:[%s7190_s1 + $0x134] ss:$8 sps:$4 sm:$0xff]  }
  0x22   : > { %2507 = vmatprep.subr.bf16.mxu0 %v5003_v29  ;;  %v5075_v17 = vld [vmem:[%s7190_s1 + $0x7a0] ss:$8 sps:$4 sm:$0xff]   ;;  %v5083_v19 = vld [vmem:[%s7190_s1 + $0x7b4] ss:$8 sps:$4 sm:$0xff]   ;;  %v5078_v20 = vld [vmem:[%s7190_s1 + $0x130] ss:$8 sps:$4 sm:$0xff]  }
  0x23   : > { %v5081_v21 = vld [vmem:[%s7190_s1 + $0x7b0] ss:$8 sps:$4 sm:$0xff]   ;;  %v5086_v22 = vld [vmem:[%s7190_s1 + $0x144] ss:$8 sps:$4 sm:$0xff]   ;;  %v5084_v24 = vld [vmem:[%s7190_s1 + $0x140] ss:$8 sps:$4 sm:$0xff]  }
  0x24   : > { %1175 = vmatpush1.bf16.msra.mxu1 %v5005_v30  ;;  %v5089_v23 = vld [vmem:[%s7190_s1 + $0x7c4] ss:$8 sps:$4 sm:$0xff]   ;;  %v5087_v25 = vld [vmem:[%s7190_s1 + $0x7c0] ss:$8 sps:$4 sm:$0xff]   ;;  %v5092_v26 = vld [vmem:[%s7190_s1 + $0x154] ss:$8 sps:$4 sm:$0xff]  }
  0x25   : > { %2508 = vmatpush1.bf16.msra.mxu0 %v5006_v31  ;;  %1176 = vmatprep.subr.bf16.mxu1 %v5007_v32  ;;  %v5095_v27 = vld [vmem:[%s7190_s1 + $0x7d4] ss:$8 sps:$4 sm:$0xff]   ;;  %v6016_v28 = vld [vmem:[%s5882_s17 + $0x48] sm:$0xff]  ;;  %v5090_v30 = vld [vmem:[%s7190_s1 + $0x150] ss:$8 sps:$4 sm:$0xff]  }
  0x26   : > { %2509 = vmatprep.subr.bf16.mxu0 %v5009_v33  ;;  %v4222_v29 = vld [vmem:[%s5882_s17 + $0x7c] sm:$0xff]  ;;  %v5093_v31 = vld [vmem:[%s7190_s1 + $0x7d0] ss:$8 sps:$4 sm:$0xff]   ;;  %v4058_v32 = vcombine.high %v6016_v28, %v6016_v28  ;;  %v5110_v48 = vld [vmem:[%s7190_s1 + $0x184] ss:$8 sps:$4 sm:$0xff]  }
  0x27   : > { %v4383_v33 = vcombine.high %v4222_v29, %v4222_v29  ;;  %v5111_v52 = vld [vmem:[%s7190_s1 + $0x800] ss:$8 sps:$4 sm:$0xff]   ;;  %v5116_v53 = vld [vmem:[%s7190_s1 + $0x194] ss:$8 sps:$4 sm:$0xff]  }
  0x28   : > { %1177 = vmatpush1.bf16.msra.mxu1 %v5011_v34  ;;  %v4057_v34 = vcombine.low %v6016_v28, %v6016_v28 }
  0x29   : > { %2510 = vmatpush1.bf16.msra.mxu0 %v5012_v35  ;;  %1178 = vmatprep.subr.bf16.mxu1 %v5013_v36  ;;  %v4382_v35 = vcombine.low %v4222_v29, %v4222_v29  ;;  %v5098_v36 = vld [vmem:[%s7190_s1 + $0x164] ss:$8 sps:$4 sm:$0xff]  }
  0x2a   : > { %2511 = vmatprep.subr.bf16.mxu0 %v5015_v37  ;;  %v5101_v37 = vld [vmem:[%s7190_s1 + $0x7e4] ss:$8 sps:$4 sm:$0xff]  }
  0x2c   : > { %1179 = vmatpush1.bf16.msra.mxu1 %v5017_v38  ;;  %v5096_v38 = vld [vmem:[%s7190_s1 + $0x160] ss:$8 sps:$4 sm:$0xff]  }
  0x2d   : > { %2512 = vmatpush1.bf16.msra.mxu0 %v5018_v39  ;;  %1180 = vmatprep.subr.bf16.mxu1 %v5019_v40  ;;  %v5099_v39 = vld [vmem:[%s7190_s1 + $0x7e0] ss:$8 sps:$4 sm:$0xff]   ;;  %v5104_v40 = vld [vmem:[%s7190_s1 + $0x174] ss:$8 sps:$4 sm:$0xff]  }
  0x2e   : > { %2513 = vmatprep.subr.bf16.mxu0 %v5021_v41  ;;  %v5107_v41 = vld [vmem:[%s7190_s1 + $0x7f4] ss:$8 sps:$4 sm:$0xff]  }
  0x30   : > { %1181 = vmatpush1.bf16.msra.mxu1 %v5023_v42  ;;  %v5162_v42 = vld [vmem:[%s5882_s17 + $0xc] ss:$36 sps:$4 sm:$0xff]  }
  0x31   : > { %2514 = vmatpush1.bf16.msra.mxu0 %v5024_v43  ;;  %1182 = vmatprep.subr.bf16.mxu1 %v5025_v44  ;;  %v6049_v43 = vld [vmem:[%s5882_s17 + $0x3c] sm:$0xff] }
  0x32   : > { %2515 = vmatprep.subr.bf16.mxu0 %v5027_v45  ;;  %v6052_v44 = vld [vmem:[%s5882_s17 + $0x60] sm:$0xff]  ;;  %v5102_v45 = vld [vmem:[%s7190_s1 + $0x170] ss:$8 sps:$4 sm:$0xff]  }
  0x34   : > { %1183 = vmatpush1.bf16.msra.mxu1 %v5029_v46  ;;  %v5105_v46 = vld [vmem:[%s7190_s1 + $0x7f0] ss:$8 sps:$4 sm:$0xff]  }
  0x35   : > { %2516 = vmatpush1.bf16.msra.mxu0 %v5030_v47  ;;  %1184 = vmatprep.subr.bf16.mxu1 %v5031_v49  ;;  %v4376_v47 = vcombine.high %v6049_v43, %v6052_v44  ;;  %v5113_v49 = vld [vmem:[%s7190_s1 + $0x804] ss:$8 sps:$4 sm:$0xff]  }
  0x36   : > { %2517 = vmatprep.subr.bf16.mxu0 %v5033_v50  ;;  %v5108_v50 = vld [vmem:[%s7190_s1 + $0x180] ss:$8 sps:$4 sm:$0xff]  }
  0x38   : > { %1185 = vmatpush1.bf16.msra.mxu1 %v5035_v54  ;;  %v5119_v54 = vld [vmem:[%s7190_s1 + $0x814] ss:$8 sps:$4 sm:$0xff]  }
  0x39   : > { %2518 = vmatpush1.bf16.msra.mxu0 %v5036_v55  ;;  %1186 = vmatprep.subr.bf16.mxu1 %v5037_v56  ;;  %v5114_v55 = vld [vmem:[%s7190_s1 + $0x190] ss:$8 sps:$4 sm:$0xff]  }
  0x3a   : > { %2519 = vmatprep.subr.bf16.mxu0 %v5039_v57  ;;  %v5117_v56 = vld [vmem:[%s7190_s1 + $0x810] ss:$8 sps:$4 sm:$0xff]   ;;  %v5122_v57 = vld [vmem:[%s7190_s1 + $0x1a4] ss:$8 sps:$4 sm:$0xff]  }
  0x3c   : > { %1187 = vmatpush1.bf16.msra.mxu1 %v5041_v58  ;;  %v5125_v58 = vld [vmem:[%s7190_s1 + $0x824] ss:$8 sps:$4 sm:$0xff]  }
  0x3d   : > { %2520 = vmatpush1.bf16.msra.mxu0 %v5042_v59  ;;  %1188 = vmatprep.subr.bf16.mxu1 %v5043_v60  ;;  %v5120_v59 = vld [vmem:[%s7190_s1 + $0x1a0] ss:$8 sps:$4 sm:$0xff]  }
  0x3e   : > { %2521 = vmatprep.subr.bf16.mxu0 %v5045_v61  ;;  %v5123_v60 = vld [vmem:[%s7190_s1 + $0x820] ss:$8 sps:$4 sm:$0xff]   ;;  %v5128_v61 = vld [vmem:[%s7190_s1 + $0x1b4] ss:$8 sps:$4 sm:$0xff]  }
  0x40   : > { %1189 = vmatpush1.bf16.msra.mxu1 %v5047_v62  ;;  %v5131_v62 = vld [vmem:[%s7190_s1 + $0x834] ss:$8 sps:$4 sm:$0xff]  }
  0x41   : > { %2522 = vmatpush1.bf16.msra.mxu0 %v5048_v63  ;;  %1190 = vmatprep.subr.bf16.mxu1 %v5049_v0  ;;  %v5126_v63 = vld [vmem:[%s7190_s1 + $0x1b0] ss:$8 sps:$4 sm:$0xff]  }
  0x42   : > { %2523 = vmatprep.subr.bf16.mxu0 %v5051_v1  ;;  %v5129_v0 = vld [vmem:[%s7190_s1 + $0x830] ss:$8 sps:$4 sm:$0xff]   ;;  %v5134_v1 = vld [vmem:[%s7190_s1 + $0x1c4] ss:$8 sps:$4 sm:$0xff]  }
  0x44   : > { %1191 = vmatpush1.bf16.msra.mxu1 %v5053_v2  ;;  %v5137_v2 = vld [vmem:[%s7190_s1 + $0x844] ss:$8 sps:$4 sm:$0xff]  }
  0x45   : > { %2524 = vmatpush1.bf16.msra.mxu0 %v5054_v3  ;;  %1211 = vmatprep.subr.bf16.mxu1 %v5060_v4  ;;  %v5132_v3 = vld [vmem:[%s7190_s1 + $0x1c0] ss:$8 sps:$4 sm:$0xff]  }
  0x46   : > { %2544 = vmatprep.subr.bf16.mxu0 %v5065_v5  ;;  %v5135_v4 = vld [vmem:[%s7190_s1 + $0x840] ss:$8 sps:$4 sm:$0xff]   ;;  %v5140_v5 = vld [vmem:[%s7190_s1 + $0x1d4] ss:$8 sps:$4 sm:$0xff]  }
  0x47   : > { %1193 = vmatmul.mubr.bf16.vlgmr.msra.gmra.mrb[0].mxu1 %v5055_v6  ;;  %v5143_v6 = vld [vmem:[%s7190_s1 + $0x854] ss:$8 sps:$4 sm:$0xff]  }
  0x48   : > { %2526 = vmatmul.mubr.bf16.vlgmr.msra.gmra.mrb[0].mxu0 %v4373_v7  ;;  %1212 = vmatpush1.bf16.msra.mxu1 %v5058_v8  ;;  %v5138_v7 = vld [vmem:[%s7190_s1 + $0x1d0] ss:$8 sps:$4 sm:$0xff]  }
  0x49   : > { %2545 = vmatpush1.bf16.msra.mxu0 %v5063_v9  ;;  %1213 = vmatprep.subr.bf16.mxu1 %v5068_v10  ;;  %v5141_v8 = vld [vmem:[%s7190_s1 + $0x850] ss:$8 sps:$4 sm:$0xff]   ;;  %v5150_v9 = vld [vmem:[%s7190_s1 + $0x1e4] ss:$8 sps:$4 sm:$0xff]  }
  0x4a   : > { %2546 = vmatprep.subr.bf16.mxu0 %v5071_v11  ;;  %1202 = vmatprep.mubr.bf16.mxu1 %v4058_v32  ;;  %v5153_v10 = vld [vmem:[%s7190_s1 + $0x864] ss:$8 sps:$4 sm:$0xff]   ;;  %v5148_v11 = vld [vmem:[%s7190_s1 + $0x1e0] ss:$8 sps:$4 sm:$0xff]  }
  0x4b   : > { %2535 = vmatprep.mubr.bf16.mxu0 %v4383_v33  ;;  %v5181_v32 = vld [vmem:[%s7190_s1 + $0x224] ss:$8 sps:$4 sm:$0xff]  }
  0x4c   : > { %1214 = vmatpush1.bf16.msra.mxu1 %v5066_v12  ;;  %v5151_v12 = vld [vmem:[%s7190_s1 + $0x860] ss:$8 sps:$4 sm:$0xff]   ;;  %v5184_v33 = vld [vmem:[%s7190_s1 + $0x8a4] ss:$8 sps:$4 sm:$0xff]  }
  0x4d   : > { %2547 = vmatpush1.bf16.msra.mxu0 %v5069_v13  ;;  %1215 = vmatprep.subr.bf16.mxu1 %v5074_v14  ;;  %v5156_v13 = vld [vmem:[%s7190_s1 + $0x1f4] ss:$8 sps:$4 sm:$0xff]  }
  0x4e   : > { %2548 = vmatprep.subr.bf16.mxu0 %v5077_v15  ;;  %v5159_v14 = vld [vmem:[%s7190_s1 + $0x874] ss:$8 sps:$4 sm:$0xff]   ;;  %v5154_v15 = vld [vmem:[%s7190_s1 + $0x1f0] ss:$8 sps:$4 sm:$0xff]  }
  0x4f   : > { %1203 = vmatmul.mubr.bf16.gmra.mrb[4].mxu1 %v4057_v34  ;;  %v5179_v34 = vld [vmem:[%s7190_s1 + $0x220] ss:$8 sps:$4 sm:$0xff]  }
  0x50   : > { %1216 = vmatpush1.bf16.msra.mxu1 %v5072_v16  ;;  %2536 = vmatmul.mubr.bf16.gmra.mrb[4].mxu0 %v4382_v35  ;;  %v5157_v16 = vld [vmem:[%s7190_s1 + $0x870] ss:$8 sps:$4 sm:$0xff]  }
  0x51   : > { %2549 = vmatpush1.bf16.msra.mxu0 %v5075_v17  ;;  %1217 = vmatprep.subr.bf16.mxu1 %v5080_v18  ;;  %v5165_v17 = vld [vmem:[%s7190_s1 + $0x204] ss:$8 sps:$4 sm:$0xff]  }
  0x52   : > { %2550 = vmatprep.subr.bf16.mxu0 %v5083_v19  ;;  %1243 = vmatprep.mubr.bf16.mxu1 %v5162_v42  ;;  %v5160_v18 = vld [vmem:[%s5882_s17 + $0x8] ss:$36 sps:$4 sm:$0xff]   ;;  %v5185_v42 = vld [vmem:[%s7190_s1 + $0x230] ss:$8 sps:$4 sm:$0xff]  }
  0x53   : > { %2576 = vmatprep.mubr.bf16.mxu0 %v4376_v47  ;;  %v5170_v19 = vld [vmem:[%s7190_s1 + $0x884] ss:$8 sps:$4 sm:$0xff]   ;;  %v5191_v47 = vld [vmem:[%s7190_s1 + $0x240] ss:$8 sps:$4 sm:$0xff]  }
  0x54   : > { %1218 = vmatpush1.bf16.msra.mxu1 %v5078_v20  ;;  %v5163_v20 = vld [vmem:[%s7190_s1 + $0x200] ss:$8 sps:$4 sm:$0xff]  }
  0x55   : > { %2551 = vmatpush1.bf16.msra.mxu0 %v5081_v21  ;;  %1219 = vmatprep.subr.bf16.mxu1 %v5086_v22  ;;  %v4375_v21 = vcombine.low %v6049_v43, %v6052_v44  ;;  %v6171_v22 = vld [vmem:[%s5882_s17 + $0x50] sm:$0xff] }
  0x56   : > { %2552 = vmatprep.subr.bf16.mxu0 %v5089_v23  ;;  %v4223_v23 = vld [vmem:[%s5882_s17 + $0x84] sm:$0xff]  ;;  %v4059_v35 = vcombine.low %v6171_v22, %v6171_v22  ;;  %v5188_v44 = vld [vmem:[%s7190_s1 + $0x8b0] ss:$8 sps:$4 sm:$0xff]  }
  0x57   : > { %v4385_v29 = vcombine.high %v4223_v23, %v4223_v23 }
  0x58   : > { %1220 = vmatpush1.bf16.msra.mxu1 %v5084_v24  ;;  %v5168_v24 = vld [vmem:[%s7190_s1 + $0x880] ss:$8 sps:$4 sm:$0xff]  }
  0x59   : > { %2553 = vmatpush1.bf16.msra.mxu0 %v5087_v25  ;;  %1221 = vmatprep.subr.bf16.mxu1 %v5092_v26  ;;  %v5173_v25 = vld [vmem:[%s7190_s1 + $0x214] ss:$8 sps:$4 sm:$0xff]  }
  0x5a   : > { %2554 = vmatprep.subr.bf16.mxu0 %v5095_v27  ;;  %v5176_v26 = vld [vmem:[%s7190_s1 + $0x894] ss:$8 sps:$4 sm:$0xff]   ;;  %v4060_v27 = vcombine.high %v6171_v22, %v6171_v22 }
  0x5c   : > { %1222 = vmatpush1.bf16.msra.mxu1 %v5090_v30  ;;  %v5171_v30 = vld [vmem:[%s7190_s1 + $0x210] ss:$8 sps:$4 sm:$0xff]  }
  0x5d   : > { %2555 = vmatpush1.bf16.msra.mxu0 %v5093_v31  ;;  %1223 = vmatprep.subr.bf16.mxu1 %v5098_v36  ;;  %v5174_v31 = vld [vmem:[%s7190_s1 + $0x890] ss:$8 sps:$4 sm:$0xff]   ;;  %v5182_v36 = vld [vmem:[%s7190_s1 + $0x8a0] ss:$8 sps:$4 sm:$0xff]  }
  0x5e   : > { %2556 = vmatprep.subr.bf16.mxu0 %v5101_v37  ;;  %v4384_v37 = vcombine.low %v4223_v23, %v4223_v23  ;;  %v5253_v23 = vld [vmem:[%s7190_s1 + $0x954] ss:$8 sps:$4 sm:$0xff]  }
  0x60   : > { %1224 = vmatpush1.bf16.msra.mxu1 %v5096_v38  ;;  %v6206_v38 = vld [vmem:[%s5882_s17 + $0x10] sm:$0xff] }
  0x61   : > { %2557 = vmatpush1.bf16.msra.mxu0 %v5099_v39  ;;  %1225 = vmatprep.subr.bf16.mxu1 %v5104_v40  ;;  %v5187_v39 = vld [vmem:[%s7190_s1 + $0x234] ss:$8 sps:$4 sm:$0xff]  }
  0x62   : > { %2558 = vmatprep.subr.bf16.mxu0 %v5107_v41  ;;  %v5190_v40 = vld [vmem:[%s7190_s1 + $0x8b4] ss:$8 sps:$4 sm:$0xff]   ;;  %v4053_v41 = vcombine.high %v6206_v38, %v5901_v51  ;;  %v5196_v51 = vld [vmem:[%s7190_s1 + $0x8c4] ss:$8 sps:$4 sm:$0xff]  }
  0x64   : > { %1226 = vmatpush1.bf16.msra.mxu1 %v5102_v45  ;;  %v5193_v45 = vld [vmem:[%s7190_s1 + $0x244] ss:$8 sps:$4 sm:$0xff]  }
  0x65   : > { %2559 = vmatpush1.bf16.msra.mxu0 %v5105_v46  ;;  %1227 = vmatprep.subr.bf16.mxu1 %v5110_v48  ;;  %v5698_v46 = vmov 0   ;;  %v5194_v48 = vld [vmem:[%s7190_s1 + $0x8c0] ss:$8 sps:$4 sm:$0xff]  }
  0x66   : > { %2560 = vmatprep.subr.bf16.mxu0 %v5113_v49  ;;  %v5199_v49 = vld [vmem:[%s7190_s1 + $0x254] ss:$8 sps:$4 sm:$0xff]  }
  0x68   : > { %1228 = vmatpush1.bf16.msra.mxu1 %v5108_v50  ;;  %v5202_v50 = vld [vmem:[%s7190_s1 + $0x8d4] ss:$8 sps:$4 sm:$0xff]  }
  0x69   : > { %2561 = vmatpush1.bf16.msra.mxu0 %v5111_v52  ;;  %1229 = vmatprep.subr.bf16.mxu1 %v5116_v53  ;;  %v5197_v52 = vld [vmem:[%s7190_s1 + $0x250] ss:$8 sps:$4 sm:$0xff]  }
  0x6a   : > { %2562 = vmatprep.subr.bf16.mxu0 %v5119_v54  ;;  %v5200_v53 = vld [vmem:[%s7190_s1 + $0x8d0] ss:$8 sps:$4 sm:$0xff]   ;;  %v5207_v54 = vld [vmem:[%s7190_s1 + $0x264] ss:$8 sps:$4 sm:$0xff]  }
  0x6c   : > { %1230 = vmatpush1.bf16.msra.mxu1 %v5114_v55  ;;  %v5210_v55 = vld [vmem:[%s7190_s1 + $0x8e4] ss:$8 sps:$4 sm:$0xff]  }
  0x6d   : > { %2563 = vmatpush1.bf16.msra.mxu0 %v5117_v56  ;;  %1231 = vmatprep.subr.bf16.mxu1 %v5122_v57  ;;  %v5205_v56 = vld [vmem:[%s7190_s1 + $0x260] ss:$8 sps:$4 sm:$0xff]  }
  0x6e   : > { %2564 = vmatprep.subr.bf16.mxu0 %v5125_v58  ;;  %v5208_v57 = vld [vmem:[%s7190_s1 + $0x8e0] ss:$8 sps:$4 sm:$0xff]   ;;  %v5213_v58 = vld [vmem:[%s7190_s1 + $0x274] ss:$8 sps:$4 sm:$0xff]  }
  0x70   : > { %1232 = vmatpush1.bf16.msra.mxu1 %v5120_v59  ;;  %v5216_v59 = vld [vmem:[%s7190_s1 + $0x8f4] ss:$8 sps:$4 sm:$0xff]  }
  0x71   : > { %2565 = vmatpush1.bf16.msra.mxu0 %v5123_v60  ;;  %1233 = vmatprep.subr.bf16.mxu1 %v5128_v61  ;;  %v5211_v60 = vld [vmem:[%s7190_s1 + $0x270] ss:$8 sps:$4 sm:$0xff]  }
  0x72   : > { %2566 = vmatprep.subr.bf16.mxu0 %v5131_v62  ;;  %v5214_v61 = vld [vmem:[%s7190_s1 + $0x8f0] ss:$8 sps:$4 sm:$0xff]   ;;  %v5219_v62 = vld [vmem:[%s7190_s1 + $0x284] ss:$8 sps:$4 sm:$0xff]  }
  0x74   : > { %1234 = vmatpush1.bf16.msra.mxu1 %v5126_v63  ;;  %v5222_v63 = vld [vmem:[%s7190_s1 + $0x904] ss:$8 sps:$4 sm:$0xff]  }
  0x75   : > { %2567 = vmatpush1.bf16.msra.mxu0 %v5129_v0  ;;  %1235 = vmatprep.subr.bf16.mxu1 %v5134_v1  ;;  %v5217_v0 = vld [vmem:[%s7190_s1 + $0x280] ss:$8 sps:$4 sm:$0xff]  }
  0x76   : > { %2568 = vmatprep.subr.bf16.mxu0 %v5137_v2  ;;  %v5223_v1 = vld [vmem:[%s5882_s17 + $0x44] ss:$36 sps:$4 sm:$0xff]  }
  0x77   : > { %v5220_v2 = vld [vmem:[%s7190_s1 + $0x900] ss:$8 sps:$4 sm:$0xff]  }
  0x78   : > { %1236 = vmatpush1.bf16.msra.mxu1 %v5132_v3  ;;  %v5226_v3 = vld [vmem:[%s7190_s1 + $0x294] ss:$8 sps:$4 sm:$0xff]  }
  0x79   : > { %2569 = vmatpush1.bf16.msra.mxu0 %v5135_v4  ;;  %1237 = vmatprep.subr.bf16.mxu1 %v5140_v5  ;;  %v5229_v4 = vld [vmem:[%s7190_s1 + $0x914] ss:$8 sps:$4 sm:$0xff]   ;;  %v5224_v5 = vld [vmem:[%s7190_s1 + $0x290] ss:$8 sps:$4 sm:$0xff]  }
  0x7a   : > { %2570 = vmatprep.subr.bf16.mxu0 %v5143_v6  ;;  %v5227_v6 = vld [vmem:[%s7190_s1 + $0x910] ss:$8 sps:$4 sm:$0xff]  }
  0x7c   : > { %1238 = vmatpush1.bf16.msra.mxu1 %v5138_v7  ;;  %v5232_v7 = vld [vmem:[%s7190_s1 + $0x2a4] ss:$8 sps:$4 sm:$0xff]  }
  0x7d   : > { %2571 = vmatpush1.bf16.msra.mxu0 %v5141_v8  ;;  %1239 = vmatprep.subr.bf16.mxu1 %v5150_v9  ;;  %v5235_v8 = vld [vmem:[%s7190_s1 + $0x924] ss:$8 sps:$4 sm:$0xff]   ;;  %v5230_v9 = vld [vmem:[%s7190_s1 + $0x2a0] ss:$8 sps:$4 sm:$0xff]  }
  0x7e   : > { %2572 = vmatprep.subr.bf16.mxu0 %v5153_v10  ;;  %v5306_v10 = vld [vmem:[%s5882_s17 + $0x8c] ss:$0 sps:$4 sm:$0xff]  }
  0x80   : > { %1240 = vmatpush1.bf16.msra.mxu1 %v5148_v11  ;;  %v6308_v11 = vld [vmem:[%s5882_s17 + $0x6c] sm:$0xff] }
  0x81   : > { %2573 = vmatpush1.bf16.msra.mxu0 %v5151_v12  ;;  %1241 = vmatprep.subr.bf16.mxu1 %v5156_v13  ;;  %v5233_v12 = vld [vmem:[%s7190_s1 + $0x920] ss:$8 sps:$4 sm:$0xff]   ;;  %v5238_v13 = vld [vmem:[%s7190_s1 + $0x2b4] ss:$8 sps:$4 sm:$0xff]  }
  0x82   : > { %2574 = vmatprep.subr.bf16.mxu0 %v5159_v14  ;;  %v5241_v14 = vld [vmem:[%s7190_s1 + $0x934] ss:$8 sps:$4 sm:$0xff]  }
  0x84   : > { %1242 = vmatpush1.bf16.msra.mxu1 %v5154_v15  ;;  %v4691_v15 = vcombine.high %v6016_v28, %v6308_v11  ;;  %v5247_v28 = vld [vmem:[%s7190_s1 + $0x944] ss:$8 sps:$4 sm:$0xff]  }
  0x85   : > { %2575 = vmatpush1.bf16.msra.mxu0 %v5157_v16  ;;  %1262 = vmatprep.subr.bf16.mxu1 %v5165_v17  ;;  %v5236_v16 = vld [vmem:[%s7190_s1 + $0x2b0] ss:$8 sps:$4 sm:$0xff]  }
  0x86   : > { %2595 = vmatprep.subr.bf16.mxu0 %v5170_v19  ;;  %v5239_v17 = vld [vmem:[%s7190_s1 + $0x930] ss:$8 sps:$4 sm:$0xff]   ;;  %v5242_v19 = vld [vmem:[%s7190_s1 + $0x2c0] ss:$8 sps:$4 sm:$0xff]  }
  0x87   : > { %1244 = vmatmul.mubr.bf16.vlgmr.msra.gmra.mrb[0].mxu1 %v5160_v18  ;;  %v5244_v18 = vld [vmem:[%s7190_s1 + $0x2c4] ss:$8 sps:$4 sm:$0xff]  }
  0x88   : > { %2577 = vmatmul.mubr.bf16.vlgmr.msra.gmra.mrb[0].mxu0 %v4375_v21  ;;  %1263 = vmatpush1.bf16.msra.mxu1 %v5163_v20  ;;  %v5245_v20 = vld [vmem:[%s7190_s1 + $0x940] ss:$8 sps:$4 sm:$0xff]   ;;  %v5250_v21 = vld [vmem:[%s7190_s1 + $0x2d4] ss:$8 sps:$4 sm:$0xff]  }
  0x89   : > { %2596 = vmatpush1.bf16.msra.mxu0 %v5168_v24  ;;  %1264 = vmatprep.subr.bf16.mxu1 %v5173_v25  ;;  %v5248_v24 = vld [vmem:[%s7190_s1 + $0x2d0] ss:$8 sps:$4 sm:$0xff]  }
  0x8a   : > { %2597 = vmatprep.subr.bf16.mxu0 %v5176_v26  ;;  %1253 = vmatprep.mubr.bf16.mxu1 %v4060_v27  ;;  %v5251_v25 = vld [vmem:[%s7190_s1 + $0x950] ss:$8 sps:$4 sm:$0xff]   ;;  %v5256_v26 = vld [vmem:[%s7190_s1 + $0x2e4] ss:$8 sps:$4 sm:$0xff]  }
  0x8b   : > { %2586 = vmatprep.mubr.bf16.mxu0 %v4385_v29  ;;  %v5259_v27 = vld [vmem:[%s7190_s1 + $0x964] ss:$8 sps:$4 sm:$0xff]   ;;  %v5254_v29 = vld [vmem:[%s7190_s1 + $0x2e0] ss:$8 sps:$4 sm:$0xff]  }
  0x8c   : > { %1265 = vmatpush1.bf16.msra.mxu1 %v5171_v30  ;;  %v5257_v30 = vld [vmem:[%s7190_s1 + $0x960] ss:$8 sps:$4 sm:$0xff]  }
  0x8d   : > { %2598 = vmatpush1.bf16.msra.mxu0 %v5174_v31  ;;  %1266 = vmatprep.subr.bf16.mxu1 %v5181_v32  ;;  %v5262_v31 = vld [vmem:[%s7190_s1 + $0x2f4] ss:$8 sps:$4 sm:$0xff]  }
  0x8e   : > { %2599 = vmatprep.subr.bf16.mxu0 %v5184_v33  ;;  %v5265_v32 = vld [vmem:[%s7190_s1 + $0x974] ss:$8 sps:$4 sm:$0xff]   ;;  %v5260_v33 = vld [vmem:[%s7190_s1 + $0x2f0] ss:$8 sps:$4 sm:$0xff]  }
  0x8f   : > { %1254 = vmatmul.mubr.bf16.gmra.mrb[8].mxu1 %v4059_v35  ;;  %v5270_v35 = vld [vmem:[%s7190_s1 + $0x304] ss:$8 sps:$4 sm:$0xff]  }
  0x90   : > { %2587 = vmatmul.mubr.bf16.gmra.mrb[8].mxu0 %v4384_v37  ;;  %1267 = vmatpush1.bf16.msra.mxu1 %v5179_v34  ;;  %v5263_v34 = vld [vmem:[%s7190_s1 + $0x970] ss:$8 sps:$4 sm:$0xff]  }
  0x91   : > { %2600 = vmatpush1.bf16.msra.mxu0 %v5182_v36  ;;  %1268 = vmatprep.subr.bf16.mxu1 %v5187_v39  ;;  %v5273_v36 = vld [vmem:[%s7190_s1 + $0x984] ss:$8 sps:$4 sm:$0xff]   ;;  %v5667_v37 = vld [vmem:[%s5882_s17 + $0x34] sm:$0xff] }
  0x92   : > { %2601 = vmatprep.subr.bf16.mxu0 %v5190_v40  ;;  %2627 = vmatprep.mubr.bf16.mxu0 %v5698_v46  ;;  %v4052_v39 = vcombine.low %v6206_v38, %v5667_v37  ;;  %v5268_v40 = vld [vmem:[%s7190_s1 + $0x300] ss:$8 sps:$4 sm:$0xff]   ;;  %v5279_v38 = vld [vmem:[%s7190_s1 + $0x994] ss:$8 sps:$4 sm:$0xff]  }
  0x93   : > { %1294 = vmatprep.mubr.bf16.mxu1 %v4053_v41  ;;  %v5271_v41 = vld [vmem:[%s7190_s1 + $0x980] ss:$8 sps:$4 sm:$0xff]  }
  0x94   : > { %1269 = vmatpush1.bf16.msra.mxu1 %v5185_v42  ;;  %v5276_v42 = vld [vmem:[%s7190_s1 + $0x314] ss:$8 sps:$4 sm:$0xff]   ;;  %v5348_v37 = vld [vmem:[%s7190_s1 + $0xa40] ss:$8 sps:$4 sm:$0xff]  }
  0x95   : > { %2602 = vmatpush1.bf16.msra.mxu0 %v5188_v44  ;;  %1270 = vmatprep.subr.bf16.mxu1 %v5193_v45  ;;  %v5668_v44 = vld [vmem:[%s5882_s17 + $0x58] sm:$0xff] }
  0x96   : > { %2603 = vmatprep.subr.bf16.mxu0 %v5196_v51  ;;  %v4062_v45 = vcombine.high %v5668_v44, %v5668_v44  ;;  %v5274_v51 = vld [vmem:[%s7190_s1 + $0x310] ss:$8 sps:$4 sm:$0xff]  }
  0x98   : > { %1271 = vmatpush1.bf16.msra.mxu1 %v5191_v47  ;;  %v5277_v47 = vld [vmem:[%s7190_s1 + $0x990] ss:$8 sps:$4 sm:$0xff]  }
  0x99   : > { %2604 = vmatpush1.bf16.msra.mxu0 %v5194_v48  ;;  %1272 = vmatprep.subr.bf16.mxu1 %v5199_v49  ;;  %v5284_v48 = vld [vmem:[%s7190_s1 + $0x324] ss:$8 sps:$4 sm:$0xff]  }
  0x9a   : > { %2605 = vmatprep.subr.bf16.mxu0 %v5202_v50  ;;  %v5287_v49 = vld [vmem:[%s7190_s1 + $0x9a4] ss:$8 sps:$4 sm:$0xff]   ;;  %v5282_v50 = vld [vmem:[%s7190_s1 + $0x320] ss:$8 sps:$4 sm:$0xff]  }
  0x9c   : > { %1273 = vmatpush1.bf16.msra.mxu1 %v5197_v52  ;;  %v4061_v52 = vcombine.low %v5668_v44, %v5668_v44  ;;  %v5362_v44 = vld [vmem:[%s7190_s1 + $0xa64] ss:$8 sps:$4 sm:$0xff]  }
  0x9d   : > { %2606 = vmatpush1.bf16.msra.mxu0 %v5200_v53  ;;  %1274 = vmatprep.subr.bf16.mxu1 %v5207_v54  ;;  %v6412_v53 = vld [vmem:[%s5882_s17 + $0x18] sm:$0xff]  ;;  %v5285_v54 = vld [vmem:[%s7190_s1 + $0x9a0] ss:$8 sps:$4 sm:$0xff]  }
  0x9e   : > { %2607 = vmatprep.subr.bf16.mxu0 %v5210_v55  ;;  %v5290_v55 = vld [vmem:[%s7190_s1 + $0x334] ss:$8 sps:$4 sm:$0xff]  }
  0xa0   : > { %1275 = vmatpush1.bf16.msra.mxu1 %v5205_v56  ;;  %v5293_v56 = vld [vmem:[%s7190_s1 + $0x9b4] ss:$8 sps:$4 sm:$0xff]  }
  0xa1   : > { %2608 = vmatpush1.bf16.msra.mxu0 %v5208_v57  ;;  %1276 = vmatprep.subr.bf16.mxu1 %v5213_v58  ;;  %v4055_v57 = vcombine.high %v6412_v53, %v6049_v43  ;;  %v5288_v58 = vld [vmem:[%s7190_s1 + $0x330] ss:$8 sps:$4 sm:$0xff]   ;;  %v5299_v43 = vld [vmem:[%s7190_s1 + $0x9c4] ss:$8 sps:$4 sm:$0xff]  }
  0xa2   : > { %2609 = vmatprep.subr.bf16.mxu0 %v5216_v59  ;;  %v5291_v59 = vld [vmem:[%s7190_s1 + $0x9b0] ss:$8 sps:$4 sm:$0xff]  }
  0xa4   : > { %1277 = vmatpush1.bf16.msra.mxu1 %v5211_v60  ;;  %v5296_v60 = vld [vmem:[%s7190_s1 + $0x344] ss:$8 sps:$4 sm:$0xff]  }
  0xa5   : > { %2610 = vmatpush1.bf16.msra.mxu0 %v5214_v61  ;;  %1278 = vmatprep.subr.bf16.mxu1 %v5219_v62  ;;  %v5294_v61 = vld [vmem:[%s7190_s1 + $0x340] ss:$8 sps:$4 sm:$0xff]  }
  0xa6   : > { %3628 = vmatprep.subr.bf16.mxu0 %v5222_v63  ;;  %v5297_v62 = vld [vmem:[%s7190_s1 + $0x9c0] ss:$8 sps:$4 sm:$0xff]   ;;  %v5302_v63 = vld [vmem:[%s7190_s1 + $0x354] ss:$8 sps:$4 sm:$0xff]  }
  0xa8   : > { %2628 = vmatmul.mubr.bf16.vlgmr.msra.gmra.mrb[0].mxu0 %v5223_v1  ;;  %1279 = vmatpush1.bf16.msra.mxu1 %v5217_v0  ;;  %v5305_v0 = vld [vmem:[%s7190_s1 + $0x9d4] ss:$8 sps:$4 sm:$0xff]   ;;  %v5300_v1 = vld [vmem:[%s7190_s1 + $0x350] ss:$8 sps:$4 sm:$0xff]  }
  0xa9   : > { %3629 = vmatpush1.bf16.msra.mxu0 %v5220_v2  ;;  %1280 = vmatprep.subr.bf16.mxu1 %v5226_v3  ;;  %v5303_v2 = vld [vmem:[%s7190_s1 + $0x9d0] ss:$8 sps:$4 sm:$0xff]   ;;  %v5309_v3 = vld [vmem:[%s7190_s1 + $0x364] ss:$8 sps:$4 sm:$0xff]  }
  0xaa   : > { %3630 = vmatprep.subr.bf16.mxu0 %v5229_v4  ;;  %2637 = vmatprep.mubr.bf16.mxu0 %v5698_v46  ;;  %v5312_v4 = vld [vmem:[%s7190_s1 + $0x9e4] ss:$8 sps:$4 sm:$0xff]  }
  0xac   : > { %1281 = vmatpush1.bf16.msra.mxu1 %v5224_v5  ;;  %v5307_v5 = vld [vmem:[%s7190_s1 + $0x360] ss:$8 sps:$4 sm:$0xff]  }
  0xad   : > { %3631 = vmatpush1.bf16.msra.mxu0 %v5227_v6  ;;  %1282 = vmatprep.subr.bf16.mxu1 %v5232_v7  ;;  %v5310_v6 = vld [vmem:[%s7190_s1 + $0x9e0] ss:$8 sps:$4 sm:$0xff]   ;;  %v5315_v7 = vld [vmem:[%s7190_s1 + $0x374] ss:$8 sps:$4 sm:$0xff]  }
  0xae   : > { %3632 = vmatprep.subr.bf16.mxu0 %v5235_v8  ;;  %v5318_v8 = vld [vmem:[%s7190_s1 + $0x9f4] ss:$8 sps:$4 sm:$0xff]  }
  0xb0   : > { %2638 = vmatmul.mubr.bf16.gmra.mrb[12].mxu0 %v5306_v10  ;;  %1283 = vmatpush1.bf16.msra.mxu1 %v5230_v9  ;;  %v5313_v9 = vld [vmem:[%s7190_s1 + $0x370] ss:$8 sps:$4 sm:$0xff]  }
  0xb1   : > { %3633 = vmatpush1.bf16.msra.mxu0 %v5233_v12  ;;  %1284 = vmatprep.subr.bf16.mxu1 %v5238_v13  ;;  %v5316_v10 = vld [vmem:[%s7190_s1 + $0x9f0] ss:$8 sps:$4 sm:$0xff]   ;;  %v5321_v12 = vld [vmem:[%s7190_s1 + $0x384] ss:$8 sps:$4 sm:$0xff]  }
  0xb2   : > { %3634 = vmatprep.subr.bf16.mxu0 %v5241_v14  ;;  %3660 = vmatprep.mubr.bf16.mxu0 %v4691_v15  ;;  %v5326_v13 = vld [vmem:[%s7190_s1 + $0xa04] ss:$8 sps:$4 sm:$0xff]   ;;  %v5319_v14 = vld [vmem:[%s7190_s1 + $0x380] ss:$8 sps:$4 sm:$0xff]  }
  0xb3   : > { %v5669_v15 = vld [vmem:[%s5882_s17 + $0x48] sm:$0xff] }
  0xb4   : > { %1285 = vmatpush1.bf16.msra.mxu1 %v5236_v16  ;;  %v4690_v16 = vcombine.low %v5669_v15, %v6308_v11  ;;  %v5327_v11 = vld [vmem:[%s7190_s1 + $0x390] ss:$8 sps:$4 sm:$0xff]  }
  0xb5   : > { %3635 = vmatpush1.bf16.msra.mxu0 %v5239_v17  ;;  %1286 = vmatprep.subr.bf16.mxu1 %v5244_v18  ;;  %v5324_v17 = vld [vmem:[%s7190_s1 + $0xa00] ss:$8 sps:$4 sm:$0xff]   ;;  %v4541_v18 = vld [vmem:[%s5882_s17 + $0x90] sm:$0xff] }
  0xb6   : > { %3636 = vmatprep.subr.bf16.mxu0 %v5247_v28  ;;  %v5329_v28 = vld [vmem:[%s7190_s1 + $0x394] ss:$8 sps:$4 sm:$0xff]   ;;  %v5403_v15 = vld [vmem:[%s7190_s1 + $0x450] ss:$8 sps:$4 sm:$0xff]  }
  0xb8   : > { %1287 = vmatpush1.bf16.msra.mxu1 %v5242_v19  ;;  %v5332_v19 = vld [vmem:[%s7190_s1 + $0xa14] ss:$8 sps:$4 sm:$0xff]  }
  0xb9   : > { %3637 = vmatpush1.bf16.msra.mxu0 %v5245_v20  ;;  %1288 = vmatprep.subr.bf16.mxu1 %v5250_v21  ;;  %v4700_v20 = vcombine.high %v4541_v18, %v4541_v18  ;;  %v5330_v21 = vld [vmem:[%s7190_s1 + $0xa10] ss:$8 sps:$4 sm:$0xff]  }
  0xba   : > { %3638 = vmatprep.subr.bf16.mxu0 %v5253_v23  ;;  %v5335_v23 = vld [vmem:[%s7190_s1 + $0x3a4] ss:$8 sps:$4 sm:$0xff]  }
  0xbc   : > { %1289 = vmatpush1.bf16.msra.mxu1 %v5248_v24  ;;  %v5338_v24 = vld [vmem:[%s7190_s1 + $0xa24] ss:$8 sps:$4 sm:$0xff]  }
  0xbd   : > { %3639 = vmatpush1.bf16.msra.mxu0 %v5251_v25  ;;  %1290 = vmatprep.subr.bf16.mxu1 %v5256_v26  ;;  %v5333_v25 = vld [vmem:[%s7190_s1 + $0x3a0] ss:$8 sps:$4 sm:$0xff]  }
  0xbe   : > { %3640 = vmatprep.subr.bf16.mxu0 %v5259_v27  ;;  %v5336_v26 = vld [vmem:[%s7190_s1 + $0xa20] ss:$8 sps:$4 sm:$0xff]   ;;  %v4699_v27 = vcombine.low %v4541_v18, %v4541_v18  ;;  %v5416_v18 = vld [vmem:[%s7190_s1 + $0xae4] ss:$8 sps:$4 sm:$0xff]  }
  0xc0   : > { %1291 = vmatpush1.bf16.msra.mxu1 %v5254_v29  ;;  %v6519_v29 = vld [vmem:[%s5882_s17 + $0x74] sm:$0xff] }
  0xc1   : > { %3641 = vmatpush1.bf16.msra.mxu0 %v5257_v30  ;;  %1292 = vmatprep.subr.bf16.mxu1 %v5262_v31  ;;  %v5341_v30 = vld [vmem:[%s7190_s1 + $0x3b4] ss:$8 sps:$4 sm:$0xff]  }
  0xc2   : > { %3642 = vmatprep.subr.bf16.mxu0 %v5265_v32  ;;  %v5344_v31 = vld [vmem:[%s7190_s1 + $0xa34] ss:$8 sps:$4 sm:$0xff]   ;;  %v4693_v32 = vcombine.high %v6171_v22, %v6519_v29  ;;  %v5350_v22 = vld [vmem:[%s7190_s1 + $0xa44] ss:$8 sps:$4 sm:$0xff]  }
  0xc4   : > { %1293 = vmatpush1.bf16.msra.mxu1 %v5260_v33  ;;  %v5339_v33 = vld [vmem:[%s7190_s1 + $0x3b0] ss:$8 sps:$4 sm:$0xff]  }
  0xc5   : > { %3643 = vmatpush1.bf16.msra.mxu0 %v5263_v34  ;;  %1313 = vmatprep.subr.bf16.mxu1 %v5270_v35  ;;  %v5342_v34 = vld [vmem:[%s7190_s1 + $0xa30] ss:$8 sps:$4 sm:$0xff]   ;;  %v5347_v35 = vld [vmem:[%s7190_s1 + $0x3c4] ss:$8 sps:$4 sm:$0xff]  }
  0xc6   : > { %3644 = vmatprep.subr.bf16.mxu0 %v5273_v36  ;;  %v5345_v36 = vld [vmem:[%s7190_s1 + $0x3c0] ss:$8 sps:$4 sm:$0xff]  }
  0xc7   : > { %1295 = vmatmul.mubr.bf16.vlgmr.msra.gmra.mrb[0].mxu1 %v4052_v39  ;;  %v5353_v39 = vld [vmem:[%s7190_s1 + $0x3d4] ss:$8 sps:$4 sm:$0xff]  }
  0xc8   : > { %1314 = vmatpush1.bf16.msra.mxu1 %v5268_v40  ;;  %1304 = vmatprep.mubr.bf16.mxu1 %v4062_v45  ;;  %v5356_v40 = vld [vmem:[%s7190_s1 + $0xa54] ss:$8 sps:$4 sm:$0xff]   ;;  %v5357_v45 = vld [vmem:[%s7190_s1 + $0x3e0] ss:$8 sps:$4 sm:$0xff]  }
  0xc9   : > { %3645 = vmatpush1.bf16.msra.mxu0 %v5271_v41  ;;  %1315 = vmatprep.subr.bf16.mxu1 %v5276_v42  ;;  %v5351_v41 = vld [vmem:[%s7190_s1 + $0x3d0] ss:$8 sps:$4 sm:$0xff]  }
  0xca   : > { %3646 = vmatprep.subr.bf16.mxu0 %v5279_v38  ;;  %v5354_v42 = vld [vmem:[%s7190_s1 + $0xa50] ss:$8 sps:$4 sm:$0xff]   ;;  %v5359_v38 = vld [vmem:[%s7190_s1 + $0x3e4] ss:$8 sps:$4 sm:$0xff]  }
  0xcc   : > { %1316 = vmatpush1.bf16.msra.mxu1 %v5274_v51  ;;  %v5360_v51 = vld [vmem:[%s7190_s1 + $0xa60] ss:$8 sps:$4 sm:$0xff]  }
  0xcd   : > { %3647 = vmatpush1.bf16.msra.mxu0 %v5277_v47  ;;  %1317 = vmatprep.subr.bf16.mxu1 %v5284_v48  ;;  %v5365_v47 = vld [vmem:[%s7190_s1 + $0x3f4] ss:$8 sps:$4 sm:$0xff]  }
  0xce   : > { %3648 = vmatprep.subr.bf16.mxu0 %v5287_v49  ;;  %v5368_v48 = vld [vmem:[%s7190_s1 + $0xa74] ss:$8 sps:$4 sm:$0xff]   ;;  %v5363_v49 = vld [vmem:[%s7190_s1 + $0x3f0] ss:$8 sps:$4 sm:$0xff]  }
  0xcf   : > { %1305 = vmatmul.mubr.bf16.gmra.mrb[12].mxu1 %v4061_v52  ;;  %v5373_v52 = vld [vmem:[%s7190_s1 + $0x404] ss:$8 sps:$4 sm:$0xff]  }
  0xd0   : > { %1318 = vmatpush1.bf16.msra.mxu1 %v5282_v50  ;;  %1345 = vmatprep.mubr.bf16.mxu1 %v4055_v57  ;;  %v5366_v50 = vld [vmem:[%s7190_s1 + $0xa70] ss:$8 sps:$4 sm:$0xff]   ;;  %v5371_v57 = vld [vmem:[%s7190_s1 + $0x400] ss:$8 sps:$4 sm:$0xff]  }
  0xd1   : > { %3649 = vmatpush1.bf16.msra.mxu0 %v5285_v54  ;;  %1319 = vmatprep.subr.bf16.mxu1 %v5290_v55  ;;  %v5376_v54 = vld [vmem:[%s7190_s1 + $0xa84] ss:$8 sps:$4 sm:$0xff]   ;;  %v5670_v55 = vld [vmem:[%s5882_s17 + $0x3c] sm:$0xff] }
  0xd2   : > { %3650 = vmatprep.subr.bf16.mxu0 %v5293_v56  ;;  %v4054_v56 = vcombine.low %v6412_v53, %v5670_v55  ;;  %v5382_v53 = vld [vmem:[%s7190_s1 + $0xa94] ss:$8 sps:$4 sm:$0xff]  }
  0xd4   : > { %1320 = vmatpush1.bf16.msra.mxu1 %v5288_v58  ;;  %v5374_v58 = vld [vmem:[%s7190_s1 + $0xa80] ss:$8 sps:$4 sm:$0xff]  }
  0xd5   : > { %3651 = vmatpush1.bf16.msra.mxu0 %v5291_v59  ;;  %1321 = vmatprep.subr.bf16.mxu1 %v5296_v60  ;;  %v5379_v59 = vld [vmem:[%s7190_s1 + $0x414] ss:$8 sps:$4 sm:$0xff]   ;;  %v5671_v60 = vld [vmem:[%s5882_s17 + $0x60] sm:$0xff] }
  0xd6   : > { %3652 = vmatprep.subr.bf16.mxu0 %v5299_v43  ;;  %v4064_v43 = vcombine.high %v5671_v60, %v5671_v60 }
  0xd8   : > { %1322 = vmatpush1.bf16.msra.mxu1 %v5294_v61  ;;  %v5377_v61 = vld [vmem:[%s7190_s1 + $0x410] ss:$8 sps:$4 sm:$0xff]  }
  0xd9   : > { %3653 = vmatpush1.bf16.msra.mxu0 %v5297_v62  ;;  %1323 = vmatprep.subr.bf16.mxu1 %v5302_v63  ;;  %v5380_v62 = vld [vmem:[%s7190_s1 + $0xa90] ss:$8 sps:$4 sm:$0xff]   ;;  %v5387_v63 = vld [vmem:[%s7190_s1 + $0x424] ss:$8 sps:$4 sm:$0xff]  }
  0xda   : > { %3654 = vmatprep.subr.bf16.mxu0 %v5305_v0  ;;  %v5390_v0 = vld [vmem:[%s7190_s1 + $0xaa4] ss:$8 sps:$4 sm:$0xff]  }
  0xdc   : > { %1324 = vmatpush1.bf16.msra.mxu1 %v5300_v1  ;;  %v4063_v1 = vcombine.low %v5671_v60, %v5671_v60 }
  0xdd   : > { %3655 = vmatpush1.bf16.msra.mxu0 %v5303_v2  ;;  %1325 = vmatprep.subr.bf16.mxu1 %v5309_v3  ;;  %v5385_v2 = vld [vmem:[%s7190_s1 + $0x420] ss:$8 sps:$4 sm:$0xff]  }
  0xde   : > { %3656 = vmatprep.subr.bf16.mxu0 %v5312_v4  ;;  %v5388_v3 = vld [vmem:[%s7190_s1 + $0xaa0] ss:$8 sps:$4 sm:$0xff]   ;;  %v5393_v4 = vld [vmem:[%s7190_s1 + $0x434] ss:$8 sps:$4 sm:$0xff]  }
  0xe0   : > { %1326 = vmatpush1.bf16.msra.mxu1 %v5307_v5  ;;  %v5396_v5 = vld [vmem:[%s7190_s1 + $0xab4] ss:$8 sps:$4 sm:$0xff]  }
  0xe1   : > { %3657 = vmatpush1.bf16.msra.mxu0 %v5310_v6  ;;  %1327 = vmatprep.subr.bf16.mxu1 %v5315_v7  ;;  %v5391_v6 = vld [vmem:[%s7190_s1 + $0x430] ss:$8 sps:$4 sm:$0xff]  }
  0xe2   : > { %3658 = vmatprep.subr.bf16.mxu0 %v5318_v8  ;;  %v5394_v7 = vld [vmem:[%s7190_s1 + $0xab0] ss:$8 sps:$4 sm:$0xff]   ;;  %v5399_v8 = vld [vmem:[%s7190_s1 + $0x444] ss:$8 sps:$4 sm:$0xff]  }
  0xe4   : > { %1328 = vmatpush1.bf16.msra.mxu1 %v5313_v9  ;;  %v5402_v9 = vld [vmem:[%s7190_s1 + $0xac4] ss:$8 sps:$4 sm:$0xff]  }
  0xe5   : > { %3659 = vmatpush1.bf16.msra.mxu0 %v5316_v10  ;;  %1329 = vmatprep.subr.bf16.mxu1 %v5321_v12  ;;  %v5397_v10 = vld [vmem:[%s7190_s1 + $0x440] ss:$8 sps:$4 sm:$0xff]  }
  0xe6   : > { %3679 = vmatprep.subr.bf16.mxu0 %v5326_v13  ;;  %v5400_v12 = vld [vmem:[%s7190_s1 + $0xac0] ss:$8 sps:$4 sm:$0xff]   ;;  %v5405_v13 = vld [vmem:[%s7190_s1 + $0x454] ss:$8 sps:$4 sm:$0xff]  }
  0xe8   : > { %3661 = vmatmul.mubr.bf16.vlgmr.msra.gmra.mrb[0].mxu0 %v4690_v16  ;;  %1330 = vmatpush1.bf16.msra.mxu1 %v5319_v14  ;;  %v5408_v14 = vld [vmem:[%s7190_s1 + $0xad4] ss:$8 sps:$4 sm:$0xff]   ;;  %v5406_v16 = vld [vmem:[%s7190_s1 + $0xad0] ss:$8 sps:$4 sm:$0xff]  }
  0xe9   : > { %3680 = vmatpush1.bf16.msra.mxu0 %v5324_v17  ;;  %1331 = vmatprep.subr.bf16.mxu1 %v5329_v28  ;;  %v5413_v17 = vld [vmem:[%s7190_s1 + $0x464] ss:$8 sps:$4 sm:$0xff]   ;;  %v5411_v28 = vld [vmem:[%s7190_s1 + $0x460] ss:$8 sps:$4 sm:$0xff]  }
  0xea   : > { %3681 = vmatprep.subr.bf16.mxu0 %v5332_v19  ;;  %3670 = vmatprep.mubr.bf16.mxu0 %v4700_v20  ;;  %v5414_v19 = vld [vmem:[%s7190_s1 + $0xae0] ss:$8 sps:$4 sm:$0xff]   ;;  %v5419_v20 = vld [vmem:[%s7190_s1 + $0x474] ss:$8 sps:$4 sm:$0xff]  }
  0xec   : > { %1332 = vmatpush1.bf16.msra.mxu1 %v5327_v11  ;;  %v5422_v11 = vld [vmem:[%s7190_s1 + $0xaf4] ss:$8 sps:$4 sm:$0xff]  }
  0xed   : > { %3682 = vmatpush1.bf16.msra.mxu0 %v5330_v21  ;;  %1333 = vmatprep.subr.bf16.mxu1 %v5335_v23  ;;  %v5417_v21 = vld [vmem:[%s7190_s1 + $0x470] ss:$8 sps:$4 sm:$0xff]  }
  0xee   : > { %3683 = vmatprep.subr.bf16.mxu0 %v5338_v24  ;;  %v5420_v23 = vld [vmem:[%s7190_s1 + $0xaf0] ss:$8 sps:$4 sm:$0xff]   ;;  %v5428_v24 = vld [vmem:[%s7190_s1 + $0x484] ss:$8 sps:$4 sm:$0xff]  }
  0xf0   : > { %3671 = vmatmul.mubr.bf16.gmra.mrb[16].mxu0 %v4699_v27  ;;  %1334 = vmatpush1.bf16.msra.mxu1 %v5333_v25  ;;  %v5431_v25 = vld [vmem:[%s7190_s1 + $0xb04] ss:$8 sps:$4 sm:$0xff]   ;;  %v5672_v27 = vld [vmem:[%s5882_s17 + $0x50] sm:$0xff] }
  0xf1   : > { %3684 = vmatpush1.bf16.msra.mxu0 %v5336_v26  ;;  %1335 = vmatprep.subr.bf16.mxu1 %v5341_v30  ;;  %v5425_v26 = vld [vmem:[%s5882_s17 + $0x20] ss:$36 sps:$4 sm:$0xff]   ;;  %v4692_v30 = vcombine.low %v5672_v27, %v6519_v29  ;;  %v5437_v29 = vld [vmem:[%s7190_s1 + $0xb14] ss:$8 sps:$4 sm:$0xff]  }
  0xf2   : > { %3685 = vmatprep.subr.bf16.mxu0 %v5344_v31  ;;  %3711 = vmatprep.mubr.bf16.mxu0 %v4693_v32  ;;  %v4542_v31 = vld [vmem:[%s5882_s17 + $0x98] sm:$0xff]  ;;  %v5426_v32 = vld [vmem:[%s7190_s1 + $0x480] ss:$8 sps:$4 sm:$0xff]   ;;  %v5506_v27 = vld [vmem:[%s7190_s1 + $0xbc4] ss:$8 sps:$4 sm:$0xff]  }
  0xf4   : > { %1336 = vmatpush1.bf16.msra.mxu1 %v5339_v33  ;;  %v5429_v33 = vld [vmem:[%s7190_s1 + $0xb00] ss:$8 sps:$4 sm:$0xff]  }
  0xf5   : > { %3686 = vmatpush1.bf16.msra.mxu0 %v5342_v34  ;;  %1337 = vmatprep.subr.bf16.mxu1 %v5347_v35  ;;  %v5434_v34 = vld [vmem:[%s7190_s1 + $0x494] ss:$8 sps:$4 sm:$0xff]   ;;  %v4702_v35 = vcombine.high %v4542_v31, %v4542_v31 }
  0xf6   : > { %3687 = vmatprep.subr.bf16.mxu0 %v5350_v22  ;;  %v5432_v22 = vld [vmem:[%s7190_s1 + $0x490] ss:$8 sps:$4 sm:$0xff]  }
  0xf8   : > { %1338 = vmatpush1.bf16.msra.mxu1 %v5345_v36  ;;  %v5435_v36 = vld [vmem:[%s7190_s1 + $0xb10] ss:$8 sps:$4 sm:$0xff]  }
  0xf9   : > { %3688 = vmatpush1.bf16.msra.mxu0 %v5348_v37  ;;  %1339 = vmatprep.subr.bf16.mxu1 %v5353_v39  ;;  %v5442_v37 = vld [vmem:[%s7190_s1 + $0x4a4] ss:$8 sps:$4 sm:$0xff]  }
  0xfa   : > { %3689 = vmatprep.subr.bf16.mxu0 %v5356_v40  ;;  %v5446_v39 = vld [vmem:[%s7190_s1 + $0xb24] ss:$8 sps:$4 sm:$0xff]   ;;  %v5439_v40 = vld [vmem:[%s5882_s17 + $0x68] ss:$0 sps:$4 sm:$0xff]  }
  0xfc   : > { %1340 = vmatpush1.bf16.msra.mxu1 %v5351_v41  ;;  %v5440_v41 = vld [vmem:[%s7190_s1 + $0x4a0] ss:$8 sps:$4 sm:$0xff]  }
  0xfd   : > { %3690 = vmatpush1.bf16.msra.mxu0 %v5354_v42  ;;  %1341 = vmatprep.subr.bf16.mxu1 %v5359_v38  ;;  %v4701_v42 = vcombine.low %v4542_v31, %v4542_v31  ;;  %v5444_v38 = vld [vmem:[%s7190_s1 + $0xb20] ss:$8 sps:$4 sm:$0xff]  }
  0xfe   : > { %3691 = vmatprep.subr.bf16.mxu0 %v5362_v44  ;;  %v5449_v44 = vld [vmem:[%s7190_s1 + $0x4b4] ss:$8 sps:$4 sm:$0xff]   ;;  %v5504_v31 = vld [vmem:[%s7190_s1 + $0xbc0] ss:$8 sps:$4 sm:$0xff]  }
 0x100   : > { %1342 = vmatpush1.bf16.msra.mxu1 %v5357_v45  ;;  %v5452_v45 = vld [vmem:[%s7190_s1 + $0xb34] ss:$8 sps:$4 sm:$0xff]  }
 0x101   : > { %3692 = vmatpush1.bf16.msra.mxu0 %v5360_v51  ;;  %1343 = vmatprep.subr.bf16.mxu1 %v5365_v47  ;;  %v5527_v51 = vld [vmem:[%s5882_s17 + $0x5c] ss:$36 sps:$4 sm:$0xff]   ;;  %v5447_v47 = vld [vmem:[%s7190_s1 + $0x4b0] ss:$8 sps:$4 sm:$0xff]  }
 0x102   : > { %3693 = vmatprep.subr.bf16.mxu0 %v5368_v48  ;;  %v5450_v48 = vld [vmem:[%s7190_s1 + $0xb30] ss:$8 sps:$4 sm:$0xff]  }
 0x104   : > { %1344 = vmatpush1.bf16.msra.mxu1 %v5363_v49 }
 0x105   : > { %3694 = vmatpush1.bf16.msra.mxu0 %v5366_v50  ;;  %1364 = vmatprep.subr.bf16.mxu1 %v5373_v52  ;;  %v5530_v52 = vld [vmem:[%s5882_s17 + $0x28] ss:$36 sps:$4 sm:$0xff]  }
 0x106   : > { %3695 = vmatprep.subr.bf16.mxu0 %v5376_v54 }
 0x107   : > { %1346 = vmatmul.mubr.bf16.vlgmr.msra.gmra.mrb[0].mxu1 %v4054_v56  ;;  %v5455_v56 = vld [vmem:[%s7190_s1 + $0x4c4] ss:$8 sps:$4 sm:$0xff]  }
 0x108   : > { %1365 = vmatpush1.bf16.msra.mxu1 %v5371_v57  ;;  %1355 = vmatprep.mubr.bf16.mxu1 %v4064_v43  ;;  %v5458_v57 = vld [vmem:[%s7190_s1 + $0xb44] ss:$8 sps:$4 sm:$0xff]   ;;  %v5453_v43 = vld [vmem:[%s7190_s1 + $0x4c0] ss:$8 sps:$4 sm:$0xff]  }
 0x109   : > { %3696 = vmatpush1.bf16.msra.mxu0 %v5374_v58  ;;  %1366 = vmatprep.subr.bf16.mxu1 %v5379_v59 }
 0x10a   : > { %3697 = vmatprep.subr.bf16.mxu0 %v5382_v53 }
 0x10c   : > { %1367 = vmatpush1.bf16.msra.mxu1 %v5377_v61  ;;  %v5456_v61 = vld [vmem:[%s7190_s1 + $0xb40] ss:$8 sps:$4 sm:$0xff]  }
 0x10d   : > { %3698 = vmatpush1.bf16.msra.mxu0 %v5380_v62  ;;  %1368 = vmatprep.subr.bf16.mxu1 %v5387_v63  ;;  %v5461_v62 = vld [vmem:[%s7190_s1 + $0x4d4] ss:$8 sps:$4 sm:$0xff]  }
 0x10e   : > { %3699 = vmatprep.subr.bf16.mxu0 %v5390_v0  ;;  %v5464_v63 = vld [vmem:[%s7190_s1 + $0xb54] ss:$8 sps:$4 sm:$0xff]   ;;  %v5459_v0 = vld [vmem:[%s7190_s1 + $0x4d0] ss:$8 sps:$4 sm:$0xff]  }
 0x10f   : > { %1356 = vmatmul.mubr.bf16.gmra.mrb[16].mxu1 %v4063_v1  ;;  %v5462_v1 = vld [vmem:[%s7190_s1 + $0xb50] ss:$8 sps:$4 sm:$0xff]  }
 0x110   : > { %1369 = vmatpush1.bf16.msra.mxu1 %v5385_v2  ;;  %1396 = vmatprep.mubr.bf16.mxu1 %v5698_v46  ;;  %v5467_v2 = vld [vmem:[%s7190_s1 + $0x4e4] ss:$8 sps:$4 sm:$0xff]  }
 0x111   : > { %3700 = vmatpush1.bf16.msra.mxu0 %v5388_v3  ;;  %1370 = vmatprep.subr.bf16.mxu1 %v5393_v4  ;;  %v5470_v3 = vld [vmem:[%s7190_s1 + $0xb64] ss:$8 sps:$4 sm:$0xff]   ;;  %v5465_v4 = vld [vmem:[%s7190_s1 + $0x4e0] ss:$8 sps:$4 sm:$0xff]  }
 0x112   : > { %3701 = vmatprep.subr.bf16.mxu0 %v5396_v5  ;;  %v5468_v5 = vld [vmem:[%s7190_s1 + $0xb60] ss:$8 sps:$4 sm:$0xff]  }
 0x114   : > { %1371 = vmatpush1.bf16.msra.mxu1 %v5391_v6  ;;  %v5473_v6 = vld [vmem:[%s7190_s1 + $0x4f4] ss:$8 sps:$4 sm:$0xff]  }
 0x115   : > { %3702 = vmatpush1.bf16.msra.mxu0 %v5394_v7  ;;  %1372 = vmatprep.subr.bf16.mxu1 %v5399_v8  ;;  %v5476_v7 = vld [vmem:[%s7190_s1 + $0xb74] ss:$8 sps:$4 sm:$0xff]   ;;  %v5471_v8 = vld [vmem:[%s7190_s1 + $0x4f0] ss:$8 sps:$4 sm:$0xff]  }
 0x116   : > { %3703 = vmatprep.subr.bf16.mxu0 %v5402_v9  ;;  %v5474_v9 = vld [vmem:[%s7190_s1 + $0xb70] ss:$8 sps:$4 sm:$0xff]  }
 0x118   : > { %1373 = vmatpush1.bf16.msra.mxu1 %v5397_v10  ;;  %v5479_v10 = vld [vmem:[%s7190_s1 + $0x504] ss:$8 sps:$4 sm:$0xff]  }
 0x119   : > { %3704 = vmatpush1.bf16.msra.mxu0 %v5400_v12  ;;  %1374 = vmatprep.subr.bf16.mxu1 %v5405_v13  ;;  %v5482_v12 = vld [vmem:[%s7190_s1 + $0xb84] ss:$8 sps:$4 sm:$0xff]   ;;  %v5477_v13 = vld [vmem:[%s7190_s1 + $0x500] ss:$8 sps:$4 sm:$0xff]  }
 0x11a   : > { %3705 = vmatprep.subr.bf16.mxu0 %v5408_v14  ;;  %v5480_v14 = vld [vmem:[%s7190_s1 + $0xb80] ss:$8 sps:$4 sm:$0xff]  }
 0x11c   : > { %1375 = vmatpush1.bf16.msra.mxu1 %v5403_v15  ;;  %v5485_v15 = vld [vmem:[%s7190_s1 + $0x514] ss:$8 sps:$4 sm:$0xff]  }
 0x11d   : > { %3706 = vmatpush1.bf16.msra.mxu0 %v5406_v16  ;;  %1376 = vmatprep.subr.bf16.mxu1 %v5413_v17  ;;  %v5488_v16 = vld [vmem:[%s7190_s1 + $0xb94] ss:$8 sps:$4 sm:$0xff]   ;;  %v5483_v17 = vld [vmem:[%s7190_s1 + $0x510] ss:$8 sps:$4 sm:$0xff]  }
 0x11e   : > { %3707 = vmatprep.subr.bf16.mxu0 %v5416_v18  ;;  %v5486_v18 = vld [vmem:[%s7190_s1 + $0xb90] ss:$8 sps:$4 sm:$0xff]  }
 0x120   : > { %1377 = vmatpush1.bf16.msra.mxu1 %v5411_v28  ;;  %v5491_v28 = vld [vmem:[%s7190_s1 + $0x524] ss:$8 sps:$4 sm:$0xff]  }
 0x121   : > { %3708 = vmatpush1.bf16.msra.mxu0 %v5414_v19  ;;  %1378 = vmatprep.subr.bf16.mxu1 %v5419_v20  ;;  %v5494_v19 = vld [vmem:[%s7190_s1 + $0xba4] ss:$8 sps:$4 sm:$0xff]   ;;  %v5489_v20 = vld [vmem:[%s7190_s1 + $0x520] ss:$8 sps:$4 sm:$0xff]  }
 0x122   : > { %3709 = vmatprep.subr.bf16.mxu0 %v5422_v11  ;;  %v6738_v49 = vpop.f32.mrb[4].mxu1  ;;  %v5492_v11 = vld [vmem:[%s7190_s1 + $0xba0] ss:$8 sps:$4 sm:$0xff]  }
 0x123   : > { %v6740_v50 = vpop.f32.mrb[4].mxu0  ;;  %v6743_v54 = vpop.f32.mrb[5].mxu1 }
 0x124   : > { %1379 = vmatpush1.bf16.msra.mxu1 %v5417_v21  ;;  %v6745_v55 = vpop.f32.mrb[5].mxu0  ;;  %v1208_v58 = vpop.f32.mrb[6].mxu1  ;;  %v5497_v21 = vld [vmem:[%s7190_s1 + $0x534] ss:$8 sps:$4 sm:$0xff]  }
 0x125   : > { %3710 = vmatpush1.bf16.msra.mxu0 %v5420_v23  ;;  %2391 = vmatprep.subr.bf16.mxu1 %v5428_v24  ;;  %v2541_v59 = vpop.f32.mrb[6].mxu0  ;;  %v1209_v53 = vpop.f32.mrb[7].mxu1  ;;  %v5500_v23 = vld [vmem:[%s7190_s1 + $0xbb4] ss:$8 sps:$4 sm:$0xff]   ;;  %v5495_v24 = vld [vmem:[%s7190_s1 + $0x530] ss:$8 sps:$4 sm:$0xff]  }
 0x126   : > { %3730 = vmatprep.subr.bf16.mxu0 %v5431_v25  ;;  %v2542_v60 = vpop.f32.mrb[7].mxu0  ;;  %v5498_v25 = vld [vmem:[%s7190_s1 + $0xbb0] ss:$8 sps:$4 sm:$0xff]  }
 0x127   : > { %1397 = vmatmul.mubr.bf16.vlgmr.msra.gmra.mrb[0].mxu1 %v5425_v26  ;;  %v5503_v26 = vld [vmem:[%s7190_s1 + $0x544] ss:$8 sps:$4 sm:$0xff]   ;;  %v5531_v60 = vld [vmem:[%s7190_s1 + $0x580] ss:$8 sps:$4 sm:$0xff]  }
 0x128   : > { %3712 = vmatmul.mubr.bf16.vlgmr.msra.gmra.mrb[0].mxu0 %v4692_v30  ;;  %2392 = vmatpush1.bf16.msra.mxu1 %v5426_v32  ;;  %v5501_v30 = vld [vmem:[%s7190_s1 + $0x540] ss:$8 sps:$4 sm:$0xff]   ;;  %v5509_v32 = vld [vmem:[%s7190_s1 + $0x554] ss:$8 sps:$4 sm:$0xff]   ;;  %v4220_v59 = vld [vmem:[%s5882_s17 + $0x6c] sm:$0xff] }
 0x129   : > { %3731 = vmatpush1.bf16.msra.mxu0 %v5429_v33  ;;  %2393 = vmatprep.subr.bf16.mxu1 %v5434_v34  ;;  %v5512_v33 = vld [vmem:[%s7190_s1 + $0xbd4] ss:$8 sps:$4 sm:$0xff]   ;;  %v5507_v34 = vld [vmem:[%s7190_s1 + $0x550] ss:$8 sps:$4 sm:$0xff]  }
 0x12a   : > { %3732 = vmatprep.subr.bf16.mxu0 %v5437_v29  ;;  %1406 = vmatprep.mubr.bf16.mxu1 %v5698_v46  ;;  %v5510_v29 = vld [vmem:[%s7190_s1 + $0xbd0] ss:$8 sps:$4 sm:$0xff]  }
 0x12b   : > { %3721 = vmatprep.mubr.bf16.mxu0 %v4702_v35  ;;  %v5515_v35 = vld [vmem:[%s7190_s1 + $0x564] ss:$8 sps:$4 sm:$0xff]  }
 0x12c   : > { %2394 = vmatpush1.bf16.msra.mxu1 %v5432_v22  ;;  %v5518_v22 = vld [vmem:[%s7190_s1 + $0xbe4] ss:$8 sps:$4 sm:$0xff]  }
 0x12d   : > { %3733 = vmatpush1.bf16.msra.mxu0 %v5435_v36  ;;  %2395 = vmatprep.subr.bf16.mxu1 %v5442_v37  ;;  %v5513_v36 = vld [vmem:[%s7190_s1 + $0x560] ss:$8 sps:$4 sm:$0xff]  }
 0x12e   : > { %3734 = vmatprep.subr.bf16.mxu0 %v5446_v39  ;;  %v5516_v37 = vld [vmem:[%s7190_s1 + $0xbe0] ss:$8 sps:$4 sm:$0xff]   ;;  %v5521_v39 = vld [vmem:[%s7190_s1 + $0x574] ss:$8 sps:$4 sm:$0xff]  }
 0x12f   : > { %1407 = vmatmul.mubr.bf16.gmra.mrb[20].mxu1 %v5439_v40  ;;  %v5524_v40 = vld [vmem:[%s7190_s1 + $0xbf4] ss:$8 sps:$4 sm:$0xff]  }
 0x130   : > { %3722 = vmatmul.mubr.bf16.gmra.mrb[20].mxu0 %v4701_v42  ;;  %2396 = vmatpush1.bf16.msra.mxu1 %v5440_v41  ;;  %v5519_v41 = vld [vmem:[%s7190_s1 + $0x570] ss:$8 sps:$4 sm:$0xff]  }
 0x131   : > { %3735 = vmatpush1.bf16.msra.mxu0 %v5444_v38  ;;  %2397 = vmatprep.subr.bf16.mxu1 %v5449_v44  ;;  %v5522_v42 = vld [vmem:[%s7190_s1 + $0xbf0] ss:$8 sps:$4 sm:$0xff]   ;;  %v5533_v38 = vld [vmem:[%s7190_s1 + $0x584] ss:$8 sps:$4 sm:$0xff]  }
 0x132   : > { %3736 = vmatprep.subr.bf16.mxu0 %v5452_v45  ;;  %3762 = vmatprep.mubr.bf16.mxu0 %v5527_v51  ;;  %v5536_v44 = vld [vmem:[%s7190_s1 + $0xc04] ss:$8 sps:$4 sm:$0xff]   ;;  %v5525_v51 = vld [vmem:[%s5882_s17 + $0x58] ss:$36 sps:$4 sm:$0xff]  }
 0x133   : > { %2423 = vmatprep.mubr.bf16.mxu1 %v5530_v52 }
 0x134   : > { %2398 = vmatpush1.bf16.msra.mxu1 %v5447_v47 }
 0x135   : > { %3737 = vmatpush1.bf16.msra.mxu0 %v5450_v48  ;;  %2399 = vmatprep.subr.bf16.mxu1 %v5455_v56  ;;  %v5528_v56 = vld [vmem:[%s5882_s17 + $0x24] ss:$36 sps:$4 sm:$0xff]  }
 0x136   : > { %3738 = vmatprep.subr.bf16.mxu0 %v5458_v57  ;;  %v4543_v57 = vld [vmem:[%s5882_s17 + $0xa0] sm:$0xff] }
 0x138   : > { %2400 = vmatpush1.bf16.msra.mxu1 %v5453_v43 }
 0x139   : > { %3739 = vmatpush1.bf16.msra.mxu0 %v5456_v61  ;;  %2401 = vmatprep.subr.bf16.mxu1 %v5461_v62  ;;  %v5539_v62 = vld [vmem:[%s7190_s1 + $0x594] ss:$8 sps:$4 sm:$0xff]  }
 0x13a   : > { %3740 = vmatprep.subr.bf16.mxu0 %v5464_v63 }
 0x13c   : > { %2402 = vmatpush1.bf16.msra.mxu1 %v5459_v0 }
 0x13d   : > { %3741 = vmatpush1.bf16.msra.mxu0 %v5462_v1  ;;  %2403 = vmatprep.subr.bf16.mxu1 %v5467_v2  ;;  %v4704_v1 = vcombine.high %v4543_v57, %v4543_v57  ;;  %v4379_v2 = vcombine.high %v4220_v59, %v4220_v59 }
 0x13e   : > { %3742 = vmatprep.subr.bf16.mxu0 %v5470_v3  ;;  %v5537_v3 = vld [vmem:[%s7190_s1 + $0x590] ss:$8 sps:$4 sm:$0xff]  }
 0x140   : > { %2404 = vmatpush1.bf16.msra.mxu1 %v5465_v4  ;;  %v5540_v4 = vld [vmem:[%s7190_s1 + $0xc10] ss:$8 sps:$4 sm:$0xff]  }
 0x141   : > { %3743 = vmatpush1.bf16.msra.mxu0 %v5468_v5  ;;  %2405 = vmatprep.subr.bf16.mxu1 %v5473_v6  ;;  %v5546_v5 = vld [vmem:[%s7190_s1 + $0x5a4] ss:$8 sps:$4 sm:$0xff]  }
 0x142   : > { %3744 = vmatprep.subr.bf16.mxu0 %v5476_v7  ;;  %v5550_v6 = vld [vmem:[%s7190_s1 + $0xc24] ss:$8 sps:$4 sm:$0xff]   ;;  %v4703_v7 = vcombine.low %v4543_v57, %v4543_v57  ;;  %v5596_v57 = vld [vmem:[%s7190_s1 + $0xca0] ss:$8 sps:$4 sm:$0xff]  }
 0x144   : > { %2406 = vmatpush1.bf16.msra.mxu1 %v5471_v8  ;;  %v4378_v8 = vcombine.low %v4220_v59, %v4220_v59  ;;  %v5601_v59 = vld [vmem:[%s7190_s1 + $0x634] ss:$8 sps:$4 sm:$0xff]  }
 0x145   : > { %3745 = vmatpush1.bf16.msra.mxu0 %v5474_v9  ;;  %2407 = vmatprep.subr.bf16.mxu1 %v5479_v10  ;;  %v5544_v9 = vld [vmem:[%s7190_s1 + $0x5a0] ss:$8 sps:$4 sm:$0xff]  }
 0x146   : > { %3746 = vmatprep.subr.bf16.mxu0 %v5482_v12  ;;  %v5548_v10 = vld [vmem:[%s7190_s1 + $0xc20] ss:$8 sps:$4 sm:$0xff]   ;;  %v5553_v12 = vld [vmem:[%s7190_s1 + $0x5b4] ss:$8 sps:$4 sm:$0xff]  }
 0x148   : > { %2408 = vmatpush1.bf16.msra.mxu1 %v5477_v13  ;;  %v5556_v13 = vld [vmem:[%s7190_s1 + $0xc34] ss:$8 sps:$4 sm:$0xff]  }
 0x149   : > { %3747 = vmatpush1.bf16.msra.mxu0 %v5480_v14  ;;  %2409 = vmatprep.subr.bf16.mxu1 %v5485_v15  ;;  %v5633_v14 = vld [vmem:[%s5882_s17 + $0x30] ss:$36 sps:$4 sm:$0xff]   ;;  %v5636_v15 = vld [vmem:[%s5882_s17 + $0x64] ss:$36 sps:$4 sm:$0xff]  }
 0x14a   : > { %3748 = vmatprep.subr.bf16.mxu0 %v5488_v16  ;;  %v5551_v16 = vld [vmem:[%s7190_s1 + $0x5b0] ss:$8 sps:$4 sm:$0xff]  }
 0x14c   : > { %2410 = vmatpush1.bf16.msra.mxu1 %v5483_v17  ;;  %v5554_v17 = vld [vmem:[%s7190_s1 + $0xc30] ss:$8 sps:$4 sm:$0xff]  }
 0x14d   : > { %3749 = vmatpush1.bf16.msra.mxu0 %v5486_v18  ;;  %2411 = vmatprep.subr.bf16.mxu1 %v5491_v28  ;;  %v5559_v18 = vld [vmem:[%s7190_s1 + $0x5c4] ss:$8 sps:$4 sm:$0xff]  }
 0x14e   : > { %3750 = vmatprep.subr.bf16.mxu0 %v5494_v19  ;;  %v5562_v28 = vld [vmem:[%s7190_s1 + $0xc44] ss:$8 sps:$4 sm:$0xff]   ;;  %v5557_v19 = vld [vmem:[%s7190_s1 + $0x5c0] ss:$8 sps:$4 sm:$0xff]  }
 0x150   : > { %2412 = vmatpush1.bf16.msra.mxu1 %v5489_v20  ;;  %v5560_v20 = vld [vmem:[%s7190_s1 + $0xc40] ss:$8 sps:$4 sm:$0xff]  }
 0x151   : > { %3751 = vmatpush1.bf16.msra.mxu0 %v5492_v11  ;;  %2413 = vmatprep.subr.bf16.mxu1 %v5497_v21  ;;  %v5565_v11 = vld [vmem:[%s7190_s1 + $0x5d4] ss:$8 sps:$4 sm:$0xff]  }
 0x152   : > { %3752 = vmatprep.subr.bf16.mxu0 %v5500_v23  ;;  %v5568_v21 = vld [vmem:[%s7190_s1 + $0xc54] ss:$8 sps:$4 sm:$0xff]   ;;  %v5563_v23 = vld [vmem:[%s7190_s1 + $0x5d0] ss:$8 sps:$4 sm:$0xff]  }
 0x154   : > { %2414 = vmatpush1.bf16.msra.mxu1 %v5495_v24  ;;  %v5566_v24 = vld [vmem:[%s7190_s1 + $0xc50] ss:$8 sps:$4 sm:$0xff]  }
 0x155   : > { %3753 = vmatpush1.bf16.msra.mxu0 %v5498_v25  ;;  %2415 = vmatprep.subr.bf16.mxu1 %v5503_v26  ;;  %v5571_v25 = vld [vmem:[%s7190_s1 + $0x5e4] ss:$8 sps:$4 sm:$0xff]  }
 0x156   : > { %3754 = vmatprep.subr.bf16.mxu0 %v5506_v27  ;;  %v5574_v26 = vld [vmem:[%s7190_s1 + $0xc64] ss:$8 sps:$4 sm:$0xff]   ;;  %v5569_v27 = vld [vmem:[%s7190_s1 + $0x5e0] ss:$8 sps:$4 sm:$0xff]  }
 0x158   : > { %2416 = vmatpush1.bf16.msra.mxu1 %v5501_v30  ;;  %v5572_v30 = vld [vmem:[%s7190_s1 + $0xc60] ss:$8 sps:$4 sm:$0xff]  }
 0x159   : > { %3755 = vmatpush1.bf16.msra.mxu0 %v5504_v31  ;;  %2417 = vmatprep.subr.bf16.mxu1 %v5509_v32  ;;  %v5577_v31 = vld [vmem:[%s7190_s1 + $0x5f4] ss:$8 sps:$4 sm:$0xff]  }
 0x15a   : > { %3756 = vmatprep.subr.bf16.mxu0 %v5512_v33  ;;  %v5580_v32 = vld [vmem:[%s7190_s1 + $0xc74] ss:$8 sps:$4 sm:$0xff]   ;;  %v5575_v33 = vld [vmem:[%s7190_s1 + $0x5f0] ss:$8 sps:$4 sm:$0xff]  }
 0x15c   : > { %2418 = vmatpush1.bf16.msra.mxu1 %v5507_v34  ;;  %v5578_v34 = vld [vmem:[%s7190_s1 + $0xc70] ss:$8 sps:$4 sm:$0xff]  }
 0x15d   : > { %3757 = vmatpush1.bf16.msra.mxu0 %v5510_v29  ;;  %2419 = vmatprep.subr.bf16.mxu1 %v5515_v35  ;;  %v5583_v29 = vld [vmem:[%s7190_s1 + $0x604] ss:$8 sps:$4 sm:$0xff]  }
 0x15e   : > { %3758 = vmatprep.subr.bf16.mxu0 %v5518_v22  ;;  %v5586_v35 = vld [vmem:[%s7190_s1 + $0xc84] ss:$8 sps:$4 sm:$0xff]  }
 0x160   : > { %2420 = vmatpush1.bf16.msra.mxu1 %v5513_v36 }
 0x161   : > { %3759 = vmatpush1.bf16.msra.mxu0 %v5516_v37  ;;  %2421 = vmatprep.subr.bf16.mxu1 %v5521_v39  ;;  %v5581_v37 = vld [vmem:[%s7190_s1 + $0x600] ss:$8 sps:$4 sm:$0xff]  }
 0x162   : > { %3760 = vmatprep.subr.bf16.mxu0 %v5524_v40  ;;  %v1255_v45 = vpop.f32.mrb[8].mxu1  ;;  %v5584_v39 = vld [vmem:[%s7190_s1 + $0xc80] ss:$8 sps:$4 sm:$0xff]  }
 0x163   : > { %v6898_v47 = vpop.f32.mrb[8].mxu0  ;;  %v6901_v48 = vadd.f32 %v1255_v45, %v6738_v49  ;;  %v1257_v52 = vpop.f32.mrb[9].mxu1  ;;  %v5534_v49 = vld [vmem:[%s7190_s1 + $0xc00] ss:$8 sps:$4 sm:$0xff]   ;;  %v5590_v45 = vld [vmem:[%s7190_s1 + $0xc90] ss:$8 sps:$4 sm:$0xff]  }
 0x164   : > { %v6905_v58 = vpop.f32.mrb[9].mxu0  ;;  %v6909_v53 = vadd.f32 %v1257_v52, %v6743_v54  ;;  %2422 = vmatpush1.bf16.msra.mxu1 %v5519_v41  ;;  %v1259_v61 = vpop.f32.mrb[10].mxu1  ;;  %v5542_v54 = vld [vmem:[%s7190_s1 + $0xc14] ss:$8 sps:$4 sm:$0xff]   ;;  %v5598_v52 = vld [vmem:[%s7190_s1 + $0xca4] ss:$8 sps:$4 sm:$0xff]  }
 0x165   : > { %3761 = vmatpush1.bf16.msra.mxu0 %v5522_v42  ;;  %v2592_v43 = vpop.f32.mrb[10].mxu0  ;;  %2442 = vmatprep.subr.bf16.mxu1 %v5533_v38  ;;  %v1260_v0 = vpop.f32.mrb[11].mxu1  ;;  %v5589_v41 = vld [vmem:[%s7190_s1 + $0x614] ss:$8 sps:$4 sm:$0xff]   ;;  %v5607_v61 = vld [vmem:[%s7190_s1 + $0x644] ss:$8 sps:$4 sm:$0xff]  }
 0x166   : > { %3781 = vmatprep.subr.bf16.mxu0 %v5536_v44  ;;  %v2593_v63 = vpop.f32.mrb[11].mxu0  ;;  %v5592_v42 = vld [vmem:[%s7190_s1 + $0xc94] ss:$8 sps:$4 sm:$0xff]   ;;  %v5587_v44 = vld [vmem:[%s7190_s1 + $0x610] ss:$8 sps:$4 sm:$0xff]  }
 0x167   : > { %2424 = vmatmul.mubr.bf16.vlgmr.msra.gmra.mrb[0].mxu1 %v5528_v56  ;;  %v5593_v56 = vld [vmem:[%s7190_s1 + $0x620] ss:$8 sps:$4 sm:$0xff]   ;;  %v5602_v43 = vld [vmem:[%s7190_s1 + $0xcb0] ss:$8 sps:$4 sm:$0xff]   ;;  %v5613_v0 = vld [vmem:[%s7190_s1 + $0x654] ss:$8 sps:$4 sm:$0xff]  }
 0x168   : > { %3763 = vmatmul.mubr.bf16.vlgmr.msra.gmra.mrb[0].mxu0 %v5525_v51  ;;  %2443 = vmatpush1.bf16.msra.mxu1 %v5531_v60  ;;  %v5595_v51 = vld [vmem:[%s7190_s1 + $0x624] ss:$8 sps:$4 sm:$0xff]   ;;  %v5604_v60 = vld [vmem:[%s7190_s1 + $0xcb4] ss:$8 sps:$4 sm:$0xff]   ;;  %v5608_v63 = vld [vmem:[%s7190_s1 + $0xcc0] ss:$8 sps:$4 sm:$0xff]  }
 0x169   : > { %3782 = vmatpush1.bf16.msra.mxu0 %v5534_v49  ;;  %2444 = vmatprep.subr.bf16.mxu1 %v5539_v62  ;;  %v5599_v49 = vld [vmem:[%s7190_s1 + $0x630] ss:$8 sps:$4 sm:$0xff]   ;;  %v5610_v62 = vld [vmem:[%s7190_s1 + $0xcc4] ss:$8 sps:$4 sm:$0xff]  }
 0x16a   : > { %3783 = vmatprep.subr.bf16.mxu0 %v5542_v54  ;;  %3772 = vmatprep.mubr.bf16.mxu0 %v4704_v1  ;;  %v5605_v54 = vld [vmem:[%s7190_s1 + $0x640] ss:$8 sps:$4 sm:$0xff]   ;;  %v5616_v1 = vld [vmem:[%s7190_s1 + $0xcd4] ss:$8 sps:$4 sm:$0xff]  }
 0x16b   : > { %2433 = vmatprep.mubr.bf16.mxu1 %v4379_v2  ;;  %v5611_v2 = vld [vmem:[%s7190_s1 + $0x650] ss:$8 sps:$4 sm:$0xff]  }
 0x16c   : > { %2445 = vmatpush1.bf16.msra.mxu1 %v5537_v3  ;;  %v5614_v3 = vld [vmem:[%s7190_s1 + $0xcd0] ss:$8 sps:$4 sm:$0xff]  }
 0x16d   : > { %3784 = vmatpush1.bf16.msra.mxu0 %v5540_v4  ;;  %2446 = vmatprep.subr.bf16.mxu1 %v5546_v5  ;;  %v5621_v4 = vld [vmem:[%s7190_s1 + $0x664] ss:$8 sps:$4 sm:$0xff]  }
 0x16e   : > { %3785 = vmatprep.subr.bf16.mxu0 %v5550_v6  ;;  %v5624_v5 = vld [vmem:[%s7190_s1 + $0xce4] ss:$8 sps:$4 sm:$0xff]   ;;  %v5619_v6 = vld [vmem:[%s7190_s1 + $0x660] ss:$8 sps:$4 sm:$0xff]  }
 0x16f   : > { %2434 = vmatmul.mubr.bf16.gmra.mrb[24].mxu1 %v4378_v8  ;;  %v5627_v8 = vld [vmem:[%s7190_s1 + $0x674] ss:$8 sps:$4 sm:$0xff]  }
 0x170   : > { %3773 = vmatmul.mubr.bf16.gmra.mrb[24].mxu0 %v4703_v7  ;;  %2447 = vmatpush1.bf16.msra.mxu1 %v5544_v9  ;;  %v5622_v7 = vld [vmem:[%s7190_s1 + $0xce0] ss:$8 sps:$4 sm:$0xff]   ;;  %v5630_v9 = vld [vmem:[%s7190_s1 + $0xcf4] ss:$8 sps:$4 sm:$0xff]  }
 0x171   : > { %3786 = vmatpush1.bf16.msra.mxu0 %v5548_v10  ;;  %2448 = vmatprep.subr.bf16.mxu1 %v5553_v12  ;;  %v5625_v10 = vld [vmem:[%s7190_s1 + $0x670] ss:$8 sps:$4 sm:$0xff]  }
 0x172   : > { %3787 = vmatprep.subr.bf16.mxu0 %v5556_v13  ;;  %2474 = vmatprep.mubr.bf16.mxu1 %v5633_v14  ;;  %v5628_v12 = vld [vmem:[%s7190_s1 + $0xcf0] ss:$8 sps:$4 sm:$0xff]   ;;  %v5639_v13 = vld [vmem:[%s7190_s1 + $0xd04] ss:$8 sps:$4 sm:$0xff]  }
 0x173   : > { %3813 = vmatprep.mubr.bf16.mxu0 %v5636_v15 }
 0x174   : > { %2449 = vmatpush1.bf16.msra.mxu1 %v5551_v16 }
 0x175   : > { %3788 = vmatpush1.bf16.msra.mxu0 %v5554_v17  ;;  %2450 = vmatprep.subr.bf16.mxu1 %v5559_v18  ;;  %v5631_v17 = vld [vmem:[%s5882_s17 + $0x2c] ss:$36 sps:$4 sm:$0xff]   ;;  %v5634_v18 = vld [vmem:[%s5882_s17 + $0x60] ss:$36 sps:$4 sm:$0xff]  }
 0x176   : > { %3789 = vmatprep.subr.bf16.mxu0 %v5562_v28  ;;  %v4544_v28 = vld [vmem:[%s5882_s17 + $0xa8] sm:$0xff] }
 0x178   : > { %2451 = vmatpush1.bf16.msra.mxu1 %v5557_v19 }
 0x179   : > { %3790 = vmatpush1.bf16.msra.mxu0 %v5560_v20  ;;  %2452 = vmatprep.subr.bf16.mxu1 %v5565_v11  ;;  %v5637_v20 = vld [vmem:[%s7190_s1 + $0xd00] ss:$8 sps:$4 sm:$0xff]  }
 0x17a   : > { %3791 = vmatprep.subr.bf16.mxu0 %v5568_v21 }
 0x17c   : > { %2453 = vmatpush1.bf16.msra.mxu1 %v5563_v23  ;;  %v5673_v23 = vld [vmem:[%s5882_s17 + $0x74] sm:$0xff] }
 0x17d   : > { %3792 = vmatpush1.bf16.msra.mxu0 %v5566_v24  ;;  %2454 = vmatprep.subr.bf16.mxu1 %v5571_v25  ;;  %v4381_v24 = vcombine.high %v5673_v23, %v5673_v23  ;;  %v4706_v25 = vcombine.high %v4544_v28, %v4544_v28 }
 0x17e   : > { %3793 = vmatprep.subr.bf16.mxu0 %v5574_v26  ;;  %v5649_v26 = vld [vmem:[%s7190_s1 + $0xd24] ss:$8 sps:$4 sm:$0xff]  }
 0x180   : > { %2455 = vmatpush1.bf16.msra.mxu1 %v5569_v27  ;;  %v4380_v27 = vcombine.low %v5673_v23, %v5673_v23 }
 0x181   : > { %3794 = vmatpush1.bf16.msra.mxu0 %v5572_v30  ;;  %2456 = vmatprep.subr.bf16.mxu1 %v5577_v31  ;;  %v4705_v30 = vcombine.low %v4544_v28, %v4544_v28  ;;  %v5647_v31 = vld [vmem:[%s7190_s1 + $0xd20] ss:$8 sps:$4 sm:$0xff]  }
 0x182   : > { %3795 = vmatprep.subr.bf16.mxu0 %v5580_v32  ;;  %v5652_v32 = vld [vmem:[%s7190_s1 + $0xd34] ss:$8 sps:$4 sm:$0xff]  }
 0x183   : > { %v7009_v22 = vpop.f32.mrb[12].mxu0 }
 0x184   : > { %v7011_v36 = vpop.f32.mrb[13].mxu0  ;;  %2457 = vmatpush1.bf16.msra.mxu1 %v5575_v33  ;;  %v5650_v33 = vld [vmem:[%s7190_s1 + $0xd30] ss:$8 sps:$4 sm:$0xff]  }
 0x185   : > { %3796 = vmatpush1.bf16.msra.mxu0 %v5578_v34  ;;  %v2643_v40 = vpop.f32.mrb[14].mxu0  ;;  %2458 = vmatprep.subr.bf16.mxu1 %v5583_v29  ;;  %v5655_v34 = vld [vmem:[%s7190_s1 + $0xd44] ss:$8 sps:$4 sm:$0xff]   ;;  %v5653_v29 = vld [vmem:[%s7190_s1 + $0xd40] ss:$8 sps:$4 sm:$0xff]  }
 0x186   : > { %3797 = vmatprep.subr.bf16.mxu0 %v5586_v35  ;;  %v2644_v38 = vpop.f32.mrb[15].mxu0  ;;  %v5658_v35 = vld [vmem:[%s7190_s1 + $0xd54] ss:$8 sps:$4 sm:$0xff]  }
 0x187   : > { %v5664_v40 = vld [vmem:[%s7190_s1 + $0xd74] ss:$8 sps:$4 sm:$0xff]   ;;  %v5665_v38 = vld [vmem:[%s5882_s17 + $0x68] ss:$36 sps:$4 sm:$0xff]  }
 0x188   : > { %2459 = vmatpush1.bf16.msra.mxu1 %v5581_v37  ;;  %v5656_v37 = vld [vmem:[%s7190_s1 + $0xd50] ss:$8 sps:$4 sm:$0xff]  }
 0x189   : > { %3798 = vmatpush1.bf16.msra.mxu0 %v5584_v39  ;;  %2460 = vmatprep.subr.bf16.mxu1 %v5589_v41  ;;  %v5659_v39 = vld [vmem:[%s7190_s1 + $0xd60] ss:$8 sps:$4 sm:$0xff]   ;;  %v5662_v41 = vld [vmem:[%s7190_s1 + $0xd70] ss:$8 sps:$4 sm:$0xff]  }
 0x18a   : > { %3799 = vmatprep.subr.bf16.mxu0 %v5592_v42 }
 0x18c   : > { %2461 = vmatpush1.bf16.msra.mxu1 %v5587_v44  ;;  %v5666_v44 = vld [vmem:[%s5882_s17 + $0xb0] ss:$0 sps:$4 sm:$0xff]  }
 0x18d   : > { %3800 = vmatpush1.bf16.msra.mxu0 %v5590_v45  ;;  %2462 = vmatprep.subr.bf16.mxu1 %v5595_v51 }
 0x18e   : > { %3801 = vmatprep.subr.bf16.mxu0 %v5598_v52 }
 0x190   : > { %2463 = vmatpush1.bf16.msra.mxu1 %v5593_v56 }
 0x191   : > { %3802 = vmatpush1.bf16.msra.mxu0 %v5596_v57  ;;  %2464 = vmatprep.subr.bf16.mxu1 %v5601_v59 }
 0x192   : > { %3803 = vmatprep.subr.bf16.mxu0 %v5604_v60 }
 0x194   : > { %2465 = vmatpush1.bf16.msra.mxu1 %v5599_v49 }
 0x195   : > { %3804 = vmatpush1.bf16.msra.mxu0 %v5602_v43  ;;  %2466 = vmatprep.subr.bf16.mxu1 %v5607_v61 }
 0x196   : > { %3805 = vmatprep.subr.bf16.mxu0 %v5610_v62 }
 0x198   : > { %2467 = vmatpush1.bf16.msra.mxu1 %v5605_v54 }
 0x199   : > { %3806 = vmatpush1.bf16.msra.mxu0 %v5608_v63  ;;  %2468 = vmatprep.subr.bf16.mxu1 %v5613_v0 }
 0x19a   : > { %3807 = vmatprep.subr.bf16.mxu0 %v5616_v1 }
 0x19c   : > { %2469 = vmatpush1.bf16.msra.mxu1 %v5611_v2 }
 0x19d   : > { %3808 = vmatpush1.bf16.msra.mxu0 %v5614_v3  ;;  %2470 = vmatprep.subr.bf16.mxu1 %v5621_v4 }
 0x19e   : > { %3809 = vmatprep.subr.bf16.mxu0 %v5624_v5 }
 0x1a0   : > { %2471 = vmatpush1.bf16.msra.mxu1 %v5619_v6 }
 0x1a1   : > { %3810 = vmatpush1.bf16.msra.mxu0 %v5622_v7  ;;  %2472 = vmatprep.subr.bf16.mxu1 %v5627_v8 }
 0x1a2   : > { %3811 = vmatprep.subr.bf16.mxu0 %v5630_v9  ;;  %v1306_v14 = vpop.f32.mrb[12].mxu1 }
 0x1a3   : > { %v7107_v15 = vadd.f32 %v1306_v14, %v6901_v48  ;;  %v1308_v16 = vpop.f32.mrb[13].mxu1  ;;  %v5642_v48 = vld [vmem:[%s7190_s1 + $0xd14] ss:$8 sps:$4 sm:$0xff]  }
 0x1a4   : > { %v7113_v19 = vadd.f32 %v1308_v16, %v6909_v53  ;;  %2473 = vmatpush1.bf16.msra.mxu1 %v5625_v10  ;;  %v1310_v11 = vpop.f32.mrb[14].mxu1  ;;  %v5640_v53 = vld [vmem:[%s7190_s1 + $0xd10] ss:$8 sps:$4 sm:$0xff]  }
 0x1a5   : > { %3812 = vmatpush1.bf16.msra.mxu0 %v5628_v12  ;;  %4860 = vmatprep.subr.bf16.mxu1 %v5639_v13  ;;  %v1311_v21 = vpop.f32.mrb[15].mxu1 }
 0x1a6   : > { %3832 = vmatprep.subr.bf16.mxu0 %v5639_v13 }
 0x1a7   : > { %2475 = vmatmul.mubr.bf16.vlgmr.msra.gmra.mrb[0].mxu1 %v5631_v17 }
 0x1a8   : > { %3814 = vmatmul.mubr.bf16.vlgmr.msra.gmra.mrb[0].mxu0 %v5634_v18  ;;  %4868 = vmatpush1.bf16.msra.mxu1 %v5637_v20 }
 0x1a9   : > { %3833 = vmatpush1.bf16.msra.mxu0 %v5637_v20  ;;  %4861 = vmatprep.subr.bf16.mxu1 %v5642_v48 }
 0x1aa   : > { %3834 = vmatprep.subr.bf16.mxu0 %v5642_v48  ;;  %2484 = vmatprep.mubr.bf16.mxu1 %v4381_v24 }
 0x1ab   : > { %3823 = vmatprep.mubr.bf16.mxu0 %v4706_v25 }
 0x1ac   : > { %4869 = vmatpush1.bf16.msra.mxu1 %v5640_v53 }
 0x1ad   : > { %3835 = vmatpush1.bf16.msra.mxu0 %v5640_v53  ;;  %4862 = vmatprep.subr.bf16.mxu1 %v5649_v26 }
 0x1ae   : > { %3836 = vmatprep.subr.bf16.mxu0 %v5649_v26 }
 0x1af   : > { %2485 = vmatmul.mubr.bf16.gmra.mrb[28].mxu1 %v4380_v27 }
 0x1b0   : > { %3824 = vmatmul.mubr.bf16.gmra.mrb[28].mxu0 %v4705_v30  ;;  %4870 = vmatpush1.bf16.msra.mxu1 %v5647_v31 }
 0x1b1   : > { %3837 = vmatpush1.bf16.msra.mxu0 %v5647_v31  ;;  %4863 = vmatprep.subr.bf16.mxu1 %v5652_v32 }
 0x1b2   : > { %3838 = vmatprep.subr.bf16.mxu0 %v5652_v32  ;;  %3864 = vmatprep.mubr.bf16.mxu0 %v5698_v46 }
 0x1b3   : > { %3874 = vmatprep.mubr.bf16.mxu1 %v5698_v46  ;;  %v5661_v46 = vld [vmem:[%s7190_s1 + $0xd64] ss:$8 sps:$4 sm:$0xff]  }
 0x1b4   : > { %4871 = vmatpush1.bf16.msra.mxu1 %v5650_v33 }
 0x1b5   : > { %3839 = vmatpush1.bf16.msra.mxu0 %v5650_v33  ;;  %4864 = vmatprep.subr.bf16.mxu1 %v5655_v34 }
 0x1b6   : > { %3840 = vmatprep.subr.bf16.mxu0 %v5655_v34 }
 0x1b8   : > { %4872 = vmatpush1.bf16.msra.mxu1 %v5653_v29 }
 0x1b9   : > { %3841 = vmatpush1.bf16.msra.mxu0 %v5653_v29  ;;  %4865 = vmatprep.subr.bf16.mxu1 %v5658_v35 }
 0x1ba   : > { %3842 = vmatprep.subr.bf16.mxu0 %v5658_v35 }
 0x1bc   : > { %4873 = vmatpush1.bf16.msra.mxu1 %v5656_v37 }
 0x1bd   : > { %3843 = vmatpush1.bf16.msra.mxu0 %v5656_v37  ;;  %4866 = vmatprep.subr.bf16.mxu1 %v5661_v46 }
 0x1be   : > { %3844 = vmatprep.subr.bf16.mxu0 %v5661_v46 }
 0x1c0   : > { %4874 = vmatpush1.bf16.msra.mxu1 %v5659_v39 }
 0x1c1   : > { %3845 = vmatpush1.bf16.msra.mxu0 %v5659_v39  ;;  %4867 = vmatprep.subr.bf16.mxu1 %v5664_v40 }
 0x1c2   : > { %3846 = vmatprep.subr.bf16.mxu0 %v5664_v40 }
 0x1c3   : > { %v3672_v42 = vpop.f32.mrb[16].mxu0 }
 0x1c4   : > { %v3674_v45 = vpop.f32.mrb[17].mxu0  ;;  %4875 = vmatpush1.bf16.msra.mxu1 %v5662_v41 }
 0x1c5   : > { %3847 = vmatpush1.bf16.msra.mxu0 %v5662_v41  ;;  %v3676_v51 = vpop.f32.mrb[18].mxu0 }
 0x1c6   : > { %v3677_v52 = vpop.f32.mrb[19].mxu0 }
 0x1c7   : > { %3875 = vmatmul.mubr.bf16.vlgmr.msra.gmra.mrb[32].mxu1 %v5666_v44 }
 0x1c8   : > { %3865 = vmatmul.mubr.bf16.vlgmr.msra.gmra.mrb[0].mxu0 %v5665_v38 }
 0x1e2   : > { %v1357_v56 = vpop.f32.mrb[16].mxu1 }
 0x1e3   : > { %v1358_v57 = vadd.f32 %v1357_v56, %v7107_v15  ;;  %v1359_v59 = vpop.f32.mrb[17].mxu1 }
 0x1e4   : > { %v1360_v60 = vadd.f32 %v1359_v59, %v7113_v19  ;;  %v1361_v49 = vpop.f32.mrb[18].mxu1 }
 0x1e5   : > { %v1362_v43 = vpop.f32.mrb[19].mxu1 }
 0x202   : > { %v1408_v61 = vpop.f32.mrb[20].mxu1 }
 0x203   : > { %v3723_v62 = vpop.f32.mrb[20].mxu0  ;;  %v1409_v54 = vadd.f32 %v1408_v61, %v1358_v57  ;;  %v1410_v0 = vpop.f32.mrb[21].mxu1 }
 0x204   : > { %v3724_v63 = vadd.f32 %v3723_v62, %v3672_v42  ;;  %v3725_v1 = vpop.f32.mrb[21].mxu0  ;;  %v1411_v2 = vadd.f32 %v1410_v0, %v1360_v60  ;;  %v1412_v4 = vpop.f32.mrb[22].mxu1  ;;  %v3903_v42 = vlaneseq }
 0x205   : > { %v3726_v3 = vadd.f32 %v3725_v1, %v3674_v45  ;;  %v3727_v5 = vpop.f32.mrb[22].mxu0  ;;  %v1413_v6 = vpop.f32.mrb[23].mxu1 }
 0x206   : > { %v3728_v7 = vpop.f32.mrb[23].mxu0  ;;  %v3904_v38 = vshrl.u32 %v3903_v42, 7 }
 0x208   : > { %v3905_v44 = vsub.s32 0, %v3904_v38  ;;  %v3909_v45 = vsub.s32 1, %v3904_v38 }
 0x242   : > { %v2435_v9 = vpop.f32.mrb[24].mxu1 }
 0x243   : > { %v3774_v8 = vpop.f32.mrb[24].mxu0  ;;  %v2437_v13 = vpop.f32.mrb[25].mxu1 }
 0x244   : > { %v3775_v10 = vadd.f32 %v3774_v8, %v3724_v63  ;;  %v3776_v12 = vpop.f32.mrb[25].mxu0  ;;  %v2439_v15 = vpop.f32.mrb[26].mxu1 }
 0x245   : > { %v3777_v14 = vadd.f32 %v3776_v12, %v3726_v3  ;;  %v3778_v16 = vpop.f32.mrb[26].mxu0  ;;  %v2440_v17 = vpop.f32.mrb[27].mxu1 }
 0x246   : > { %v3779_v18 = vpop.f32.mrb[27].mxu0 }
 0x27a   : > { %v2476_v28 = vpop.f32.mrb[0].mxu1 }
 0x27b   : > { %v2478_v19 = vpop.f32.mrb[1].mxu1 }
 0x27c   : > { %v2480_v20 = vpop.f32.mrb[2].mxu1 }
 0x27d   : > { %v2482_v11 = vpop.f32.mrb[3].mxu1 }
 0x282   : > { %v2486_v48 = vpop.f32.mrb[28].mxu1 }
 0x283   : > { %v3825_v21 = vpop.f32.mrb[28].mxu0  ;;  %v2487_v23 = vadd.f32 %v2486_v48, %v2435_v9  ;;  %v2488_v25 = vpop.f32.mrb[29].mxu1 }
 0x284   : > { %v3826_v24 = vadd.f32 %v3825_v21, %v3775_v10  ;;  %v3827_v53 = vpop.f32.mrb[29].mxu0  ;;  %v2489_v26 = vadd.f32 %v2488_v25, %v2437_v13  ;;  %v2490_v30 = vpop.f32.mrb[30].mxu1 }
 0x285   : > { %v3828_v27 = vadd.f32 %v3827_v53, %v3777_v14  ;;  %v3829_v31 = vpop.f32.mrb[30].mxu0  ;;  %v2538_v32 = vadd.f32 %v6740_v50, %v2487_v23  ;;  %v2491_v33 = vpop.f32.mrb[31].mxu1  ;;  %v3901_v50 = vld [vmem:[%s7191_s2] sm:$0x3] }
 0x286   : > { %v3830_v34 = vpop.f32.mrb[31].mxu0  ;;  %v2540_v29 = vadd.f32 %v6745_v55, %v2489_v26  ;;  %v3906_v55 = vrot.slane %v3901_v50, %v3905_v44  ;;  %v3910_v52 = vrot.slane %v3901_v50, %v3909_v45 }
 0x287   : > { %v2589_v35 = vadd.f32 %v6898_v47, %v2538_v32 }
 0x288   : > { %v2591_v37 = vadd.f32 %v6905_v58, %v2540_v29 }
 0x289   : > { %v2640_v46 = vadd.f32 %v7009_v22, %v2589_v35 }
 0x28a   : > { %v2642_v39 = vadd.f32 %v7011_v36, %v2591_v37 }
 0x28b   : > { %v2650_v40 = vadd.f32 %v2640_v46, %v1409_v54 }
 0x28c   : > { %v2651_v41 = vadd.f32 %v2642_v39, %v1411_v2 }
 0x29a   : > { %v3876_v47 = vpop.f32.mrb[32].mxu1 }
 0x29b   : > { %v3866_v51 = vpop.f32.mrb[0].mxu0  ;;  %v3877_v56 = vadd.f32 %v3876_v47, %v3826_v24  ;;  %v3878_v57 = vpop.f32.mrb[33].mxu1 }
 0x29c   : > { %v4876_v58 = vadd.f32 %v3866_v51, %v2476_v28  ;;  %v3868_v22 = vpop.f32.mrb[1].mxu0  ;;  %v3879_v59 = vadd.f32 %v3878_v57, %v3828_v27  ;;  %v3880_v49 = vpop.f32.mrb[34].mxu1 }
 0x29d   : > { %v4877_v36 = vadd.f32 %v3868_v22, %v2478_v19  ;;  %v3870_v60 = vpop.f32.mrb[2].mxu0  ;;  %v3887_v61 = vadd.f32 %v3877_v56, %v2650_v40  ;;  %v3881_v63 = vpop.f32.mrb[35].mxu1 }
 0x29e   : > { %v3913_v43 = vadd.f32 %v4876_v58, %v3906_v55  ;;  %v4878_v62 = vadd.f32 %v3870_v60, %v2480_v20  ;;  %v3872_v54 = vpop.f32.mrb[3].mxu0  ;;  %v3888_v1 = vadd.f32 %v3879_v59, %v2651_v41 }
 0x29f   : > { %v3914_v0 = vadd.f32 %v4877_v36, %v3910_v52  ;;  %v4879_v2 = vadd.f32 %v3872_v54, %v2482_v11  ;;  %v3917_v4 = vadd.f32 %v3906_v55, %v3887_v61 }
 0x2a0   : > { %v3919_v3 = vmax.f32 %v3913_v43, 0.0  ;;  %v3915_v5 = vadd.f32 %v4878_v62, %v3906_v55  ;;  %v3918_v7 = vadd.f32 %v3910_v52, %v3888_v1 }
 0x2a1   : > { %v3920_v6 = vmax.f32 %v3914_v0, 0.0  ;;  %v3916_v8 = vadd.f32 %v4879_v2, %v3910_v52  ;;  %v3923_v9 = vmax.f32 %v3917_v4, 0.0 }
 0x2a2   : > { %v3921_v10 = vmax.f32 %v3915_v5, 0.0  ;;  %v3924_v13 = vmax.f32 %v3918_v7, 0.0 }
 0x2a3   : > { %v4857_v12 = vpack.c.bf16 %v3920_v6, %v3919_v3  ;;  %v3922_v14 = vmax.f32 %v3916_v8, 0.0 }
 0x2a4   : > { %v4859_v15 = vpack.c.bf16 %v3924_v13, %v3923_v9 }
 0x2a5   : > { %3945 = vst [vmem:[%s194_s26] sm:$0xff] %v4857_v12  ;;  %v4858_v16 = vpack.c.bf16 %v3922_v14, %v3921_v10 }
 0x2a6   : > { %3947 = vst [vmem:[%s194_s26 + $0x10] sm:$0xff] %v4859_v15 }
 0x2a7   : > { %3946 = vst [vmem:[%s194_s26 + $0x8] sm:$0xff] %v4858_v16 }
 0x2a8 PF: > { %s13_s14 = sadd.s32 1, %s5696_s14   ;;  %s7193_s12 = smov %s5692_s13 }
 0x2a9   : > { %p10_p5 = scmp.ge.s32.totalorder %s13_s14, 4   ;;  %s7194_s13 = smov %s7196_s15 }
 0x2ab   :  { %12 = sbr.rel (!%p10_p5) target bundleno = 2 (0x2), region = 67 }

// kernel: alexnet_forward.13
= control target key start
LH: loop header
LB: loop body
LE: loop exit
PB: predicated region body
PF: predicated region fallthrough
CT: control target
= control target key end

     0   :  { %s3926_s12 = smov 0   ;;  %s3928_s13 = smov 0   ;;  %s4948_s0 = inlined_call_operand.vmem [shape: bf16[2,40,768], index: 0, kind: input, shape index: {}]   ;;  %s4949_s1 = inlined_call_operand.vmem [shape: bf16[3,768,256], index: 1, kind: input, shape index: {}]   ;;  %s4950_s2 = inlined_call_operand.vmem [shape: f32[1,256], index: 2, kind: input, shape index: {}]   ;;  %s4951_s3 = inlined_call_operand.vmem [shape: bf16[2,24,256], index: 3, kind: output, shape index: {}]  }
   0x1   :  { %s3930_s14 = smov 0  }
   0x2 LB: > { %s25_s15 = sadd.s32 1, %s3900_s13  ;;  %p2775_p0 = scmp.ge.s32.totalorder %s3904_s14, 1  ;;  %s3904_s14 = sphi %s3930_s14, %s13_s14   ;;  %s3900_s13 = sphi %s3928_s13, %s4953_s13   ;;  %s3896_s12 = sphi %s3926_s12, %s4952_s12  }
   0x3   : > { %p27_p1 = scmp.ge.s32.totalorder %s25_s15, 2  ;;  %p151_p2 = scmp.lt.s32.totalorder %s3904_s14, 3 }
   0x5   : > { %s4955_s15 = smov (%p27_p1, %s25_s15), 0  ;;  %p152_p3 = pnand %p2775_p0, %p151_p2 }
   0x6   : > { %v3410_v0 = vld [vmem:[%s4949_s1 + $0x4] ss:$8 sps:$4 sm:$0xff] (!%p152_p3)   ;;  %v3414_v2 = vld [vmem:[%s4949_s1] ss:$8 sps:$4 sm:$0xff] (!%p152_p3)   ;;  %v3416_v4 = vld [vmem:[%s4949_s1 + $0x14] ss:$8 sps:$4 sm:$0xff] (!%p152_p3)  }
   0x7   : > { %155 = sbr.rel (%p152_p3) target bundleno = 552 (0x228), region = 32  ;;  %v3412_v1 = vld [vmem:[%s4949_s1 + $0x404] ss:$8 sps:$4 sm:$0xff] (!%p152_p3)   ;;  %838 = vmatprep.subr.bf16.mxu1 (!%p152_p3), %v3410_v0  ;;  %v3415_v3 = vld [vmem:[%s4949_s1 + $0x400] ss:$8 sps:$4 sm:$0xff] (!%p152_p3)   ;;  %p180_p4 = scmp.lt.s32.totalorder (!%p152_p3), %s3896_s12, 1 }
   0x8   : > { %1697 = vmatprep.subr.bf16.mxu0 (!%p152_p3), %v3412_v1  ;;  %839 = vmatpush1.bf16.msra.mxu1 (!%p152_p3), %v3414_v2  ;;  %v3418_v5 = vld [vmem:[%s4949_s1 + $0x414] ss:$8 sps:$4 sm:$0xff] (!%p152_p3)   ;;  %v3420_v6 = vld [vmem:[%s4949_s1 + $0x10] ss:$8 sps:$4 sm:$0xff] (!%p152_p3)   ;;  %v3422_v8 = vld [vmem:[%s4949_s1 + $0x24] ss:$8 sps:$4 sm:$0xff] (!%p152_p3)  }
   0x9   : > { %1698 = vmatpush1.bf16.msra.mxu0 (!%p152_p3), %v3415_v3  ;;  %840 = vmatprep.subr.bf16.mxu1 (!%p152_p3), %v3416_v4  ;;  %v3421_v7 = vld [vmem:[%s4949_s1 + $0x410] ss:$8 sps:$4 sm:$0xff] (!%p152_p3)   ;;  %v3424_v9 = vld [vmem:[%s4949_s1 + $0x424] ss:$8 sps:$4 sm:$0xff] (!%p152_p3)   ;;  %v3426_v10 = vld [vmem:[%s4949_s1 + $0x20] ss:$8 sps:$4 sm:$0xff] (!%p152_p3)  }
   0xa   : > { %1699 = vmatprep.subr.bf16.mxu0 (!%p152_p3), %v3418_v5  ;;  %v3427_v11 = vld [vmem:[%s4949_s1 + $0x420] ss:$8 sps:$4 sm:$0xff] (!%p152_p3)   ;;  %v3428_v12 = vld [vmem:[%s4949_s1 + $0x34] ss:$8 sps:$4 sm:$0xff] (!%p152_p3)   ;;  %v3432_v14 = vld [vmem:[%s4949_s1 + $0x30] ss:$8 sps:$4 sm:$0xff] (!%p152_p3)  }
   0xb   : > { %v3430_v13 = vld [vmem:[%s4949_s1 + $0x434] ss:$8 sps:$4 sm:$0xff] (!%p152_p3)   ;;  %v3433_v15 = vld [vmem:[%s4949_s1 + $0x430] ss:$8 sps:$4 sm:$0xff] (!%p152_p3)   ;;  %v3434_v16 = vld [vmem:[%s4949_s1 + $0x44] ss:$8 sps:$4 sm:$0xff] (!%p152_p3)  }
   0xc   : > { %841 = vmatpush1.bf16.msra.mxu1 (!%p152_p3), %v3420_v6  ;;  %v3436_v17 = vld [vmem:[%s4949_s1 + $0x444] ss:$8 sps:$4 sm:$0xff] (!%p152_p3)   ;;  %v3438_v18 = vld [vmem:[%s4949_s1 + $0x40] ss:$8 sps:$4 sm:$0xff] (!%p152_p3)   ;;  %v3440_v20 = vld [vmem:[%s4949_s1 + $0x54] ss:$8 sps:$4 sm:$0xff] (!%p152_p3)  }
   0xd   : > { %1700 = vmatpush1.bf16.msra.mxu0 (!%p152_p3), %v3421_v7  ;;  %842 = vmatprep.subr.bf16.mxu1 (!%p152_p3), %v3422_v8  ;;  %v3439_v19 = vld [vmem:[%s4949_s1 + $0x440] ss:$8 sps:$4 sm:$0xff] (!%p152_p3)   ;;  %v3442_v21 = vld [vmem:[%s4949_s1 + $0x454] ss:$8 sps:$4 sm:$0xff] (!%p152_p3)   ;;  %v3444_v22 = vld [vmem:[%s4949_s1 + $0x50] ss:$8 sps:$4 sm:$0xff] (!%p152_p3)  }
   0xe   : > { %1701 = vmatprep.subr.bf16.mxu0 %v3424_v9  ;;  %v3445_v23 = vld [vmem:[%s4949_s1 + $0x450] ss:$8 sps:$4 sm:$0xff]   ;;  %v3446_v24 = vld [vmem:[%s4949_s1 + $0x64] ss:$8 sps:$4 sm:$0xff]   ;;  %v3450_v26 = vld [vmem:[%s4949_s1 + $0x60] ss:$8 sps:$4 sm:$0xff]  }
   0xf   : > { %v3448_v25 = vld [vmem:[%s4949_s1 + $0x464] ss:$8 sps:$4 sm:$0xff]   ;;  %v3451_v27 = vld [vmem:[%s4949_s1 + $0x460] ss:$8 sps:$4 sm:$0xff]   ;;  %v3452_v28 = vld [vmem:[%s4949_s1 + $0x74] ss:$8 sps:$4 sm:$0xff]  }
  0x10   : > { %843 = vmatpush1.bf16.msra.mxu1 %v3426_v10  ;;  %v3454_v29 = vld [vmem:[%s4949_s1 + $0x474] ss:$8 sps:$4 sm:$0xff]   ;;  %v3456_v30 = vld [vmem:[%s4949_s1 + $0x70] ss:$8 sps:$4 sm:$0xff]   ;;  %v3458_v32 = vld [vmem:[%s4949_s1 + $0x84] ss:$8 sps:$4 sm:$0xff]  }
  0x11   : > { %1702 = vmatpush1.bf16.msra.mxu0 %v3427_v11  ;;  %844 = vmatprep.subr.bf16.mxu1 %v3428_v12  ;;  %v3457_v31 = vld [vmem:[%s4949_s1 + $0x470] ss:$8 sps:$4 sm:$0xff]   ;;  %v3460_v33 = vld [vmem:[%s4949_s1 + $0x484] ss:$8 sps:$4 sm:$0xff]   ;;  %v3462_v34 = vld [vmem:[%s4949_s1 + $0x80] ss:$8 sps:$4 sm:$0xff]  }
  0x12   : > { %1703 = vmatprep.subr.bf16.mxu0 %v3430_v13  ;;  %v3463_v35 = vld [vmem:[%s4949_s1 + $0x480] ss:$8 sps:$4 sm:$0xff]   ;;  %v3464_v36 = vld [vmem:[%s4949_s1 + $0x94] ss:$8 sps:$4 sm:$0xff]   ;;  %s4957_s12 = smov (!%p180_p4, %s3896_s12), 1 }
  0x13   : > { %v3466_v37 = vld [vmem:[%s4949_s1 + $0x494] ss:$8 sps:$4 sm:$0xff]   ;;  %v3468_v38 = vld [vmem:[%s4949_s1 + $0x90] ss:$8 sps:$4 sm:$0xff]   ;;  %v3470_v40 = vld [vmem:[%s4949_s1 + $0xa4] ss:$8 sps:$4 sm:$0xff]  }
  0x14   : > { %845 = vmatpush1.bf16.msra.mxu1 %v3432_v14  ;;  %v3469_v39 = vld [vmem:[%s4949_s1 + $0x490] ss:$8 sps:$4 sm:$0xff]   ;;  %s3384_s29 = smul.u32 120, %s4957_s12  ;;  %v3472_v41 = vld [vmem:[%s4949_s1 + $0x4a4] ss:$8 sps:$4 sm:$0xff]  }
  0x15   : > { %1704 = vmatpush1.bf16.msra.mxu0 %v3433_v15  ;;  %846 = vmatprep.subr.bf16.mxu1 %v3434_v16  ;;  %v3474_v42 = vld [vmem:[%s4949_s1 + $0xa0] ss:$8 sps:$4 sm:$0xff]   ;;  %v3476_v44 = vld [vmem:[%s4949_s1 + $0xb4] ss:$8 sps:$4 sm:$0xff]   ;;  %v3480_v46 = vld [vmem:[%s4949_s1 + $0xb0] ss:$8 sps:$4 sm:$0xff]  }
  0x16   : > { %1705 = vmatprep.subr.bf16.mxu0 %v3436_v17  ;;  %v3475_v43 = vld [vmem:[%s4949_s1 + $0x4a0] ss:$8 sps:$4 sm:$0xff]   ;;  %s4089_s17 = scalar_lea.vmem %s4948_s0, %s3384_s29  ;;  %v3478_v45 = vld [vmem:[%s4949_s1 + $0x4b4] ss:$8 sps:$4 sm:$0xff]   ;;  %v3481_v47 = vld [vmem:[%s4949_s1 + $0x4b0] ss:$8 sps:$4 sm:$0xff]  }
  0x17   : > { %v3508_v48 = vld [vmem:[%s4089_s17 + $0x4] ss:$24 sps:$4 sm:$0xff]   ;;  %v3486_v54 = vld [vmem:[%s4949_s1 + $0xc0] ss:$8 sps:$4 sm:$0xff]   ;;  %v3492_v58 = vld [vmem:[%s4949_s1 + $0xd0] ss:$8 sps:$4 sm:$0xff]  }
  0x18   : > { %847 = vmatpush1.bf16.msra.mxu1 %v3438_v18  ;;  %v3482_v49 = vld [vmem:[%s4949_s1 + $0xc4] ss:$8 sps:$4 sm:$0xff]   ;;  %v4111_v52 = vld [vmem:[%s4089_s17 + $0x38] sm:$0xff]  ;;  %870 = vmatprep.mubr.bf16.mxu1 %v3508_v48  ;;  %v3487_v55 = vld [vmem:[%s4949_s1 + $0x4c0] ss:$8 sps:$4 sm:$0xff]   ;;  %s3385_s21 = smul.u32 24, %s4957_s12 }
  0x19   : > { %1706 = vmatpush1.bf16.msra.mxu0 %v3439_v19  ;;  %848 = vmatprep.subr.bf16.mxu1 %v3440_v20  ;;  %v3484_v50 = vld [vmem:[%s4949_s1 + $0x4c4] ss:$8 sps:$4 sm:$0xff]   ;;  %v3488_v56 = vld [vmem:[%s4949_s1 + $0xd4] ss:$8 sps:$4 sm:$0xff]   ;;  %v3493_v59 = vld [vmem:[%s4949_s1 + $0x4d0] ss:$8 sps:$4 sm:$0xff]  }
  0x1a   : > { %1707 = vmatprep.subr.bf16.mxu0 %v3442_v21  ;;  %v4108_v51 = vld [vmem:[%s4089_s17 + $0x20] sm:$0xff]  ;;  %v3490_v57 = vld [vmem:[%s4949_s1 + $0x4d4] ss:$8 sps:$4 sm:$0xff]   ;;  %v3504_v2 = vld [vmem:[%s4949_s1 + $0xf0] ss:$8 sps:$4 sm:$0xff]   ;;  %s194_s24 = scalar_lea.vmem %s4951_s3, %s3385_s21 }
  0x1b   : > { %v2994_v53 = vcombine.high %v4108_v51, %v4111_v52  ;;  %v3494_v60 = vld [vmem:[%s4949_s1 + $0xe4] ss:$8 sps:$4 sm:$0xff]   ;;  %v3498_v62 = vld [vmem:[%s4949_s1 + $0xe0] ss:$8 sps:$4 sm:$0xff]   ;;  %v3500_v0 = vld [vmem:[%s4949_s1 + $0xf4] ss:$8 sps:$4 sm:$0xff]   ;;  %v2993_v7 = vcombine.low %v4108_v51, %v4111_v52 }
  0x1c   : > { %849 = vmatpush1.bf16.msra.mxu1 %v3444_v22  ;;  %v3496_v61 = vld [vmem:[%s4949_s1 + $0x4e4] ss:$8 sps:$4 sm:$0xff]   ;;  %v3499_v63 = vld [vmem:[%s4949_s1 + $0x4e0] ss:$8 sps:$4 sm:$0xff]   ;;  %v3502_v1 = vld [vmem:[%s4949_s1 + $0x4f4] ss:$8 sps:$4 sm:$0xff]  }
  0x1d   : > { %1708 = vmatpush1.bf16.msra.mxu0 %v3445_v23  ;;  %850 = vmatprep.subr.bf16.mxu1 %v3446_v24  ;;  %v3505_v3 = vld [vmem:[%s4949_s1 + $0x4f0] ss:$8 sps:$4 sm:$0xff]   ;;  %v3511_v4 = vld [vmem:[%s4949_s1 + $0x104] ss:$8 sps:$4 sm:$0xff]   ;;  %v3509_v8 = vld [vmem:[%s4949_s1 + $0x100] ss:$8 sps:$4 sm:$0xff]  }
  0x1e   : > { %1709 = vmatprep.subr.bf16.mxu0 %v3448_v25  ;;  %1729 = vmatprep.mubr.bf16.mxu0 %v2994_v53  ;;  %v3516_v5 = vld [vmem:[%s4949_s1 + $0x504] ss:$8 sps:$4 sm:$0xff]   ;;  %v3506_v6 = vld [vmem:[%s4089_s17] ss:$24 sps:$4 sm:$0xff]   ;;  %v3519_v10 = vld [vmem:[%s4949_s1 + $0x114] ss:$8 sps:$4 sm:$0xff]  }
  0x1f   : > { %v3514_v9 = vld [vmem:[%s4949_s1 + $0x500] ss:$8 sps:$4 sm:$0xff]   ;;  %v3522_v11 = vld [vmem:[%s4949_s1 + $0x514] ss:$8 sps:$4 sm:$0xff]   ;;  %v3517_v12 = vld [vmem:[%s4949_s1 + $0x110] ss:$8 sps:$4 sm:$0xff]  }
  0x20   : > { %851 = vmatpush1.bf16.msra.mxu1 %v3450_v26  ;;  %v3520_v13 = vld [vmem:[%s4949_s1 + $0x510] ss:$8 sps:$4 sm:$0xff]   ;;  %v3525_v14 = vld [vmem:[%s4949_s1 + $0x124] ss:$8 sps:$4 sm:$0xff]   ;;  %v3523_v16 = vld [vmem:[%s4949_s1 + $0x120] ss:$8 sps:$4 sm:$0xff]  }
  0x21   : > { %1710 = vmatpush1.bf16.msra.mxu0 %v3451_v27  ;;  %852 = vmatprep.subr.bf16.mxu1 %v3452_v28  ;;  %v3528_v15 = vld [vmem:[%s4949_s1 + $0x524] ss:$8 sps:$4 sm:$0xff]   ;;  %v3526_v17 = vld [vmem:[%s4949_s1 + $0x520] ss:$8 sps:$4 sm:$0xff]   ;;  %v3531_v18 = vld [vmem:[%s4949_s1 + $0x134] ss:$8 sps:$4 sm:$0xff]  }
  0x22   : > { %1711 = vmatprep.subr.bf16.mxu0 %v3454_v29  ;;  %v3534_v19 = vld [vmem:[%s4949_s1 + $0x534] ss:$8 sps:$4 sm:$0xff]   ;;  %v3529_v20 = vld [vmem:[%s4949_s1 + $0x130] ss:$8 sps:$4 sm:$0xff]   ;;  %v3537_v22 = vld [vmem:[%s4949_s1 + $0x144] ss:$8 sps:$4 sm:$0xff]  }
  0x23   : > { %v3532_v21 = vld [vmem:[%s4949_s1 + $0x530] ss:$8 sps:$4 sm:$0xff]   ;;  %v3540_v23 = vld [vmem:[%s4949_s1 + $0x544] ss:$8 sps:$4 sm:$0xff]   ;;  %v3535_v24 = vld [vmem:[%s4949_s1 + $0x140] ss:$8 sps:$4 sm:$0xff]  }
  0x24   : > { %853 = vmatpush1.bf16.msra.mxu1 %v3456_v30  ;;  %v3538_v25 = vld [vmem:[%s4949_s1 + $0x540] ss:$8 sps:$4 sm:$0xff]   ;;  %v3543_v26 = vld [vmem:[%s4949_s1 + $0x154] ss:$8 sps:$4 sm:$0xff]   ;;  %v3541_v30 = vld [vmem:[%s4949_s1 + $0x150] ss:$8 sps:$4 sm:$0xff]  }
  0x25   : > { %1712 = vmatpush1.bf16.msra.mxu0 %v3457_v31  ;;  %854 = vmatprep.subr.bf16.mxu1 %v3458_v32  ;;  %v3546_v27 = vld [vmem:[%s4949_s1 + $0x554] ss:$8 sps:$4 sm:$0xff]   ;;  %v3544_v31 = vld [vmem:[%s4949_s1 + $0x550] ss:$8 sps:$4 sm:$0xff]   ;;  %v3559_v53 = vld [vmem:[%s4949_s1 + $0x180] ss:$8 sps:$4 sm:$0xff]  }
  0x26   : > { %1713 = vmatprep.subr.bf16.mxu0 %v3460_v33  ;;  %v4227_v28 = vld [vmem:[%s4089_s17 + $0x30] sm:$0xff] }
  0x27   : > { %v4230_v29 = vld [vmem:[%s4089_s17 + $0x50] sm:$0xff]  ;;  %v2785_v32 = vcombine.high %v4227_v28, %v4227_v28 }
  0x28   : > { %855 = vmatpush1.bf16.msra.mxu1 %v3462_v34  ;;  %v3000_v33 = vcombine.high %v4230_v29, %v4230_v29  ;;  %v2784_v34 = vcombine.low %v4227_v28, %v4227_v28  ;;  %v3556_v48 = vld [vmem:[%s4949_s1 + $0x570] ss:$8 sps:$4 sm:$0xff]  }
  0x29   : > { %1714 = vmatpush1.bf16.msra.mxu0 %v3463_v35  ;;  %856 = vmatprep.subr.bf16.mxu1 %v3464_v36  ;;  %v2999_v35 = vcombine.low %v4230_v29, %v4230_v29  ;;  %v3549_v36 = vld [vmem:[%s4949_s1 + $0x164] ss:$8 sps:$4 sm:$0xff]  }
  0x2a   : > { %1715 = vmatprep.subr.bf16.mxu0 %v3466_v37  ;;  %v3552_v37 = vld [vmem:[%s4949_s1 + $0x564] ss:$8 sps:$4 sm:$0xff]  }
  0x2c   : > { %857 = vmatpush1.bf16.msra.mxu1 %v3468_v38  ;;  %v3547_v38 = vld [vmem:[%s4949_s1 + $0x160] ss:$8 sps:$4 sm:$0xff]  }
  0x2d   : > { %1716 = vmatpush1.bf16.msra.mxu0 %v3469_v39  ;;  %858 = vmatprep.subr.bf16.mxu1 %v3470_v40  ;;  %v3550_v39 = vld [vmem:[%s4949_s1 + $0x560] ss:$8 sps:$4 sm:$0xff]  }
  0x2e   : > { %1717 = vmatprep.subr.bf16.mxu0 %v3472_v41  ;;  %v4259_v40 = vld [vmem:[%s4089_s17 + $0x8] sm:$0xff]  ;;  %v3555_v41 = vld [vmem:[%s4949_s1 + $0x174] ss:$8 sps:$4 sm:$0xff]  }
  0x30   : > { %859 = vmatpush1.bf16.msra.mxu1 %v3474_v42  ;;  %v3558_v42 = vld [vmem:[%s4949_s1 + $0x574] ss:$8 sps:$4 sm:$0xff]  }
  0x31   : > { %1718 = vmatpush1.bf16.msra.mxu0 %v3475_v43  ;;  %860 = vmatprep.subr.bf16.mxu1 %v3476_v44  ;;  %v2781_v43 = vcombine.high %v4259_v40, %v4108_v51  ;;  %v4270_v44 = vld [vmem:[%s4089_s17 + $0x28] sm:$0xff] }
  0x32   : > { %1719 = vmatprep.subr.bf16.mxu0 %v3478_v45  ;;  %v4273_v45 = vld [vmem:[%s4089_s17 + $0x40] sm:$0xff] }
  0x34   : > { %861 = vmatpush1.bf16.msra.mxu1 %v3480_v46  ;;  %v3553_v46 = vld [vmem:[%s4949_s1 + $0x170] ss:$8 sps:$4 sm:$0xff]  }
  0x35   : > { %1720 = vmatpush1.bf16.msra.mxu0 %v3481_v47  ;;  %862 = vmatprep.subr.bf16.mxu1 %v3482_v49  ;;  %v2996_v47 = vcombine.high %v4270_v44, %v4273_v45  ;;  %v3561_v49 = vld [vmem:[%s4949_s1 + $0x184] ss:$8 sps:$4 sm:$0xff]  }
  0x36   : > { %1721 = vmatprep.subr.bf16.mxu0 %v3484_v50  ;;  %v3564_v50 = vld [vmem:[%s4949_s1 + $0x584] ss:$8 sps:$4 sm:$0xff]  }
  0x38   : > { %863 = vmatpush1.bf16.msra.mxu1 %v3486_v54  ;;  %v3562_v54 = vld [vmem:[%s4949_s1 + $0x580] ss:$8 sps:$4 sm:$0xff]  }
  0x39   : > { %1722 = vmatpush1.bf16.msra.mxu0 %v3487_v55  ;;  %864 = vmatprep.subr.bf16.mxu1 %v3488_v56  ;;  %v3567_v55 = vld [vmem:[%s4949_s1 + $0x194] ss:$8 sps:$4 sm:$0xff]  }
  0x3a   : > { %1723 = vmatprep.subr.bf16.mxu0 %v3490_v57  ;;  %v3570_v56 = vld [vmem:[%s4949_s1 + $0x594] ss:$8 sps:$4 sm:$0xff]   ;;  %v3565_v57 = vld [vmem:[%s4949_s1 + $0x190] ss:$8 sps:$4 sm:$0xff]  }
  0x3c   : > { %865 = vmatpush1.bf16.msra.mxu1 %v3492_v58  ;;  %v3568_v58 = vld [vmem:[%s4949_s1 + $0x590] ss:$8 sps:$4 sm:$0xff]  }
  0x3d   : > { %1724 = vmatpush1.bf16.msra.mxu0 %v3493_v59  ;;  %866 = vmatprep.subr.bf16.mxu1 %v3494_v60  ;;  %v3573_v59 = vld [vmem:[%s4949_s1 + $0x1a4] ss:$8 sps:$4 sm:$0xff]  }
  0x3e   : > { %1725 = vmatprep.subr.bf16.mxu0 %v3496_v61  ;;  %v3576_v60 = vld [vmem:[%s4949_s1 + $0x5a4] ss:$8 sps:$4 sm:$0xff]   ;;  %v3571_v61 = vld [vmem:[%s4949_s1 + $0x1a0] ss:$8 sps:$4 sm:$0xff]  }
  0x40   : > { %867 = vmatpush1.bf16.msra.mxu1 %v3498_v62  ;;  %v3574_v62 = vld [vmem:[%s4949_s1 + $0x5a0] ss:$8 sps:$4 sm:$0xff]  }
  0x41   : > { %1726 = vmatpush1.bf16.msra.mxu0 %v3499_v63  ;;  %868 = vmatprep.subr.bf16.mxu1 %v3500_v0  ;;  %v3579_v63 = vld [vmem:[%s4949_s1 + $0x1b4] ss:$8 sps:$4 sm:$0xff]  }
  0x42   : > { %1727 = vmatprep.subr.bf16.mxu0 %v3502_v1  ;;  %v3582_v0 = vld [vmem:[%s4949_s1 + $0x5b4] ss:$8 sps:$4 sm:$0xff]   ;;  %v3577_v1 = vld [vmem:[%s4949_s1 + $0x1b0] ss:$8 sps:$4 sm:$0xff]  }
  0x44   : > { %869 = vmatpush1.bf16.msra.mxu1 %v3504_v2  ;;  %v3580_v2 = vld [vmem:[%s4949_s1 + $0x5b0] ss:$8 sps:$4 sm:$0xff]  }
  0x45   : > { %1728 = vmatpush1.bf16.msra.mxu0 %v3505_v3  ;;  %889 = vmatprep.subr.bf16.mxu1 %v3511_v4  ;;  %v3585_v3 = vld [vmem:[%s4949_s1 + $0x1c4] ss:$8 sps:$4 sm:$0xff]  }
  0x46   : > { %1748 = vmatprep.subr.bf16.mxu0 %v3516_v5  ;;  %v3588_v4 = vld [vmem:[%s4949_s1 + $0x5c4] ss:$8 sps:$4 sm:$0xff]   ;;  %v3583_v5 = vld [vmem:[%s4949_s1 + $0x1c0] ss:$8 sps:$4 sm:$0xff]  }
  0x47   : > { %871 = vmatmul.mubr.bf16.vlgmr.msra.gmra.mrb[0].mxu1 %v3506_v6  ;;  %v3586_v6 = vld [vmem:[%s4949_s1 + $0x5c0] ss:$8 sps:$4 sm:$0xff]  }
  0x48   : > { %1730 = vmatmul.mubr.bf16.vlgmr.msra.gmra.mrb[0].mxu0 %v2993_v7  ;;  %890 = vmatpush1.bf16.msra.mxu1 %v3509_v8  ;;  %v3591_v7 = vld [vmem:[%s4949_s1 + $0x1d4] ss:$8 sps:$4 sm:$0xff]  }
  0x49   : > { %1749 = vmatpush1.bf16.msra.mxu0 %v3514_v9  ;;  %891 = vmatprep.subr.bf16.mxu1 %v3519_v10  ;;  %v3594_v8 = vld [vmem:[%s4949_s1 + $0x5d4] ss:$8 sps:$4 sm:$0xff]   ;;  %v3589_v9 = vld [vmem:[%s4949_s1 + $0x1d0] ss:$8 sps:$4 sm:$0xff]  }
  0x4a   : > { %1750 = vmatprep.subr.bf16.mxu0 %v3522_v11  ;;  %880 = vmatprep.mubr.bf16.mxu1 %v2785_v32  ;;  %v3592_v10 = vld [vmem:[%s4949_s1 + $0x5d0] ss:$8 sps:$4 sm:$0xff]   ;;  %v3601_v11 = vld [vmem:[%s4949_s1 + $0x1e4] ss:$8 sps:$4 sm:$0xff]  }
  0x4b   : > { %1739 = vmatprep.mubr.bf16.mxu0 %v3000_v33  ;;  %v3624_v32 = vld [vmem:[%s4949_s1 + $0x610] ss:$8 sps:$4 sm:$0xff]   ;;  %v3631_v33 = vld [vmem:[%s4949_s1 + $0x224] ss:$8 sps:$4 sm:$0xff]  }
  0x4c   : > { %892 = vmatpush1.bf16.msra.mxu1 %v3517_v12  ;;  %v3604_v12 = vld [vmem:[%s4949_s1 + $0x5e4] ss:$8 sps:$4 sm:$0xff]  }
  0x4d   : > { %1751 = vmatpush1.bf16.msra.mxu0 %v3520_v13  ;;  %893 = vmatprep.subr.bf16.mxu1 %v3525_v14  ;;  %v3599_v13 = vld [vmem:[%s4949_s1 + $0x1e0] ss:$8 sps:$4 sm:$0xff]  }
  0x4e   : > { %1752 = vmatprep.subr.bf16.mxu0 %v3528_v15  ;;  %v3602_v14 = vld [vmem:[%s4949_s1 + $0x5e0] ss:$8 sps:$4 sm:$0xff]   ;;  %v3607_v15 = vld [vmem:[%s4949_s1 + $0x1f4] ss:$8 sps:$4 sm:$0xff]  }
  0x4f   : > { %881 = vmatmul.mubr.bf16.gmra.mrb[4].mxu1 %v2784_v34  ;;  %v3634_v34 = vld [vmem:[%s4949_s1 + $0x624] ss:$8 sps:$4 sm:$0xff]  }
  0x50   : > { %894 = vmatpush1.bf16.msra.mxu1 %v3523_v16  ;;  %1740 = vmatmul.mubr.bf16.gmra.mrb[4].mxu0 %v2999_v35  ;;  %v3610_v16 = vld [vmem:[%s4949_s1 + $0x5f4] ss:$8 sps:$4 sm:$0xff]  }
  0x51   : > { %1753 = vmatpush1.bf16.msra.mxu0 %v3526_v17  ;;  %895 = vmatprep.subr.bf16.mxu1 %v3531_v18  ;;  %v3605_v17 = vld [vmem:[%s4949_s1 + $0x1f0] ss:$8 sps:$4 sm:$0xff]  }
  0x52   : > { %1754 = vmatprep.subr.bf16.mxu0 %v3534_v19  ;;  %921 = vmatprep.mubr.bf16.mxu1 %v2781_v43  ;;  %v3608_v18 = vld [vmem:[%s4949_s1 + $0x5f0] ss:$8 sps:$4 sm:$0xff]   ;;  %v3615_v19 = vld [vmem:[%s4949_s1 + $0x204] ss:$8 sps:$4 sm:$0xff]  }
  0x53   : > { %1780 = vmatprep.mubr.bf16.mxu0 %v2996_v47  ;;  %v4421_v35 = vld [vmem:[%s4089_s17 + $0x10] sm:$0xff] }
  0x54   : > { %896 = vmatpush1.bf16.msra.mxu1 %v3529_v20  ;;  %v3620_v20 = vld [vmem:[%s4949_s1 + $0x604] ss:$8 sps:$4 sm:$0xff]   ;;  %v3638_v47 = vld [vmem:[%s4949_s1 + $0x630] ss:$8 sps:$4 sm:$0xff]  }
  0x55   : > { %1755 = vmatpush1.bf16.msra.mxu0 %v3532_v21  ;;  %897 = vmatprep.subr.bf16.mxu1 %v3537_v22  ;;  %v3613_v21 = vld [vmem:[%s4949_s1 + $0x200] ss:$8 sps:$4 sm:$0xff]   ;;  %v2780_v22 = vcombine.low %v4259_v40, %v4108_v51  ;;  %v3626_v51 = vld [vmem:[%s4949_s1 + $0x614] ss:$8 sps:$4 sm:$0xff]  }
  0x56   : > { %1756 = vmatprep.subr.bf16.mxu0 %v3540_v23  ;;  %v2995_v23 = vcombine.low %v4270_v44, %v4273_v45  ;;  %v3632_v40 = vld [vmem:[%s4949_s1 + $0x620] ss:$8 sps:$4 sm:$0xff]  }
  0x58   : > { %898 = vmatpush1.bf16.msra.mxu1 %v3535_v24  ;;  %v3618_v24 = vld [vmem:[%s4949_s1 + $0x600] ss:$8 sps:$4 sm:$0xff]  }
  0x59   : > { %1757 = vmatpush1.bf16.msra.mxu0 %v3538_v25  ;;  %899 = vmatprep.subr.bf16.mxu1 %v3543_v26  ;;  %v4396_v25 = vld [vmem:[%s4089_s17 + $0x58] sm:$0xff] }
  0x5a   : > { %1758 = vmatprep.subr.bf16.mxu0 %v3546_v27  ;;  %v3623_v26 = vld [vmem:[%s4949_s1 + $0x214] ss:$8 sps:$4 sm:$0xff]   ;;  %v2787_v27 = vcombine.high %v4111_v52, %v4111_v52 }
  0x5c   : > { %900 = vmatpush1.bf16.msra.mxu1 %v3541_v30  ;;  %v3002_v30 = vcombine.high %v4396_v25, %v4396_v25 }
  0x5d   : > { %1759 = vmatpush1.bf16.msra.mxu0 %v3544_v31  ;;  %901 = vmatprep.subr.bf16.mxu1 %v3549_v36  ;;  %v3621_v31 = vld [vmem:[%s4949_s1 + $0x210] ss:$8 sps:$4 sm:$0xff]   ;;  %v2786_v36 = vcombine.low %v4111_v52, %v4111_v52  ;;  %v3637_v52 = vld [vmem:[%s4949_s1 + $0x234] ss:$8 sps:$4 sm:$0xff]  }
  0x5e   : > { %1760 = vmatprep.subr.bf16.mxu0 %v3552_v37  ;;  %v3001_v37 = vcombine.low %v4396_v25, %v4396_v25 }
  0x60   : > { %902 = vmatpush1.bf16.msra.mxu1 %v3547_v38  ;;  %v4428_v38 = vld [vmem:[%s4089_s17 + $0x48] sm:$0xff] }
  0x61   : > { %1761 = vmatpush1.bf16.msra.mxu0 %v3550_v39  ;;  %903 = vmatprep.subr.bf16.mxu1 %v3555_v41  ;;  %v3629_v39 = vld [vmem:[%s4949_s1 + $0x220] ss:$8 sps:$4 sm:$0xff]   ;;  %v3640_v41 = vld [vmem:[%s4949_s1 + $0x634] ss:$8 sps:$4 sm:$0xff]   ;;  %v3205_v43 = vcombine.high %v4227_v28, %v4428_v38 }
  0x62   : > { %1762 = vmatprep.subr.bf16.mxu0 %v3558_v42  ;;  %v2783_v42 = vcombine.high %v4421_v35, %v4270_v44 }
  0x64   : > { %904 = vmatpush1.bf16.msra.mxu1 %v3553_v46  ;;  %v3635_v46 = vld [vmem:[%s4949_s1 + $0x230] ss:$8 sps:$4 sm:$0xff]  }
  0x65   : > { %1763 = vmatpush1.bf16.msra.mxu0 %v3556_v48  ;;  %905 = vmatprep.subr.bf16.mxu1 %v3561_v49  ;;  %v3643_v48 = vld [vmem:[%s4949_s1 + $0x244] ss:$8 sps:$4 sm:$0xff]  }
  0x66   : > { %1764 = vmatprep.subr.bf16.mxu0 %v3564_v50  ;;  %v3646_v49 = vld [vmem:[%s4949_s1 + $0x644] ss:$8 sps:$4 sm:$0xff]   ;;  %v3641_v50 = vld [vmem:[%s4949_s1 + $0x240] ss:$8 sps:$4 sm:$0xff]  }
  0x68   : > { %906 = vmatpush1.bf16.msra.mxu1 %v3559_v53  ;;  %v3644_v53 = vld [vmem:[%s4949_s1 + $0x640] ss:$8 sps:$4 sm:$0xff]  }
  0x69   : > { %1765 = vmatpush1.bf16.msra.mxu0 %v3562_v54  ;;  %907 = vmatprep.subr.bf16.mxu1 %v3567_v55  ;;  %v3649_v54 = vld [vmem:[%s4949_s1 + $0x254] ss:$8 sps:$4 sm:$0xff]  }
  0x6a   : > { %1766 = vmatprep.subr.bf16.mxu0 %v3570_v56  ;;  %v3652_v55 = vld [vmem:[%s4949_s1 + $0x654] ss:$8 sps:$4 sm:$0xff]   ;;  %v3647_v56 = vld [vmem:[%s4949_s1 + $0x250] ss:$8 sps:$4 sm:$0xff]  }
  0x6c   : > { %908 = vmatpush1.bf16.msra.mxu1 %v3565_v57  ;;  %v3650_v57 = vld [vmem:[%s4949_s1 + $0x650] ss:$8 sps:$4 sm:$0xff]  }
  0x6d   : > { %1767 = vmatpush1.bf16.msra.mxu0 %v3568_v58  ;;  %909 = vmatprep.subr.bf16.mxu1 %v3573_v59  ;;  %v3655_v58 = vld [vmem:[%s4949_s1 + $0x264] ss:$8 sps:$4 sm:$0xff]  }
  0x6e   : > { %1768 = vmatprep.subr.bf16.mxu0 %v3576_v60  ;;  %v3658_v59 = vld [vmem:[%s4949_s1 + $0x664] ss:$8 sps:$4 sm:$0xff]   ;;  %v3653_v60 = vld [vmem:[%s4949_s1 + $0x260] ss:$8 sps:$4 sm:$0xff]  }
  0x70   : > { %910 = vmatpush1.bf16.msra.mxu1 %v3571_v61  ;;  %v3656_v61 = vld [vmem:[%s4949_s1 + $0x660] ss:$8 sps:$4 sm:$0xff]  }
  0x71   : > { %1769 = vmatpush1.bf16.msra.mxu0 %v3574_v62  ;;  %911 = vmatprep.subr.bf16.mxu1 %v3579_v63  ;;  %v3661_v62 = vld [vmem:[%s4949_s1 + $0x274] ss:$8 sps:$4 sm:$0xff]  }
  0x72   : > { %1770 = vmatprep.subr.bf16.mxu0 %v3582_v0  ;;  %v3664_v63 = vld [vmem:[%s4949_s1 + $0x674] ss:$8 sps:$4 sm:$0xff]   ;;  %v3659_v0 = vld [vmem:[%s4949_s1 + $0x270] ss:$8 sps:$4 sm:$0xff]  }
  0x74   : > { %912 = vmatpush1.bf16.msra.mxu1 %v3577_v1  ;;  %v3662_v1 = vld [vmem:[%s4949_s1 + $0x670] ss:$8 sps:$4 sm:$0xff]  }
  0x75   : > { %1771 = vmatpush1.bf16.msra.mxu0 %v3580_v2  ;;  %913 = vmatprep.subr.bf16.mxu1 %v3585_v3  ;;  %v3667_v2 = vld [vmem:[%s4949_s1 + $0x284] ss:$8 sps:$4 sm:$0xff]  }
  0x76   : > { %1772 = vmatprep.subr.bf16.mxu0 %v3588_v4  ;;  %v3670_v3 = vld [vmem:[%s4949_s1 + $0x684] ss:$8 sps:$4 sm:$0xff]   ;;  %v3665_v4 = vld [vmem:[%s4949_s1 + $0x280] ss:$8 sps:$4 sm:$0xff]  }
  0x78   : > { %914 = vmatpush1.bf16.msra.mxu1 %v3583_v5  ;;  %v3668_v5 = vld [vmem:[%s4949_s1 + $0x680] ss:$8 sps:$4 sm:$0xff]  }
  0x79   : > { %1773 = vmatpush1.bf16.msra.mxu0 %v3586_v6  ;;  %915 = vmatprep.subr.bf16.mxu1 %v3591_v7  ;;  %v3673_v6 = vld [vmem:[%s4949_s1 + $0x294] ss:$8 sps:$4 sm:$0xff]  }
  0x7a   : > { %1774 = vmatprep.subr.bf16.mxu0 %v3594_v8  ;;  %v3676_v7 = vld [vmem:[%s4949_s1 + $0x694] ss:$8 sps:$4 sm:$0xff]   ;;  %v3671_v8 = vld [vmem:[%s4949_s1 + $0x290] ss:$8 sps:$4 sm:$0xff]  }
  0x7c   : > { %916 = vmatpush1.bf16.msra.mxu1 %v3589_v9  ;;  %v3674_v9 = vld [vmem:[%s4949_s1 + $0x690] ss:$8 sps:$4 sm:$0xff]  }
  0x7d   : > { %1775 = vmatpush1.bf16.msra.mxu0 %v3592_v10  ;;  %917 = vmatprep.subr.bf16.mxu1 %v3601_v11  ;;  %v3679_v10 = vld [vmem:[%s4949_s1 + $0x2a4] ss:$8 sps:$4 sm:$0xff]  }
  0x7e   : > { %1776 = vmatprep.subr.bf16.mxu0 %v3604_v12  ;;  %v3682_v11 = vld [vmem:[%s4949_s1 + $0x6a4] ss:$8 sps:$4 sm:$0xff]   ;;  %v3677_v12 = vld [vmem:[%s4949_s1 + $0x2a0] ss:$8 sps:$4 sm:$0xff]  }
  0x80   : > { %918 = vmatpush1.bf16.msra.mxu1 %v3599_v13  ;;  %v3680_v13 = vld [vmem:[%s4949_s1 + $0x6a0] ss:$8 sps:$4 sm:$0xff]  }
  0x81   : > { %1777 = vmatpush1.bf16.msra.mxu0 %v3602_v14  ;;  %919 = vmatprep.subr.bf16.mxu1 %v3607_v15  ;;  %v3685_v14 = vld [vmem:[%s4949_s1 + $0x2b4] ss:$8 sps:$4 sm:$0xff]  }
  0x82   : > { %1778 = vmatprep.subr.bf16.mxu0 %v3610_v16  ;;  %v3688_v15 = vld [vmem:[%s4949_s1 + $0x6b4] ss:$8 sps:$4 sm:$0xff]   ;;  %v3683_v16 = vld [vmem:[%s4949_s1 + $0x2b0] ss:$8 sps:$4 sm:$0xff]  }
  0x84   : > { %920 = vmatpush1.bf16.msra.mxu1 %v3605_v17  ;;  %v3686_v17 = vld [vmem:[%s4949_s1 + $0x6b0] ss:$8 sps:$4 sm:$0xff]  }
  0x85   : > { %1779 = vmatpush1.bf16.msra.mxu0 %v3608_v18  ;;  %940 = vmatprep.subr.bf16.mxu1 %v3615_v19  ;;  %v3691_v18 = vld [vmem:[%s4949_s1 + $0x2c4] ss:$8 sps:$4 sm:$0xff]  }
  0x86   : > { %2460 = vmatprep.subr.bf16.mxu0 %v3620_v20  ;;  %v3694_v19 = vld [vmem:[%s4949_s1 + $0x6c4] ss:$8 sps:$4 sm:$0xff]   ;;  %v3689_v20 = vld [vmem:[%s4949_s1 + $0x2c0] ss:$8 sps:$4 sm:$0xff]  }
  0x87   : > { %922 = vmatmul.mubr.bf16.vlgmr.msra.gmra.mrb[0].mxu1 %v2780_v22  ;;  %v3697_v22 = vld [vmem:[%s4949_s1 + $0x2d4] ss:$8 sps:$4 sm:$0xff]  }
  0x88   : > { %1781 = vmatmul.mubr.bf16.vlgmr.msra.gmra.mrb[0].mxu0 %v2995_v23  ;;  %941 = vmatpush1.bf16.msra.mxu1 %v3613_v21  ;;  %v3692_v21 = vld [vmem:[%s4949_s1 + $0x6c0] ss:$8 sps:$4 sm:$0xff]   ;;  %v3700_v23 = vld [vmem:[%s4949_s1 + $0x6d4] ss:$8 sps:$4 sm:$0xff]  }
  0x89   : > { %2461 = vmatpush1.bf16.msra.mxu0 %v3618_v24  ;;  %942 = vmatprep.subr.bf16.mxu1 %v3623_v26  ;;  %v3695_v24 = vld [vmem:[%s4949_s1 + $0x2d0] ss:$8 sps:$4 sm:$0xff]  }
  0x8a   : > { %2462 = vmatprep.subr.bf16.mxu0 %v3626_v51  ;;  %931 = vmatprep.mubr.bf16.mxu1 %v2787_v27  ;;  %v3698_v26 = vld [vmem:[%s4949_s1 + $0x6d0] ss:$8 sps:$4 sm:$0xff]   ;;  %v3705_v51 = vld [vmem:[%s4949_s1 + $0x2e4] ss:$8 sps:$4 sm:$0xff]  }
  0x8b   : > { %1790 = vmatprep.mubr.bf16.mxu0 %v3002_v30  ;;  %v3708_v27 = vld [vmem:[%s4949_s1 + $0x6e4] ss:$8 sps:$4 sm:$0xff]   ;;  %v3703_v30 = vld [vmem:[%s4949_s1 + $0x2e0] ss:$8 sps:$4 sm:$0xff]  }
  0x8c   : > { %943 = vmatpush1.bf16.msra.mxu1 %v3621_v31  ;;  %v3706_v31 = vld [vmem:[%s4949_s1 + $0x6e0] ss:$8 sps:$4 sm:$0xff]  }
  0x8d   : > { %2463 = vmatpush1.bf16.msra.mxu0 %v3624_v32  ;;  %944 = vmatprep.subr.bf16.mxu1 %v3631_v33  ;;  %v3711_v32 = vld [vmem:[%s4949_s1 + $0x2f4] ss:$8 sps:$4 sm:$0xff]  }
  0x8e   : > { %2464 = vmatprep.subr.bf16.mxu0 %v3634_v34  ;;  %v3714_v33 = vld [vmem:[%s4949_s1 + $0x6f4] ss:$8 sps:$4 sm:$0xff]   ;;  %v3709_v34 = vld [vmem:[%s4949_s1 + $0x2f0] ss:$8 sps:$4 sm:$0xff]  }
  0x8f   : > { %932 = vmatmul.mubr.bf16.gmra.mrb[8].mxu1 %v2786_v36  ;;  %v3712_v36 = vld [vmem:[%s4949_s1 + $0x6f0] ss:$8 sps:$4 sm:$0xff]  }
  0x90   : > { %1791 = vmatmul.mubr.bf16.gmra.mrb[8].mxu0 %v3001_v37  ;;  %945 = vmatpush1.bf16.msra.mxu1 %v3629_v39  ;;  %v3719_v37 = vld [vmem:[%s4949_s1 + $0x304] ss:$8 sps:$4 sm:$0xff]  }
  0x91   : > { %2465 = vmatpush1.bf16.msra.mxu0 %v3632_v40  ;;  %946 = vmatprep.subr.bf16.mxu1 %v3637_v52  ;;  %v3724_v39 = vld [vmem:[%s4949_s1 + $0x704] ss:$8 sps:$4 sm:$0xff]   ;;  %v2782_v40 = vcombine.low %v4421_v35, %v4270_v44  ;;  %v3204_v52 = vcombine.low %v4227_v28, %v4428_v38  ;;  %v3727_v44 = vld [vmem:[%s4949_s1 + $0x314] ss:$8 sps:$4 sm:$0xff]  }
  0x92   : > { %2466 = vmatprep.subr.bf16.mxu0 %v3640_v41  ;;  %972 = vmatprep.mubr.bf16.mxu1 %v2783_v42  ;;  %v3105_v41 = vld [vmem:[%s4089_s17 + $0x60] sm:$0xff]  ;;  %v3730_v35 = vld [vmem:[%s4949_s1 + $0x714] ss:$8 sps:$4 sm:$0xff]  }
  0x93   : > { %2492 = vmatprep.mubr.bf16.mxu0 %v3205_v43  ;;  %v3717_v42 = vld [vmem:[%s4949_s1 + $0x300] ss:$8 sps:$4 sm:$0xff]  }
  0x94   : > { %947 = vmatpush1.bf16.msra.mxu1 %v3635_v46  ;;  %v3722_v43 = vld [vmem:[%s4949_s1 + $0x700] ss:$8 sps:$4 sm:$0xff]   ;;  %v2789_v46 = vcombine.high %v4273_v45, %v4273_v45 }
  0x95   : > { %2467 = vmatpush1.bf16.msra.mxu0 %v3638_v47  ;;  %948 = vmatprep.subr.bf16.mxu1 %v3643_v48  ;;  %v3211_v47 = vcombine.high %v3105_v41, %v3105_v41  ;;  %v3725_v48 = vld [vmem:[%s4949_s1 + $0x310] ss:$8 sps:$4 sm:$0xff]  }
  0x96   : > { %2468 = vmatprep.subr.bf16.mxu0 %v3646_v49  ;;  %v3728_v49 = vld [vmem:[%s4949_s1 + $0x710] ss:$8 sps:$4 sm:$0xff]  }
  0x98   : > { %949 = vmatpush1.bf16.msra.mxu1 %v3641_v50  ;;  %v3735_v50 = vld [vmem:[%s4949_s1 + $0x324] ss:$8 sps:$4 sm:$0xff]  }
  0x99   : > { %2469 = vmatpush1.bf16.msra.mxu0 %v3644_v53  ;;  %950 = vmatprep.subr.bf16.mxu1 %v3649_v54  ;;  %v3738_v53 = vld [vmem:[%s4949_s1 + $0x724] ss:$8 sps:$4 sm:$0xff]   ;;  %v2788_v54 = vcombine.low %v4273_v45, %v4273_v45  ;;  %v3741_v45 = vld [vmem:[%s4949_s1 + $0x334] ss:$8 sps:$4 sm:$0xff]  }
  0x9a   : > { %2470 = vmatprep.subr.bf16.mxu0 %v3652_v55  ;;  %v3210_v55 = vcombine.low %v3105_v41, %v3105_v41  ;;  %v3802_v41 = vld [vmem:[%s4949_s1 + $0x7d0] ss:$8 sps:$4 sm:$0xff]  }
  0x9c   : > { %951 = vmatpush1.bf16.msra.mxu1 %v3647_v56  ;;  %v4636_v56 = vld [vmem:[%s4089_s17 + $0x18] sm:$0xff] }
  0x9d   : > { %2471 = vmatpush1.bf16.msra.mxu0 %v3650_v57  ;;  %952 = vmatprep.subr.bf16.mxu1 %v3655_v58  ;;  %v4639_v57 = vld [vmem:[%s4089_s17 + $0x38] sm:$0xff]  ;;  %v3733_v58 = vld [vmem:[%s4949_s1 + $0x320] ss:$8 sps:$4 sm:$0xff]  }
  0x9e   : > { %2472 = vmatprep.subr.bf16.mxu0 %v3658_v59  ;;  %v3736_v59 = vld [vmem:[%s4949_s1 + $0x720] ss:$8 sps:$4 sm:$0xff]  }
  0xa0   : > { %953 = vmatpush1.bf16.msra.mxu1 %v3653_v60  ;;  %v3744_v60 = vld [vmem:[%s4949_s1 + $0x734] ss:$8 sps:$4 sm:$0xff]  }
  0xa1   : > { %2473 = vmatpush1.bf16.msra.mxu0 %v3656_v61  ;;  %954 = vmatprep.subr.bf16.mxu1 %v3661_v62  ;;  %v2992_v61 = vcombine.high %v4636_v56, %v4227_v28  ;;  %v3207_v62 = vcombine.high %v4639_v57, %v4230_v29  ;;  %v3747_v28 = vld [vmem:[%s4949_s1 + $0x344] ss:$8 sps:$4 sm:$0xff]  }
  0xa2   : > { %2474 = vmatprep.subr.bf16.mxu0 %v3664_v63  ;;  %v3739_v63 = vld [vmem:[%s4949_s1 + $0x330] ss:$8 sps:$4 sm:$0xff]   ;;  %v3750_v29 = vld [vmem:[%s4949_s1 + $0x744] ss:$8 sps:$4 sm:$0xff]  }
  0xa4   : > { %955 = vmatpush1.bf16.msra.mxu1 %v3659_v0  ;;  %v3742_v0 = vld [vmem:[%s4949_s1 + $0x730] ss:$8 sps:$4 sm:$0xff]  }
  0xa5   : > { %2475 = vmatpush1.bf16.msra.mxu0 %v3662_v1  ;;  %956 = vmatprep.subr.bf16.mxu1 %v3667_v2  ;;  %v3745_v1 = vld [vmem:[%s4949_s1 + $0x340] ss:$8 sps:$4 sm:$0xff]  }
  0xa6   : > { %2476 = vmatprep.subr.bf16.mxu0 %v3670_v3  ;;  %v3748_v2 = vld [vmem:[%s4949_s1 + $0x740] ss:$8 sps:$4 sm:$0xff]   ;;  %v3753_v3 = vld [vmem:[%s4949_s1 + $0x354] ss:$8 sps:$4 sm:$0xff]  }
  0xa8   : > { %957 = vmatpush1.bf16.msra.mxu1 %v3665_v4  ;;  %v3756_v4 = vld [vmem:[%s4949_s1 + $0x754] ss:$8 sps:$4 sm:$0xff]  }
  0xa9   : > { %2477 = vmatpush1.bf16.msra.mxu0 %v3668_v5  ;;  %958 = vmatprep.subr.bf16.mxu1 %v3673_v6  ;;  %v3751_v5 = vld [vmem:[%s4949_s1 + $0x350] ss:$8 sps:$4 sm:$0xff]  }
  0xaa   : > { %2478 = vmatprep.subr.bf16.mxu0 %v3676_v7  ;;  %v3754_v6 = vld [vmem:[%s4949_s1 + $0x750] ss:$8 sps:$4 sm:$0xff]   ;;  %v3759_v7 = vld [vmem:[%s4949_s1 + $0x364] ss:$8 sps:$4 sm:$0xff]  }
  0xac   : > { %959 = vmatpush1.bf16.msra.mxu1 %v3671_v8  ;;  %v3762_v8 = vld [vmem:[%s4949_s1 + $0x764] ss:$8 sps:$4 sm:$0xff]  }
  0xad   : > { %2479 = vmatpush1.bf16.msra.mxu0 %v3674_v9  ;;  %960 = vmatprep.subr.bf16.mxu1 %v3679_v10  ;;  %v3757_v9 = vld [vmem:[%s4949_s1 + $0x360] ss:$8 sps:$4 sm:$0xff]  }
  0xae   : > { %2480 = vmatprep.subr.bf16.mxu0 %v3682_v11  ;;  %v3760_v10 = vld [vmem:[%s4949_s1 + $0x760] ss:$8 sps:$4 sm:$0xff]   ;;  %v3765_v11 = vld [vmem:[%s4949_s1 + $0x374] ss:$8 sps:$4 sm:$0xff]  }
  0xb0   : > { %961 = vmatpush1.bf16.msra.mxu1 %v3677_v12  ;;  %v3768_v12 = vld [vmem:[%s4949_s1 + $0x774] ss:$8 sps:$4 sm:$0xff]  }
  0xb1   : > { %2481 = vmatpush1.bf16.msra.mxu0 %v3680_v13  ;;  %962 = vmatprep.subr.bf16.mxu1 %v3685_v14  ;;  %v3763_v13 = vld [vmem:[%s4949_s1 + $0x370] ss:$8 sps:$4 sm:$0xff]  }
  0xb2   : > { %2482 = vmatprep.subr.bf16.mxu0 %v3688_v15  ;;  %v3766_v14 = vld [vmem:[%s4949_s1 + $0x770] ss:$8 sps:$4 sm:$0xff]   ;;  %v3771_v15 = vld [vmem:[%s4949_s1 + $0x384] ss:$8 sps:$4 sm:$0xff]  }
  0xb4   : > { %963 = vmatpush1.bf16.msra.mxu1 %v3683_v16  ;;  %v3774_v16 = vld [vmem:[%s4949_s1 + $0x784] ss:$8 sps:$4 sm:$0xff]  }
  0xb5   : > { %2483 = vmatpush1.bf16.msra.mxu0 %v3686_v17  ;;  %964 = vmatprep.subr.bf16.mxu1 %v3691_v18  ;;  %v3769_v17 = vld [vmem:[%s4949_s1 + $0x380] ss:$8 sps:$4 sm:$0xff]  }
  0xb6   : > { %2484 = vmatprep.subr.bf16.mxu0 %v3694_v19  ;;  %v3772_v18 = vld [vmem:[%s4949_s1 + $0x780] ss:$8 sps:$4 sm:$0xff]   ;;  %v3777_v19 = vld [vmem:[%s4949_s1 + $0x394] ss:$8 sps:$4 sm:$0xff]  }
  0xb8   : > { %965 = vmatpush1.bf16.msra.mxu1 %v3689_v20  ;;  %v3780_v20 = vld [vmem:[%s4949_s1 + $0x794] ss:$8 sps:$4 sm:$0xff]  }
  0xb9   : > { %2485 = vmatpush1.bf16.msra.mxu0 %v3692_v21  ;;  %966 = vmatprep.subr.bf16.mxu1 %v3697_v22  ;;  %v3775_v21 = vld [vmem:[%s4949_s1 + $0x390] ss:$8 sps:$4 sm:$0xff]  }
  0xba   : > { %2486 = vmatprep.subr.bf16.mxu0 %v3700_v23  ;;  %v3778_v22 = vld [vmem:[%s4949_s1 + $0x790] ss:$8 sps:$4 sm:$0xff]   ;;  %v3783_v23 = vld [vmem:[%s4949_s1 + $0x3a4] ss:$8 sps:$4 sm:$0xff]  }
  0xbc   : > { %967 = vmatpush1.bf16.msra.mxu1 %v3695_v24  ;;  %v3786_v24 = vld [vmem:[%s4949_s1 + $0x7a4] ss:$8 sps:$4 sm:$0xff]  }
  0xbd   : > { %2487 = vmatpush1.bf16.msra.mxu0 %v3698_v26  ;;  %968 = vmatprep.subr.bf16.mxu1 %v3705_v51  ;;  %v3781_v26 = vld [vmem:[%s4949_s1 + $0x3a0] ss:$8 sps:$4 sm:$0xff]  }
  0xbe   : > { %2488 = vmatprep.subr.bf16.mxu0 %v3708_v27  ;;  %v3784_v51 = vld [vmem:[%s4949_s1 + $0x7a0] ss:$8 sps:$4 sm:$0xff]   ;;  %v3789_v27 = vld [vmem:[%s4949_s1 + $0x3b4] ss:$8 sps:$4 sm:$0xff]  }
  0xc0   : > { %969 = vmatpush1.bf16.msra.mxu1 %v3703_v30  ;;  %v3792_v30 = vld [vmem:[%s4949_s1 + $0x7b4] ss:$8 sps:$4 sm:$0xff]  }
  0xc1   : > { %2489 = vmatpush1.bf16.msra.mxu0 %v3706_v31  ;;  %970 = vmatprep.subr.bf16.mxu1 %v3711_v32  ;;  %v3787_v31 = vld [vmem:[%s4949_s1 + $0x3b0] ss:$8 sps:$4 sm:$0xff]  }
  0xc2   : > { %2490 = vmatprep.subr.bf16.mxu0 %v3714_v33  ;;  %v3790_v32 = vld [vmem:[%s4949_s1 + $0x7b0] ss:$8 sps:$4 sm:$0xff]   ;;  %v3795_v33 = vld [vmem:[%s4949_s1 + $0x3c4] ss:$8 sps:$4 sm:$0xff]  }
  0xc4   : > { %971 = vmatpush1.bf16.msra.mxu1 %v3709_v34  ;;  %v3798_v34 = vld [vmem:[%s4949_s1 + $0x7c4] ss:$8 sps:$4 sm:$0xff]  }
  0xc5   : > { %2491 = vmatpush1.bf16.msra.mxu0 %v3712_v36  ;;  %1646 = vmatprep.subr.bf16.mxu1 %v3719_v37  ;;  %v3793_v36 = vld [vmem:[%s4949_s1 + $0x3c0] ss:$8 sps:$4 sm:$0xff]  }
  0xc6   : > { %2511 = vmatprep.subr.bf16.mxu0 %v3724_v39  ;;  %v3796_v37 = vld [vmem:[%s4949_s1 + $0x7c0] ss:$8 sps:$4 sm:$0xff]   ;;  %v3801_v39 = vld [vmem:[%s4949_s1 + $0x3d4] ss:$8 sps:$4 sm:$0xff]  }
  0xc7   : > { %973 = vmatmul.mubr.bf16.vlgmr.msra.gmra.mrb[0].mxu1 %v2782_v40  ;;  %v3804_v40 = vld [vmem:[%s4949_s1 + $0x7d4] ss:$8 sps:$4 sm:$0xff]  }
  0xc8   : > { %2493 = vmatmul.mubr.bf16.vlgmr.msra.gmra.mrb[0].mxu0 %v3204_v52  ;;  %1647 = vmatpush1.bf16.msra.mxu1 %v3717_v42  ;;  %v3799_v52 = vld [vmem:[%s4949_s1 + $0x3d0] ss:$8 sps:$4 sm:$0xff]   ;;  %v3809_v42 = vld [vmem:[%s4949_s1 + $0x3e4] ss:$8 sps:$4 sm:$0xff]  }
  0xc9   : > { %2512 = vmatpush1.bf16.msra.mxu0 %v3722_v43  ;;  %1648 = vmatprep.subr.bf16.mxu1 %v3727_v44  ;;  %v3812_v43 = vld [vmem:[%s4949_s1 + $0x7e4] ss:$8 sps:$4 sm:$0xff]   ;;  %v3807_v44 = vld [vmem:[%s4949_s1 + $0x3e0] ss:$8 sps:$4 sm:$0xff]  }
  0xca   : > { %2513 = vmatprep.subr.bf16.mxu0 %v3730_v35  ;;  %982 = vmatprep.mubr.bf16.mxu1 %v2789_v46  ;;  %v3810_v35 = vld [vmem:[%s4949_s1 + $0x7e0] ss:$8 sps:$4 sm:$0xff]   ;;  %v3815_v46 = vld [vmem:[%s4949_s1 + $0x3f4] ss:$8 sps:$4 sm:$0xff]  }
  0xcb   : > { %2502 = vmatprep.mubr.bf16.mxu0 %v3211_v47  ;;  %v3818_v47 = vld [vmem:[%s4949_s1 + $0x7f4] ss:$8 sps:$4 sm:$0xff]  }
  0xcc   : > { %1649 = vmatpush1.bf16.msra.mxu1 %v3725_v48  ;;  %v3813_v48 = vld [vmem:[%s4949_s1 + $0x3f0] ss:$8 sps:$4 sm:$0xff]  }
  0xcd   : > { %2514 = vmatpush1.bf16.msra.mxu0 %v3728_v49  ;;  %1650 = vmatprep.subr.bf16.mxu1 %v3735_v50  ;;  %v3816_v49 = vld [vmem:[%s4949_s1 + $0x7f0] ss:$8 sps:$4 sm:$0xff]   ;;  %v3825_v50 = vld [vmem:[%s4949_s1 + $0x804] ss:$8 sps:$4 sm:$0xff]  }
  0xce   : > { %2515 = vmatprep.subr.bf16.mxu0 %v3738_v53  ;;  %v3879_v53 = vld [vmem:[%s4089_s17 + $0x30] sm:$0xff] }
  0xcf   : > { %983 = vmatmul.mubr.bf16.gmra.mrb[12].mxu1 %v2788_v54  ;;  %v2991_v54 = vcombine.low %v4636_v56, %v3879_v53  ;;  %v2998_v56 = vcombine.high %v4428_v38, %v4428_v38 }
  0xd0   : > { %2503 = vmatmul.mubr.bf16.gmra.mrb[12].mxu0 %v3210_v55  ;;  %1651 = vmatpush1.bf16.msra.mxu1 %v3733_v58  ;;  %v3880_v55 = vld [vmem:[%s4089_s17 + $0x50] sm:$0xff] }
  0xd1   : > { %2516 = vmatpush1.bf16.msra.mxu0 %v3736_v59  ;;  %1652 = vmatprep.subr.bf16.mxu1 %v3741_v45  ;;  %v3206_v58 = vcombine.low %v4639_v57, %v3880_v55  ;;  %v3106_v59 = vld [vmem:[%s4089_s17 + $0x68] sm:$0xff]  ;;  %v3826_v57 = vld [vmem:[%s4949_s1 + $0x810] ss:$8 sps:$4 sm:$0xff]  }
  0xd2   : > { %2517 = vmatprep.subr.bf16.mxu0 %v3744_v60  ;;  %1678 = vmatprep.mubr.bf16.mxu1 %v2992_v61  ;;  %v3823_v45 = vld [vmem:[%s4949_s1 + $0x800] ss:$8 sps:$4 sm:$0xff]   ;;  %v3828_v60 = vld [vmem:[%s4949_s1 + $0x814] ss:$8 sps:$4 sm:$0xff]   ;;  %v3213_v61 = vcombine.high %v3106_v59, %v3106_v59 }
  0xd3   : > { %2543 = vmatprep.mubr.bf16.mxu0 %v3207_v62  ;;  %v3835_v62 = vld [vmem:[%s4949_s1 + $0x824] ss:$8 sps:$4 sm:$0xff]  }
  0xd4   : > { %1653 = vmatpush1.bf16.msra.mxu1 %v3739_v63  ;;  %v2997_v63 = vcombine.low %v4428_v38, %v4428_v38 }
  0xd5   : > { %2518 = vmatpush1.bf16.msra.mxu0 %v3742_v0  ;;  %1654 = vmatprep.subr.bf16.mxu1 %v3747_v28  ;;  %v3212_v0 = vcombine.low %v3106_v59, %v3106_v59  ;;  %v4832_v28 = vld [vmem:[%s4089_s17 + $0x40] sm:$0xff] }
  0xd6   : > { %2519 = vmatprep.subr.bf16.mxu0 %v3750_v29  ;;  %v4835_v29 = vld [vmem:[%s4089_s17 + $0x70] sm:$0xff]  ;;  %v3209_v38 = vcombine.high %v4832_v28, %v4396_v25  ;;  %v3839_v25 = vld [vmem:[%s4949_s1 + $0x840] ss:$8 sps:$4 sm:$0xff]  }
  0xd8   : > { %1655 = vmatpush1.bf16.msra.mxu1 %v3745_v1  ;;  %v3833_v1 = vld [vmem:[%s4949_s1 + $0x820] ss:$8 sps:$4 sm:$0xff]  }
  0xd9   : > { %2520 = vmatpush1.bf16.msra.mxu0 %v3748_v2  ;;  %1656 = vmatprep.subr.bf16.mxu1 %v3753_v3  ;;  %v3838_v2 = vld [vmem:[%s4949_s1 + $0x834] ss:$8 sps:$4 sm:$0xff]   ;;  %v3215_v3 = vcombine.high %v4835_v29, %v4835_v29 }
  0xda   : > { %2521 = vmatprep.subr.bf16.mxu0 %v3756_v4  ;;  %v3836_v4 = vld [vmem:[%s4949_s1 + $0x830] ss:$8 sps:$4 sm:$0xff]  }
  0xdc   : > { %1657 = vmatpush1.bf16.msra.mxu1 %v3751_v5  ;;  %v3841_v5 = vld [vmem:[%s4949_s1 + $0x844] ss:$8 sps:$4 sm:$0xff]  }
  0xdd   : > { %2522 = vmatpush1.bf16.msra.mxu0 %v3754_v6  ;;  %1658 = vmatprep.subr.bf16.mxu1 %v3759_v7  ;;  %v3844_v6 = vld [vmem:[%s4949_s1 + $0x854] ss:$8 sps:$4 sm:$0xff]   ;;  %v3842_v7 = vld [vmem:[%s4949_s1 + $0x850] ss:$8 sps:$4 sm:$0xff]  }
  0xde   : > { %2523 = vmatprep.subr.bf16.mxu0 %v3762_v8  ;;  %v3847_v8 = vld [vmem:[%s4949_s1 + $0x864] ss:$8 sps:$4 sm:$0xff]  }
  0xe0   : > { %1659 = vmatpush1.bf16.msra.mxu1 %v3757_v9  ;;  %v3845_v9 = vld [vmem:[%s4949_s1 + $0x860] ss:$8 sps:$4 sm:$0xff]  }
  0xe1   : > { %2524 = vmatpush1.bf16.msra.mxu0 %v3760_v10  ;;  %1660 = vmatprep.subr.bf16.mxu1 %v3765_v11  ;;  %v3850_v10 = vld [vmem:[%s4949_s1 + $0x874] ss:$8 sps:$4 sm:$0xff]   ;;  %v3848_v11 = vld [vmem:[%s4949_s1 + $0x870] ss:$8 sps:$4 sm:$0xff]  }
  0xe2   : > { %2525 = vmatprep.subr.bf16.mxu0 %v3768_v12  ;;  %v3853_v12 = vld [vmem:[%s4949_s1 + $0x884] ss:$8 sps:$4 sm:$0xff]  }
  0xe4   : > { %1661 = vmatpush1.bf16.msra.mxu1 %v3763_v13  ;;  %v3851_v13 = vld [vmem:[%s4949_s1 + $0x880] ss:$8 sps:$4 sm:$0xff]  }
  0xe5   : > { %2526 = vmatpush1.bf16.msra.mxu0 %v3766_v14  ;;  %1662 = vmatprep.subr.bf16.mxu1 %v3771_v15  ;;  %v3856_v14 = vld [vmem:[%s4949_s1 + $0x894] ss:$8 sps:$4 sm:$0xff]   ;;  %v3854_v15 = vld [vmem:[%s4949_s1 + $0x890] ss:$8 sps:$4 sm:$0xff]  }
  0xe6   : > { %2527 = vmatprep.subr.bf16.mxu0 %v3774_v16  ;;  %v3859_v16 = vld [vmem:[%s4949_s1 + $0x8a4] ss:$8 sps:$4 sm:$0xff]  }
  0xe8   : > { %1663 = vmatpush1.bf16.msra.mxu1 %v3769_v17  ;;  %v3857_v17 = vld [vmem:[%s4949_s1 + $0x8a0] ss:$8 sps:$4 sm:$0xff]  }
  0xe9   : > { %2528 = vmatpush1.bf16.msra.mxu0 %v3772_v18  ;;  %1664 = vmatprep.subr.bf16.mxu1 %v3777_v19  ;;  %v3862_v18 = vld [vmem:[%s4949_s1 + $0x8b4] ss:$8 sps:$4 sm:$0xff]  }
  0xea   : > { %2529 = vmatprep.subr.bf16.mxu0 %v3780_v20 }
  0xec   : > { %1665 = vmatpush1.bf16.msra.mxu1 %v3775_v21 }
  0xed   : > { %2530 = vmatpush1.bf16.msra.mxu0 %v3778_v22  ;;  %1666 = vmatprep.subr.bf16.mxu1 %v3783_v23  ;;  %v3860_v23 = vld [vmem:[%s4949_s1 + $0x8b0] ss:$8 sps:$4 sm:$0xff]  }
  0xee   : > { %2531 = vmatprep.subr.bf16.mxu0 %v3786_v24 }
  0xf0   : > { %1667 = vmatpush1.bf16.msra.mxu1 %v3781_v26 }
  0xf1   : > { %2532 = vmatpush1.bf16.msra.mxu0 %v3784_v51  ;;  %1668 = vmatprep.subr.bf16.mxu1 %v3789_v27  ;;  %v3865_v51 = vld [vmem:[%s4949_s1 + $0x8c4] ss:$8 sps:$4 sm:$0xff]  }
  0xf2   : > { %2533 = vmatprep.subr.bf16.mxu0 %v3792_v30 }
  0xf4   : > { %1669 = vmatpush1.bf16.msra.mxu1 %v3787_v31  ;;  %v3863_v31 = vld [vmem:[%s4949_s1 + $0x8c0] ss:$8 sps:$4 sm:$0xff]  }
  0xf5   : > { %2534 = vmatpush1.bf16.msra.mxu0 %v3790_v32  ;;  %1670 = vmatprep.subr.bf16.mxu1 %v3795_v33  ;;  %v3868_v32 = vld [vmem:[%s4949_s1 + $0x8d4] ss:$8 sps:$4 sm:$0xff]   ;;  %v3866_v33 = vld [vmem:[%s4949_s1 + $0x8d0] ss:$8 sps:$4 sm:$0xff]  }
  0xf6   : > { %2535 = vmatprep.subr.bf16.mxu0 %v3798_v34  ;;  %v3871_v34 = vld [vmem:[%s4949_s1 + $0x8e4] ss:$8 sps:$4 sm:$0xff]  }
  0xf8   : > { %1671 = vmatpush1.bf16.msra.mxu1 %v3793_v36  ;;  %v3869_v36 = vld [vmem:[%s4949_s1 + $0x8e0] ss:$8 sps:$4 sm:$0xff]  }
  0xf9   : > { %2536 = vmatpush1.bf16.msra.mxu0 %v3796_v37  ;;  %1672 = vmatprep.subr.bf16.mxu1 %v3801_v39  ;;  %v3874_v37 = vld [vmem:[%s4949_s1 + $0x8f4] ss:$8 sps:$4 sm:$0xff]   ;;  %v3872_v39 = vld [vmem:[%s4949_s1 + $0x8f0] ss:$8 sps:$4 sm:$0xff]  }
  0xfa   : > { %2537 = vmatprep.subr.bf16.mxu0 %v3804_v40  ;;  %v3881_v40 = vld [vmem:[%s4089_s17 + $0x58] sm:$0xff] }
  0xfc   : > { %1673 = vmatpush1.bf16.msra.mxu1 %v3799_v52  ;;  %v3208_v52 = vcombine.low %v4832_v28, %v3881_v40 }
  0xfd   : > { %2538 = vmatpush1.bf16.msra.mxu0 %v3802_v41  ;;  %1674 = vmatprep.subr.bf16.mxu1 %v3809_v42  ;;  %v3214_v41 = vcombine.low %v4835_v29, %v4835_v29 }
  0xfe   : > { %2539 = vmatprep.subr.bf16.mxu0 %v3812_v43 }
 0x100   : > { %1675 = vmatpush1.bf16.msra.mxu1 %v3807_v44 }
 0x101   : > { %2540 = vmatpush1.bf16.msra.mxu0 %v3810_v35  ;;  %1676 = vmatprep.subr.bf16.mxu1 %v3815_v46 }
 0x102   : > { %2541 = vmatprep.subr.bf16.mxu0 %v3818_v47 }
 0x104   : > { %1677 = vmatpush1.bf16.msra.mxu1 %v3813_v48 }
 0x105   : > { %2542 = vmatpush1.bf16.msra.mxu0 %v3816_v49  ;;  %3320 = vmatprep.subr.bf16.mxu1 %v3825_v50 }
 0x106   : > { %2562 = vmatprep.subr.bf16.mxu0 %v3825_v50 }
 0x107   : > { %1679 = vmatmul.mubr.bf16.vlgmr.msra.gmra.mrb[0].mxu1 %v2991_v54 }
 0x108   : > { %2544 = vmatmul.mubr.bf16.vlgmr.msra.gmra.mrb[0].mxu0 %v3206_v58  ;;  %3336 = vmatpush1.bf16.msra.mxu1 %v3823_v45 }
 0x109   : > { %2563 = vmatpush1.bf16.msra.mxu0 %v3823_v45  ;;  %3321 = vmatprep.subr.bf16.mxu1 %v3828_v60 }
 0x10a   : > { %2564 = vmatprep.subr.bf16.mxu0 %v3828_v60  ;;  %1688 = vmatprep.mubr.bf16.mxu1 %v2998_v56 }
 0x10b   : > { %2553 = vmatprep.mubr.bf16.mxu0 %v3213_v61 }
 0x10c   : > { %3337 = vmatpush1.bf16.msra.mxu1 %v3826_v57 }
 0x10d   : > { %2565 = vmatpush1.bf16.msra.mxu0 %v3826_v57  ;;  %3322 = vmatprep.subr.bf16.mxu1 %v3835_v62 }
 0x10e   : > { %2566 = vmatprep.subr.bf16.mxu0 %v3835_v62 }
 0x10f   : > { %1689 = vmatmul.mubr.bf16.gmra.mrb[16].mxu1 %v2997_v63 }
 0x110   : > { %2554 = vmatmul.mubr.bf16.gmra.mrb[16].mxu0 %v3212_v0  ;;  %3338 = vmatpush1.bf16.msra.mxu1 %v3833_v1 }
 0x111   : > { %2567 = vmatpush1.bf16.msra.mxu0 %v3833_v1  ;;  %3323 = vmatprep.subr.bf16.mxu1 %v3838_v2 }
 0x112   : > { %2568 = vmatprep.subr.bf16.mxu0 %v3838_v2  ;;  %2594 = vmatprep.mubr.bf16.mxu0 %v3209_v38 }
 0x113   : > { %2604 = vmatprep.mubr.bf16.mxu1 %v3215_v3 }
 0x114   : > { %3339 = vmatpush1.bf16.msra.mxu1 %v3836_v4 }
 0x115   : > { %2569 = vmatpush1.bf16.msra.mxu0 %v3836_v4  ;;  %3324 = vmatprep.subr.bf16.mxu1 %v3841_v5 }
 0x116   : > { %2570 = vmatprep.subr.bf16.mxu0 %v3841_v5 }
 0x118   : > { %3340 = vmatpush1.bf16.msra.mxu1 %v3839_v25 }
 0x119   : > { %2571 = vmatpush1.bf16.msra.mxu0 %v3839_v25  ;;  %3325 = vmatprep.subr.bf16.mxu1 %v3844_v6 }
 0x11a   : > { %2572 = vmatprep.subr.bf16.mxu0 %v3844_v6 }
 0x11c   : > { %3341 = vmatpush1.bf16.msra.mxu1 %v3842_v7 }
 0x11d   : > { %2573 = vmatpush1.bf16.msra.mxu0 %v3842_v7  ;;  %3326 = vmatprep.subr.bf16.mxu1 %v3847_v8 }
 0x11e   : > { %2574 = vmatprep.subr.bf16.mxu0 %v3847_v8 }
 0x120   : > { %3342 = vmatpush1.bf16.msra.mxu1 %v3845_v9 }
 0x121   : > { %2575 = vmatpush1.bf16.msra.mxu0 %v3845_v9  ;;  %3327 = vmatprep.subr.bf16.mxu1 %v3850_v10 }
 0x122   : > { %2576 = vmatprep.subr.bf16.mxu0 %v3850_v10  ;;  %v882_v19 = vpop.f32.mrb[4].mxu1 }
 0x123   : > { %v4895_v20 = vpop.f32.mrb[4].mxu0  ;;  %v884_v21 = vpop.f32.mrb[5].mxu1 }
 0x124   : > { %3343 = vmatpush1.bf16.msra.mxu1 %v3848_v11  ;;  %v4897_v22 = vpop.f32.mrb[5].mxu0  ;;  %v886_v24 = vpop.f32.mrb[6].mxu1 }
 0x125   : > { %2577 = vmatpush1.bf16.msra.mxu0 %v3848_v11  ;;  %3328 = vmatprep.subr.bf16.mxu1 %v3853_v12  ;;  %v1745_v26 = vpop.f32.mrb[6].mxu0  ;;  %v887_v27 = vpop.f32.mrb[7].mxu1 }
 0x126   : > { %2578 = vmatprep.subr.bf16.mxu0 %v3853_v12  ;;  %v1746_v30 = vpop.f32.mrb[7].mxu0 }
 0x128   : > { %3344 = vmatpush1.bf16.msra.mxu1 %v3851_v13 }
 0x129   : > { %2579 = vmatpush1.bf16.msra.mxu0 %v3851_v13  ;;  %3329 = vmatprep.subr.bf16.mxu1 %v3856_v14 }
 0x12a   : > { %2580 = vmatprep.subr.bf16.mxu0 %v3856_v14 }
 0x12c   : > { %3345 = vmatpush1.bf16.msra.mxu1 %v3854_v15 }
 0x12d   : > { %2581 = vmatpush1.bf16.msra.mxu0 %v3854_v15  ;;  %3330 = vmatprep.subr.bf16.mxu1 %v3859_v16  ;;  %v2633_v15 = vlaneseq }
 0x12e   : > { %2582 = vmatprep.subr.bf16.mxu0 %v3859_v16 }
 0x12f   : > { %v2634_v16 = vshrl.u32 %v2633_v15, 7 }
 0x130   : > { %3346 = vmatpush1.bf16.msra.mxu1 %v3857_v17 }
 0x131   : > { %2583 = vmatpush1.bf16.msra.mxu0 %v3857_v17  ;;  %3331 = vmatprep.subr.bf16.mxu1 %v3862_v18  ;;  %v2635_v17 = vsub.s32 0, %v2634_v16 }
 0x132   : > { %2584 = vmatprep.subr.bf16.mxu0 %v3862_v18  ;;  %v2631_v18 = vld [vmem:[%s4950_s2] sm:$0x3] }
 0x134   : > { %3347 = vmatpush1.bf16.msra.mxu1 %v3860_v23 }
 0x135   : > { %2585 = vmatpush1.bf16.msra.mxu0 %v3860_v23  ;;  %3332 = vmatprep.subr.bf16.mxu1 %v3865_v51 }
 0x136   : > { %2586 = vmatprep.subr.bf16.mxu0 %v3865_v51 }
 0x138   : > { %3348 = vmatpush1.bf16.msra.mxu1 %v3863_v31 }
 0x139   : > { %2587 = vmatpush1.bf16.msra.mxu0 %v3863_v31  ;;  %3333 = vmatprep.subr.bf16.mxu1 %v3868_v32 }
 0x13a   : > { %2588 = vmatprep.subr.bf16.mxu0 %v3868_v32 }
 0x13c   : > { %3349 = vmatpush1.bf16.msra.mxu1 %v3866_v33 }
 0x13d   : > { %2589 = vmatpush1.bf16.msra.mxu0 %v3866_v33  ;;  %3334 = vmatprep.subr.bf16.mxu1 %v3871_v34 }
 0x13e   : > { %2590 = vmatprep.subr.bf16.mxu0 %v3871_v34 }
 0x140   : > { %3350 = vmatpush1.bf16.msra.mxu1 %v3869_v36 }
 0x141   : > { %2591 = vmatpush1.bf16.msra.mxu0 %v3869_v36  ;;  %3335 = vmatprep.subr.bf16.mxu1 %v3874_v37 }
 0x142   : > { %2592 = vmatprep.subr.bf16.mxu0 %v3874_v37 }
 0x144   : > { %3351 = vmatpush1.bf16.msra.mxu1 %v3872_v39 }
 0x145   : > { %2593 = vmatpush1.bf16.msra.mxu0 %v3872_v39 }
 0x147   : > { %2605 = vmatmul.mubr.bf16.vlgmr.msra.gmra.mrb[20].mxu1 %v3214_v41 }
 0x148   : > { %2595 = vmatmul.mubr.bf16.vlgmr.msra.gmra.mrb[0].mxu0 %v3208_v52 }
 0x162   : > { %v933_v42 = vpop.f32.mrb[8].mxu1 }
 0x163   : > { %v1792_v43 = vpop.f32.mrb[8].mxu0  ;;  %v934_v44 = vadd.f32 %v933_v42, %v882_v19  ;;  %v935_v35 = vpop.f32.mrb[9].mxu1  ;;  %v2639_v19 = vsub.s32 1, %v2634_v16 }
 0x164   : > { %v1794_v46 = vpop.f32.mrb[9].mxu0  ;;  %v936_v47 = vadd.f32 %v935_v35, %v884_v21  ;;  %v937_v48 = vpop.f32.mrb[10].mxu1 }
 0x165   : > { %v1796_v49 = vpop.f32.mrb[10].mxu0  ;;  %v938_v50 = vpop.f32.mrb[11].mxu1  ;;  %v2640_v23 = vrot.slane %v2631_v18, %v2639_v19 }
 0x166   : > { %v1797_v53 = vpop.f32.mrb[11].mxu0 }
 0x1a2   : > { %v984_v54 = vpop.f32.mrb[12].mxu1 }
 0x1a3   : > { %v2504_v55 = vpop.f32.mrb[12].mxu0  ;;  %v985_v58 = vadd.f32 %v984_v54, %v934_v44  ;;  %v986_v59 = vpop.f32.mrb[13].mxu1 }
 0x1a4   : > { %v2506_v45 = vpop.f32.mrb[13].mxu0  ;;  %v987_v60 = vadd.f32 %v986_v59, %v936_v47  ;;  %v988_v56 = vpop.f32.mrb[14].mxu1 }
 0x1a5   : > { %v2508_v61 = vpop.f32.mrb[14].mxu0  ;;  %v989_v57 = vpop.f32.mrb[15].mxu1 }
 0x1a6   : > { %v2509_v62 = vpop.f32.mrb[15].mxu0 }
 0x1da   : > { %v1680_v63 = vpop.f32.mrb[0].mxu1 }
 0x1db   : > { %v1682_v0 = vpop.f32.mrb[1].mxu1 }
 0x1dc   : > { %v1684_v28 = vpop.f32.mrb[2].mxu1 }
 0x1dd   : > { %v1686_v29 = vpop.f32.mrb[3].mxu1 }
 0x1e2   : > { %v1690_v1 = vpop.f32.mrb[16].mxu1 }
 0x1e3   : > { %v2555_v2 = vpop.f32.mrb[16].mxu0  ;;  %v1742_v38 = vadd.f32 %v4895_v20, %v1690_v1  ;;  %v1692_v4 = vpop.f32.mrb[17].mxu1  ;;  %v2636_v20 = vrot.slane %v2631_v18, %v2635_v17 }
 0x1e4   : > { %v2556_v3 = vadd.f32 %v2555_v2, %v2504_v55  ;;  %v2557_v5 = vpop.f32.mrb[17].mxu0  ;;  %v1744_v25 = vadd.f32 %v4897_v22, %v1692_v4  ;;  %v1694_v7 = vpop.f32.mrb[18].mxu1 }
 0x1e5   : > { %v2558_v6 = vadd.f32 %v2557_v5, %v2506_v45  ;;  %v2559_v8 = vpop.f32.mrb[18].mxu0  ;;  %v1793_v9 = vadd.f32 %v1792_v43, %v1742_v38  ;;  %v1695_v10 = vpop.f32.mrb[19].mxu1 }
 0x1e6   : > { %v2560_v11 = vpop.f32.mrb[19].mxu0  ;;  %v1795_v12 = vadd.f32 %v1794_v46, %v1744_v25 }
 0x1e7   : > { %v1803_v13 = vadd.f32 %v1793_v9, %v985_v58 }
 0x1e8   : > { %v1804_v14 = vadd.f32 %v1795_v12, %v987_v60 }
 0x21a   : > { %v2606_v22 = vpop.f32.mrb[20].mxu1 }
 0x21b   : > { %v2596_v21 = vpop.f32.mrb[0].mxu0  ;;  %v2607_v26 = vadd.f32 %v2606_v22, %v2556_v3  ;;  %v2608_v27 = vpop.f32.mrb[21].mxu1 }
 0x21c   : > { %v3352_v24 = vadd.f32 %v2596_v21, %v1680_v63  ;;  %v2598_v51 = vpop.f32.mrb[1].mxu0  ;;  %v2609_v31 = vadd.f32 %v2608_v27, %v2558_v6  ;;  %v2610_v33 = vpop.f32.mrb[22].mxu1 }
 0x21d   : > { %v3353_v30 = vadd.f32 %v2598_v51, %v1682_v0  ;;  %v2600_v32 = vpop.f32.mrb[2].mxu0  ;;  %v2617_v36 = vadd.f32 %v2607_v26, %v1803_v13  ;;  %v2611_v40 = vpop.f32.mrb[23].mxu1 }
 0x21e   : > { %v2643_v34 = vadd.f32 %v3352_v24, %v2636_v20  ;;  %v3354_v37 = vadd.f32 %v2600_v32, %v1684_v28  ;;  %v2602_v39 = vpop.f32.mrb[3].mxu0  ;;  %v2618_v41 = vadd.f32 %v2609_v31, %v1804_v14 }
 0x21f   : > { %v2644_v52 = vadd.f32 %v3353_v30, %v2640_v23  ;;  %v3355_v42 = vadd.f32 %v2602_v39, %v1686_v29  ;;  %v2647_v44 = vadd.f32 %v2636_v20, %v2617_v36 }
 0x220   : > { %v2649_v43 = vmax.f32 %v2643_v34, 0.0  ;;  %v2645_v35 = vadd.f32 %v3354_v37, %v2636_v20  ;;  %v2648_v47 = vadd.f32 %v2640_v23, %v2618_v41 }
 0x221   : > { %v2650_v46 = vmax.f32 %v2644_v52, 0.0  ;;  %v2646_v48 = vadd.f32 %v3355_v42, %v2640_v23  ;;  %v2653_v49 = vmax.f32 %v2647_v44, 0.0 }
 0x222   : > { %v2651_v50 = vmax.f32 %v2645_v35, 0.0  ;;  %v2654_v54 = vmax.f32 %v2648_v47, 0.0 }
 0x223   : > { %v3317_v53 = vpack.c.bf16 %v2650_v46, %v2649_v43  ;;  %v2652_v55 = vmax.f32 %v2646_v48, 0.0 }
 0x224   : > { %v3319_v58 = vpack.c.bf16 %v2654_v54, %v2653_v49 }
 0x225   : > { %2675 = vst [vmem:[%s194_s24] sm:$0xff] %v3317_v53  ;;  %v3318_v59 = vpack.c.bf16 %v2652_v55, %v2651_v50 }
 0x226   : > { %2677 = vst [vmem:[%s194_s24 + $0x10] sm:$0xff] %v3319_v58 }
 0x227   : > { %2676 = vst [vmem:[%s194_s24 + $0x8] sm:$0xff] %v3318_v59 }
 0x228 PF: > { %s13_s14 = sadd.s32 1, %s3904_s14   ;;  %s4952_s12 = smov %s3900_s13 }
 0x229   : > { %p10_p5 = scmp.ge.s32.totalorder %s13_s14, 4   ;;  %s4953_s13 = smov %s4955_s15 }
 0x22b   :  { %12 = sbr.rel (!%p10_p5) target bundleno = 2 (0x2), region = 67 }

</bundles_post_ra>
